<compile_context>
chip_gen: v6e
topology: v6e:2x2x1
jax: 0.10.0
libtpu: 0.0.40
codegen_flags: <defaults>
</compile_context>

<pallas_src>
import math
import numpy as np
import jax
import jax.numpy as jnp
from jax.experimental import pallas as pl
from jax.experimental.pallas import tpu as pltpu

LEAKY = 0.1


# ------------------------------ in-kernel helpers ----------------------------

def _leaky(x):
    return jnp.where(x >= 0, x, LEAKY * x)


def _dot(a, b):
    """MXU matmul with bf16 operands, f32 accumulation."""
    return jnp.dot(a.astype(jnp.bfloat16), b.astype(jnp.bfloat16),
                   preferred_element_type=jnp.float32)


def _const_spec(a):
    nd = a.ndim
    return pl.BlockSpec(a.shape, lambda i: (0,) * nd)


# --------------------------- fused ST-block half kernel ----------------------

def _make_st_half_kernel(S, Gci, GCout, scale, has_att0, has_down):
    def kernel(*refs):
        refs = list(refs)
        o_ref = refs.pop()
        it = iter(refs)
        x_ref = next(it)
        w_in, b_in, alpha = next(it), next(it), next(it)
        att0 = next(it) if has_att0 else None
        w_out, b_out = next(it), next(it)
        if has_down:
            w_d1, b_d1 = next(it), next(it)
        w_ff, b_ff = next(it), next(it)
        if has_down:
            w_d2, b_d2 = next(it), next(it)

        x = x_ref[0]                                        # (R, G*Cin) f32
        qk = _dot(x, w_in[...]) + b_in[...]                 # (R, 2*S*G*ci)
        acc = jnp.zeros((x.shape[0], GCout), jnp.float32)
        for s in range(S):                                  # S is tiny & static
            q_s = qk[:, s * Gci:(s + 1) * Gci]              # (R, G*ci)
            k_s = qk[:, (S + s) * Gci:(S + s + 1) * Gci]
            att_t = jnp.tanh(_dot(k_s, q_s.T) * scale)      # transposed scores
            att_t = att_t * alpha[0:1, s:s + 1]
            if has_att0:
                att_t = att_t + att0[s]
            o_s = _dot(att_t, x)                            # (R, G*Cin)
            acc = acc + _dot(o_s, w_out[s])                 # (R, G*Cout)
        acc = acc + b_out[...]
        d1 = (_dot(x, w_d1[...]) + b_d1[...]) if has_down else x
        y1 = _leaky(acc + d1)
        ff = _dot(y1, w_ff[...]) + b_ff[...]
        d2 = (_dot(x, w_d2[...]) + b_d2[...]) if has_down else x
        o_ref[0] = _leaky(ff + d2)
    return kernel


def st_half_call(x_wide, wp, *, S, Gci, GCout, scale, has_att0, has_down):
    B, R, GCin = x_wide.shape
    in_specs = [pl.BlockSpec((1, R, GCin), lambda i: (i, 0, 0))]
    args = [x_wide]

    def add(a):
        in_specs.append(_const_spec(a))
        args.append(a)

    add(wp['w_in']); add(wp['b_in']); add(wp['alpha'])
    if has_att0:
        add(wp['att0T'])
    add(wp['w_out']); add(wp['b_out'])
    if has_down:
        add(wp['w_d1']); add(wp['b_d1'])
    add(wp['w_ff']); add(wp['b_ff'])
    if has_down:
        add(wp['w_d2']); add(wp['b_d2'])

    return pl.pallas_call(
        _make_st_half_kernel(S, Gci, GCout, scale, has_att0, has_down),
        out_shape=jax.ShapeDtypeStruct((B, R, GCout), jnp.float32),
        grid=(B,),
        in_specs=in_specs,
        out_specs=pl.BlockSpec((1, R, GCout), lambda i: (i, 0, 0)),
        compiler_params=pltpu.CompilerParams(dimension_semantics=("parallel",)),
    )(*args)


# ------------------------------ fused head kernel ----------------------------

def _make_head_kernel(S, Gm, GC, scale):
    def kernel(x1_ref, x2_ref, w_q, b_q, w_kv, b_kv, w_ff, b_ff, o_ref):
        x1 = x1_ref[0]                                      # (R, G*C)
        x2 = x2_ref[0]
        q_all = _dot(x1, w_q[...]) + b_q[...]               # (R, S*G*mid)
        kv_all = _dot(x2, w_kv[...]) + b_kv[...]            # (R, 2*S*G*mid)
        acc = jnp.zeros((x1.shape[0], GC), jnp.float32)
        for s in range(S):
            q_s = q_all[:, s * Gm:(s + 1) * Gm]
            k_s = kv_all[:, s * Gm:(s + 1) * Gm]
            v_s = kv_all[:, (S + s) * Gm:(S + s + 1) * Gm]
            att = jnp.tanh(_dot(q_s, k_s.T) * scale)        # (R, R)
            o_s = _dot(att, v_s)                            # (R, G*mid)
            acc = acc + _dot(o_s, w_ff[s])                  # (R, G*C)
        y = acc + b_ff[...] + x1
        o_ref[0] = _leaky(y)
    return kernel


def head_att_call(x1_wide, x2_wide, wp, *, S, Gm, scale):
    B, R, GC = x1_wide.shape
    xspec = pl.BlockSpec((1, R, GC), lambda i: (i, 0, 0))
    in_specs = [xspec, xspec]
    args = [x1_wide, x2_wide]
    for key in ('w_q', 'b_q', 'w_kv', 'b_kv', 'w_ff', 'b_ff'):
        in_specs.append(_const_spec(wp[key]))
        args.append(wp[key])
    return pl.pallas_call(
        _make_head_kernel(S, Gm, GC, scale),
        out_shape=jax.ShapeDtypeStruct((B, R, GC), jnp.float32),
        grid=(B,),
        in_specs=in_specs,
        out_specs=pl.BlockSpec((1, R, GC), lambda i: (i, 0, 0)),
        compiler_params=pltpu.CompilerParams(dimension_semantics=("parallel",)),
    )(*args)


# ------------------------------- input map kernel ----------------------------

def input_map_call(rows, p):
    Rtot, Cn = rows.shape
    Cout = p['w'].shape[1]

    def kernel(x_ref, w_ref, b_ref, o_ref):
        y = jnp.dot(x_ref[...], w_ref[...],
                    preferred_element_type=jnp.float32) + b_ref[...]
        o_ref[...] = _leaky(y)

    return pl.pallas_call(
        kernel,
        out_shape=jax.ShapeDtypeStruct((Rtot, Cout), jnp.float32),
        grid=(1,),
        in_specs=[pl.BlockSpec((Rtot, Cn), lambda i: (0, 0)),
                  _const_spec(p['w']), _const_spec(p['b'])],
        out_specs=pl.BlockSpec((Rtot, Cout), lambda i: (0, 0)),
        compiler_params=pltpu.CompilerParams(dimension_semantics=("arbitrary",)),
    )(rows, p['w'], p['b'])


# ---------------------- host-side parameter preparation ----------------------

def make_pe(channel, joint_num, time_len, domain):
    """Positional encoding as a (T, V, C) numpy array (channel-last)."""
    if domain == 'temporal':
        pos = np.repeat(np.arange(time_len), joint_num)
    else:
        pos = np.tile(np.arange(joint_num), time_len)
    position = pos.astype(np.float32)[:, None]
    pe = np.zeros((time_len * joint_num, channel), np.float32)
    div_term = np.exp(np.arange(0, channel, 2).astype(np.float32) *
                      -(math.log(10000.0) / channel))
    pe[:, 0::2] = np.sin(position * div_term)
    pe[:, 1::2] = np.cos(position * div_term)
    return pe.reshape(time_len, joint_num, channel)


def _fold_bn(w, b, bn, eps=1e-5):
    s = bn['gamma'] / np.sqrt(bn['var'] + eps)
    return ((w * s[None, :]).astype(np.float32),
            (b * s + bn['beta'] - bn['mean'] * s).astype(np.float32))


def _bd(w, n):
    """(cin, cout) -> (n*cin, n*cout) block-diagonal weight (kron(I_n, W))."""
    return np.kron(np.eye(n, dtype=np.float32), w.astype(np.float32))


def _bf16(a):
    return jnp.asarray(a, dtype=jnp.bfloat16)


def _f32(a):
    return jnp.asarray(a, dtype=jnp.float32)


def _pack_st_half(in_net, alphas, att0, out_net, ff_net, down1, down2,
                  pe_wide, G, cin, cout, ci, S):
    w_in, b_in = in_net['w'], in_net['b']
    w_in_bd = np.concatenate([_bd(w_in[:, j * ci:(j + 1) * ci], G)
                              for j in range(2 * S)], axis=1)
    b_in_w = np.concatenate([np.tile(b_in[j * ci:(j + 1) * ci], G)
                             for j in range(2 * S)])
    b_in_full = pe_wide.astype(np.float32) @ w_in_bd + b_in_w[None, :]

    wo, bo = _fold_bn(out_net['conv']['w'], out_net['conv']['b'], out_net['bn'])
    wf, bf = _fold_bn(ff_net['conv']['w'], ff_net['conv']['b'], ff_net['bn'])

    p = {'w_in': _bf16(w_in_bd),
         'b_in': _f32(b_in_full),
         'alpha': _f32(alphas.reshape(1, S)),
         'w_out': _bf16(np.stack([_bd(wo[s * cin:(s + 1) * cin, :], G)
                                  for s in range(S)])),
         'b_out': _f32(np.tile(bo, G)[None, :]),
         'w_ff': _bf16(_bd(wf, G)),
         'b_ff': _f32(np.tile(bf, G)[None, :])}
    if att0 is not None:
        p['att0T'] = _f32(np.transpose(att0, (0, 2, 1)))
    if down1 is not None:
        w1, b1 = _fold_bn(down1['conv']['w'], down1['conv']['b'], down1['bn'])
        w2, b2 = _fold_bn(down2['conv']['w'], down2['conv']['b'], down2['bn'])
        p['w_d1'] = _bf16(_bd(w1, G))
        p['b_d1'] = _f32(np.tile(b1, G)[None, :])
        p['w_d2'] = _bf16(_bd(w2, G))
        p['b_d2'] = _f32(np.tile(b2, G)[None, :])
    return p


def _pack_head(wq, bq, wkv, bkv, ff_conv, ff_bn, C0, S, G):
    mid = C0 // S
    w_q_bd = np.concatenate([_bd(wq[:, s * mid:(s + 1) * mid], G)
                             for s in range(S)], axis=1)
    b_q_w = np.concatenate([np.tile(bq[s * mid:(s + 1) * mid], G)
                            for s in range(S)])[None, :]
    kv_blocks = ([_bd(wkv[:, s * mid:(s + 1) * mid], G) for s in range(S)] +
                 [_bd(wkv[:, C0 + s * mid:C0 + (s + 1) * mid], G)
                  for s in range(S)])
    w_kv_bd = np.concatenate(kv_blocks, axis=1)
    b_kv_w = np.concatenate(
        [np.tile(bkv[s * mid:(s + 1) * mid], G) for s in range(S)] +
        [np.tile(bkv[C0 + s * mid:C0 + (s + 1) * mid], G)
         for s in range(S)])[None, :]
    wf, bf = _fold_bn(ff_conv['w'], ff_conv['b'], ff_bn)
    w_ff_bd = np.stack([_bd(wf[s * mid:(s + 1) * mid, :], G) for s in range(S)])
    return {'w_q': _bf16(w_q_bd), 'b_q': _f32(b_q_w),
            'w_kv': _bf16(w_kv_bd), 'b_kv': _f32(b_kv_w),
            'w_ff': _bf16(w_ff_bd), 'b_ff': _f32(np.tile(bf, G)[None, :])}


def _pack_layer(raw, cin, cout, ci, S, T, V):
    pes = make_pe(cin, V, T, 'spatial')        # (T, V, cin)
    pet = make_pe(cout, V, T, 'temporal')      # (T, V, cout)
    spatial = _pack_st_half(
        raw['in_nets'], raw['alphas'], raw['attention0s'],
        raw['out_nets'], raw['ff_nets'], raw.get('downs1'), raw.get('downs2'),
        pes.transpose(1, 0, 2).reshape(V, T * cin), G=T,
        cin=cin, cout=cout, ci=ci, S=S)
    temporal = _pack_st_half(
        raw['in_nett'], raw['alphat'], None,   # glo_reg_t=False -> no attention0t
        raw['out_nett'], raw['ff_nett'], raw.get('downt1'), raw.get('downt2'),
        pet.reshape(T, V * cout), G=V,
        cin=cout, cout=cout, ci=ci, S=S)
    return {'spatial': spatial, 'temporal': temporal}


def init_raw_params(config, num_channel, num_point, num_frame, S, seed=42):
    rng = np.random.default_rng(seed)

    def conv(cin, cout):
        # TODO(synk): PyTorch uses kaiming fan_out; exact init is irrelevant here.
        return {'w': (rng.standard_normal((cin, cout)) *
                      math.sqrt(2.0 / cout)).astype(np.float32),
                'b': (rng.standard_normal((cout,)) * 0.01).astype(np.float32)}

    def bn(c):
        return {'gamma': np.ones(c, np.float32), 'beta': np.zeros(c, np.float32),
                'mean': np.zeros(c, np.float32), 'var': np.ones(c, np.float32)}

    V = num_point
    params = {'input_map': {'conv': conv(num_channel, config[0][0]),
                            'bn': bn(config[0][0])}}
    layers = []
    for (cin, cout, ci, stride) in config:
        p = {'in_nets': conv(cin, 2 * S * ci),
             'alphas': np.ones((S,), np.float32),
             'attention0s': np.ones((S, V, V), np.float32) / V,
             'out_nets': {'conv': conv(cin * S, cout), 'bn': bn(cout)},
             'ff_nets': {'conv': conv(cout, cout), 'bn': bn(cout)},
             'in_nett': conv(cout, 2 * S * ci),
             'alphat': np.ones((S,), np.float32),
             'out_nett': {'conv': conv(cout * S, cout), 'bn': bn(cout)},
             'ff_nett': {'conv': conv(cout, cout), 'bn': bn(cout)}}
        if cin != cout or stride != 1:
            p['downs1'] = {'conv': conv(cin, cout), 'bn': bn(cout)}
            p['downs2'] = {'conv': conv(cin, cout), 'bn': bn(cout)}
            p['downt1'] = {'conv': conv(cout, cout), 'bn': bn(cout)}
            p['downt2'] = {'conv': conv(cout, cout), 'bn': bn(cout)}
        layers.append(p)
    params['layers'] = layers
    C0 = config[-1][1]
    params['intra_satt'] = {'in': conv(C0, 3 * C0),
                            'ff': {'conv': conv(C0, C0), 'bn': bn(C0)}}
    params['intra_tatt'] = {'in': conv(C0, 3 * C0),
                            'ff': {'conv': conv(C0, C0), 'bn': bn(C0)}}
    params['inter_satt'] = {'q': conv(C0, C0), 'kv': conv(C0, 2 * C0),
                            'ff': {'conv': conv(C0, C0), 'bn': bn(C0)}}
    params['inter_tatt'] = {'q': conv(C0, C0), 'kv': conv(C0, 2 * C0),
                            'ff': {'conv': conv(C0, C0), 'bn': bn(C0)}}
    return params


def pack_params(raw, config, num_frame, num_point, S):
    T, V = num_frame, num_point
    wim, bim = _fold_bn(raw['input_map']['conv']['w'],
                        raw['input_map']['conv']['b'], raw['input_map']['bn'])
    packed = {'input_map': {'w': _f32(wim), 'b': _f32(bim[None, :])},
              'layers': [_pack_layer(raw['layers'][i], cin, cout, ci, S, T, V)
                         for i, (cin, cout, ci, stride) in enumerate(config)]}
    C0 = config[-1][1]

    def head(pp, G, intra):
        if intra:
            w, b = pp['in']['w'], pp['in']['b']
            wq, bq, wkv, bkv = w[:, :C0], b[:C0], w[:, C0:], b[C0:]
        else:
            wq, bq = pp['q']['w'], pp['q']['b']
            wkv, bkv = pp['kv']['w'], pp['kv']['b']
        return _pack_head(wq, bq, wkv, bkv, pp['ff']['conv'], pp['ff']['bn'],
                          C0, S, G)

    packed['intra_satt'] = head(raw['intra_satt'], T, True)
    packed['intra_tatt'] = head(raw['intra_tatt'], V, True)
    packed['inter_satt'] = head(raw['inter_satt'], T, False)
    packed['inter_tatt'] = head(raw['inter_tatt'], V, False)
    return packed


# -------------------------------- DSTANet forward ----------------------------

def dstanet_forward(packed, x1, x2, config, S, T, V):
    N, Cn, _, _, M = x1.shape

    def prep(x):  # (N, C, T, V, M) -> (N*M, V, T, C)
        return jnp.transpose(x, (0, 4, 3, 2, 1)).reshape(N * M, V, T, Cn)

    xin = jnp.concatenate([prep(x1), prep(x2)], axis=0)         # (B0, V, T, Cn)
    B0 = 2 * N * M
    C_first = config[0][0]

    h = input_map_call(xin.reshape(B0 * V * T, Cn), packed['input_map'])
    x_v = h.reshape(B0, V, T * C_first)                         # V-wide layout

    z_t = None
    for i, (cin, cout, ci, stride) in enumerate(config):
        lw = packed['layers'][i]
        has_down = (cin != cout or stride != 1)
        # TODO(synk): stride != 1 temporal downsampling not implemented.
        y_v = st_half_call(x_v, lw['spatial'], S=S, Gci=T * ci,
                           GCout=T * cout, scale=1.0 / (ci * T),
                           has_att0=True, has_down=has_down)
        y_t = jnp.transpose(y_v.reshape(B0, V, T, cout),
                            (0, 2, 1, 3)).reshape(B0, T, V * cout)
        z_t = st_half_call(y_t, lw['temporal'], S=S, Gci=V * ci,
                           GCout=V * cout, scale=1.0 / (ci * V),
                           has_att0=False, has_down=has_down)
        if i + 1 < len(config):
            x_v = jnp.transpose(z_t.reshape(B0, T, V, cout),
                                (0, 2, 1, 3)).reshape(B0, V, T * cout)

    C0 = config[-1][1]
    mid = C0 // S
    NM = N * M
    y1_t, y2_t = z_t[:NM], z_t[NM:]

    def t_to_v(zt):
        return jnp.transpose(zt.reshape(-1, T, V, C0),
                             (0, 2, 1, 3)).reshape(-1, V, T * C0)

    y1_v, y2_v = t_to_v(y1_t), t_to_v(y2_t)

    cat_t = jnp.concatenate([y1_t, y2_t], axis=0)
    cat_v = jnp.concatenate([y1_v, y2_v], axis=0)
    cat_t_sw = jnp.concatenate([y2_t, y1_t], axis=0)
    cat_v_sw = jnp.concatenate([y2_v, y1_v], axis=0)

    intra_t = head_att_call(cat_t, cat_t, packed['intra_tatt'],
                            S=S, Gm=V * mid, scale=1.0 / (mid * V))
    intra_s = head_att_call(cat_v, cat_v, packed['intra_satt'],
                            S=S, Gm=T * mid, scale=1.0 / (mid * T))
    inter_t = head_att_call(cat_t, cat_t_sw, packed['inter_tatt'],
                            S=S, Gm=V * mid, scale=1.0 / (mid * V))
    inter_s = head_att_call(cat_v, cat_v_sw, packed['inter_satt'],
                            S=S, Gm=T * mid, scale=1.0 / (mid * T))

    out1s, out2s = intra_t[:NM], intra_t[NM:]
    out1t, out2t = intra_s[:NM], intra_s[NM:]
    out11s, out22s = inter_t[:NM], inter_t[NM:]
    out11t, out22t = inter_s[:NM], inter_s[NM:]

    def pool_t_wide(o):     # (NM, T, V*C0): mean over M, T -> (N, V, C0)
        return o.reshape(N, M, T, V, C0).mean(axis=(1, 2))

    def pool_v_wide(o):     # (NM, V, T*C0): mean over M, V -> (N, T, C0)
        return o.reshape(N, M, V, T, C0).mean(axis=(1, 2))

    def gmean_t(o):
        return o.reshape(N, M, T, V, C0).mean(axis=(1, 2, 3))

    def gmean_v(o):
        return o.reshape(N, M, V, T, C0).mean(axis=(1, 2, 3))

    out1g = jnp.concatenate([gmean_t(out1s), gmean_v(out1t),
                             gmean_t(out11s), gmean_v(out11t)], axis=-1)
    out2g = jnp.concatenate([gmean_t(out2s), gmean_v(out2t),
                             gmean_t(out22s), gmean_v(out22t)], axis=-1)

    return (pool_t_wide(out1s), pool_v_wide(out1t),
            pool_t_wide(out2s), pool_v_wide(out2t),
            pool_t_wide(out11s), pool_v_wide(out11t),
            pool_t_wide(out22s), pool_v_wide(out22t),
            out1g, out2g, gmean_t(y1_t), gmean_t(y2_t))


# --------------------------------------- main --------------------------------

if __name__ == "__main__":
    # Small but consistent shapes: N=2 sequences, C=3 channels, T=16 frames,
    # V=8 joints, M=2 persons; num_subset=3; two ST attention layers.
    N, C, T, V, M = 2, 3, 16, 8, 2
    num_subset = 3
    config = [(8, 12, 4, 1), (12, 12, 4, 1)]   # (in_c, out_c, inter_c, stride)

    key = jax.random.PRNGKey(0)
    k1, k2 = jax.random.split(key)
    x1 = jax.random.normal(k1, (N, C, T, V, M), jnp.float32)
    x2 = jax.random.normal(k2, (N, C, T, V, M), jnp.float32)

    raw = init_raw_params(config, num_channel=C, num_point=V, num_frame=T,
                          S=num_subset, seed=42)
    packed = pack_params(raw, config, num_frame=T, num_point=V, S=num_subset)

    fwd = jax.jit(lambda p, a, b: dstanet_forward(p, a, b, config,
                                                  num_subset, T, V))
    outs = jax.block_until_ready(fwd(packed, x1, x2))

    assert len(outs) == 12
    assert all(bool(jnp.all(jnp.isfinite(o))) for o in outs)
    print("KERNEL_OK")
</pallas_src>

<mosaic_0001>
module attributes {stable_mosaic.version = 11 : i64} {
  func.func @kernel(%arg0: i32, %arg1: memref<1024x3xf32, #tpu.memory_space<vmem>>, %arg2: memref<3x8xf32, #tpu.memory_space<vmem>>, %arg3: memref<1x8xf32, #tpu.memory_space<vmem>>, %arg4: memref<1024x8xf32, #tpu.memory_space<vmem>>) attributes {dimension_semantics = [#tpu.dimension_semantics<arbitrary>], iteration_bounds = array<i64: 1>, scalar_prefetch = 0 : i64, scratch_operands = 0 : i64, tpu.core_type = #tpu.core_type<tc>, window_params = [{pipeline_mode = #tpu.pipeline_mode<synchronous>, transform_indices = @transform_0, window_bounds = array<i64: 1024, 3>}, {pipeline_mode = #tpu.pipeline_mode<synchronous>, transform_indices = @transform_1, window_bounds = array<i64: 3, 8>}, {pipeline_mode = #tpu.pipeline_mode<synchronous>, transform_indices = @transform_2, window_bounds = array<i64: 1, 8>}, {pipeline_mode = #tpu.pipeline_mode<synchronous>, transform_indices = @transform_3, window_bounds = array<i64: 1024, 8>}]} {
    %c0 = arith.constant 0 : index
    %c0_0 = arith.constant 0 : index
    %0 = vector.load %arg1[%c0, %c0_0] : memref<1024x3xf32, #tpu.memory_space<vmem>>, vector<1024x3xf32>
    %c0_1 = arith.constant 0 : index
    %c0_2 = arith.constant 0 : index
    %1 = vector.load %arg2[%c0_1, %c0_2] : memref<3x8xf32, #tpu.memory_space<vmem>>, vector<3x8xf32>
    %cst = arith.constant dense<0.000000e+00> : vector<1024x8xf32>
    %2 = tpu.matmul %0, %1, %cst {dimension_numbers = #tpu.dot_dimension_numbers<[1], [0], [0], [1], [0, 0, 1, 1], [], []>} : vector<1024x3xf32>, vector<3x8xf32>, vector<1024x8xf32> -> vector<1024x8xf32>
    %c0_3 = arith.constant 0 : index
    %c0_4 = arith.constant 0 : index
    %3 = vector.load %arg3[%c0_3, %c0_4] : memref<1x8xf32, #tpu.memory_space<vmem>>, vector<1x8xf32>
    %4 = vector.broadcast %3 : vector<1x8xf32> to vector<1024x8xf32>
    %5 = arith.addf %2, %4 : vector<1024x8xf32>
    %cst_5 = arith.constant 0.000000e+00 : f32
    %6 = vector.broadcast %cst_5 : f32 to vector<1024x8xf32>
    %7 = arith.cmpf oge, %5, %6 : vector<1024x8xf32>
    %cst_6 = arith.constant 1.000000e-01 : f32
    %8 = vector.broadcast %cst_6 : f32 to vector<1024x8xf32>
    %9 = arith.mulf %8, %5 : vector<1024x8xf32>
    %10 = arith.select %7, %5, %9 : vector<1024x8xi1>, vector<1024x8xf32>
    %c0_7 = arith.constant 0 : index
    %c0_8 = arith.constant 0 : index
    %11 = vector.load %arg4[%c0_7, %c0_8] : memref<1024x8xf32, #tpu.memory_space<vmem>>, vector<1024x8xf32>
    tpu.vector_store %arg4[%c0_7, %c0_8], %10 {strides = array<i32>} : memref<1024x8xf32, #tpu.memory_space<vmem>>, vector<1024x8xf32>,
    return
  }
  func.func @transform_0(%arg0: i32) -> (i32, i32) {
    %c0_i32 = arith.constant 0 : i32
    %c0_i32_0 = arith.constant 0 : i32
    %c0_i32_1 = arith.constant 0 : i32
    return %c0_i32, %c0_i32_0 : i32, i32
  }
  func.func @transform_1(%arg0: i32) -> (i32, i32) {
    %c0_i32 = arith.constant 0 : i32
    %c0_i32_0 = arith.constant 0 : i32
    %c0_i32_1 = arith.constant 0 : i32
    return %c0_i32, %c0_i32_0 : i32, i32
  }
  func.func @transform_2(%arg0: i32) -> (i32, i32) {
    %c0_i32 = arith.constant 0 : i32
    %c0_i32_0 = arith.constant 0 : i32
    %c0_i32_1 = arith.constant 0 : i32
    return %c0_i32, %c0_i32_0 : i32, i32
  }
  func.func @transform_3(%arg0: i32) -> (i32, i32) {
    %c0_i32 = arith.constant 0 : i32
    %c0_i32_0 = arith.constant 0 : i32
    %c0_i32_1 = arith.constant 0 : i32
    return %c0_i32, %c0_i32_0 : i32, i32
  }
}

module attributes {stable_mosaic.version = 11 : i64} {
  func.func @kernel(%arg0: i32, %arg1: memref<1x8x128xf32, #tpu.memory_space<vmem>>, %arg2: memref<128x384xbf16, #tpu.memory_space<vmem>>, %arg3: memref<8x384xf32, #tpu.memory_space<vmem>>, %arg4: memref<1x3xf32, #tpu.memory_space<vmem>>, %arg5: memref<3x8x8xf32, #tpu.memory_space<vmem>>, %arg6: memref<3x128x192xbf16, #tpu.memory_space<vmem>>, %arg7: memref<1x192xf32, #tpu.memory_space<vmem>>, %arg8: memref<128x192xbf16, #tpu.memory_space<vmem>>, %arg9: memref<1x192xf32, #tpu.memory_space<vmem>>, %arg10: memref<192x192xbf16, #tpu.memory_space<vmem>>, %arg11: memref<1x192xf32, #tpu.memory_space<vmem>>, %arg12: memref<128x192xbf16, #tpu.memory_space<vmem>>, %arg13: memref<1x192xf32, #tpu.memory_space<vmem>>, %arg14: memref<1x8x192xf32, #tpu.memory_space<vmem>>) attributes {dimension_semantics = [#tpu.dimension_semantics<parallel>], iteration_bounds = array<i64: 8>, scalar_prefetch = 0 : i64, scratch_operands = 0 : i64, tpu.core_type = #tpu.core_type<tc>, window_params = [{transform_indices = @transform_0, window_bounds = array<i64: 1, 8, 128>}, {pipeline_mode = #tpu.pipeline_mode<synchronous>, transform_indices = @transform_1, window_bounds = array<i64: 128, 384>}, {pipeline_mode = #tpu.pipeline_mode<synchronous>, transform_indices = @transform_2, window_bounds = array<i64: 8, 384>}, {pipeline_mode = #tpu.pipeline_mode<synchronous>, transform_indices = @transform_3, window_bounds = array<i64: 1, 3>}, {pipeline_mode = #tpu.pipeline_mode<synchronous>, transform_indices = @transform_4, window_bounds = array<i64: 3, 8, 8>}, {pipeline_mode = #tpu.pipeline_mode<synchronous>, transform_indices = @transform_5, window_bounds = array<i64: 3, 128, 192>}, {pipeline_mode = #tpu.pipeline_mode<synchronous>, transform_indices = @transform_6, window_bounds = array<i64: 1, 192>}, {pipeline_mode = #tpu.pipeline_mode<synchronous>, transform_indices = @transform_7, window_bounds = array<i64: 128, 192>}, {pipeline_mode = #tpu.pipeline_mode<synchronous>, transform_indices = @transform_8, window_bounds = array<i64: 1, 192>}, {pipeline_mode = #tpu.pipeline_mode<synchronous>, transform_indices = @transform_9, window_bounds = array<i64: 192, 192>}, {pipeline_mode = #tpu.pipeline_mode<synchronous>, transform_indices = @transform_10, window_bounds = array<i64: 1, 192>}, {pipeline_mode = #tpu.pipeline_mode<synchronous>, transform_indices = @transform_11, window_bounds = array<i64: 128, 192>}, {pipeline_mode = #tpu.pipeline_mode<synchronous>, transform_indices = @transform_12, window_bounds = array<i64: 1, 192>}, {transform_indices = @transform_13, window_bounds = array<i64: 1, 8, 192>}]} {
    %c0 = arith.constant 0 : index
    %c0_0 = arith.constant 0 : index
    %c0_1 = arith.constant 0 : index
    %0 = vector.load %arg1[%c0, %c0_0, %c0_1] : memref<1x8x128xf32, #tpu.memory_space<vmem>>, vector<1x8x128xf32>
    %1 = vector.shape_cast %0 : vector<1x8x128xf32> to vector<8x128xf32>
    %c0_2 = arith.constant 0 : index
    %c0_3 = arith.constant 0 : index
    %2 = vector.load %arg2[%c0_2, %c0_3] : memref<128x384xbf16, #tpu.memory_space<vmem>>, vector<128x384xbf16>
    %3 = arith.truncf %1 : vector<8x128xf32> to vector<8x128xbf16>
    %cst = arith.constant dense<0.000000e+00> : vector<8x384xf32>
    %4 = tpu.matmul %3, %2, %cst {dimension_numbers = #tpu.dot_dimension_numbers<[1], [0], [0], [1], [0, 0, 1, 1], [], []>} : vector<8x128xbf16>, vector<128x384xbf16>, vector<8x384xf32> -> vector<8x384xf32>
    %c0_4 = arith.constant 0 : index
    %c0_5 = arith.constant 0 : index
    %5 = vector.load %arg3[%c0_4, %c0_5] : memref<8x384xf32, #tpu.memory_space<vmem>>, vector<8x384xf32>
    %6 = arith.addf %4, %5 : vector<8x384xf32>
    %cst_6 = arith.constant 0.000000e+00 : f32
    %7 = vector.broadcast %cst_6 : f32 to vector<8x192xf32>
    %8 = vector.extract_strided_slice %6 {offsets = [0, 0], sizes = [8, 64], strides = [1, 1]} : vector<8x384xf32> to vector<8x64xf32>
    %9 = vector.extract_strided_slice %6 {offsets = [0, 192], sizes = [8, 64], strides = [1, 1]} : vector<8x384xf32> to vector<8x64xf32>
    %10 = tpu.transpose %8, [1, 0] : vector<8x64xf32> -> vector<64x8xf32>
    %11 = arith.truncf %9 : vector<8x64xf32> to vector<8x64xbf16>
    %12 = arith.truncf %10 : vector<64x8xf32> to vector<64x8xbf16>
    %cst_7 = arith.constant dense<0.000000e+00> : vector<8x8xf32>
    %13 = tpu.matmul %11, %12, %cst_7 {dimension_numbers = #tpu.dot_dimension_numbers<[1], [0], [0], [1], [0, 0, 1, 1], [], []>} : vector<8x64xbf16>, vector<64x8xbf16>, vector<8x8xf32> -> vector<8x8xf32>
    %cst_8 = arith.constant 1.562500e-02 : f32
    %14 = vector.broadcast %cst_8 : f32 to vector<8x8xf32>
    %15 = arith.mulf %13, %14 : vector<8x8xf32>
    %16 = math.tanh %15 : vector<8x8xf32>
    %c0_9 = arith.constant 0 : index
    %c0_10 = arith.constant 0 : index
    %17 = vector.load %arg4[%c0_9, %c0_10] : memref<1x3xf32, #tpu.memory_space<vmem>>, vector<1x1xf32>
    %18 = vector.broadcast %17 : vector<1x1xf32> to vector<8x8xf32>
    %19 = arith.mulf %16, %18 : vector<8x8xf32>
    %c0_11 = arith.constant 0 : index
    %c0_12 = arith.constant 0 : index
    %c0_13 = arith.constant 0 : index
    %20 = vector.load %arg5[%c0_11, %c0_12, %c0_13] : memref<3x8x8xf32, #tpu.memory_space<vmem>>, vector<1x8x8xf32>
    %21 = vector.shape_cast %20 : vector<1x8x8xf32> to vector<8x8xf32>
    %22 = arith.addf %19, %21 : vector<8x8xf32>
    %23 = arith.truncf %22 : vector<8x8xf32> to vector<8x8xbf16>
    %24 = arith.truncf %1 : vector<8x128xf32> to vector<8x128xbf16>
    %cst_14 = arith.constant dense<0.000000e+00> : vector<8x128xf32>
    %25 = tpu.matmul %23, %24, %cst_14 {dimension_numbers = #tpu.dot_dimension_numbers<[1], [0], [0], [1], [0, 0, 1, 1], [], []>} : vector<8x8xbf16>, vector<8x128xbf16>, vector<8x128xf32> -> vector<8x128xf32>
    %c0_15 = arith.constant 0 : index
    %c0_16 = arith.constant 0 : index
    %c0_17 = arith.constant 0 : index
    %26 = vector.load %arg6[%c0_15, %c0_16, %c0_17] : memref<3x128x192xbf16, #tpu.memory_space<vmem>>, vector<1x128x192xbf16>
    %27 = vector.shape_cast %26 : vector<1x128x192xbf16> to vector<128x192xbf16>
    %28 = arith.truncf %25 : vector<8x128xf32> to vector<8x128xbf16>
    %cst_18 = arith.constant dense<0.000000e+00> : vector<8x192xf32>
    %29 = tpu.matmul %28, %27, %cst_18 {dimension_numbers = #tpu.dot_dimension_numbers<[1], [0], [0], [1], [0, 0, 1, 1], [], []>} : vector<8x128xbf16>, vector<128x192xbf16>, vector<8x192xf32> -> vector<8x192xf32>
    %30 = arith.addf %7, %29 : vector<8x192xf32>
    %31 = vector.extract_strided_slice %6 {offsets = [0, 64], sizes = [8, 64], strides = [1, 1]} : vector<8x384xf32> to vector<8x64xf32>
    %32 = vector.extract_strided_slice %6 {offsets = [0, 256], sizes = [8, 64], strides = [1, 1]} : vector<8x384xf32> to vector<8x64xf32>
    %33 = tpu.transpose %31, [1, 0] : vector<8x64xf32> -> vector<64x8xf32>
    %34 = arith.truncf %32 : vector<8x64xf32> to vector<8x64xbf16>
    %35 = arith.truncf %33 : vector<64x8xf32> to vector<64x8xbf16>
    %cst_19 = arith.constant dense<0.000000e+00> : vector<8x8xf32>
    %36 = tpu.matmul %34, %35, %cst_19 {dimension_numbers = #tpu.dot_dimension_numbers<[1], [0], [0], [1], [0, 0, 1, 1], [], []>} : vector<8x64xbf16>, vector<64x8xbf16>, vector<8x8xf32> -> vector<8x8xf32>
    %cst_20 = arith.constant 1.562500e-02 : f32
    %37 = vector.broadcast %cst_20 : f32 to vector<8x8xf32>
    %38 = arith.mulf %36, %37 : vector<8x8xf32>
    %39 = math.tanh %38 : vector<8x8xf32>
    %c0_21 = arith.constant 0 : index
    %c1 = arith.constant 1 : index
    %40 = vector.load %arg4[%c0_21, %c1] : memref<1x3xf32, #tpu.memory_space<vmem>>, vector<1x1xf32>
    %41 = vector.broadcast %40 : vector<1x1xf32> to vector<8x8xf32>
    %42 = arith.mulf %39, %41 : vector<8x8xf32>
    %c1_22 = arith.constant 1 : index
    %c0_23 = arith.constant 0 : index
    %c0_24 = arith.constant 0 : index
    %43 = vector.load %arg5[%c1_22, %c0_23, %c0_24] : memref<3x8x8xf32, #tpu.memory_space<vmem>>, vector<1x8x8xf32>
    %44 = vector.shape_cast %43 : vector<1x8x8xf32> to vector<8x8xf32>
    %45 = arith.addf %42, %44 : vector<8x8xf32>
    %46 = arith.truncf %45 : vector<8x8xf32> to vector<8x8xbf16>
    %47 = arith.truncf %1 : vector<8x128xf32> to vector<8x128xbf16>
    %cst_25 = arith.constant dense<0.000000e+00> : vector<8x128xf32>
    %48 = tpu.matmul %46, %47, %cst_25 {dimension_numbers = #tpu.dot_dimension_numbers<[1], [0], [0], [1], [0, 0, 1, 1], [], []>} : vector<8x8xbf16>, vector<8x128xbf16>, vector<8x128xf32> -> vector<8x128xf32>
    %c1_26 = arith.constant 1 : index
    %c0_27 = arith.constant 0 : index
    %c0_28 = arith.constant 0 : index
    %49 = vector.load %arg6[%c1_26, %c0_27, %c0_28] : memref<3x128x192xbf16, #tpu.memory_space<vmem>>, vector<1x128x192xbf16>
    %50 = vector.shape_cast %49 : vector<1x128x192xbf16> to vector<128x192xbf16>
    %51 = arith.truncf %48 : vector<8x128xf32> to vector<8x128xbf16>
    %cst_29 = arith.constant dense<0.000000e+00> : vector<8x192xf32>
    %52 = tpu.matmul %51, %50, %cst_29 {dimension_numbers = #tpu.dot_dimension_numbers<[1], [0], [0], [1], [0, 0, 1, 1], [], []>} : vector<8x128xbf16>, vector<128x192xbf16>, vector<8x192xf32> -> vector<8x192xf32>
    %53 = arith.addf %30, %52 : vector<8x192xf32>
    %54 = vector.extract_strided_slice %6 {offsets = [0, 128], sizes = [8, 64], strides = [1, 1]} : vector<8x384xf32> to vector<8x64xf32>
    %55 = vector.extract_strided_slice %6 {offsets = [0, 320], sizes = [8, 64], strides = [1, 1]} : vector<8x384xf32> to vector<8x64xf32>
    %56 = tpu.transpose %54, [1, 0] : vector<8x64xf32> -> vector<64x8xf32>
    %57 = arith.truncf %55 : vector<8x64xf32> to vector<8x64xbf16>
    %58 = arith.truncf %56 : vector<64x8xf32> to vector<64x8xbf16>
    %cst_30 = arith.constant dense<0.000000e+00> : vector<8x8xf32>
    %59 = tpu.matmul %57, %58, %cst_30 {dimension_numbers = #tpu.dot_dimension_numbers<[1], [0], [0], [1], [0, 0, 1, 1], [], []>} : vector<8x64xbf16>, vector<64x8xbf16>, vector<8x8xf32> -> vector<8x8xf32>
    %cst_31 = arith.constant 1.562500e-02 : f32
    %60 = vector.broadcast %cst_31 : f32 to vector<8x8xf32>
    %61 = arith.mulf %59, %60 : vector<8x8xf32>
    %62 = math.tanh %61 : vector<8x8xf32>
    %c0_32 = arith.constant 0 : index
    %c2 = arith.constant 2 : index
    %63 = vector.load %arg4[%c0_32, %c2] : memref<1x3xf32, #tpu.memory_space<vmem>>, vector<1x1xf32>
    %64 = vector.broadcast %63 : vector<1x1xf32> to vector<8x8xf32>
    %65 = arith.mulf %62, %64 : vector<8x8xf32>
    %c2_33 = arith.constant 2 : index
    %c0_34 = arith.constant 0 : index
    %c0_35 = arith.constant 0 : index
    %66 = vector.load %arg5[%c2_33, %c0_34, %c0_35] : memref<3x8x8xf32, #tpu.memory_space<vmem>>, vector<1x8x8xf32>
    %67 = vector.shape_cast %66 : vector<1x8x8xf32> to vector<8x8xf32>
    %68 = arith.addf %65, %67 : vector<8x8xf32>
    %69 = arith.truncf %68 : vector<8x8xf32> to vector<8x8xbf16>
    %70 = arith.truncf %1 : vector<8x128xf32> to vector<8x128xbf16>
    %cst_36 = arith.constant dense<0.000000e+00> : vector<8x128xf32>
    %71 = tpu.matmul %69, %70, %cst_36 {dimension_numbers = #tpu.dot_dimension_numbers<[1], [0], [0], [1], [0, 0, 1, 1], [], []>} : vector<8x8xbf16>, vector<8x128xbf16>, vector<8x128xf32> -> vector<8x128xf32>
    %c2_37 = arith.constant 2 : index
    %c0_38 = arith.constant 0 : index
    %c0_39 = arith.constant 0 : index
    %72 = vector.load %arg6[%c2_37, %c0_38, %c0_39] : memref<3x128x192xbf16, #tpu.memory_space<vmem>>, vector<1x128x192xbf16>
    %73 = vector.shape_cast %72 : vector<1x128x192xbf16> to vector<128x192xbf16>
    %74 = arith.truncf %71 : vector<8x128xf32> to vector<8x128xbf16>
    %cst_40 = arith.constant dense<0.000000e+00> : vector<8x192xf32>
    %75 = tpu.matmul %74, %73, %cst_40 {dimension_numbers = #tpu.dot_dimension_numbers<[1], [0], [0], [1], [0, 0, 1, 1], [], []>} : vector<8x128xbf16>, vector<128x192xbf16>, vector<8x192xf32> -> vector<8x192xf32>
    %76 = arith.addf %53, %75 : vector<8x192xf32>
    %c0_41 = arith.constant 0 : index
    %c0_42 = arith.constant 0 : index
    %77 = vector.load %arg7[%c0_41, %c0_42] : memref<1x192xf32, #tpu.memory_space<vmem>>, vector<1x192xf32>
    %78 = vector.broadcast %77 : vector<1x192xf32> to vector<8x192xf32>
    %79 = arith.addf %76, %78 : vector<8x192xf32>
    %c0_43 = arith.constant 0 : index
    %c0_44 = arith.constant 0 : index
    %80 = vector.load %arg8[%c0_43, %c0_44] : memref<128x192xbf16, #tpu.memory_space<vmem>>, vector<128x192xbf16>
    %81 = arith.truncf %1 : vector<8x128xf32> to vector<8x128xbf16>
    %cst_45 = arith.constant dense<0.000000e+00> : vector<8x192xf32>
    %82 = tpu.matmul %81, %80, %cst_45 {dimension_numbers = #tpu.dot_dimension_numbers<[1], [0], [0], [1], [0, 0, 1, 1], [], []>} : vector<8x128xbf16>, vector<128x192xbf16>, vector<8x192xf32> -> vector<8x192xf32>
    %c0_46 = arith.constant 0 : index
    %c0_47 = arith.constant 0 : index
    %83 = vector.load %arg9[%c0_46, %c0_47] : memref<1x192xf32, #tpu.memory_space<vmem>>, vector<1x192xf32>
    %84 = vector.broadcast %83 : vector<1x192xf32> to vector<8x192xf32>
    %85 = arith.addf %82, %84 : vector<8x192xf32>
    %86 = arith.addf %79, %85 : vector<8x192xf32>
    %cst_48 = arith.constant 0.000000e+00 : f32
    %87 = vector.broadcast %cst_48 : f32 to vector<8x192xf32>
    %88 = arith.cmpf oge, %86, %87 : vector<8x192xf32>
    %cst_49 = arith.constant 1.000000e-01 : f32
    %89 = vector.broadcast %cst_49 : f32 to vector<8x192xf32>
    %90 = arith.mulf %89, %86 : vector<8x192xf32>
    %91 = arith.select %88, %86, %90 : vector<8x192xi1>, vector<8x192xf32>
    %c0_50 = arith.constant 0 : index
    %c0_51 = arith.constant 0 : index
    %92 = vector.load %arg10[%c0_50, %c0_51] : memref<192x192xbf16, #tpu.memory_space<vmem>>, vector<192x192xbf16>
    %93 = arith.truncf %91 : vector<8x192xf32> to vector<8x192xbf16>
    %cst_52 = arith.constant dense<0.000000e+00> : vector<8x192xf32>
    %94 = tpu.matmul %93, %92, %cst_52 {dimension_numbers = #tpu.dot_dimension_numbers<[1], [0], [0], [1], [0, 0, 1, 1], [], []>} : vector<8x192xbf16>, vector<192x192xbf16>, vector<8x192xf32> -> vector<8x192xf32>
    %c0_53 = arith.constant 0 : index
    %c0_54 = arith.constant 0 : index
    %95 = vector.load %arg11[%c0_53, %c0_54] : memref<1x192xf32, #tpu.memory_space<vmem>>, vector<1x192xf32>
    %96 = vector.broadcast %95 : vector<1x192xf32> to vector<8x192xf32>
    %97 = arith.addf %94, %96 : vector<8x192xf32>
    %c0_55 = arith.constant 0 : index
    %c0_56 = arith.constant 0 : index
    %98 = vector.load %arg12[%c0_55, %c0_56] : memref<128x192xbf16, #tpu.memory_space<vmem>>, vector<128x192xbf16>
    %99 = arith.truncf %1 : vector<8x128xf32> to vector<8x128xbf16>
    %cst_57 = arith.constant dense<0.000000e+00> : vector<8x192xf32>
    %100 = tpu.matmul %99, %98, %cst_57 {dimension_numbers = #tpu.dot_dimension_numbers<[1], [0], [0], [1], [0, 0, 1, 1], [], []>} : vector<8x128xbf16>, vector<128x192xbf16>, vector<8x192xf32> -> vector<8x192xf32>
    %c0_58 = arith.constant 0 : index
    %c0_59 = arith.constant 0 : index
    %101 = vector.load %arg13[%c0_58, %c0_59] : memref<1x192xf32, #tpu.memory_space<vmem>>, vector<1x192xf32>
    %102 = vector.broadcast %101 : vector<1x192xf32> to vector<8x192xf32>
    %103 = arith.addf %100, %102 : vector<8x192xf32>
    %104 = arith.addf %97, %103 : vector<8x192xf32>
    %cst_60 = arith.constant 0.000000e+00 : f32
    %105 = vector.broadcast %cst_60 : f32 to vector<8x192xf32>
    %106 = arith.cmpf oge, %104, %105 : vector<8x192xf32>
    %cst_61 = arith.constant 1.000000e-01 : f32
    %107 = vector.broadcast %cst_61 : f32 to vector<8x192xf32>
    %108 = arith.mulf %107, %104 : vector<8x192xf32>
    %109 = arith.select %106, %104, %108 : vector<8x192xi1>, vector<8x192xf32>
    %c0_62 = arith.constant 0 : index
    %c0_63 = arith.constant 0 : index
    %c0_64 = arith.constant 0 : index
    %110 = vector.load %arg14[%c0_62, %c0_63, %c0_64] : memref<1x8x192xf32, #tpu.memory_space<vmem>>, vector<1x8x192xf32>
    %111 = vector.shape_cast %110 : vector<1x8x192xf32> to vector<8x192xf32>
    %112 = vector.shape_cast %109 : vector<8x192xf32> to vector<1x8x192xf32>
    tpu.vector_store %arg14[%c0_62, %c0_63, %c0_64], %112 {strides = array<i32>} : memref<1x8x192xf32, #tpu.memory_space<vmem>>, vector<1x8x192xf32>,
    return
  }
  func.func @transform_0(%arg0: i32) -> (i32, i32, i32) {
    %c0_i32 = arith.constant 0 : i32
    %c0_i32_0 = arith.constant 0 : i32
    %c0_i32_1 = arith.constant 0 : i32
    return %arg0, %c0_i32, %c0_i32_0 : i32, i32, i32
  }
  func.func @transform_1(%arg0: i32) -> (i32, i32) {
    %c0_i32 = arith.constant 0 : i32
    %c0_i32_0 = arith.constant 0 : i32
    %c0_i32_1 = arith.constant 0 : i32
    return %c0_i32, %c0_i32_0 : i32, i32
  }
  func.func @transform_2(%arg0: i32) -> (i32, i32) {
    %c0_i32 = arith.constant 0 : i32
    %c0_i32_0 = arith.constant 0 : i32
    %c0_i32_1 = arith.constant 0 : i32
    return %c0_i32, %c0_i32_0 : i32, i32
  }
  func.func @transform_3(%arg0: i32) -> (i32, i32) {
    %c0_i32 = arith.constant 0 : i32
    %c0_i32_0 = arith.constant 0 : i32
    %c0_i32_1 = arith.constant 0 : i32
    return %c0_i32, %c0_i32_0 : i32, i32
  }
  func.func @transform_4(%arg0: i32) -> (i32, i32, i32) {
    %c0_i32 = arith.constant 0 : i32
    %c0_i32_0 = arith.constant 0 : i32
    %c0_i32_1 = arith.constant 0 : i32
    %c0_i32_2 = arith.constant 0 : i32
    return %c0_i32, %c0_i32_0, %c0_i32_1 : i32, i32, i32
  }
  func.func @transform_5(%arg0: i32) -> (i32, i32, i32) {
    %c0_i32 = arith.constant 0 : i32
    %c0_i32_0 = arith.constant 0 : i32
    %c0_i32_1 = arith.constant 0 : i32
    %c0_i32_2 = arith.constant 0 : i32
    return %c0_i32, %c0_i32_0, %c0_i32_1 : i32, i32, i32
  }
  func.func @transform_6(%arg0: i32) -> (i32, i32) {
    %c0_i32 = arith.constant 0 : i32
    %c0_i32_0 = arith.constant 0 : i32
    %c0_i32_1 = arith.constant 0 : i32
    return %c0_i32, %c0_i32_0 : i32, i32
  }
  func.func @transform_7(%arg0: i32) -> (i32, i32) {
    %c0_i32 = arith.constant 0 : i32
    %c0_i32_0 = arith.constant 0 : i32
    %c0_i32_1 = arith.constant 0 : i32
    return %c0_i32, %c0_i32_0 : i32, i32
  }
  func.func @transform_8(%arg0: i32) -> (i32, i32) {
    %c0_i32 = arith.constant 0 : i32
    %c0_i32_0 = arith.constant 0 : i32
    %c0_i32_1 = arith.constant 0 : i32
    return %c0_i32, %c0_i32_0 : i32, i32
  }
  func.func @transform_9(%arg0: i32) -> (i32, i32) {
    %c0_i32 = arith.constant 0 : i32
    %c0_i32_0 = arith.constant 0 : i32
    %c0_i32_1 = arith.constant 0 : i32
    return %c0_i32, %c0_i32_0 : i32, i32
  }
  func.func @transform_10(%arg0: i32) -> (i32, i32) {
    %c0_i32 = arith.constant 0 : i32
    %c0_i32_0 = arith.constant 0 : i32
    %c0_i32_1 = arith.constant 0 : i32
    return %c0_i32, %c0_i32_0 : i32, i32
  }
  func.func @transform_11(%arg0: i32) -> (i32, i32) {
    %c0_i32 = arith.constant 0 : i32
    %c0_i32_0 = arith.constant 0 : i32
    %c0_i32_1 = arith.constant 0 : i32
    return %c0_i32, %c0_i32_0 : i32, i32
  }
  func.func @transform_12(%arg0: i32) -> (i32, i32) {
    %c0_i32 = arith.constant 0 : i32
    %c0_i32_0 = arith.constant 0 : i32
    %c0_i32_1 = arith.constant 0 : i32
    return %c0_i32, %c0_i32_0 : i32, i32
  }
  func.func @transform_13(%arg0: i32) -> (i32, i32, i32) {
    %c0_i32 = arith.constant 0 : i32
    %c0_i32_0 = arith.constant 0 : i32
    %c0_i32_1 = arith.constant 0 : i32
    return %arg0, %c0_i32, %c0_i32_0 : i32, i32, i32
  }
}

module attributes {stable_mosaic.version = 11 : i64} {
  func.func @kernel(%arg0: i32, %arg1: memref<1x16x96xf32, #tpu.memory_space<vmem>>, %arg2: memref<96x192xbf16, #tpu.memory_space<vmem>>, %arg3: memref<16x192xf32, #tpu.memory_space<vmem>>, %arg4: memref<1x3xf32, #tpu.memory_space<vmem>>, %arg5: memref<3x96x96xbf16, #tpu.memory_space<vmem>>, %arg6: memref<1x96xf32, #tpu.memory_space<vmem>>, %arg7: memref<96x96xbf16, #tpu.memory_space<vmem>>, %arg8: memref<1x96xf32, #tpu.memory_space<vmem>>, %arg9: memref<96x96xbf16, #tpu.memory_space<vmem>>, %arg10: memref<1x96xf32, #tpu.memory_space<vmem>>, %arg11: memref<96x96xbf16, #tpu.memory_space<vmem>>, %arg12: memref<1x96xf32, #tpu.memory_space<vmem>>, %arg13: memref<1x16x96xf32, #tpu.memory_space<vmem>>) attributes {dimension_semantics = [#tpu.dimension_semantics<parallel>], iteration_bounds = array<i64: 8>, scalar_prefetch = 0 : i64, scratch_operands = 0 : i64, tpu.core_type = #tpu.core_type<tc>, window_params = [{transform_indices = @transform_0, window_bounds = array<i64: 1, 16, 96>}, {pipeline_mode = #tpu.pipeline_mode<synchronous>, transform_indices = @transform_1, window_bounds = array<i64: 96, 192>}, {pipeline_mode = #tpu.pipeline_mode<synchronous>, transform_indices = @transform_2, window_bounds = array<i64: 16, 192>}, {pipeline_mode = #tpu.pipeline_mode<synchronous>, transform_indices = @transform_3, window_bounds = array<i64: 1, 3>}, {pipeline_mode = #tpu.pipeline_mode<synchronous>, transform_indices = @transform_4, window_bounds = array<i64: 3, 96, 96>}, {pipeline_mode = #tpu.pipeline_mode<synchronous>, transform_indices = @transform_5, window_bounds = array<i64: 1, 96>}, {pipeline_mode = #tpu.pipeline_mode<synchronous>, transform_indices = @transform_6, window_bounds = array<i64: 96, 96>}, {pipeline_mode = #tpu.pipeline_mode<synchronous>, transform_indices = @transform_7, window_bounds = array<i64: 1, 96>}, {pipeline_mode = #tpu.pipeline_mode<synchronous>, transform_indices = @transform_8, window_bounds = array<i64: 96, 96>}, {pipeline_mode = #tpu.pipeline_mode<synchronous>, transform_indices = @transform_9, window_bounds = array<i64: 1, 96>}, {pipeline_mode = #tpu.pipeline_mode<synchronous>, transform_indices = @transform_10, window_bounds = array<i64: 96, 96>}, {pipeline_mode = #tpu.pipeline_mode<synchronous>, transform_indices = @transform_11, window_bounds = array<i64: 1, 96>}, {transform_indices = @transform_12, window_bounds = array<i64: 1, 16, 96>}]} {
    %c0 = arith.constant 0 : index
    %c0_0 = arith.constant 0 : index
    %c0_1 = arith.constant 0 : index
    %0 = vector.load %arg1[%c0, %c0_0, %c0_1] : memref<1x16x96xf32, #tpu.memory_space<vmem>>, vector<1x16x96xf32>
    %1 = vector.shape_cast %0 : vector<1x16x96xf32> to vector<16x96xf32>
    %c0_2 = arith.constant 0 : index
    %c0_3 = arith.constant 0 : index
    %2 = vector.load %arg2[%c0_2, %c0_3] : memref<96x192xbf16, #tpu.memory_space<vmem>>, vector<96x192xbf16>
    %3 = arith.truncf %1 : vector<16x96xf32> to vector<16x96xbf16>
    %cst = arith.constant dense<0.000000e+00> : vector<16x192xf32>
    %4 = tpu.matmul %3, %2, %cst {dimension_numbers = #tpu.dot_dimension_numbers<[1], [0], [0], [1], [0, 0, 1, 1], [], []>} : vector<16x96xbf16>, vector<96x192xbf16>, vector<16x192xf32> -> vector<16x192xf32>
    %c0_4 = arith.constant 0 : index
    %c0_5 = arith.constant 0 : index
    %5 = vector.load %arg3[%c0_4, %c0_5] : memref<16x192xf32, #tpu.memory_space<vmem>>, vector<16x192xf32>
    %6 = arith.addf %4, %5 : vector<16x192xf32>
    %cst_6 = arith.constant 0.000000e+00 : f32
    %7 = vector.broadcast %cst_6 : f32 to vector<16x96xf32>
    %8 = vector.extract_strided_slice %6 {offsets = [0, 0], sizes = [16, 32], strides = [1, 1]} : vector<16x192xf32> to vector<16x32xf32>
    %9 = vector.extract_strided_slice %6 {offsets = [0, 96], sizes = [16, 32], strides = [1, 1]} : vector<16x192xf32> to vector<16x32xf32>
    %10 = tpu.transpose %8, [1, 0] : vector<16x32xf32> -> vector<32x16xf32>
    %11 = arith.truncf %9 : vector<16x32xf32> to vector<16x32xbf16>
    %12 = arith.truncf %10 : vector<32x16xf32> to vector<32x16xbf16>
    %cst_7 = arith.constant dense<0.000000e+00> : vector<16x16xf32>
    %13 = tpu.matmul %11, %12, %cst_7 {dimension_numbers = #tpu.dot_dimension_numbers<[1], [0], [0], [1], [0, 0, 1, 1], [], []>} : vector<16x32xbf16>, vector<32x16xbf16>, vector<16x16xf32> -> vector<16x16xf32>
    %cst_8 = arith.constant 3.125000e-02 : f32
    %14 = vector.broadcast %cst_8 : f32 to vector<16x16xf32>
    %15 = arith.mulf %13, %14 : vector<16x16xf32>
    %16 = math.tanh %15 : vector<16x16xf32>
    %c0_9 = arith.constant 0 : index
    %c0_10 = arith.constant 0 : index
    %17 = vector.load %arg4[%c0_9, %c0_10] : memref<1x3xf32, #tpu.memory_space<vmem>>, vector<1x1xf32>
    %18 = vector.broadcast %17 : vector<1x1xf32> to vector<16x16xf32>
    %19 = arith.mulf %16, %18 : vector<16x16xf32>
    %20 = arith.truncf %19 : vector<16x16xf32> to vector<16x16xbf16>
    %21 = arith.truncf %1 : vector<16x96xf32> to vector<16x96xbf16>
    %cst_11 = arith.constant dense<0.000000e+00> : vector<16x96xf32>
    %22 = tpu.matmul %20, %21, %cst_11 {dimension_numbers = #tpu.dot_dimension_numbers<[1], [0], [0], [1], [0, 0, 1, 1], [], []>} : vector<16x16xbf16>, vector<16x96xbf16>, vector<16x96xf32> -> vector<16x96xf32>
    %c0_12 = arith.constant 0 : index
    %c0_13 = arith.constant 0 : index
    %c0_14 = arith.constant 0 : index
    %23 = vector.load %arg5[%c0_12, %c0_13, %c0_14] : memref<3x96x96xbf16, #tpu.memory_space<vmem>>, vector<1x96x96xbf16>
    %24 = vector.shape_cast %23 : vector<1x96x96xbf16> to vector<96x96xbf16>
    %25 = arith.truncf %22 : vector<16x96xf32> to vector<16x96xbf16>
    %cst_15 = arith.constant dense<0.000000e+00> : vector<16x96xf32>
    %26 = tpu.matmul %25, %24, %cst_15 {dimension_numbers = #tpu.dot_dimension_numbers<[1], [0], [0], [1], [0, 0, 1, 1], [], []>} : vector<16x96xbf16>, vector<96x96xbf16>, vector<16x96xf32> -> vector<16x96xf32>
    %27 = arith.addf %7, %26 : vector<16x96xf32>
    %28 = vector.extract_strided_slice %6 {offsets = [0, 32], sizes = [16, 32], strides = [1, 1]} : vector<16x192xf32> to vector<16x32xf32>
    %29 = vector.extract_strided_slice %6 {offsets = [0, 128], sizes = [16, 32], strides = [1, 1]} : vector<16x192xf32> to vector<16x32xf32>
    %30 = tpu.transpose %28, [1, 0] : vector<16x32xf32> -> vector<32x16xf32>
    %31 = arith.truncf %29 : vector<16x32xf32> to vector<16x32xbf16>
    %32 = arith.truncf %30 : vector<32x16xf32> to vector<32x16xbf16>
    %cst_16 = arith.constant dense<0.000000e+00> : vector<16x16xf32>
    %33 = tpu.matmul %31, %32, %cst_16 {dimension_numbers = #tpu.dot_dimension_numbers<[1], [0], [0], [1], [0, 0, 1, 1], [], []>} : vector<16x32xbf16>, vector<32x16xbf16>, vector<16x16xf32> -> vector<16x16xf32>
    %cst_17 = arith.constant 3.125000e-02 : f32
    %34 = vector.broadcast %cst_17 : f32 to vector<16x16xf32>
    %35 = arith.mulf %33, %34 : vector<16x16xf32>
    %36 = math.tanh %35 : vector<16x16xf32>
    %c0_18 = arith.constant 0 : index
    %c1 = arith.constant 1 : index
    %37 = vector.load %arg4[%c0_18, %c1] : memref<1x3xf32, #tpu.memory_space<vmem>>, vector<1x1xf32>
    %38 = vector.broadcast %37 : vector<1x1xf32> to vector<16x16xf32>
    %39 = arith.mulf %36, %38 : vector<16x16xf32>
    %40 = arith.truncf %39 : vector<16x16xf32> to vector<16x16xbf16>
    %41 = arith.truncf %1 : vector<16x96xf32> to vector<16x96xbf16>
    %cst_19 = arith.constant dense<0.000000e+00> : vector<16x96xf32>
    %42 = tpu.matmul %40, %41, %cst_19 {dimension_numbers = #tpu.dot_dimension_numbers<[1], [0], [0], [1], [0, 0, 1, 1], [], []>} : vector<16x16xbf16>, vector<16x96xbf16>, vector<16x96xf32> -> vector<16x96xf32>
    %c1_20 = arith.constant 1 : index
    %c0_21 = arith.constant 0 : index
    %c0_22 = arith.constant 0 : index
    %43 = vector.load %arg5[%c1_20, %c0_21, %c0_22] : memref<3x96x96xbf16, #tpu.memory_space<vmem>>, vector<1x96x96xbf16>
    %44 = vector.shape_cast %43 : vector<1x96x96xbf16> to vector<96x96xbf16>
    %45 = arith.truncf %42 : vector<16x96xf32> to vector<16x96xbf16>
    %cst_23 = arith.constant dense<0.000000e+00> : vector<16x96xf32>
    %46 = tpu.matmul %45, %44, %cst_23 {dimension_numbers = #tpu.dot_dimension_numbers<[1], [0], [0], [1], [0, 0, 1, 1], [], []>} : vector<16x96xbf16>, vector<96x96xbf16>, vector<16x96xf32> -> vector<16x96xf32>
    %47 = arith.addf %27, %46 : vector<16x96xf32>
    %48 = vector.extract_strided_slice %6 {offsets = [0, 64], sizes = [16, 32], strides = [1, 1]} : vector<16x192xf32> to vector<16x32xf32>
    %49 = vector.extract_strided_slice %6 {offsets = [0, 160], sizes = [16, 32], strides = [1, 1]} : vector<16x192xf32> to vector<16x32xf32>
    %50 = tpu.transpose %48, [1, 0] : vector<16x32xf32> -> vector<32x16xf32>
    %51 = arith.truncf %49 : vector<16x32xf32> to vector<16x32xbf16>
    %52 = arith.truncf %50 : vector<32x16xf32> to vector<32x16xbf16>
    %cst_24 = arith.constant dense<0.000000e+00> : vector<16x16xf32>
    %53 = tpu.matmul %51, %52, %cst_24 {dimension_numbers = #tpu.dot_dimension_numbers<[1], [0], [0], [1], [0, 0, 1, 1], [], []>} : vector<16x32xbf16>, vector<32x16xbf16>, vector<16x16xf32> -> vector<16x16xf32>
    %cst_25 = arith.constant 3.125000e-02 : f32
    %54 = vector.broadcast %cst_25 : f32 to vector<16x16xf32>
    %55 = arith.mulf %53, %54 : vector<16x16xf32>
    %56 = math.tanh %55 : vector<16x16xf32>
    %c0_26 = arith.constant 0 : index
    %c2 = arith.constant 2 : index
    %57 = vector.load %arg4[%c0_26, %c2] : memref<1x3xf32, #tpu.memory_space<vmem>>, vector<1x1xf32>
    %58 = vector.broadcast %57 : vector<1x1xf32> to vector<16x16xf32>
    %59 = arith.mulf %56, %58 : vector<16x16xf32>
    %60 = arith.truncf %59 : vector<16x16xf32> to vector<16x16xbf16>
    %61 = arith.truncf %1 : vector<16x96xf32> to vector<16x96xbf16>
    %cst_27 = arith.constant dense<0.000000e+00> : vector<16x96xf32>
    %62 = tpu.matmul %60, %61, %cst_27 {dimension_numbers = #tpu.dot_dimension_numbers<[1], [0], [0], [1], [0, 0, 1, 1], [], []>} : vector<16x16xbf16>, vector<16x96xbf16>, vector<16x96xf32> -> vector<16x96xf32>
    %c2_28 = arith.constant 2 : index
    %c0_29 = arith.constant 0 : index
    %c0_30 = arith.constant 0 : index
    %63 = vector.load %arg5[%c2_28, %c0_29, %c0_30] : memref<3x96x96xbf16, #tpu.memory_space<vmem>>, vector<1x96x96xbf16>
    %64 = vector.shape_cast %63 : vector<1x96x96xbf16> to vector<96x96xbf16>
    %65 = arith.truncf %62 : vector<16x96xf32> to vector<16x96xbf16>
    %cst_31 = arith.constant dense<0.000000e+00> : vector<16x96xf32>
    %66 = tpu.matmul %65, %64, %cst_31 {dimension_numbers = #tpu.dot_dimension_numbers<[1], [0], [0], [1], [0, 0, 1, 1], [], []>} : vector<16x96xbf16>, vector<96x96xbf16>, vector<16x96xf32> -> vector<16x96xf32>
    %67 = arith.addf %47, %66 : vector<16x96xf32>
    %c0_32 = arith.constant 0 : index
    %c0_33 = arith.constant 0 : index
    %68 = vector.load %arg6[%c0_32, %c0_33] : memref<1x96xf32, #tpu.memory_space<vmem>>, vector<1x96xf32>
    %69 = vector.broadcast %68 : vector<1x96xf32> to vector<16x96xf32>
    %70 = arith.addf %67, %69 : vector<16x96xf32>
    %c0_34 = arith.constant 0 : index
    %c0_35 = arith.constant 0 : index
    %71 = vector.load %arg7[%c0_34, %c0_35] : memref<96x96xbf16, #tpu.memory_space<vmem>>, vector<96x96xbf16>
    %72 = arith.truncf %1 : vector<16x96xf32> to vector<16x96xbf16>
    %cst_36 = arith.constant dense<0.000000e+00> : vector<16x96xf32>
    %73 = tpu.matmul %72, %71, %cst_36 {dimension_numbers = #tpu.dot_dimension_numbers<[1], [0], [0], [1], [0, 0, 1, 1], [], []>} : vector<16x96xbf16>, vector<96x96xbf16>, vector<16x96xf32> -> vector<16x96xf32>
    %c0_37 = arith.constant 0 : index
    %c0_38 = arith.constant 0 : index
    %74 = vector.load %arg8[%c0_37, %c0_38] : memref<1x96xf32, #tpu.memory_space<vmem>>, vector<1x96xf32>
    %75 = vector.broadcast %74 : vector<1x96xf32> to vector<16x96xf32>
    %76 = arith.addf %73, %75 : vector<16x96xf32>
    %77 = arith.addf %70, %76 : vector<16x96xf32>
    %cst_39 = arith.constant 0.000000e+00 : f32
    %78 = vector.broadcast %cst_39 : f32 to vector<16x96xf32>
    %79 = arith.cmpf oge, %77, %78 : vector<16x96xf32>
    %cst_40 = arith.constant 1.000000e-01 : f32
    %80 = vector.broadcast %cst_40 : f32 to vector<16x96xf32>
    %81 = arith.mulf %80, %77 : vector<16x96xf32>
    %82 = arith.select %79, %77, %81 : vector<16x96xi1>, vector<16x96xf32>
    %c0_41 = arith.constant 0 : index
    %c0_42 = arith.constant 0 : index
    %83 = vector.load %arg9[%c0_41, %c0_42] : memref<96x96xbf16, #tpu.memory_space<vmem>>, vector<96x96xbf16>
    %84 = arith.truncf %82 : vector<16x96xf32> to vector<16x96xbf16>
    %cst_43 = arith.constant dense<0.000000e+00> : vector<16x96xf32>
    %85 = tpu.matmul %84, %83, %cst_43 {dimension_numbers = #tpu.dot_dimension_numbers<[1], [0], [0], [1], [0, 0, 1, 1], [], []>} : vector<16x96xbf16>, vector<96x96xbf16>, vector<16x96xf32> -> vector<16x96xf32>
    %c0_44 = arith.constant 0 : index
    %c0_45 = arith.constant 0 : index
    %86 = vector.load %arg10[%c0_44, %c0_45] : memref<1x96xf32, #tpu.memory_space<vmem>>, vector<1x96xf32>
    %87 = vector.broadcast %86 : vector<1x96xf32> to vector<16x96xf32>
    %88 = arith.addf %85, %87 : vector<16x96xf32>
    %c0_46 = arith.constant 0 : index
    %c0_47 = arith.constant 0 : index
    %89 = vector.load %arg11[%c0_46, %c0_47] : memref<96x96xbf16, #tpu.memory_space<vmem>>, vector<96x96xbf16>
    %90 = arith.truncf %1 : vector<16x96xf32> to vector<16x96xbf16>
    %cst_48 = arith.constant dense<0.000000e+00> : vector<16x96xf32>
    %91 = tpu.matmul %90, %89, %cst_48 {dimension_numbers = #tpu.dot_dimension_numbers<[1], [0], [0], [1], [0, 0, 1, 1], [], []>} : vector<16x96xbf16>, vector<96x96xbf16>, vector<16x96xf32> -> vector<16x96xf32>
    %c0_49 = arith.constant 0 : index
    %c0_50 = arith.constant 0 : index
    %92 = vector.load %arg12[%c0_49, %c0_50] : memref<1x96xf32, #tpu.memory_space<vmem>>, vector<1x96xf32>
    %93 = vector.broadcast %92 : vector<1x96xf32> to vector<16x96xf32>
    %94 = arith.addf %91, %93 : vector<16x96xf32>
    %95 = arith.addf %88, %94 : vector<16x96xf32>
    %cst_51 = arith.constant 0.000000e+00 : f32
    %96 = vector.broadcast %cst_51 : f32 to vector<16x96xf32>
    %97 = arith.cmpf oge, %95, %96 : vector<16x96xf32>
    %cst_52 = arith.constant 1.000000e-01 : f32
    %98 = vector.broadcast %cst_52 : f32 to vector<16x96xf32>
    %99 = arith.mulf %98, %95 : vector<16x96xf32>
    %100 = arith.select %97, %95, %99 : vector<16x96xi1>, vector<16x96xf32>
    %c0_53 = arith.constant 0 : index
    %c0_54 = arith.constant 0 : index
    %c0_55 = arith.constant 0 : index
    %101 = vector.load %arg13[%c0_53, %c0_54, %c0_55] : memref<1x16x96xf32, #tpu.memory_space<vmem>>, vector<1x16x96xf32>
    %102 = vector.shape_cast %101 : vector<1x16x96xf32> to vector<16x96xf32>
    %103 = vector.shape_cast %100 : vector<16x96xf32> to vector<1x16x96xf32>
    tpu.vector_store %arg13[%c0_53, %c0_54, %c0_55], %103 {strides = array<i32>} : memref<1x16x96xf32, #tpu.memory_space<vmem>>, vector<1x16x96xf32>,
    return
  }
  func.func @transform_0(%arg0: i32) -> (i32, i32, i32) {
    %c0_i32 = arith.constant 0 : i32
    %c0_i32_0 = arith.constant 0 : i32
    %c0_i32_1 = arith.constant 0 : i32
    return %arg0, %c0_i32, %c0_i32_0 : i32, i32, i32
  }
  func.func @transform_1(%arg0: i32) -> (i32, i32) {
    %c0_i32 = arith.constant 0 : i32
    %c0_i32_0 = arith.constant 0 : i32
    %c0_i32_1 = arith.constant 0 : i32
    return %c0_i32, %c0_i32_0 : i32, i32
  }
  func.func @transform_2(%arg0: i32) -> (i32, i32) {
    %c0_i32 = arith.constant 0 : i32
    %c0_i32_0 = arith.constant 0 : i32
    %c0_i32_1 = arith.constant 0 : i32
    return %c0_i32, %c0_i32_0 : i32, i32
  }
  func.func @transform_3(%arg0: i32) -> (i32, i32) {
    %c0_i32 = arith.constant 0 : i32
    %c0_i32_0 = arith.constant 0 : i32
    %c0_i32_1 = arith.constant 0 : i32
    return %c0_i32, %c0_i32_0 : i32, i32
  }
  func.func @transform_4(%arg0: i32) -> (i32, i32, i32) {
    %c0_i32 = arith.constant 0 : i32
    %c0_i32_0 = arith.constant 0 : i32
    %c0_i32_1 = arith.constant 0 : i32
    %c0_i32_2 = arith.constant 0 : i32
    return %c0_i32, %c0_i32_0, %c0_i32_1 : i32, i32, i32
  }
  func.func @transform_5(%arg0: i32) -> (i32, i32) {
    %c0_i32 = arith.constant 0 : i32
    %c0_i32_0 = arith.constant 0 : i32
    %c0_i32_1 = arith.constant 0 : i32
    return %c0_i32, %c0_i32_0 : i32, i32
  }
  func.func @transform_6(%arg0: i32) -> (i32, i32) {
    %c0_i32 = arith.constant 0 : i32
    %c0_i32_0 = arith.constant 0 : i32
    %c0_i32_1 = arith.constant 0 : i32
    return %c0_i32, %c0_i32_0 : i32, i32
  }
  func.func @transform_7(%arg0: i32) -> (i32, i32) {
    %c0_i32 = arith.constant 0 : i32
    %c0_i32_0 = arith.constant 0 : i32
    %c0_i32_1 = arith.constant 0 : i32
    return %c0_i32, %c0_i32_0 : i32, i32
  }
  func.func @transform_8(%arg0: i32) -> (i32, i32) {
    %c0_i32 = arith.constant 0 : i32
    %c0_i32_0 = arith.constant 0 : i32
    %c0_i32_1 = arith.constant 0 : i32
    return %c0_i32, %c0_i32_0 : i32, i32
  }
  func.func @transform_9(%arg0: i32) -> (i32, i32) {
    %c0_i32 = arith.constant 0 : i32
    %c0_i32_0 = arith.constant 0 : i32
    %c0_i32_1 = arith.constant 0 : i32
    return %c0_i32, %c0_i32_0 : i32, i32
  }
  func.func @transform_10(%arg0: i32) -> (i32, i32) {
    %c0_i32 = arith.constant 0 : i32
    %c0_i32_0 = arith.constant 0 : i32
    %c0_i32_1 = arith.constant 0 : i32
    return %c0_i32, %c0_i32_0 : i32, i32
  }
  func.func @transform_11(%arg0: i32) -> (i32, i32) {
    %c0_i32 = arith.constant 0 : i32
    %c0_i32_0 = arith.constant 0 : i32
    %c0_i32_1 = arith.constant 0 : i32
    return %c0_i32, %c0_i32_0 : i32, i32
  }
  func.func @transform_12(%arg0: i32) -> (i32, i32, i32) {
    %c0_i32 = arith.constant 0 : i32
    %c0_i32_0 = arith.constant 0 : i32
    %c0_i32_1 = arith.constant 0 : i32
    return %arg0, %c0_i32, %c0_i32_0 : i32, i32, i32
  }
}

module attributes {stable_mosaic.version = 11 : i64} {
  func.func @kernel(%arg0: i32, %arg1: memref<1x8x192xf32, #tpu.memory_space<vmem>>, %arg2: memref<192x384xbf16, #tpu.memory_space<vmem>>, %arg3: memref<8x384xf32, #tpu.memory_space<vmem>>, %arg4: memref<1x3xf32, #tpu.memory_space<vmem>>, %arg5: memref<3x8x8xf32, #tpu.memory_space<vmem>>, %arg6: memref<3x192x192xbf16, #tpu.memory_space<vmem>>, %arg7: memref<1x192xf32, #tpu.memory_space<vmem>>, %arg8: memref<192x192xbf16, #tpu.memory_space<vmem>>, %arg9: memref<1x192xf32, #tpu.memory_space<vmem>>, %arg10: memref<1x8x192xf32, #tpu.memory_space<vmem>>) attributes {dimension_semantics = [#tpu.dimension_semantics<parallel>], iteration_bounds = array<i64: 8>, scalar_prefetch = 0 : i64, scratch_operands = 0 : i64, tpu.core_type = #tpu.core_type<tc>, window_params = [{transform_indices = @transform_0, window_bounds = array<i64: 1, 8, 192>}, {pipeline_mode = #tpu.pipeline_mode<synchronous>, transform_indices = @transform_1, window_bounds = array<i64: 192, 384>}, {pipeline_mode = #tpu.pipeline_mode<synchronous>, transform_indices = @transform_2, window_bounds = array<i64: 8, 384>}, {pipeline_mode = #tpu.pipeline_mode<synchronous>, transform_indices = @transform_3, window_bounds = array<i64: 1, 3>}, {pipeline_mode = #tpu.pipeline_mode<synchronous>, transform_indices = @transform_4, window_bounds = array<i64: 3, 8, 8>}, {pipeline_mode = #tpu.pipeline_mode<synchronous>, transform_indices = @transform_5, window_bounds = array<i64: 3, 192, 192>}, {pipeline_mode = #tpu.pipeline_mode<synchronous>, transform_indices = @transform_6, window_bounds = array<i64: 1, 192>}, {pipeline_mode = #tpu.pipeline_mode<synchronous>, transform_indices = @transform_7, window_bounds = array<i64: 192, 192>}, {pipeline_mode = #tpu.pipeline_mode<synchronous>, transform_indices = @transform_8, window_bounds = array<i64: 1, 192>}, {transform_indices = @transform_9, window_bounds = array<i64: 1, 8, 192>}]} {
    %c0 = arith.constant 0 : index
    %c0_0 = arith.constant 0 : index
    %c0_1 = arith.constant 0 : index
    %0 = vector.load %arg1[%c0, %c0_0, %c0_1] : memref<1x8x192xf32, #tpu.memory_space<vmem>>, vector<1x8x192xf32>
    %1 = vector.shape_cast %0 : vector<1x8x192xf32> to vector<8x192xf32>
    %c0_2 = arith.constant 0 : index
    %c0_3 = arith.constant 0 : index
    %2 = vector.load %arg2[%c0_2, %c0_3] : memref<192x384xbf16, #tpu.memory_space<vmem>>, vector<192x384xbf16>
    %3 = arith.truncf %1 : vector<8x192xf32> to vector<8x192xbf16>
    %cst = arith.constant dense<0.000000e+00> : vector<8x384xf32>
    %4 = tpu.matmul %3, %2, %cst {dimension_numbers = #tpu.dot_dimension_numbers<[1], [0], [0], [1], [0, 0, 1, 1], [], []>} : vector<8x192xbf16>, vector<192x384xbf16>, vector<8x384xf32> -> vector<8x384xf32>
    %c0_4 = arith.constant 0 : index
    %c0_5 = arith.constant 0 : index
    %5 = vector.load %arg3[%c0_4, %c0_5] : memref<8x384xf32, #tpu.memory_space<vmem>>, vector<8x384xf32>
    %6 = arith.addf %4, %5 : vector<8x384xf32>
    %cst_6 = arith.constant 0.000000e+00 : f32
    %7 = vector.broadcast %cst_6 : f32 to vector<8x192xf32>
    %8 = vector.extract_strided_slice %6 {offsets = [0, 0], sizes = [8, 64], strides = [1, 1]} : vector<8x384xf32> to vector<8x64xf32>
    %9 = vector.extract_strided_slice %6 {offsets = [0, 192], sizes = [8, 64], strides = [1, 1]} : vector<8x384xf32> to vector<8x64xf32>
    %10 = tpu.transpose %8, [1, 0] : vector<8x64xf32> -> vector<64x8xf32>
    %11 = arith.truncf %9 : vector<8x64xf32> to vector<8x64xbf16>
    %12 = arith.truncf %10 : vector<64x8xf32> to vector<64x8xbf16>
    %cst_7 = arith.constant dense<0.000000e+00> : vector<8x8xf32>
    %13 = tpu.matmul %11, %12, %cst_7 {dimension_numbers = #tpu.dot_dimension_numbers<[1], [0], [0], [1], [0, 0, 1, 1], [], []>} : vector<8x64xbf16>, vector<64x8xbf16>, vector<8x8xf32> -> vector<8x8xf32>
    %cst_8 = arith.constant 1.562500e-02 : f32
    %14 = vector.broadcast %cst_8 : f32 to vector<8x8xf32>
    %15 = arith.mulf %13, %14 : vector<8x8xf32>
    %16 = math.tanh %15 : vector<8x8xf32>
    %c0_9 = arith.constant 0 : index
    %c0_10 = arith.constant 0 : index
    %17 = vector.load %arg4[%c0_9, %c0_10] : memref<1x3xf32, #tpu.memory_space<vmem>>, vector<1x1xf32>
    %18 = vector.broadcast %17 : vector<1x1xf32> to vector<8x8xf32>
    %19 = arith.mulf %16, %18 : vector<8x8xf32>
    %c0_11 = arith.constant 0 : index
    %c0_12 = arith.constant 0 : index
    %c0_13 = arith.constant 0 : index
    %20 = vector.load %arg5[%c0_11, %c0_12, %c0_13] : memref<3x8x8xf32, #tpu.memory_space<vmem>>, vector<1x8x8xf32>
    %21 = vector.shape_cast %20 : vector<1x8x8xf32> to vector<8x8xf32>
    %22 = arith.addf %19, %21 : vector<8x8xf32>
    %23 = arith.truncf %22 : vector<8x8xf32> to vector<8x8xbf16>
    %24 = arith.truncf %1 : vector<8x192xf32> to vector<8x192xbf16>
    %cst_14 = arith.constant dense<0.000000e+00> : vector<8x192xf32>
    %25 = tpu.matmul %23, %24, %cst_14 {dimension_numbers = #tpu.dot_dimension_numbers<[1], [0], [0], [1], [0, 0, 1, 1], [], []>} : vector<8x8xbf16>, vector<8x192xbf16>, vector<8x192xf32> -> vector<8x192xf32>
    %c0_15 = arith.constant 0 : index
    %c0_16 = arith.constant 0 : index
    %c0_17 = arith.constant 0 : index
    %26 = vector.load %arg6[%c0_15, %c0_16, %c0_17] : memref<3x192x192xbf16, #tpu.memory_space<vmem>>, vector<1x192x192xbf16>
    %27 = vector.shape_cast %26 : vector<1x192x192xbf16> to vector<192x192xbf16>
    %28 = arith.truncf %25 : vector<8x192xf32> to vector<8x192xbf16>
    %cst_18 = arith.constant dense<0.000000e+00> : vector<8x192xf32>
    %29 = tpu.matmul %28, %27, %cst_18 {dimension_numbers = #tpu.dot_dimension_numbers<[1], [0], [0], [1], [0, 0, 1, 1], [], []>} : vector<8x192xbf16>, vector<192x192xbf16>, vector<8x192xf32> -> vector<8x192xf32>
    %30 = arith.addf %7, %29 : vector<8x192xf32>
    %31 = vector.extract_strided_slice %6 {offsets = [0, 64], sizes = [8, 64], strides = [1, 1]} : vector<8x384xf32> to vector<8x64xf32>
    %32 = vector.extract_strided_slice %6 {offsets = [0, 256], sizes = [8, 64], strides = [1, 1]} : vector<8x384xf32> to vector<8x64xf32>
    %33 = tpu.transpose %31, [1, 0] : vector<8x64xf32> -> vector<64x8xf32>
    %34 = arith.truncf %32 : vector<8x64xf32> to vector<8x64xbf16>
    %35 = arith.truncf %33 : vector<64x8xf32> to vector<64x8xbf16>
    %cst_19 = arith.constant dense<0.000000e+00> : vector<8x8xf32>
    %36 = tpu.matmul %34, %35, %cst_19 {dimension_numbers = #tpu.dot_dimension_numbers<[1], [0], [0], [1], [0, 0, 1, 1], [], []>} : vector<8x64xbf16>, vector<64x8xbf16>, vector<8x8xf32> -> vector<8x8xf32>
    %cst_20 = arith.constant 1.562500e-02 : f32
    %37 = vector.broadcast %cst_20 : f32 to vector<8x8xf32>
    %38 = arith.mulf %36, %37 : vector<8x8xf32>
    %39 = math.tanh %38 : vector<8x8xf32>
    %c0_21 = arith.constant 0 : index
    %c1 = arith.constant 1 : index
    %40 = vector.load %arg4[%c0_21, %c1] : memref<1x3xf32, #tpu.memory_space<vmem>>, vector<1x1xf32>
    %41 = vector.broadcast %40 : vector<1x1xf32> to vector<8x8xf32>
    %42 = arith.mulf %39, %41 : vector<8x8xf32>
    %c1_22 = arith.constant 1 : index
    %c0_23 = arith.constant 0 : index
    %c0_24 = arith.constant 0 : index
    %43 = vector.load %arg5[%c1_22, %c0_23, %c0_24] : memref<3x8x8xf32, #tpu.memory_space<vmem>>, vector<1x8x8xf32>
    %44 = vector.shape_cast %43 : vector<1x8x8xf32> to vector<8x8xf32>
    %45 = arith.addf %42, %44 : vector<8x8xf32>
    %46 = arith.truncf %45 : vector<8x8xf32> to vector<8x8xbf16>
    %47 = arith.truncf %1 : vector<8x192xf32> to vector<8x192xbf16>
    %cst_25 = arith.constant dense<0.000000e+00> : vector<8x192xf32>
    %48 = tpu.matmul %46, %47, %cst_25 {dimension_numbers = #tpu.dot_dimension_numbers<[1], [0], [0], [1], [0, 0, 1, 1], [], []>} : vector<8x8xbf16>, vector<8x192xbf16>, vector<8x192xf32> -> vector<8x192xf32>
    %c1_26 = arith.constant 1 : index
    %c0_27 = arith.constant 0 : index
    %c0_28 = arith.constant 0 : index
    %49 = vector.load %arg6[%c1_26, %c0_27, %c0_28] : memref<3x192x192xbf16, #tpu.memory_space<vmem>>, vector<1x192x192xbf16>
    %50 = vector.shape_cast %49 : vector<1x192x192xbf16> to vector<192x192xbf16>
    %51 = arith.truncf %48 : vector<8x192xf32> to vector<8x192xbf16>
    %cst_29 = arith.constant dense<0.000000e+00> : vector<8x192xf32>
    %52 = tpu.matmul %51, %50, %cst_29 {dimension_numbers = #tpu.dot_dimension_numbers<[1], [0], [0], [1], [0, 0, 1, 1], [], []>} : vector<8x192xbf16>, vector<192x192xbf16>, vector<8x192xf32> -> vector<8x192xf32>
    %53 = arith.addf %30, %52 : vector<8x192xf32>
    %54 = vector.extract_strided_slice %6 {offsets = [0, 128], sizes = [8, 64], strides = [1, 1]} : vector<8x384xf32> to vector<8x64xf32>
    %55 = vector.extract_strided_slice %6 {offsets = [0, 320], sizes = [8, 64], strides = [1, 1]} : vector<8x384xf32> to vector<8x64xf32>
    %56 = tpu.transpose %54, [1, 0] : vector<8x64xf32> -> vector<64x8xf32>
    %57 = arith.truncf %55 : vector<8x64xf32> to vector<8x64xbf16>
    %58 = arith.truncf %56 : vector<64x8xf32> to vector<64x8xbf16>
    %cst_30 = arith.constant dense<0.000000e+00> : vector<8x8xf32>
    %59 = tpu.matmul %57, %58, %cst_30 {dimension_numbers = #tpu.dot_dimension_numbers<[1], [0], [0], [1], [0, 0, 1, 1], [], []>} : vector<8x64xbf16>, vector<64x8xbf16>, vector<8x8xf32> -> vector<8x8xf32>
    %cst_31 = arith.constant 1.562500e-02 : f32
    %60 = vector.broadcast %cst_31 : f32 to vector<8x8xf32>
    %61 = arith.mulf %59, %60 : vector<8x8xf32>
    %62 = math.tanh %61 : vector<8x8xf32>
    %c0_32 = arith.constant 0 : index
    %c2 = arith.constant 2 : index
    %63 = vector.load %arg4[%c0_32, %c2] : memref<1x3xf32, #tpu.memory_space<vmem>>, vector<1x1xf32>
    %64 = vector.broadcast %63 : vector<1x1xf32> to vector<8x8xf32>
    %65 = arith.mulf %62, %64 : vector<8x8xf32>
    %c2_33 = arith.constant 2 : index
    %c0_34 = arith.constant 0 : index
    %c0_35 = arith.constant 0 : index
    %66 = vector.load %arg5[%c2_33, %c0_34, %c0_35] : memref<3x8x8xf32, #tpu.memory_space<vmem>>, vector<1x8x8xf32>
    %67 = vector.shape_cast %66 : vector<1x8x8xf32> to vector<8x8xf32>
    %68 = arith.addf %65, %67 : vector<8x8xf32>
    %69 = arith.truncf %68 : vector<8x8xf32> to vector<8x8xbf16>
    %70 = arith.truncf %1 : vector<8x192xf32> to vector<8x192xbf16>
    %cst_36 = arith.constant dense<0.000000e+00> : vector<8x192xf32>
    %71 = tpu.matmul %69, %70, %cst_36 {dimension_numbers = #tpu.dot_dimension_numbers<[1], [0], [0], [1], [0, 0, 1, 1], [], []>} : vector<8x8xbf16>, vector<8x192xbf16>, vector<8x192xf32> -> vector<8x192xf32>
    %c2_37 = arith.constant 2 : index
    %c0_38 = arith.constant 0 : index
    %c0_39 = arith.constant 0 : index
    %72 = vector.load %arg6[%c2_37, %c0_38, %c0_39] : memref<3x192x192xbf16, #tpu.memory_space<vmem>>, vector<1x192x192xbf16>
    %73 = vector.shape_cast %72 : vector<1x192x192xbf16> to vector<192x192xbf16>
    %74 = arith.truncf %71 : vector<8x192xf32> to vector<8x192xbf16>
    %cst_40 = arith.constant dense<0.000000e+00> : vector<8x192xf32>
    %75 = tpu.matmul %74, %73, %cst_40 {dimension_numbers = #tpu.dot_dimension_numbers<[1], [0], [0], [1], [0, 0, 1, 1], [], []>} : vector<8x192xbf16>, vector<192x192xbf16>, vector<8x192xf32> -> vector<8x192xf32>
    %76 = arith.addf %53, %75 : vector<8x192xf32>
    %c0_41 = arith.constant 0 : index
    %c0_42 = arith.constant 0 : index
    %77 = vector.load %arg7[%c0_41, %c0_42] : memref<1x192xf32, #tpu.memory_space<vmem>>, vector<1x192xf32>
    %78 = vector.broadcast %77 : vector<1x192xf32> to vector<8x192xf32>
    %79 = arith.addf %76, %78 : vector<8x192xf32>
    %80 = arith.addf %79, %1 : vector<8x192xf32>
    %cst_43 = arith.constant 0.000000e+00 : f32
    %81 = vector.broadcast %cst_43 : f32 to vector<8x192xf32>
    %82 = arith.cmpf oge, %80, %81 : vector<8x192xf32>
    %cst_44 = arith.constant 1.000000e-01 : f32
    %83 = vector.broadcast %cst_44 : f32 to vector<8x192xf32>
    %84 = arith.mulf %83, %80 : vector<8x192xf32>
    %85 = arith.select %82, %80, %84 : vector<8x192xi1>, vector<8x192xf32>
    %c0_45 = arith.constant 0 : index
    %c0_46 = arith.constant 0 : index
    %86 = vector.load %arg8[%c0_45, %c0_46] : memref<192x192xbf16, #tpu.memory_space<vmem>>, vector<192x192xbf16>
    %87 = arith.truncf %85 : vector<8x192xf32> to vector<8x192xbf16>
    %cst_47 = arith.constant dense<0.000000e+00> : vector<8x192xf32>
    %88 = tpu.matmul %87, %86, %cst_47 {dimension_numbers = #tpu.dot_dimension_numbers<[1], [0], [0], [1], [0, 0, 1, 1], [], []>} : vector<8x192xbf16>, vector<192x192xbf16>, vector<8x192xf32> -> vector<8x192xf32>
    %c0_48 = arith.constant 0 : index
    %c0_49 = arith.constant 0 : index
    %89 = vector.load %arg9[%c0_48, %c0_49] : memref<1x192xf32, #tpu.memory_space<vmem>>, vector<1x192xf32>
    %90 = vector.broadcast %89 : vector<1x192xf32> to vector<8x192xf32>
    %91 = arith.addf %88, %90 : vector<8x192xf32>
    %92 = arith.addf %91, %1 : vector<8x192xf32>
    %cst_50 = arith.constant 0.000000e+00 : f32
    %93 = vector.broadcast %cst_50 : f32 to vector<8x192xf32>
    %94 = arith.cmpf oge, %92, %93 : vector<8x192xf32>
    %cst_51 = arith.constant 1.000000e-01 : f32
    %95 = vector.broadcast %cst_51 : f32 to vector<8x192xf32>
    %96 = arith.mulf %95, %92 : vector<8x192xf32>
    %97 = arith.select %94, %92, %96 : vector<8x192xi1>, vector<8x192xf32>
    %c0_52 = arith.constant 0 : index
    %c0_53 = arith.constant 0 : index
    %c0_54 = arith.constant 0 : index
    %98 = vector.load %arg10[%c0_52, %c0_53, %c0_54] : memref<1x8x192xf32, #tpu.memory_space<vmem>>, vector<1x8x192xf32>
    %99 = vector.shape_cast %98 : vector<1x8x192xf32> to vector<8x192xf32>
    %100 = vector.shape_cast %97 : vector<8x192xf32> to vector<1x8x192xf32>
    tpu.vector_store %arg10[%c0_52, %c0_53, %c0_54], %100 {strides = array<i32>} : memref<1x8x192xf32, #tpu.memory_space<vmem>>, vector<1x8x192xf32>,
    return
  }
  func.func @transform_0(%arg0: i32) -> (i32, i32, i32) {
    %c0_i32 = arith.constant 0 : i32
    %c0_i32_0 = arith.constant 0 : i32
    %c0_i32_1 = arith.constant 0 : i32
    return %arg0, %c0_i32, %c0_i32_0 : i32, i32, i32
  }
  func.func @transform_1(%arg0: i32) -> (i32, i32) {
    %c0_i32 = arith.constant 0 : i32
    %c0_i32_0 = arith.constant 0 : i32
    %c0_i32_1 = arith.constant 0 : i32
    return %c0_i32, %c0_i32_0 : i32, i32
  }
  func.func @transform_2(%arg0: i32) -> (i32, i32) {
    %c0_i32 = arith.constant 0 : i32
    %c0_i32_0 = arith.constant 0 : i32
    %c0_i32_1 = arith.constant 0 : i32
    return %c0_i32, %c0_i32_0 : i32, i32
  }
  func.func @transform_3(%arg0: i32) -> (i32, i32) {
    %c0_i32 = arith.constant 0 : i32
    %c0_i32_0 = arith.constant 0 : i32
    %c0_i32_1 = arith.constant 0 : i32
    return %c0_i32, %c0_i32_0 : i32, i32
  }
  func.func @transform_4(%arg0: i32) -> (i32, i32, i32) {
    %c0_i32 = arith.constant 0 : i32
    %c0_i32_0 = arith.constant 0 : i32
    %c0_i32_1 = arith.constant 0 : i32
    %c0_i32_2 = arith.constant 0 : i32
    return %c0_i32, %c0_i32_0, %c0_i32_1 : i32, i32, i32
  }
  func.func @transform_5(%arg0: i32) -> (i32, i32, i32) {
    %c0_i32 = arith.constant 0 : i32
    %c0_i32_0 = arith.constant 0 : i32
    %c0_i32_1 = arith.constant 0 : i32
    %c0_i32_2 = arith.constant 0 : i32
    return %c0_i32, %c0_i32_0, %c0_i32_1 : i32, i32, i32
  }
  func.func @transform_6(%arg0: i32) -> (i32, i32) {
    %c0_i32 = arith.constant 0 : i32
    %c0_i32_0 = arith.constant 0 : i32
    %c0_i32_1 = arith.constant 0 : i32
    return %c0_i32, %c0_i32_0 : i32, i32
  }
  func.func @transform_7(%arg0: i32) -> (i32, i32) {
    %c0_i32 = arith.constant 0 : i32
    %c0_i32_0 = arith.constant 0 : i32
    %c0_i32_1 = arith.constant 0 : i32
    return %c0_i32, %c0_i32_0 : i32, i32
  }
  func.func @transform_8(%arg0: i32) -> (i32, i32) {
    %c0_i32 = arith.constant 0 : i32
    %c0_i32_0 = arith.constant 0 : i32
    %c0_i32_1 = arith.constant 0 : i32
    return %c0_i32, %c0_i32_0 : i32, i32
  }
  func.func @transform_9(%arg0: i32) -> (i32, i32, i32) {
    %c0_i32 = arith.constant 0 : i32
    %c0_i32_0 = arith.constant 0 : i32
    %c0_i32_1 = arith.constant 0 : i32
    return %arg0, %c0_i32, %c0_i32_0 : i32, i32, i32
  }
}

module attributes {stable_mosaic.version = 11 : i64} {
  func.func @kernel(%arg0: i32, %arg1: memref<1x16x96xf32, #tpu.memory_space<vmem>>, %arg2: memref<96x192xbf16, #tpu.memory_space<vmem>>, %arg3: memref<16x192xf32, #tpu.memory_space<vmem>>, %arg4: memref<1x3xf32, #tpu.memory_space<vmem>>, %arg5: memref<3x96x96xbf16, #tpu.memory_space<vmem>>, %arg6: memref<1x96xf32, #tpu.memory_space<vmem>>, %arg7: memref<96x96xbf16, #tpu.memory_space<vmem>>, %arg8: memref<1x96xf32, #tpu.memory_space<vmem>>, %arg9: memref<1x16x96xf32, #tpu.memory_space<vmem>>) attributes {dimension_semantics = [#tpu.dimension_semantics<parallel>], iteration_bounds = array<i64: 8>, scalar_prefetch = 0 : i64, scratch_operands = 0 : i64, tpu.core_type = #tpu.core_type<tc>, window_params = [{transform_indices = @transform_0, window_bounds = array<i64: 1, 16, 96>}, {pipeline_mode = #tpu.pipeline_mode<synchronous>, transform_indices = @transform_1, window_bounds = array<i64: 96, 192>}, {pipeline_mode = #tpu.pipeline_mode<synchronous>, transform_indices = @transform_2, window_bounds = array<i64: 16, 192>}, {pipeline_mode = #tpu.pipeline_mode<synchronous>, transform_indices = @transform_3, window_bounds = array<i64: 1, 3>}, {pipeline_mode = #tpu.pipeline_mode<synchronous>, transform_indices = @transform_4, window_bounds = array<i64: 3, 96, 96>}, {pipeline_mode = #tpu.pipeline_mode<synchronous>, transform_indices = @transform_5, window_bounds = array<i64: 1, 96>}, {pipeline_mode = #tpu.pipeline_mode<synchronous>, transform_indices = @transform_6, window_bounds = array<i64: 96, 96>}, {pipeline_mode = #tpu.pipeline_mode<synchronous>, transform_indices = @transform_7, window_bounds = array<i64: 1, 96>}, {transform_indices = @transform_8, window_bounds = array<i64: 1, 16, 96>}]} {
    %c0 = arith.constant 0 : index
    %c0_0 = arith.constant 0 : index
    %c0_1 = arith.constant 0 : index
    %0 = vector.load %arg1[%c0, %c0_0, %c0_1] : memref<1x16x96xf32, #tpu.memory_space<vmem>>, vector<1x16x96xf32>
    %1 = vector.shape_cast %0 : vector<1x16x96xf32> to vector<16x96xf32>
    %c0_2 = arith.constant 0 : index
    %c0_3 = arith.constant 0 : index
    %2 = vector.load %arg2[%c0_2, %c0_3] : memref<96x192xbf16, #tpu.memory_space<vmem>>, vector<96x192xbf16>
    %3 = arith.truncf %1 : vector<16x96xf32> to vector<16x96xbf16>
    %cst = arith.constant dense<0.000000e+00> : vector<16x192xf32>
    %4 = tpu.matmul %3, %2, %cst {dimension_numbers = #tpu.dot_dimension_numbers<[1], [0], [0], [1], [0, 0, 1, 1], [], []>} : vector<16x96xbf16>, vector<96x192xbf16>, vector<16x192xf32> -> vector<16x192xf32>
    %c0_4 = arith.constant 0 : index
    %c0_5 = arith.constant 0 : index
    %5 = vector.load %arg3[%c0_4, %c0_5] : memref<16x192xf32, #tpu.memory_space<vmem>>, vector<16x192xf32>
    %6 = arith.addf %4, %5 : vector<16x192xf32>
    %cst_6 = arith.constant 0.000000e+00 : f32
    %7 = vector.broadcast %cst_6 : f32 to vector<16x96xf32>
    %8 = vector.extract_strided_slice %6 {offsets = [0, 0], sizes = [16, 32], strides = [1, 1]} : vector<16x192xf32> to vector<16x32xf32>
    %9 = vector.extract_strided_slice %6 {offsets = [0, 96], sizes = [16, 32], strides = [1, 1]} : vector<16x192xf32> to vector<16x32xf32>
    %10 = tpu.transpose %8, [1, 0] : vector<16x32xf32> -> vector<32x16xf32>
    %11 = arith.truncf %9 : vector<16x32xf32> to vector<16x32xbf16>
    %12 = arith.truncf %10 : vector<32x16xf32> to vector<32x16xbf16>
    %cst_7 = arith.constant dense<0.000000e+00> : vector<16x16xf32>
    %13 = tpu.matmul %11, %12, %cst_7 {dimension_numbers = #tpu.dot_dimension_numbers<[1], [0], [0], [1], [0, 0, 1, 1], [], []>} : vector<16x32xbf16>, vector<32x16xbf16>, vector<16x16xf32> -> vector<16x16xf32>
    %cst_8 = arith.constant 3.125000e-02 : f32
    %14 = vector.broadcast %cst_8 : f32 to vector<16x16xf32>
    %15 = arith.mulf %13, %14 : vector<16x16xf32>
    %16 = math.tanh %15 : vector<16x16xf32>
    %c0_9 = arith.constant 0 : index
    %c0_10 = arith.constant 0 : index
    %17 = vector.load %arg4[%c0_9, %c0_10] : memref<1x3xf32, #tpu.memory_space<vmem>>, vector<1x1xf32>
    %18 = vector.broadcast %17 : vector<1x1xf32> to vector<16x16xf32>
    %19 = arith.mulf %16, %18 : vector<16x16xf32>
    %20 = arith.truncf %19 : vector<16x16xf32> to vector<16x16xbf16>
    %21 = arith.truncf %1 : vector<16x96xf32> to vector<16x96xbf16>
    %cst_11 = arith.constant dense<0.000000e+00> : vector<16x96xf32>
    %22 = tpu.matmul %20, %21, %cst_11 {dimension_numbers = #tpu.dot_dimension_numbers<[1], [0], [0], [1], [0, 0, 1, 1], [], []>} : vector<16x16xbf16>, vector<16x96xbf16>, vector<16x96xf32> -> vector<16x96xf32>
    %c0_12 = arith.constant 0 : index
    %c0_13 = arith.constant 0 : index
    %c0_14 = arith.constant 0 : index
    %23 = vector.load %arg5[%c0_12, %c0_13, %c0_14] : memref<3x96x96xbf16, #tpu.memory_space<vmem>>, vector<1x96x96xbf16>
    %24 = vector.shape_cast %23 : vector<1x96x96xbf16> to vector<96x96xbf16>
    %25 = arith.truncf %22 : vector<16x96xf32> to vector<16x96xbf16>
    %cst_15 = arith.constant dense<0.000000e+00> : vector<16x96xf32>
    %26 = tpu.matmul %25, %24, %cst_15 {dimension_numbers = #tpu.dot_dimension_numbers<[1], [0], [0], [1], [0, 0, 1, 1], [], []>} : vector<16x96xbf16>, vector<96x96xbf16>, vector<16x96xf32> -> vector<16x96xf32>
    %27 = arith.addf %7, %26 : vector<16x96xf32>
    %28 = vector.extract_strided_slice %6 {offsets = [0, 32], sizes = [16, 32], strides = [1, 1]} : vector<16x192xf32> to vector<16x32xf32>
    %29 = vector.extract_strided_slice %6 {offsets = [0, 128], sizes = [16, 32], strides = [1, 1]} : vector<16x192xf32> to vector<16x32xf32>
    %30 = tpu.transpose %28, [1, 0] : vector<16x32xf32> -> vector<32x16xf32>
    %31 = arith.truncf %29 : vector<16x32xf32> to vector<16x32xbf16>
    %32 = arith.truncf %30 : vector<32x16xf32> to vector<32x16xbf16>
    %cst_16 = arith.constant dense<0.000000e+00> : vector<16x16xf32>
    %33 = tpu.matmul %31, %32, %cst_16 {dimension_numbers = #tpu.dot_dimension_numbers<[1], [0], [0], [1], [0, 0, 1, 1], [], []>} : vector<16x32xbf16>, vector<32x16xbf16>, vector<16x16xf32> -> vector<16x16xf32>
    %cst_17 = arith.constant 3.125000e-02 : f32
    %34 = vector.broadcast %cst_17 : f32 to vector<16x16xf32>
    %35 = arith.mulf %33, %34 : vector<16x16xf32>
    %36 = math.tanh %35 : vector<16x16xf32>
    %c0_18 = arith.constant 0 : index
    %c1 = arith.constant 1 : index
    %37 = vector.load %arg4[%c0_18, %c1] : memref<1x3xf32, #tpu.memory_space<vmem>>, vector<1x1xf32>
    %38 = vector.broadcast %37 : vector<1x1xf32> to vector<16x16xf32>
    %39 = arith.mulf %36, %38 : vector<16x16xf32>
    %40 = arith.truncf %39 : vector<16x16xf32> to vector<16x16xbf16>
    %41 = arith.truncf %1 : vector<16x96xf32> to vector<16x96xbf16>
    %cst_19 = arith.constant dense<0.000000e+00> : vector<16x96xf32>
    %42 = tpu.matmul %40, %41, %cst_19 {dimension_numbers = #tpu.dot_dimension_numbers<[1], [0], [0], [1], [0, 0, 1, 1], [], []>} : vector<16x16xbf16>, vector<16x96xbf16>, vector<16x96xf32> -> vector<16x96xf32>
    %c1_20 = arith.constant 1 : index
    %c0_21 = arith.constant 0 : index
    %c0_22 = arith.constant 0 : index
    %43 = vector.load %arg5[%c1_20, %c0_21, %c0_22] : memref<3x96x96xbf16, #tpu.memory_space<vmem>>, vector<1x96x96xbf16>
    %44 = vector.shape_cast %43 : vector<1x96x96xbf16> to vector<96x96xbf16>
    %45 = arith.truncf %42 : vector<16x96xf32> to vector<16x96xbf16>
    %cst_23 = arith.constant dense<0.000000e+00> : vector<16x96xf32>
    %46 = tpu.matmul %45, %44, %cst_23 {dimension_numbers = #tpu.dot_dimension_numbers<[1], [0], [0], [1], [0, 0, 1, 1], [], []>} : vector<16x96xbf16>, vector<96x96xbf16>, vector<16x96xf32> -> vector<16x96xf32>
    %47 = arith.addf %27, %46 : vector<16x96xf32>
    %48 = vector.extract_strided_slice %6 {offsets = [0, 64], sizes = [16, 32], strides = [1, 1]} : vector<16x192xf32> to vector<16x32xf32>
    %49 = vector.extract_strided_slice %6 {offsets = [0, 160], sizes = [16, 32], strides = [1, 1]} : vector<16x192xf32> to vector<16x32xf32>
    %50 = tpu.transpose %48, [1, 0] : vector<16x32xf32> -> vector<32x16xf32>
    %51 = arith.truncf %49 : vector<16x32xf32> to vector<16x32xbf16>
    %52 = arith.truncf %50 : vector<32x16xf32> to vector<32x16xbf16>
    %cst_24 = arith.constant dense<0.000000e+00> : vector<16x16xf32>
    %53 = tpu.matmul %51, %52, %cst_24 {dimension_numbers = #tpu.dot_dimension_numbers<[1], [0], [0], [1], [0, 0, 1, 1], [], []>} : vector<16x32xbf16>, vector<32x16xbf16>, vector<16x16xf32> -> vector<16x16xf32>
    %cst_25 = arith.constant 3.125000e-02 : f32
    %54 = vector.broadcast %cst_25 : f32 to vector<16x16xf32>
    %55 = arith.mulf %53, %54 : vector<16x16xf32>
    %56 = math.tanh %55 : vector<16x16xf32>
    %c0_26 = arith.constant 0 : index
    %c2 = arith.constant 2 : index
    %57 = vector.load %arg4[%c0_26, %c2] : memref<1x3xf32, #tpu.memory_space<vmem>>, vector<1x1xf32>
    %58 = vector.broadcast %57 : vector<1x1xf32> to vector<16x16xf32>
    %59 = arith.mulf %56, %58 : vector<16x16xf32>
    %60 = arith.truncf %59 : vector<16x16xf32> to vector<16x16xbf16>
    %61 = arith.truncf %1 : vector<16x96xf32> to vector<16x96xbf16>
    %cst_27 = arith.constant dense<0.000000e+00> : vector<16x96xf32>
    %62 = tpu.matmul %60, %61, %cst_27 {dimension_numbers = #tpu.dot_dimension_numbers<[1], [0], [0], [1], [0, 0, 1, 1], [], []>} : vector<16x16xbf16>, vector<16x96xbf16>, vector<16x96xf32> -> vector<16x96xf32>
    %c2_28 = arith.constant 2 : index
    %c0_29 = arith.constant 0 : index
    %c0_30 = arith.constant 0 : index
    %63 = vector.load %arg5[%c2_28, %c0_29, %c0_30] : memref<3x96x96xbf16, #tpu.memory_space<vmem>>, vector<1x96x96xbf16>
    %64 = vector.shape_cast %63 : vector<1x96x96xbf16> to vector<96x96xbf16>
    %65 = arith.truncf %62 : vector<16x96xf32> to vector<16x96xbf16>
    %cst_31 = arith.constant dense<0.000000e+00> : vector<16x96xf32>
    %66 = tpu.matmul %65, %64, %cst_31 {dimension_numbers = #tpu.dot_dimension_numbers<[1], [0], [0], [1], [0, 0, 1, 1], [], []>} : vector<16x96xbf16>, vector<96x96xbf16>, vector<16x96xf32> -> vector<16x96xf32>
    %67 = arith.addf %47, %66 : vector<16x96xf32>
    %c0_32 = arith.constant 0 : index
    %c0_33 = arith.constant 0 : index
    %68 = vector.load %arg6[%c0_32, %c0_33] : memref<1x96xf32, #tpu.memory_space<vmem>>, vector<1x96xf32>
    %69 = vector.broadcast %68 : vector<1x96xf32> to vector<16x96xf32>
    %70 = arith.addf %67, %69 : vector<16x96xf32>
    %71 = arith.addf %70, %1 : vector<16x96xf32>
    %cst_34 = arith.constant 0.000000e+00 : f32
    %72 = vector.broadcast %cst_34 : f32 to vector<16x96xf32>
    %73 = arith.cmpf oge, %71, %72 : vector<16x96xf32>
    %cst_35 = arith.constant 1.000000e-01 : f32
    %74 = vector.broadcast %cst_35 : f32 to vector<16x96xf32>
    %75 = arith.mulf %74, %71 : vector<16x96xf32>
    %76 = arith.select %73, %71, %75 : vector<16x96xi1>, vector<16x96xf32>
    %c0_36 = arith.constant 0 : index
    %c0_37 = arith.constant 0 : index
    %77 = vector.load %arg7[%c0_36, %c0_37] : memref<96x96xbf16, #tpu.memory_space<vmem>>, vector<96x96xbf16>
    %78 = arith.truncf %76 : vector<16x96xf32> to vector<16x96xbf16>
    %cst_38 = arith.constant dense<0.000000e+00> : vector<16x96xf32>
    %79 = tpu.matmul %78, %77, %cst_38 {dimension_numbers = #tpu.dot_dimension_numbers<[1], [0], [0], [1], [0, 0, 1, 1], [], []>} : vector<16x96xbf16>, vector<96x96xbf16>, vector<16x96xf32> -> vector<16x96xf32>
    %c0_39 = arith.constant 0 : index
    %c0_40 = arith.constant 0 : index
    %80 = vector.load %arg8[%c0_39, %c0_40] : memref<1x96xf32, #tpu.memory_space<vmem>>, vector<1x96xf32>
    %81 = vector.broadcast %80 : vector<1x96xf32> to vector<16x96xf32>
    %82 = arith.addf %79, %81 : vector<16x96xf32>
    %83 = arith.addf %82, %1 : vector<16x96xf32>
    %cst_41 = arith.constant 0.000000e+00 : f32
    %84 = vector.broadcast %cst_41 : f32 to vector<16x96xf32>
    %85 = arith.cmpf oge, %83, %84 : vector<16x96xf32>
    %cst_42 = arith.constant 1.000000e-01 : f32
    %86 = vector.broadcast %cst_42 : f32 to vector<16x96xf32>
    %87 = arith.mulf %86, %83 : vector<16x96xf32>
    %88 = arith.select %85, %83, %87 : vector<16x96xi1>, vector<16x96xf32>
    %c0_43 = arith.constant 0 : index
    %c0_44 = arith.constant 0 : index
    %c0_45 = arith.constant 0 : index
    %89 = vector.load %arg9[%c0_43, %c0_44, %c0_45] : memref<1x16x96xf32, #tpu.memory_space<vmem>>, vector<1x16x96xf32>
    %90 = vector.shape_cast %89 : vector<1x16x96xf32> to vector<16x96xf32>
    %91 = vector.shape_cast %88 : vector<16x96xf32> to vector<1x16x96xf32>
    tpu.vector_store %arg9[%c0_43, %c0_44, %c0_45], %91 {strides = array<i32>} : memref<1x16x96xf32, #tpu.memory_space<vmem>>, vector<1x16x96xf32>,
    return
  }
  func.func @transform_0(%arg0: i32) -> (i32, i32, i32) {
    %c0_i32 = arith.constant 0 : i32
    %c0_i32_0 = arith.constant 0 : i32
    %c0_i32_1 = arith.constant 0 : i32
    return %arg0, %c0_i32, %c0_i32_0 : i32, i32, i32
  }
  func.func @transform_1(%arg0: i32) -> (i32, i32) {
    %c0_i32 = arith.constant 0 : i32
    %c0_i32_0 = arith.constant 0 : i32
    %c0_i32_1 = arith.constant 0 : i32
    return %c0_i32, %c0_i32_0 : i32, i32
  }
  func.func @transform_2(%arg0: i32) -> (i32, i32) {
    %c0_i32 = arith.constant 0 : i32
    %c0_i32_0 = arith.constant 0 : i32
    %c0_i32_1 = arith.constant 0 : i32
    return %c0_i32, %c0_i32_0 : i32, i32
  }
  func.func @transform_3(%arg0: i32) -> (i32, i32) {
    %c0_i32 = arith.constant 0 : i32
    %c0_i32_0 = arith.constant 0 : i32
    %c0_i32_1 = arith.constant 0 : i32
    return %c0_i32, %c0_i32_0 : i32, i32
  }
  func.func @transform_4(%arg0: i32) -> (i32, i32, i32) {
    %c0_i32 = arith.constant 0 : i32
    %c0_i32_0 = arith.constant 0 : i32
    %c0_i32_1 = arith.constant 0 : i32
    %c0_i32_2 = arith.constant 0 : i32
    return %c0_i32, %c0_i32_0, %c0_i32_1 : i32, i32, i32
  }
  func.func @transform_5(%arg0: i32) -> (i32, i32) {
    %c0_i32 = arith.constant 0 : i32
    %c0_i32_0 = arith.constant 0 : i32
    %c0_i32_1 = arith.constant 0 : i32
    return %c0_i32, %c0_i32_0 : i32, i32
  }
  func.func @transform_6(%arg0: i32) -> (i32, i32) {
    %c0_i32 = arith.constant 0 : i32
    %c0_i32_0 = arith.constant 0 : i32
    %c0_i32_1 = arith.constant 0 : i32
    return %c0_i32, %c0_i32_0 : i32, i32
  }
  func.func @transform_7(%arg0: i32) -> (i32, i32) {
    %c0_i32 = arith.constant 0 : i32
    %c0_i32_0 = arith.constant 0 : i32
    %c0_i32_1 = arith.constant 0 : i32
    return %c0_i32, %c0_i32_0 : i32, i32
  }
  func.func @transform_8(%arg0: i32) -> (i32, i32, i32) {
    %c0_i32 = arith.constant 0 : i32
    %c0_i32_0 = arith.constant 0 : i32
    %c0_i32_1 = arith.constant 0 : i32
    return %arg0, %c0_i32, %c0_i32_0 : i32, i32, i32
  }
}

module attributes {stable_mosaic.version = 11 : i64} {
  func.func @kernel(%arg0: i32, %arg1: memref<1x8x192xf32, #tpu.memory_space<vmem>>, %arg2: memref<1x8x192xf32, #tpu.memory_space<vmem>>, %arg3: memref<192x192xbf16, #tpu.memory_space<vmem>>, %arg4: memref<1x192xf32, #tpu.memory_space<vmem>>, %arg5: memref<192x384xbf16, #tpu.memory_space<vmem>>, %arg6: memref<1x384xf32, #tpu.memory_space<vmem>>, %arg7: memref<3x64x192xbf16, #tpu.memory_space<vmem>>, %arg8: memref<1x192xf32, #tpu.memory_space<vmem>>, %arg9: memref<1x8x192xf32, #tpu.memory_space<vmem>>) attributes {dimension_semantics = [#tpu.dimension_semantics<parallel>], iteration_bounds = array<i64: 8>, scalar_prefetch = 0 : i64, scratch_operands = 0 : i64, tpu.core_type = #tpu.core_type<tc>, window_params = [{transform_indices = @transform_0, window_bounds = array<i64: 1, 8, 192>}, {transform_indices = @transform_1, window_bounds = array<i64: 1, 8, 192>}, {pipeline_mode = #tpu.pipeline_mode<synchronous>, transform_indices = @transform_2, window_bounds = array<i64: 192, 192>}, {pipeline_mode = #tpu.pipeline_mode<synchronous>, transform_indices = @transform_3, window_bounds = array<i64: 1, 192>}, {pipeline_mode = #tpu.pipeline_mode<synchronous>, transform_indices = @transform_4, window_bounds = array<i64: 192, 384>}, {pipeline_mode = #tpu.pipeline_mode<synchronous>, transform_indices = @transform_5, window_bounds = array<i64: 1, 384>}, {pipeline_mode = #tpu.pipeline_mode<synchronous>, transform_indices = @transform_6, window_bounds = array<i64: 3, 64, 192>}, {pipeline_mode = #tpu.pipeline_mode<synchronous>, transform_indices = @transform_7, window_bounds = array<i64: 1, 192>}, {transform_indices = @transform_8, window_bounds = array<i64: 1, 8, 192>}]} {
    %c0 = arith.constant 0 : index
    %c0_0 = arith.constant 0 : index
    %c0_1 = arith.constant 0 : index
    %0 = vector.load %arg1[%c0, %c0_0, %c0_1] : memref<1x8x192xf32, #tpu.memory_space<vmem>>, vector<1x8x192xf32>
    %1 = vector.shape_cast %0 : vector<1x8x192xf32> to vector<8x192xf32>
    %c0_2 = arith.constant 0 : index
    %c0_3 = arith.constant 0 : index
    %c0_4 = arith.constant 0 : index
    %2 = vector.load %arg2[%c0_2, %c0_3, %c0_4] : memref<1x8x192xf32, #tpu.memory_space<vmem>>, vector<1x8x192xf32>
    %3 = vector.shape_cast %2 : vector<1x8x192xf32> to vector<8x192xf32>
    %c0_5 = arith.constant 0 : index
    %c0_6 = arith.constant 0 : index
    %4 = vector.load %arg3[%c0_5, %c0_6] : memref<192x192xbf16, #tpu.memory_space<vmem>>, vector<192x192xbf16>
    %5 = arith.truncf %1 : vector<8x192xf32> to vector<8x192xbf16>
    %cst = arith.constant dense<0.000000e+00> : vector<8x192xf32>
    %6 = tpu.matmul %5, %4, %cst {dimension_numbers = #tpu.dot_dimension_numbers<[1], [0], [0], [1], [0, 0, 1, 1], [], []>} : vector<8x192xbf16>, vector<192x192xbf16>, vector<8x192xf32> -> vector<8x192xf32>
    %c0_7 = arith.constant 0 : index
    %c0_8 = arith.constant 0 : index
    %7 = vector.load %arg4[%c0_7, %c0_8] : memref<1x192xf32, #tpu.memory_space<vmem>>, vector<1x192xf32>
    %8 = vector.broadcast %7 : vector<1x192xf32> to vector<8x192xf32>
    %9 = arith.addf %6, %8 : vector<8x192xf32>
    %c0_9 = arith.constant 0 : index
    %c0_10 = arith.constant 0 : index
    %10 = vector.load %arg5[%c0_9, %c0_10] : memref<192x384xbf16, #tpu.memory_space<vmem>>, vector<192x384xbf16>
    %11 = arith.truncf %3 : vector<8x192xf32> to vector<8x192xbf16>
    %cst_11 = arith.constant dense<0.000000e+00> : vector<8x384xf32>
    %12 = tpu.matmul %11, %10, %cst_11 {dimension_numbers = #tpu.dot_dimension_numbers<[1], [0], [0], [1], [0, 0, 1, 1], [], []>} : vector<8x192xbf16>, vector<192x384xbf16>, vector<8x384xf32> -> vector<8x384xf32>
    %c0_12 = arith.constant 0 : index
    %c0_13 = arith.constant 0 : index
    %13 = vector.load %arg6[%c0_12, %c0_13] : memref<1x384xf32, #tpu.memory_space<vmem>>, vector<1x384xf32>
    %14 = vector.broadcast %13 : vector<1x384xf32> to vector<8x384xf32>
    %15 = arith.addf %12, %14 : vector<8x384xf32>
    %cst_14 = arith.constant 0.000000e+00 : f32
    %16 = vector.broadcast %cst_14 : f32 to vector<8x192xf32>
    %17 = vector.extract_strided_slice %9 {offsets = [0, 0], sizes = [8, 64], strides = [1, 1]} : vector<8x192xf32> to vector<8x64xf32>
    %18 = vector.extract_strided_slice %15 {offsets = [0, 0], sizes = [8, 64], strides = [1, 1]} : vector<8x384xf32> to vector<8x64xf32>
    %19 = vector.extract_strided_slice %15 {offsets = [0, 192], sizes = [8, 64], strides = [1, 1]} : vector<8x384xf32> to vector<8x64xf32>
    %20 = tpu.transpose %18, [1, 0] : vector<8x64xf32> -> vector<64x8xf32>
    %21 = arith.truncf %17 : vector<8x64xf32> to vector<8x64xbf16>
    %22 = arith.truncf %20 : vector<64x8xf32> to vector<64x8xbf16>
    %cst_15 = arith.constant dense<0.000000e+00> : vector<8x8xf32>
    %23 = tpu.matmul %21, %22, %cst_15 {dimension_numbers = #tpu.dot_dimension_numbers<[1], [0], [0], [1], [0, 0, 1, 1], [], []>} : vector<8x64xbf16>, vector<64x8xbf16>, vector<8x8xf32> -> vector<8x8xf32>
    %cst_16 = arith.constant 1.562500e-02 : f32
    %24 = vector.broadcast %cst_16 : f32 to vector<8x8xf32>
    %25 = arith.mulf %23, %24 : vector<8x8xf32>
    %26 = math.tanh %25 : vector<8x8xf32>
    %27 = arith.truncf %26 : vector<8x8xf32> to vector<8x8xbf16>
    %28 = arith.truncf %19 : vector<8x64xf32> to vector<8x64xbf16>
    %cst_17 = arith.constant dense<0.000000e+00> : vector<8x64xf32>
    %29 = tpu.matmul %27, %28, %cst_17 {dimension_numbers = #tpu.dot_dimension_numbers<[1], [0], [0], [1], [0, 0, 1, 1], [], []>} : vector<8x8xbf16>, vector<8x64xbf16>, vector<8x64xf32> -> vector<8x64xf32>
    %c0_18 = arith.constant 0 : index
    %c0_19 = arith.constant 0 : index
    %c0_20 = arith.constant 0 : index
    %30 = vector.load %arg7[%c0_18, %c0_19, %c0_20] : memref<3x64x192xbf16, #tpu.memory_space<vmem>>, vector<1x64x192xbf16>
    %31 = vector.shape_cast %30 : vector<1x64x192xbf16> to vector<64x192xbf16>
    %32 = arith.truncf %29 : vector<8x64xf32> to vector<8x64xbf16>
    %cst_21 = arith.constant dense<0.000000e+00> : vector<8x192xf32>
    %33 = tpu.matmul %32, %31, %cst_21 {dimension_numbers = #tpu.dot_dimension_numbers<[1], [0], [0], [1], [0, 0, 1, 1], [], []>} : vector<8x64xbf16>, vector<64x192xbf16>, vector<8x192xf32> -> vector<8x192xf32>
    %34 = arith.addf %16, %33 : vector<8x192xf32>
    %35 = vector.extract_strided_slice %9 {offsets = [0, 64], sizes = [8, 64], strides = [1, 1]} : vector<8x192xf32> to vector<8x64xf32>
    %36 = vector.extract_strided_slice %15 {offsets = [0, 64], sizes = [8, 64], strides = [1, 1]} : vector<8x384xf32> to vector<8x64xf32>
    %37 = vector.extract_strided_slice %15 {offsets = [0, 256], sizes = [8, 64], strides = [1, 1]} : vector<8x384xf32> to vector<8x64xf32>
    %38 = tpu.transpose %36, [1, 0] : vector<8x64xf32> -> vector<64x8xf32>
    %39 = arith.truncf %35 : vector<8x64xf32> to vector<8x64xbf16>
    %40 = arith.truncf %38 : vector<64x8xf32> to vector<64x8xbf16>
    %cst_22 = arith.constant dense<0.000000e+00> : vector<8x8xf32>
    %41 = tpu.matmul %39, %40, %cst_22 {dimension_numbers = #tpu.dot_dimension_numbers<[1], [0], [0], [1], [0, 0, 1, 1], [], []>} : vector<8x64xbf16>, vector<64x8xbf16>, vector<8x8xf32> -> vector<8x8xf32>
    %cst_23 = arith.constant 1.562500e-02 : f32
    %42 = vector.broadcast %cst_23 : f32 to vector<8x8xf32>
    %43 = arith.mulf %41, %42 : vector<8x8xf32>
    %44 = math.tanh %43 : vector<8x8xf32>
    %45 = arith.truncf %44 : vector<8x8xf32> to vector<8x8xbf16>
    %46 = arith.truncf %37 : vector<8x64xf32> to vector<8x64xbf16>
    %cst_24 = arith.constant dense<0.000000e+00> : vector<8x64xf32>
    %47 = tpu.matmul %45, %46, %cst_24 {dimension_numbers = #tpu.dot_dimension_numbers<[1], [0], [0], [1], [0, 0, 1, 1], [], []>} : vector<8x8xbf16>, vector<8x64xbf16>, vector<8x64xf32> -> vector<8x64xf32>
    %c1 = arith.constant 1 : index
    %c0_25 = arith.constant 0 : index
    %c0_26 = arith.constant 0 : index
    %48 = vector.load %arg7[%c1, %c0_25, %c0_26] : memref<3x64x192xbf16, #tpu.memory_space<vmem>>, vector<1x64x192xbf16>
    %49 = vector.shape_cast %48 : vector<1x64x192xbf16> to vector<64x192xbf16>
    %50 = arith.truncf %47 : vector<8x64xf32> to vector<8x64xbf16>
    %cst_27 = arith.constant dense<0.000000e+00> : vector<8x192xf32>
    %51 = tpu.matmul %50, %49, %cst_27 {dimension_numbers = #tpu.dot_dimension_numbers<[1], [0], [0], [1], [0, 0, 1, 1], [], []>} : vector<8x64xbf16>, vector<64x192xbf16>, vector<8x192xf32> -> vector<8x192xf32>
    %52 = arith.addf %34, %51 : vector<8x192xf32>
    %53 = vector.extract_strided_slice %9 {offsets = [0, 128], sizes = [8, 64], strides = [1, 1]} : vector<8x192xf32> to vector<8x64xf32>
    %54 = vector.extract_strided_slice %15 {offsets = [0, 128], sizes = [8, 64], strides = [1, 1]} : vector<8x384xf32> to vector<8x64xf32>
    %55 = vector.extract_strided_slice %15 {offsets = [0, 320], sizes = [8, 64], strides = [1, 1]} : vector<8x384xf32> to vector<8x64xf32>
    %56 = tpu.transpose %54, [1, 0] : vector<8x64xf32> -> vector<64x8xf32>
    %57 = arith.truncf %53 : vector<8x64xf32> to vector<8x64xbf16>
    %58 = arith.truncf %56 : vector<64x8xf32> to vector<64x8xbf16>
    %cst_28 = arith.constant dense<0.000000e+00> : vector<8x8xf32>
    %59 = tpu.matmul %57, %58, %cst_28 {dimension_numbers = #tpu.dot_dimension_numbers<[1], [0], [0], [1], [0, 0, 1, 1], [], []>} : vector<8x64xbf16>, vector<64x8xbf16>, vector<8x8xf32> -> vector<8x8xf32>
    %cst_29 = arith.constant 1.562500e-02 : f32
    %60 = vector.broadcast %cst_29 : f32 to vector<8x8xf32>
    %61 = arith.mulf %59, %60 : vector<8x8xf32>
    %62 = math.tanh %61 : vector<8x8xf32>
    %63 = arith.truncf %62 : vector<8x8xf32> to vector<8x8xbf16>
    %64 = arith.truncf %55 : vector<8x64xf32> to vector<8x64xbf16>
    %cst_30 = arith.constant dense<0.000000e+00> : vector<8x64xf32>
    %65 = tpu.matmul %63, %64, %cst_30 {dimension_numbers = #tpu.dot_dimension_numbers<[1], [0], [0], [1], [0, 0, 1, 1], [], []>} : vector<8x8xbf16>, vector<8x64xbf16>, vector<8x64xf32> -> vector<8x64xf32>
    %c2 = arith.constant 2 : index
    %c0_31 = arith.constant 0 : index
    %c0_32 = arith.constant 0 : index
    %66 = vector.load %arg7[%c2, %c0_31, %c0_32] : memref<3x64x192xbf16, #tpu.memory_space<vmem>>, vector<1x64x192xbf16>
    %67 = vector.shape_cast %66 : vector<1x64x192xbf16> to vector<64x192xbf16>
    %68 = arith.truncf %65 : vector<8x64xf32> to vector<8x64xbf16>
    %cst_33 = arith.constant dense<0.000000e+00> : vector<8x192xf32>
    %69 = tpu.matmul %68, %67, %cst_33 {dimension_numbers = #tpu.dot_dimension_numbers<[1], [0], [0], [1], [0, 0, 1, 1], [], []>} : vector<8x64xbf16>, vector<64x192xbf16>, vector<8x192xf32> -> vector<8x192xf32>
    %70 = arith.addf %52, %69 : vector<8x192xf32>
    %c0_34 = arith.constant 0 : index
    %c0_35 = arith.constant 0 : index
    %71 = vector.load %arg8[%c0_34, %c0_35] : memref<1x192xf32, #tpu.memory_space<vmem>>, vector<1x192xf32>
    %72 = vector.broadcast %71 : vector<1x192xf32> to vector<8x192xf32>
    %73 = arith.addf %70, %72 : vector<8x192xf32>
    %74 = arith.addf %73, %1 : vector<8x192xf32>
    %cst_36 = arith.constant 0.000000e+00 : f32
    %75 = vector.broadcast %cst_36 : f32 to vector<8x192xf32>
    %76 = arith.cmpf oge, %74, %75 : vector<8x192xf32>
    %cst_37 = arith.constant 1.000000e-01 : f32
    %77 = vector.broadcast %cst_37 : f32 to vector<8x192xf32>
    %78 = arith.mulf %77, %74 : vector<8x192xf32>
    %79 = arith.select %76, %74, %78 : vector<8x192xi1>, vector<8x192xf32>
    %c0_38 = arith.constant 0 : index
    %c0_39 = arith.constant 0 : index
    %c0_40 = arith.constant 0 : index
    %80 = vector.load %arg9[%c0_38, %c0_39, %c0_40] : memref<1x8x192xf32, #tpu.memory_space<vmem>>, vector<1x8x192xf32>
    %81 = vector.shape_cast %80 : vector<1x8x192xf32> to vector<8x192xf32>
    %82 = vector.shape_cast %79 : vector<8x192xf32> to vector<1x8x192xf32>
    tpu.vector_store %arg9[%c0_38, %c0_39, %c0_40], %82 {strides = array<i32>} : memref<1x8x192xf32, #tpu.memory_space<vmem>>, vector<1x8x192xf32>,
    return
  }
  func.func @transform_0(%arg0: i32) -> (i32, i32, i32) {
    %c0_i32 = arith.constant 0 : i32
    %c0_i32_0 = arith.constant 0 : i32
    %c0_i32_1 = arith.constant 0 : i32
    return %arg0, %c0_i32, %c0_i32_0 : i32, i32, i32
  }
  func.func @transform_1(%arg0: i32) -> (i32, i32, i32) {
    %c0_i32 = arith.constant 0 : i32
    %c0_i32_0 = arith.constant 0 : i32
    %c0_i32_1 = arith.constant 0 : i32
    return %arg0, %c0_i32, %c0_i32_0 : i32, i32, i32
  }
  func.func @transform_2(%arg0: i32) -> (i32, i32) {
    %c0_i32 = arith.constant 0 : i32
    %c0_i32_0 = arith.constant 0 : i32
    %c0_i32_1 = arith.constant 0 : i32
    return %c0_i32, %c0_i32_0 : i32, i32
  }
  func.func @transform_3(%arg0: i32) -> (i32, i32) {
    %c0_i32 = arith.constant 0 : i32
    %c0_i32_0 = arith.constant 0 : i32
    %c0_i32_1 = arith.constant 0 : i32
    return %c0_i32, %c0_i32_0 : i32, i32
  }
  func.func @transform_4(%arg0: i32) -> (i32, i32) {
    %c0_i32 = arith.constant 0 : i32
    %c0_i32_0 = arith.constant 0 : i32
    %c0_i32_1 = arith.constant 0 : i32
    return %c0_i32, %c0_i32_0 : i32, i32
  }
  func.func @transform_5(%arg0: i32) -> (i32, i32) {
    %c0_i32 = arith.constant 0 : i32
    %c0_i32_0 = arith.constant 0 : i32
    %c0_i32_1 = arith.constant 0 : i32
    return %c0_i32, %c0_i32_0 : i32, i32
  }
  func.func @transform_6(%arg0: i32) -> (i32, i32, i32) {
    %c0_i32 = arith.constant 0 : i32
    %c0_i32_0 = arith.constant 0 : i32
    %c0_i32_1 = arith.constant 0 : i32
    %c0_i32_2 = arith.constant 0 : i32
    return %c0_i32, %c0_i32_0, %c0_i32_1 : i32, i32, i32
  }
  func.func @transform_7(%arg0: i32) -> (i32, i32) {
    %c0_i32 = arith.constant 0 : i32
    %c0_i32_0 = arith.constant 0 : i32
    %c0_i32_1 = arith.constant 0 : i32
    return %c0_i32, %c0_i32_0 : i32, i32
  }
  func.func @transform_8(%arg0: i32) -> (i32, i32, i32) {
    %c0_i32 = arith.constant 0 : i32
    %c0_i32_0 = arith.constant 0 : i32
    %c0_i32_1 = arith.constant 0 : i32
    return %arg0, %c0_i32, %c0_i32_0 : i32, i32, i32
  }
}

module attributes {stable_mosaic.version = 11 : i64} {
  func.func @kernel(%arg0: i32, %arg1: memref<1x16x96xf32, #tpu.memory_space<vmem>>, %arg2: memref<1x16x96xf32, #tpu.memory_space<vmem>>, %arg3: memref<96x96xbf16, #tpu.memory_space<vmem>>, %arg4: memref<1x96xf32, #tpu.memory_space<vmem>>, %arg5: memref<96x192xbf16, #tpu.memory_space<vmem>>, %arg6: memref<1x192xf32, #tpu.memory_space<vmem>>, %arg7: memref<3x32x96xbf16, #tpu.memory_space<vmem>>, %arg8: memref<1x96xf32, #tpu.memory_space<vmem>>, %arg9: memref<1x16x96xf32, #tpu.memory_space<vmem>>) attributes {dimension_semantics = [#tpu.dimension_semantics<parallel>], iteration_bounds = array<i64: 8>, scalar_prefetch = 0 : i64, scratch_operands = 0 : i64, tpu.core_type = #tpu.core_type<tc>, window_params = [{transform_indices = @transform_0, window_bounds = array<i64: 1, 16, 96>}, {transform_indices = @transform_1, window_bounds = array<i64: 1, 16, 96>}, {pipeline_mode = #tpu.pipeline_mode<synchronous>, transform_indices = @transform_2, window_bounds = array<i64: 96, 96>}, {pipeline_mode = #tpu.pipeline_mode<synchronous>, transform_indices = @transform_3, window_bounds = array<i64: 1, 96>}, {pipeline_mode = #tpu.pipeline_mode<synchronous>, transform_indices = @transform_4, window_bounds = array<i64: 96, 192>}, {pipeline_mode = #tpu.pipeline_mode<synchronous>, transform_indices = @transform_5, window_bounds = array<i64: 1, 192>}, {pipeline_mode = #tpu.pipeline_mode<synchronous>, transform_indices = @transform_6, window_bounds = array<i64: 3, 32, 96>}, {pipeline_mode = #tpu.pipeline_mode<synchronous>, transform_indices = @transform_7, window_bounds = array<i64: 1, 96>}, {transform_indices = @transform_8, window_bounds = array<i64: 1, 16, 96>}]} {
    %c0 = arith.constant 0 : index
    %c0_0 = arith.constant 0 : index
    %c0_1 = arith.constant 0 : index
    %0 = vector.load %arg1[%c0, %c0_0, %c0_1] : memref<1x16x96xf32, #tpu.memory_space<vmem>>, vector<1x16x96xf32>
    %1 = vector.shape_cast %0 : vector<1x16x96xf32> to vector<16x96xf32>
    %c0_2 = arith.constant 0 : index
    %c0_3 = arith.constant 0 : index
    %c0_4 = arith.constant 0 : index
    %2 = vector.load %arg2[%c0_2, %c0_3, %c0_4] : memref<1x16x96xf32, #tpu.memory_space<vmem>>, vector<1x16x96xf32>
    %3 = vector.shape_cast %2 : vector<1x16x96xf32> to vector<16x96xf32>
    %c0_5 = arith.constant 0 : index
    %c0_6 = arith.constant 0 : index
    %4 = vector.load %arg3[%c0_5, %c0_6] : memref<96x96xbf16, #tpu.memory_space<vmem>>, vector<96x96xbf16>
    %5 = arith.truncf %1 : vector<16x96xf32> to vector<16x96xbf16>
    %cst = arith.constant dense<0.000000e+00> : vector<16x96xf32>
    %6 = tpu.matmul %5, %4, %cst {dimension_numbers = #tpu.dot_dimension_numbers<[1], [0], [0], [1], [0, 0, 1, 1], [], []>} : vector<16x96xbf16>, vector<96x96xbf16>, vector<16x96xf32> -> vector<16x96xf32>
    %c0_7 = arith.constant 0 : index
    %c0_8 = arith.constant 0 : index
    %7 = vector.load %arg4[%c0_7, %c0_8] : memref<1x96xf32, #tpu.memory_space<vmem>>, vector<1x96xf32>
    %8 = vector.broadcast %7 : vector<1x96xf32> to vector<16x96xf32>
    %9 = arith.addf %6, %8 : vector<16x96xf32>
    %c0_9 = arith.constant 0 : index
    %c0_10 = arith.constant 0 : index
    %10 = vector.load %arg5[%c0_9, %c0_10] : memref<96x192xbf16, #tpu.memory_space<vmem>>, vector<96x192xbf16>
    %11 = arith.truncf %3 : vector<16x96xf32> to vector<16x96xbf16>
    %cst_11 = arith.constant dense<0.000000e+00> : vector<16x192xf32>
    %12 = tpu.matmul %11, %10, %cst_11 {dimension_numbers = #tpu.dot_dimension_numbers<[1], [0], [0], [1], [0, 0, 1, 1], [], []>} : vector<16x96xbf16>, vector<96x192xbf16>, vector<16x192xf32> -> vector<16x192xf32>
    %c0_12 = arith.constant 0 : index
    %c0_13 = arith.constant 0 : index
    %13 = vector.load %arg6[%c0_12, %c0_13] : memref<1x192xf32, #tpu.memory_space<vmem>>, vector<1x192xf32>
    %14 = vector.broadcast %13 : vector<1x192xf32> to vector<16x192xf32>
    %15 = arith.addf %12, %14 : vector<16x192xf32>
    %cst_14 = arith.constant 0.000000e+00 : f32
    %16 = vector.broadcast %cst_14 : f32 to vector<16x96xf32>
    %17 = vector.extract_strided_slice %9 {offsets = [0, 0], sizes = [16, 32], strides = [1, 1]} : vector<16x96xf32> to vector<16x32xf32>
    %18 = vector.extract_strided_slice %15 {offsets = [0, 0], sizes = [16, 32], strides = [1, 1]} : vector<16x192xf32> to vector<16x32xf32>
    %19 = vector.extract_strided_slice %15 {offsets = [0, 96], sizes = [16, 32], strides = [1, 1]} : vector<16x192xf32> to vector<16x32xf32>
    %20 = tpu.transpose %18, [1, 0] : vector<16x32xf32> -> vector<32x16xf32>
    %21 = arith.truncf %17 : vector<16x32xf32> to vector<16x32xbf16>
    %22 = arith.truncf %20 : vector<32x16xf32> to vector<32x16xbf16>
    %cst_15 = arith.constant dense<0.000000e+00> : vector<16x16xf32>
    %23 = tpu.matmul %21, %22, %cst_15 {dimension_numbers = #tpu.dot_dimension_numbers<[1], [0], [0], [1], [0, 0, 1, 1], [], []>} : vector<16x32xbf16>, vector<32x16xbf16>, vector<16x16xf32> -> vector<16x16xf32>
    %cst_16 = arith.constant 3.125000e-02 : f32
    %24 = vector.broadcast %cst_16 : f32 to vector<16x16xf32>
    %25 = arith.mulf %23, %24 : vector<16x16xf32>
    %26 = math.tanh %25 : vector<16x16xf32>
    %27 = arith.truncf %26 : vector<16x16xf32> to vector<16x16xbf16>
    %28 = arith.truncf %19 : vector<16x32xf32> to vector<16x32xbf16>
    %cst_17 = arith.constant dense<0.000000e+00> : vector<16x32xf32>
    %29 = tpu.matmul %27, %28, %cst_17 {dimension_numbers = #tpu.dot_dimension_numbers<[1], [0], [0], [1], [0, 0, 1, 1], [], []>} : vector<16x16xbf16>, vector<16x32xbf16>, vector<16x32xf32> -> vector<16x32xf32>
    %c0_18 = arith.constant 0 : index
    %c0_19 = arith.constant 0 : index
    %c0_20 = arith.constant 0 : index
    %30 = vector.load %arg7[%c0_18, %c0_19, %c0_20] : memref<3x32x96xbf16, #tpu.memory_space<vmem>>, vector<1x32x96xbf16>
    %31 = vector.shape_cast %30 : vector<1x32x96xbf16> to vector<32x96xbf16>
    %32 = arith.truncf %29 : vector<16x32xf32> to vector<16x32xbf16>
    %cst_21 = arith.constant dense<0.000000e+00> : vector<16x96xf32>
    %33 = tpu.matmul %32, %31, %cst_21 {dimension_numbers = #tpu.dot_dimension_numbers<[1], [0], [0], [1], [0, 0, 1, 1], [], []>} : vector<16x32xbf16>, vector<32x96xbf16>, vector<16x96xf32> -> vector<16x96xf32>
    %34 = arith.addf %16, %33 : vector<16x96xf32>
    %35 = vector.extract_strided_slice %9 {offsets = [0, 32], sizes = [16, 32], strides = [1, 1]} : vector<16x96xf32> to vector<16x32xf32>
    %36 = vector.extract_strided_slice %15 {offsets = [0, 32], sizes = [16, 32], strides = [1, 1]} : vector<16x192xf32> to vector<16x32xf32>
    %37 = vector.extract_strided_slice %15 {offsets = [0, 128], sizes = [16, 32], strides = [1, 1]} : vector<16x192xf32> to vector<16x32xf32>
    %38 = tpu.transpose %36, [1, 0] : vector<16x32xf32> -> vector<32x16xf32>
    %39 = arith.truncf %35 : vector<16x32xf32> to vector<16x32xbf16>
    %40 = arith.truncf %38 : vector<32x16xf32> to vector<32x16xbf16>
    %cst_22 = arith.constant dense<0.000000e+00> : vector<16x16xf32>
    %41 = tpu.matmul %39, %40, %cst_22 {dimension_numbers = #tpu.dot_dimension_numbers<[1], [0], [0], [1], [0, 0, 1, 1], [], []>} : vector<16x32xbf16>, vector<32x16xbf16>, vector<16x16xf32> -> vector<16x16xf32>
    %cst_23 = arith.constant 3.125000e-02 : f32
    %42 = vector.broadcast %cst_23 : f32 to vector<16x16xf32>
    %43 = arith.mulf %41, %42 : vector<16x16xf32>
    %44 = math.tanh %43 : vector<16x16xf32>
    %45 = arith.truncf %44 : vector<16x16xf32> to vector<16x16xbf16>
    %46 = arith.truncf %37 : vector<16x32xf32> to vector<16x32xbf16>
    %cst_24 = arith.constant dense<0.000000e+00> : vector<16x32xf32>
    %47 = tpu.matmul %45, %46, %cst_24 {dimension_numbers = #tpu.dot_dimension_numbers<[1], [0], [0], [1], [0, 0, 1, 1], [], []>} : vector<16x16xbf16>, vector<16x32xbf16>, vector<16x32xf32> -> vector<16x32xf32>
    %c1 = arith.constant 1 : index
    %c0_25 = arith.constant 0 : index
    %c0_26 = arith.constant 0 : index
    %48 = vector.load %arg7[%c1, %c0_25, %c0_26] : memref<3x32x96xbf16, #tpu.memory_space<vmem>>, vector<1x32x96xbf16>
    %49 = vector.shape_cast %48 : vector<1x32x96xbf16> to vector<32x96xbf16>
    %50 = arith.truncf %47 : vector<16x32xf32> to vector<16x32xbf16>
    %cst_27 = arith.constant dense<0.000000e+00> : vector<16x96xf32>
    %51 = tpu.matmul %50, %49, %cst_27 {dimension_numbers = #tpu.dot_dimension_numbers<[1], [0], [0], [1], [0, 0, 1, 1], [], []>} : vector<16x32xbf16>, vector<32x96xbf16>, vector<16x96xf32> -> vector<16x96xf32>
    %52 = arith.addf %34, %51 : vector<16x96xf32>
    %53 = vector.extract_strided_slice %9 {offsets = [0, 64], sizes = [16, 32], strides = [1, 1]} : vector<16x96xf32> to vector<16x32xf32>
    %54 = vector.extract_strided_slice %15 {offsets = [0, 64], sizes = [16, 32], strides = [1, 1]} : vector<16x192xf32> to vector<16x32xf32>
    %55 = vector.extract_strided_slice %15 {offsets = [0, 160], sizes = [16, 32], strides = [1, 1]} : vector<16x192xf32> to vector<16x32xf32>
    %56 = tpu.transpose %54, [1, 0] : vector<16x32xf32> -> vector<32x16xf32>
    %57 = arith.truncf %53 : vector<16x32xf32> to vector<16x32xbf16>
    %58 = arith.truncf %56 : vector<32x16xf32> to vector<32x16xbf16>
    %cst_28 = arith.constant dense<0.000000e+00> : vector<16x16xf32>
    %59 = tpu.matmul %57, %58, %cst_28 {dimension_numbers = #tpu.dot_dimension_numbers<[1], [0], [0], [1], [0, 0, 1, 1], [], []>} : vector<16x32xbf16>, vector<32x16xbf16>, vector<16x16xf32> -> vector<16x16xf32>
    %cst_29 = arith.constant 3.125000e-02 : f32
    %60 = vector.broadcast %cst_29 : f32 to vector<16x16xf32>
    %61 = arith.mulf %59, %60 : vector<16x16xf32>
    %62 = math.tanh %61 : vector<16x16xf32>
    %63 = arith.truncf %62 : vector<16x16xf32> to vector<16x16xbf16>
    %64 = arith.truncf %55 : vector<16x32xf32> to vector<16x32xbf16>
    %cst_30 = arith.constant dense<0.000000e+00> : vector<16x32xf32>
    %65 = tpu.matmul %63, %64, %cst_30 {dimension_numbers = #tpu.dot_dimension_numbers<[1], [0], [0], [1], [0, 0, 1, 1], [], []>} : vector<16x16xbf16>, vector<16x32xbf16>, vector<16x32xf32> -> vector<16x32xf32>
    %c2 = arith.constant 2 : index
    %c0_31 = arith.constant 0 : index
    %c0_32 = arith.constant 0 : index
    %66 = vector.load %arg7[%c2, %c0_31, %c0_32] : memref<3x32x96xbf16, #tpu.memory_space<vmem>>, vector<1x32x96xbf16>
    %67 = vector.shape_cast %66 : vector<1x32x96xbf16> to vector<32x96xbf16>
    %68 = arith.truncf %65 : vector<16x32xf32> to vector<16x32xbf16>
    %cst_33 = arith.constant dense<0.000000e+00> : vector<16x96xf32>
    %69 = tpu.matmul %68, %67, %cst_33 {dimension_numbers = #tpu.dot_dimension_numbers<[1], [0], [0], [1], [0, 0, 1, 1], [], []>} : vector<16x32xbf16>, vector<32x96xbf16>, vector<16x96xf32> -> vector<16x96xf32>
    %70 = arith.addf %52, %69 : vector<16x96xf32>
    %c0_34 = arith.constant 0 : index
    %c0_35 = arith.constant 0 : index
    %71 = vector.load %arg8[%c0_34, %c0_35] : memref<1x96xf32, #tpu.memory_space<vmem>>, vector<1x96xf32>
    %72 = vector.broadcast %71 : vector<1x96xf32> to vector<16x96xf32>
    %73 = arith.addf %70, %72 : vector<16x96xf32>
    %74 = arith.addf %73, %1 : vector<16x96xf32>
    %cst_36 = arith.constant 0.000000e+00 : f32
    %75 = vector.broadcast %cst_36 : f32 to vector<16x96xf32>
    %76 = arith.cmpf oge, %74, %75 : vector<16x96xf32>
    %cst_37 = arith.constant 1.000000e-01 : f32
    %77 = vector.broadcast %cst_37 : f32 to vector<16x96xf32>
    %78 = arith.mulf %77, %74 : vector<16x96xf32>
    %79 = arith.select %76, %74, %78 : vector<16x96xi1>, vector<16x96xf32>
    %c0_38 = arith.constant 0 : index
    %c0_39 = arith.constant 0 : index
    %c0_40 = arith.constant 0 : index
    %80 = vector.load %arg9[%c0_38, %c0_39, %c0_40] : memref<1x16x96xf32, #tpu.memory_space<vmem>>, vector<1x16x96xf32>
    %81 = vector.shape_cast %80 : vector<1x16x96xf32> to vector<16x96xf32>
    %82 = vector.shape_cast %79 : vector<16x96xf32> to vector<1x16x96xf32>
    tpu.vector_store %arg9[%c0_38, %c0_39, %c0_40], %82 {strides = array<i32>} : memref<1x16x96xf32, #tpu.memory_space<vmem>>, vector<1x16x96xf32>,
    return
  }
  func.func @transform_0(%arg0: i32) -> (i32, i32, i32) {
    %c0_i32 = arith.constant 0 : i32
    %c0_i32_0 = arith.constant 0 : i32
    %c0_i32_1 = arith.constant 0 : i32
    return %arg0, %c0_i32, %c0_i32_0 : i32, i32, i32
  }
  func.func @transform_1(%arg0: i32) -> (i32, i32, i32) {
    %c0_i32 = arith.constant 0 : i32
    %c0_i32_0 = arith.constant 0 : i32
    %c0_i32_1 = arith.constant 0 : i32
    return %arg0, %c0_i32, %c0_i32_0 : i32, i32, i32
  }
  func.func @transform_2(%arg0: i32) -> (i32, i32) {
    %c0_i32 = arith.constant 0 : i32
    %c0_i32_0 = arith.constant 0 : i32
    %c0_i32_1 = arith.constant 0 : i32
    return %c0_i32, %c0_i32_0 : i32, i32
  }
  func.func @transform_3(%arg0: i32) -> (i32, i32) {
    %c0_i32 = arith.constant 0 : i32
    %c0_i32_0 = arith.constant 0 : i32
    %c0_i32_1 = arith.constant 0 : i32
    return %c0_i32, %c0_i32_0 : i32, i32
  }
  func.func @transform_4(%arg0: i32) -> (i32, i32) {
    %c0_i32 = arith.constant 0 : i32
    %c0_i32_0 = arith.constant 0 : i32
    %c0_i32_1 = arith.constant 0 : i32
    return %c0_i32, %c0_i32_0 : i32, i32
  }
  func.func @transform_5(%arg0: i32) -> (i32, i32) {
    %c0_i32 = arith.constant 0 : i32
    %c0_i32_0 = arith.constant 0 : i32
    %c0_i32_1 = arith.constant 0 : i32
    return %c0_i32, %c0_i32_0 : i32, i32
  }
  func.func @transform_6(%arg0: i32) -> (i32, i32, i32) {
    %c0_i32 = arith.constant 0 : i32
    %c0_i32_0 = arith.constant 0 : i32
    %c0_i32_1 = arith.constant 0 : i32
    %c0_i32_2 = arith.constant 0 : i32
    return %c0_i32, %c0_i32_0, %c0_i32_1 : i32, i32, i32
  }
  func.func @transform_7(%arg0: i32) -> (i32, i32) {
    %c0_i32 = arith.constant 0 : i32
    %c0_i32_0 = arith.constant 0 : i32
    %c0_i32_1 = arith.constant 0 : i32
    return %c0_i32, %c0_i32_0 : i32, i32
  }
  func.func @transform_8(%arg0: i32) -> (i32, i32, i32) {
    %c0_i32 = arith.constant 0 : i32
    %c0_i32_0 = arith.constant 0 : i32
    %c0_i32_1 = arith.constant 0 : i32
    return %arg0, %c0_i32, %c0_i32_0 : i32, i32, i32
  }
}

</mosaic_0001>

<bundles_post_ra>
// kernel: _lambda_.9
= control target key start
LH: loop header
LB: loop body
LE: loop exit
PB: predicated region body
PF: predicated region fallthrough
CT: control target
= control target key end

     0   :  { %vm535_vm0 = vcmask 1042432   ;;  %vm150_vm1 = vcmask 23552   ;;  %vm1628_vm2 = vcmask 64512   ;;  %s3402_s1 = inlined_call_operand.vmem [shape: f32[3,8], index: 1, kind: input, shape index: {}]   ;;  %s3403_s0 = inlined_call_operand.vmem [shape: f32[1024,3], index: 0, kind: input, shape index: {}]   ;;  %s3404_s2 = inlined_call_operand.vmem [shape: f32[1,8], index: 2, kind: input, shape index: {}]   ;;  %s3405_s3 = inlined_call_operand.vmem [shape: f32[1024,8], index: 3, kind: output, shape index: {}]  }
   0x1   :  { %v142_v0 = vld [vmem:[%s3402_s1] sm:$0x7]  ;;  %v15_v3 = vld [vmem:[%s3403_s0 + $0x8] sm:$0xff]  ;;  %v16_v5 = vld [vmem:[%s3403_s0 + $0x10] sm:$0xff] }
   0x2   :  { %v14_v1 = vld [vmem:[%s3403_s0] sm:$0xff]  ;;  %2020 = vmatprep.subr.msk.mxu0 %vm535_vm0, %v142_v0  ;;  %2214 = vmatprep.subr.msk.mxu1 %vm535_vm0, %v142_v0  ;;  %v79_v4 = vld [vmem:[%s3403_s0 + $0x208] sm:$0xff]  ;;  %v80_v6 = vld [vmem:[%s3403_s0 + $0x210] sm:$0xff] }
   0x3   :  { %v78_v2 = vld [vmem:[%s3403_s0 + $0x200] sm:$0xff]  ;;  %2021 = vmatpush3.msk.msra.mxu0 %vm535_vm0, %v142_v0  ;;  %2215 = vmatpush3.msk.msra.mxu1 %vm535_vm0, %v142_v0  ;;  %v17_v7 = vld [vmem:[%s3403_s0 + $0x18] sm:$0xff]  ;;  %v19_v11 = vld [vmem:[%s3403_s0 + $0x28] sm:$0xff] }
   0x4   :  { %2022 = vmatprep.mubr.msk.f32.mxu0 %vm150_vm1, %v14_v1  ;;  %2118 = vmatprep.mubr.msk.f32.mxu1 %vm150_vm1, %v78_v2  ;;  %v81_v8 = vld [vmem:[%s3403_s0 + $0x218] sm:$0xff]  ;;  %v18_v9 = vld [vmem:[%s3403_s0 + $0x20] sm:$0xff]  ;;  %v83_v12 = vld [vmem:[%s3403_s0 + $0x228] sm:$0xff] }
   0x5   :  { %2023 = vmatmul.mubr.msk.f32.vlgmr.msra.gmra.mxu0 %vm150_vm1, %v15_v3  ;;  %2119 = vmatmul.mubr.msk.f32.vlgmr.msra.gmra.mxu1 %vm150_vm1, %v79_v4  ;;  %v82_v10 = vld [vmem:[%s3403_s0 + $0x220] sm:$0xff]  ;;  %v20_v13 = vld [vmem:[%s3403_s0 + $0x30] sm:$0xff]  ;;  %v21_v15 = vld [vmem:[%s3403_s0 + $0x38] sm:$0xff] }
   0x6   :  { %2025 = vmatprep.mubr.msk.f32.mxu0 %vm150_vm1, %v16_v5  ;;  %2121 = vmatprep.mubr.msk.f32.mxu1 %vm150_vm1, %v80_v6  ;;  %v84_v14 = vld [vmem:[%s3403_s0 + $0x230] sm:$0xff]  ;;  %v85_v16 = vld [vmem:[%s3403_s0 + $0x238] sm:$0xff]  ;;  %v22_v17 = vld [vmem:[%s3403_s0 + $0x40] sm:$0xff] }
   0x7   :  { %v86_v18 = vld [vmem:[%s3403_s0 + $0x240] sm:$0xff]  ;;  %v23_v19 = vld [vmem:[%s3403_s0 + $0x48] sm:$0xff]  ;;  %v24_v21 = vld [vmem:[%s3403_s0 + $0x50] sm:$0xff] }
   0x8   :  { %v87_v20 = vld [vmem:[%s3403_s0 + $0x248] sm:$0xff]  ;;  %v88_v22 = vld [vmem:[%s3403_s0 + $0x250] sm:$0xff]  ;;  %v25_v23 = vld [vmem:[%s3403_s0 + $0x58] sm:$0xff] }
   0x9   :  { %2026 = vmatmul.mubr.msk.f32.gmra.mxu0 %vm150_vm1, %v17_v7  ;;  %2122 = vmatmul.mubr.msk.f32.gmra.mxu1 %vm150_vm1, %v81_v8  ;;  %v89_v24 = vld [vmem:[%s3403_s0 + $0x258] sm:$0xff]  ;;  %v26_v25 = vld [vmem:[%s3403_s0 + $0x60] sm:$0xff]  ;;  %v27_v27 = vld [vmem:[%s3403_s0 + $0x68] sm:$0xff] }
   0xa   :  { %2028 = vmatprep.mubr.msk.f32.mxu0 %vm150_vm1, %v18_v9  ;;  %2124 = vmatprep.mubr.msk.f32.mxu1 %vm150_vm1, %v82_v10  ;;  %v90_v26 = vld [vmem:[%s3403_s0 + $0x260] sm:$0xff]  ;;  %v91_v28 = vld [vmem:[%s3403_s0 + $0x268] sm:$0xff]  ;;  %v28_v29 = vld [vmem:[%s3403_s0 + $0x70] sm:$0xff] }
   0xb   :  { %v92_v30 = vld [vmem:[%s3403_s0 + $0x270] sm:$0xff]  ;;  %v29_v31 = vld [vmem:[%s3403_s0 + $0x78] sm:$0xff]  ;;  %v30_v33 = vld [vmem:[%s3403_s0 + $0x80] sm:$0xff] }
   0xc   :  { %v93_v32 = vld [vmem:[%s3403_s0 + $0x278] sm:$0xff]  ;;  %v94_v34 = vld [vmem:[%s3403_s0 + $0x280] sm:$0xff]  ;;  %v31_v35 = vld [vmem:[%s3403_s0 + $0x88] sm:$0xff] }
   0xd   :  { %2029 = vmatmul.mubr.msk.f32.gmra.mxu0 %vm150_vm1, %v19_v11  ;;  %2125 = vmatmul.mubr.msk.f32.gmra.mxu1 %vm150_vm1, %v83_v12  ;;  %v95_v36 = vld [vmem:[%s3403_s0 + $0x288] sm:$0xff]  ;;  %v32_v37 = vld [vmem:[%s3403_s0 + $0x90] sm:$0xff]  ;;  %v33_v39 = vld [vmem:[%s3403_s0 + $0x98] sm:$0xff] }
   0xe   :  { %2031 = vmatprep.mubr.msk.f32.mxu0 %vm150_vm1, %v20_v13  ;;  %2127 = vmatprep.mubr.msk.f32.mxu1 %vm150_vm1, %v84_v14  ;;  %v96_v38 = vld [vmem:[%s3403_s0 + $0x290] sm:$0xff]  ;;  %v97_v40 = vld [vmem:[%s3403_s0 + $0x298] sm:$0xff]  ;;  %v34_v41 = vld [vmem:[%s3403_s0 + $0xa0] sm:$0xff] }
   0xf   :  { %v98_v42 = vld [vmem:[%s3403_s0 + $0x2a0] sm:$0xff]  ;;  %v35_v43 = vld [vmem:[%s3403_s0 + $0xa8] sm:$0xff]  ;;  %v36_v45 = vld [vmem:[%s3403_s0 + $0xb0] sm:$0xff] }
  0x10   :  { %v99_v44 = vld [vmem:[%s3403_s0 + $0x2a8] sm:$0xff]  ;;  %v100_v46 = vld [vmem:[%s3403_s0 + $0x2b0] sm:$0xff]  ;;  %v37_v47 = vld [vmem:[%s3403_s0 + $0xb8] sm:$0xff] }
  0x11   :  { %2032 = vmatmul.mubr.msk.f32.gmra.mxu0 %vm150_vm1, %v21_v15  ;;  %2128 = vmatmul.mubr.msk.f32.gmra.mxu1 %vm150_vm1, %v85_v16  ;;  %v101_v48 = vld [vmem:[%s3403_s0 + $0x2b8] sm:$0xff]  ;;  %v38_v49 = vld [vmem:[%s3403_s0 + $0xc0] sm:$0xff]  ;;  %v39_v51 = vld [vmem:[%s3403_s0 + $0xc8] sm:$0xff] }
  0x12   :  { %2034 = vmatprep.mubr.msk.f32.mxu0 %vm150_vm1, %v22_v17  ;;  %2130 = vmatprep.mubr.msk.f32.mxu1 %vm150_vm1, %v86_v18  ;;  %v102_v50 = vld [vmem:[%s3403_s0 + $0x2c0] sm:$0xff]  ;;  %v103_v52 = vld [vmem:[%s3403_s0 + $0x2c8] sm:$0xff]  ;;  %v40_v53 = vld [vmem:[%s3403_s0 + $0xd0] sm:$0xff] }
  0x13   :  { %v104_v54 = vld [vmem:[%s3403_s0 + $0x2d0] sm:$0xff]  ;;  %v41_v55 = vld [vmem:[%s3403_s0 + $0xd8] sm:$0xff]  ;;  %v42_v57 = vld [vmem:[%s3403_s0 + $0xe0] sm:$0xff] }
  0x14   :  { %v105_v56 = vld [vmem:[%s3403_s0 + $0x2d8] sm:$0xff]  ;;  %v106_v58 = vld [vmem:[%s3403_s0 + $0x2e0] sm:$0xff]  ;;  %v43_v59 = vld [vmem:[%s3403_s0 + $0xe8] sm:$0xff] }
  0x15   :  { %2035 = vmatmul.mubr.msk.f32.gmra.mxu0 %vm150_vm1, %v23_v19  ;;  %2131 = vmatmul.mubr.msk.f32.gmra.mxu1 %vm150_vm1, %v87_v20  ;;  %v107_v60 = vld [vmem:[%s3403_s0 + $0x2e8] sm:$0xff]  ;;  %v44_v61 = vld [vmem:[%s3403_s0 + $0xf0] sm:$0xff]  ;;  %v45_v63 = vld [vmem:[%s3403_s0 + $0xf8] sm:$0xff] }
  0x16   :  { %2037 = vmatprep.mubr.msk.f32.mxu0 %vm150_vm1, %v24_v21  ;;  %2133 = vmatprep.mubr.msk.f32.mxu1 %vm150_vm1, %v88_v22  ;;  %v108_v62 = vld [vmem:[%s3403_s0 + $0x2f0] sm:$0xff]  ;;  %v109_v0 = vld [vmem:[%s3403_s0 + $0x2f8] sm:$0xff]  ;;  %v46_v1 = vld [vmem:[%s3403_s0 + $0x100] sm:$0xff] }
  0x17   :  { %v110_v2 = vld [vmem:[%s3403_s0 + $0x300] sm:$0xff]  ;;  %v47_v3 = vld [vmem:[%s3403_s0 + $0x108] sm:$0xff]  ;;  %v48_v5 = vld [vmem:[%s3403_s0 + $0x110] sm:$0xff] }
  0x18   :  { %v111_v4 = vld [vmem:[%s3403_s0 + $0x308] sm:$0xff]  ;;  %v112_v6 = vld [vmem:[%s3403_s0 + $0x310] sm:$0xff]  ;;  %v49_v7 = vld [vmem:[%s3403_s0 + $0x118] sm:$0xff] }
  0x19   :  { %2038 = vmatmul.mubr.msk.f32.gmra.mxu0 %vm150_vm1, %v25_v23  ;;  %2134 = vmatmul.mubr.msk.f32.gmra.mxu1 %vm150_vm1, %v89_v24  ;;  %v113_v8 = vld [vmem:[%s3403_s0 + $0x318] sm:$0xff]  ;;  %v50_v9 = vld [vmem:[%s3403_s0 + $0x120] sm:$0xff]  ;;  %v51_v11 = vld [vmem:[%s3403_s0 + $0x128] sm:$0xff] }
  0x1a   :  { %2040 = vmatprep.mubr.msk.f32.mxu0 %vm150_vm1, %v26_v25  ;;  %2136 = vmatprep.mubr.msk.f32.mxu1 %vm150_vm1, %v90_v26  ;;  %v114_v10 = vld [vmem:[%s3403_s0 + $0x320] sm:$0xff]  ;;  %v115_v12 = vld [vmem:[%s3403_s0 + $0x328] sm:$0xff]  ;;  %v52_v13 = vld [vmem:[%s3403_s0 + $0x130] sm:$0xff] }
  0x1b   :  { %v116_v14 = vld [vmem:[%s3403_s0 + $0x330] sm:$0xff]  ;;  %v53_v15 = vld [vmem:[%s3403_s0 + $0x138] sm:$0xff]  ;;  %v54_v17 = vld [vmem:[%s3403_s0 + $0x140] sm:$0xff] }
  0x1c   :  { %v117_v16 = vld [vmem:[%s3403_s0 + $0x338] sm:$0xff]  ;;  %v118_v18 = vld [vmem:[%s3403_s0 + $0x340] sm:$0xff]  ;;  %v55_v19 = vld [vmem:[%s3403_s0 + $0x148] sm:$0xff] }
  0x1d   :  { %2041 = vmatmul.mubr.msk.f32.gmra.mxu0 %vm150_vm1, %v27_v27  ;;  %2137 = vmatmul.mubr.msk.f32.gmra.mxu1 %vm150_vm1, %v91_v28  ;;  %v119_v20 = vld [vmem:[%s3403_s0 + $0x348] sm:$0xff]  ;;  %v56_v21 = vld [vmem:[%s3403_s0 + $0x150] sm:$0xff]  ;;  %v57_v23 = vld [vmem:[%s3403_s0 + $0x158] sm:$0xff] }
  0x1e   :  { %2043 = vmatprep.mubr.msk.f32.mxu0 %vm150_vm1, %v28_v29  ;;  %2139 = vmatprep.mubr.msk.f32.mxu1 %vm150_vm1, %v92_v30  ;;  %v120_v22 = vld [vmem:[%s3403_s0 + $0x350] sm:$0xff]  ;;  %v121_v24 = vld [vmem:[%s3403_s0 + $0x358] sm:$0xff]  ;;  %v58_v25 = vld [vmem:[%s3403_s0 + $0x160] sm:$0xff] }
  0x1f   :  { %v122_v26 = vld [vmem:[%s3403_s0 + $0x360] sm:$0xff]  ;;  %v59_v27 = vld [vmem:[%s3403_s0 + $0x168] sm:$0xff]  ;;  %v60_v29 = vld [vmem:[%s3403_s0 + $0x170] sm:$0xff] }
  0x20   :  { %v123_v28 = vld [vmem:[%s3403_s0 + $0x368] sm:$0xff]  ;;  %v124_v30 = vld [vmem:[%s3403_s0 + $0x370] sm:$0xff] }
  0x21   :  { %2044 = vmatmul.mubr.msk.f32.gmra.mxu0 %vm150_vm1, %v29_v31  ;;  %2140 = vmatmul.mubr.msk.f32.gmra.mxu1 %vm150_vm1, %v93_v32  ;;  %v61_v31 = vld [vmem:[%s3403_s0 + $0x178] sm:$0xff] }
  0x22   :  { %2046 = vmatprep.mubr.msk.f32.mxu0 %vm150_vm1, %v30_v33  ;;  %2142 = vmatprep.mubr.msk.f32.mxu1 %vm150_vm1, %v94_v34  ;;  %v125_v32 = vld [vmem:[%s3403_s0 + $0x378] sm:$0xff]  ;;  %v62_v33 = vld [vmem:[%s3403_s0 + $0x180] sm:$0xff] }
  0x23   :  { %v126_v34 = vld [vmem:[%s3403_s0 + $0x380] sm:$0xff] }
  0x25   :  { %2047 = vmatmul.mubr.msk.f32.gmra.mxu0 %vm150_vm1, %v31_v35  ;;  %2143 = vmatmul.mubr.msk.f32.gmra.mxu1 %vm150_vm1, %v95_v36  ;;  %v63_v35 = vld [vmem:[%s3403_s0 + $0x188] sm:$0xff] }
  0x26   :  { %2049 = vmatprep.mubr.msk.f32.mxu0 %vm150_vm1, %v32_v37  ;;  %2145 = vmatprep.mubr.msk.f32.mxu1 %vm150_vm1, %v96_v38  ;;  %v127_v36 = vld [vmem:[%s3403_s0 + $0x388] sm:$0xff]  ;;  %v64_v37 = vld [vmem:[%s3403_s0 + $0x190] sm:$0xff] }
  0x27   :  { %v128_v38 = vld [vmem:[%s3403_s0 + $0x390] sm:$0xff] }
  0x29   :  { %2050 = vmatmul.mubr.msk.f32.gmra.mxu0 %vm150_vm1, %v33_v39  ;;  %2146 = vmatmul.mubr.msk.f32.gmra.mxu1 %vm150_vm1, %v97_v40  ;;  %v65_v39 = vld [vmem:[%s3403_s0 + $0x198] sm:$0xff] }
  0x2a   :  { %2052 = vmatprep.mubr.msk.f32.mxu0 %vm150_vm1, %v34_v41  ;;  %2148 = vmatprep.mubr.msk.f32.mxu1 %vm150_vm1, %v98_v42  ;;  %v129_v40 = vld [vmem:[%s3403_s0 + $0x398] sm:$0xff]  ;;  %v66_v41 = vld [vmem:[%s3403_s0 + $0x1a0] sm:$0xff] }
  0x2b   :  { %v130_v42 = vld [vmem:[%s3403_s0 + $0x3a0] sm:$0xff] }
  0x2d   :  { %2053 = vmatmul.mubr.msk.f32.gmra.mxu0 %vm150_vm1, %v35_v43  ;;  %2149 = vmatmul.mubr.msk.f32.gmra.mxu1 %vm150_vm1, %v99_v44  ;;  %v67_v43 = vld [vmem:[%s3403_s0 + $0x1a8] sm:$0xff] }
  0x2e   :  { %2055 = vmatprep.mubr.msk.f32.mxu0 %vm150_vm1, %v36_v45  ;;  %2151 = vmatprep.mubr.msk.f32.mxu1 %vm150_vm1, %v100_v46  ;;  %v131_v44 = vld [vmem:[%s3403_s0 + $0x3a8] sm:$0xff]  ;;  %v68_v45 = vld [vmem:[%s3403_s0 + $0x1b0] sm:$0xff] }
  0x2f   :  { %v132_v46 = vld [vmem:[%s3403_s0 + $0x3b0] sm:$0xff] }
  0x31   :  { %2056 = vmatmul.mubr.msk.f32.gmra.mxu0 %vm150_vm1, %v37_v47  ;;  %2152 = vmatmul.mubr.msk.f32.gmra.mxu1 %vm150_vm1, %v101_v48  ;;  %v69_v47 = vld [vmem:[%s3403_s0 + $0x1b8] sm:$0xff] }
  0x32   :  { %2058 = vmatprep.mubr.msk.f32.mxu0 %vm150_vm1, %v38_v49  ;;  %2154 = vmatprep.mubr.msk.f32.mxu1 %vm150_vm1, %v102_v50  ;;  %v133_v48 = vld [vmem:[%s3403_s0 + $0x3b8] sm:$0xff]  ;;  %v70_v49 = vld [vmem:[%s3403_s0 + $0x1c0] sm:$0xff] }
  0x33   :  { %v134_v50 = vld [vmem:[%s3403_s0 + $0x3c0] sm:$0xff] }
  0x35   :  { %2059 = vmatmul.mubr.msk.f32.gmra.mxu0 %vm150_vm1, %v39_v51  ;;  %2155 = vmatmul.mubr.msk.f32.gmra.mxu1 %vm150_vm1, %v103_v52  ;;  %v71_v51 = vld [vmem:[%s3403_s0 + $0x1c8] sm:$0xff] }
  0x36   :  { %2061 = vmatprep.mubr.msk.f32.mxu0 %vm150_vm1, %v40_v53  ;;  %2157 = vmatprep.mubr.msk.f32.mxu1 %vm150_vm1, %v104_v54  ;;  %v135_v52 = vld [vmem:[%s3403_s0 + $0x3c8] sm:$0xff]  ;;  %v72_v53 = vld [vmem:[%s3403_s0 + $0x1d0] sm:$0xff] }
  0x37   :  { %v136_v54 = vld [vmem:[%s3403_s0 + $0x3d0] sm:$0xff] }
  0x39   :  { %2062 = vmatmul.mubr.msk.f32.gmra.mxu0 %vm150_vm1, %v41_v55  ;;  %2158 = vmatmul.mubr.msk.f32.gmra.mxu1 %vm150_vm1, %v105_v56  ;;  %v73_v55 = vld [vmem:[%s3403_s0 + $0x1d8] sm:$0xff] }
  0x3a   :  { %2064 = vmatprep.mubr.msk.f32.mxu0 %vm150_vm1, %v42_v57  ;;  %2160 = vmatprep.mubr.msk.f32.mxu1 %vm150_vm1, %v106_v58  ;;  %v137_v56 = vld [vmem:[%s3403_s0 + $0x3d8] sm:$0xff]  ;;  %v74_v57 = vld [vmem:[%s3403_s0 + $0x1e0] sm:$0xff] }
  0x3b   :  { %v138_v58 = vld [vmem:[%s3403_s0 + $0x3e0] sm:$0xff] }
  0x3d   :  { %2065 = vmatmul.mubr.msk.f32.gmra.mxu0 %vm150_vm1, %v43_v59  ;;  %2161 = vmatmul.mubr.msk.f32.gmra.mxu1 %vm150_vm1, %v107_v60  ;;  %v75_v59 = vld [vmem:[%s3403_s0 + $0x1e8] sm:$0xff] }
  0x3e   :  { %2067 = vmatprep.mubr.msk.f32.mxu0 %vm150_vm1, %v44_v61  ;;  %2163 = vmatprep.mubr.msk.f32.mxu1 %vm150_vm1, %v108_v62  ;;  %v139_v60 = vld [vmem:[%s3403_s0 + $0x3e8] sm:$0xff]  ;;  %v76_v61 = vld [vmem:[%s3403_s0 + $0x1f0] sm:$0xff] }
  0x3f   :  { %v140_v62 = vld [vmem:[%s3403_s0 + $0x3f0] sm:$0xff] }
  0x41   :  { %2068 = vmatmul.mubr.msk.f32.gmra.mxu0 %vm150_vm1, %v45_v63  ;;  %2164 = vmatmul.mubr.msk.f32.gmra.mxu1 %vm150_vm1, %v109_v0  ;;  %v77_v63 = vld [vmem:[%s3403_s0 + $0x1f8] sm:$0xff] }
  0x42   :  { %2070 = vmatprep.mubr.msk.f32.mxu0 %vm150_vm1, %v46_v1  ;;  %2166 = vmatprep.mubr.msk.f32.mxu1 %vm150_vm1, %v110_v2  ;;  %v141_v0 = vld [vmem:[%s3403_s0 + $0x3f8] sm:$0xff]  ;;  %v2755_v1 = vld [vmem:[%s3404_s2] ss:$0 sm:$0xff] }
  0x45   :  { %2071 = vmatmul.mubr.msk.f32.gmra.mxu0 %vm150_vm1, %v47_v3  ;;  %2167 = vmatmul.mubr.msk.f32.gmra.mxu1 %vm150_vm1, %v111_v4 }
  0x46   :  { %2073 = vmatprep.mubr.msk.f32.mxu0 %vm150_vm1, %v48_v5  ;;  %2169 = vmatprep.mubr.msk.f32.mxu1 %vm150_vm1, %v112_v6 }
  0x49   :  { %2074 = vmatmul.mubr.msk.f32.gmra.mxu0 %vm150_vm1, %v49_v7  ;;  %2170 = vmatmul.mubr.msk.f32.gmra.mxu1 %vm150_vm1, %v113_v8 }
  0x4a   :  { %2076 = vmatprep.mubr.msk.f32.mxu0 %vm150_vm1, %v50_v9  ;;  %2172 = vmatprep.mubr.msk.f32.mxu1 %vm150_vm1, %v114_v10 }
  0x4d   :  { %2077 = vmatmul.mubr.msk.f32.gmra.mxu0 %vm150_vm1, %v51_v11  ;;  %2173 = vmatmul.mubr.msk.f32.gmra.mxu1 %vm150_vm1, %v115_v12 }
  0x4e   :  { %2079 = vmatprep.mubr.msk.f32.mxu0 %vm150_vm1, %v52_v13  ;;  %2175 = vmatprep.mubr.msk.f32.mxu1 %vm150_vm1, %v116_v14 }
  0x51   :  { %2080 = vmatmul.mubr.msk.f32.gmra.mxu0 %vm150_vm1, %v53_v15  ;;  %2176 = vmatmul.mubr.msk.f32.gmra.mxu1 %vm150_vm1, %v117_v16 }
  0x52   :  { %2082 = vmatprep.mubr.msk.f32.mxu0 %vm150_vm1, %v54_v17  ;;  %2178 = vmatprep.mubr.msk.f32.mxu1 %vm150_vm1, %v118_v18 }
  0x55   :  { %2083 = vmatmul.mubr.msk.f32.gmra.mxu0 %vm150_vm1, %v55_v19  ;;  %2179 = vmatmul.mubr.msk.f32.gmra.mxu1 %vm150_vm1, %v119_v20 }
  0x56   :  { %2085 = vmatprep.mubr.msk.f32.mxu0 %vm150_vm1, %v56_v21  ;;  %2181 = vmatprep.mubr.msk.f32.mxu1 %vm150_vm1, %v120_v22 }
  0x59   :  { %2086 = vmatmul.mubr.msk.f32.gmra.mxu0 %vm150_vm1, %v57_v23  ;;  %2182 = vmatmul.mubr.msk.f32.gmra.mxu1 %vm150_vm1, %v121_v24 }
  0x5a   :  { %2088 = vmatprep.mubr.msk.f32.mxu0 %vm150_vm1, %v58_v25  ;;  %2184 = vmatprep.mubr.msk.f32.mxu1 %vm150_vm1, %v122_v26 }
  0x5d   :  { %2089 = vmatmul.mubr.msk.f32.gmra.mxu0 %vm150_vm1, %v59_v27  ;;  %2185 = vmatmul.mubr.msk.f32.gmra.mxu1 %vm150_vm1, %v123_v28 }
  0x5e   :  { %2091 = vmatprep.mubr.msk.f32.mxu0 %vm150_vm1, %v60_v29  ;;  %2187 = vmatprep.mubr.msk.f32.mxu1 %vm150_vm1, %v124_v30 }
  0x61   :  { %2092 = vmatmul.mubr.msk.f32.gmra.mxu0 %vm150_vm1, %v61_v31  ;;  %2188 = vmatmul.mubr.msk.f32.gmra.mxu1 %vm150_vm1, %v125_v32 }
  0x62   :  { %2094 = vmatprep.mubr.msk.f32.mxu0 %vm150_vm1, %v62_v33  ;;  %2190 = vmatprep.mubr.msk.f32.mxu1 %vm150_vm1, %v126_v34 }
  0x65   :  { %2095 = vmatmul.mubr.msk.f32.gmra.mxu0 %vm150_vm1, %v63_v35  ;;  %2191 = vmatmul.mubr.msk.f32.gmra.mxu1 %vm150_vm1, %v127_v36 }
  0x66   :  { %2097 = vmatprep.mubr.msk.f32.mxu0 %vm150_vm1, %v64_v37  ;;  %2193 = vmatprep.mubr.msk.f32.mxu1 %vm150_vm1, %v128_v38 }
  0x69   :  { %2098 = vmatmul.mubr.msk.f32.gmra.mxu0 %vm150_vm1, %v65_v39  ;;  %2194 = vmatmul.mubr.msk.f32.gmra.mxu1 %vm150_vm1, %v129_v40 }
  0x6a   :  { %2100 = vmatprep.mubr.msk.f32.mxu0 %vm150_vm1, %v66_v41  ;;  %2196 = vmatprep.mubr.msk.f32.mxu1 %vm150_vm1, %v130_v42 }
  0x6d   :  { %2101 = vmatmul.mubr.msk.f32.gmra.mxu0 %vm150_vm1, %v67_v43  ;;  %2197 = vmatmul.mubr.msk.f32.gmra.mxu1 %vm150_vm1, %v131_v44 }
  0x6e   :  { %2103 = vmatprep.mubr.msk.f32.mxu0 %vm150_vm1, %v68_v45  ;;  %2199 = vmatprep.mubr.msk.f32.mxu1 %vm150_vm1, %v132_v46 }
  0x71   :  { %2104 = vmatmul.mubr.msk.f32.gmra.mxu0 %vm150_vm1, %v69_v47  ;;  %2200 = vmatmul.mubr.msk.f32.gmra.mxu1 %vm150_vm1, %v133_v48 }
  0x72   :  { %2106 = vmatprep.mubr.msk.f32.mxu0 %vm150_vm1, %v70_v49  ;;  %2202 = vmatprep.mubr.msk.f32.mxu1 %vm150_vm1, %v134_v50 }
  0x75   :  { %2107 = vmatmul.mubr.msk.f32.gmra.mxu0 %vm150_vm1, %v71_v51  ;;  %2203 = vmatmul.mubr.msk.f32.gmra.mxu1 %vm150_vm1, %v135_v52 }
  0x76   :  { %2109 = vmatprep.mubr.msk.f32.mxu0 %vm150_vm1, %v72_v53  ;;  %2205 = vmatprep.mubr.msk.f32.mxu1 %vm150_vm1, %v136_v54 }
  0x79   :  { %2110 = vmatmul.mubr.msk.f32.gmra.mxu0 %vm150_vm1, %v73_v55  ;;  %2206 = vmatmul.mubr.msk.f32.gmra.mxu1 %vm150_vm1, %v137_v56 }
  0x7a   :  { %2112 = vmatprep.mubr.msk.f32.mxu0 %vm150_vm1, %v74_v57  ;;  %2208 = vmatprep.mubr.msk.f32.mxu1 %vm150_vm1, %v138_v58 }
  0x7d   :  { %2113 = vmatmul.mubr.msk.f32.gmra.mxu0 %vm150_vm1, %v75_v59  ;;  %2209 = vmatmul.mubr.msk.f32.gmra.mxu1 %vm150_vm1, %v139_v60 }
  0x7e   :  { %2115 = vmatprep.mubr.msk.f32.mxu0 %vm150_vm1, %v76_v61  ;;  %2211 = vmatprep.mubr.msk.f32.mxu1 %vm150_vm1, %v140_v62 }
  0x81   :  { %2116 = vmatmul.mubr.msk.f32.gmra.mxu0 %vm150_vm1, %v77_v63  ;;  %2212 = vmatmul.mubr.msk.f32.gmra.mxu1 %vm150_vm1, %v141_v0 }
  0xc5   :  { %v2024_v2 = vpop.f32.mrf.mxu0  ;;  %v2120_v3 = vpop.f32.mrf.mxu1 }
  0xc6   :  { %v611_v4 = vadd.f32 %v2024_v2, %v2755_v1  ;;  %v931_v5 = vadd.f32 %v2120_v3, %v2755_v1 }
  0xc7   :  { %v605_v6 = vpop.f32.mrf.mxu0  ;;  %v925_v7 = vpop.f32.mrf.mxu1 }
  0xc8   :  { %vm1245_vm3 = vcmp.ge.f32.partialorder %v611_v4, 0.0  ;;  %v1373_v8 = vmul.f32 0.1, %v611_v4  ;;  %vm1309_vm4 = vcmp.ge.f32.partialorder %v931_v5, 0.0  ;;  %v1437_v9 = vmul.f32 0.1, %v931_v5 }
  0xc9   :  { %v606_v10 = vadd.f32 %v2755_v1, %v605_v6  ;;  %v926_v11 = vadd.f32 %v2755_v1, %v925_v7  ;;  %v2027_v12 = vpop.f32.mrf.mxu0  ;;  %v2123_v13 = vpop.f32.mrf.mxu1 }
  0xca   :  { %v1501_v14 = vsel %vm1245_vm3, %v611_v4, %v1373_v8  ;;  %v1565_v15 = vsel %vm1309_vm4, %v931_v5, %v1437_v9  ;;  %v621_v16 = vadd.f32 %v2027_v12, %v2755_v1  ;;  %v941_v17 = vadd.f32 %v2123_v13, %v2755_v1 }
  0xcb   :  { %1630 = vst.msk [vmem:[%s3405_s3 + $0x8] sm:$0xff] %vm1628_vm2, %v1501_v14  ;;  %1694 = vst.msk [vmem:[%s3405_s3 + $0x208] sm:$0xff] %vm1628_vm2, %v1565_v15  ;;  %vm1244_vm5 = vcmp.ge.f32.partialorder %v606_v10, 0.0  ;;  %v1372_v18 = vmul.f32 0.1, %v606_v10  ;;  %vm1308_vm6 = vcmp.ge.f32.partialorder %v926_v11, 0.0  ;;  %v615_v20 = vpop.f32.mrf.mxu0  ;;  %v935_v21 = vpop.f32.mrf.mxu1 }
  0xcc   :  { %v1436_v19 = vmul.f32 0.1, %v926_v11  ;;  %vm1247_vm7 = vcmp.ge.f32.partialorder %v621_v16, 0.0  ;;  %v1375_v22 = vmul.f32 0.1, %v621_v16  ;;  %vm1311_vm8 = vcmp.ge.f32.partialorder %v941_v17, 0.0 }
  0xcd   :  { %v1439_v23 = vmul.f32 0.1, %v941_v17  ;;  %v1500_v24 = vsel %vm1244_vm5, %v606_v10, %v1372_v18  ;;  %v616_v26 = vadd.f32 %v2755_v1, %v615_v20  ;;  %v936_v27 = vadd.f32 %v2755_v1, %v935_v21  ;;  %v2030_v28 = vpop.f32.mrf.mxu0  ;;  %v2126_v29 = vpop.f32.mrf.mxu1 }
  0xce   :  { %v1564_v25 = vsel %vm1308_vm6, %v926_v11, %v1436_v19  ;;  %1629 = vst.msk [vmem:[%s3405_s3] sm:$0xff] %vm1628_vm2, %v1500_v24  ;;  %v1503_v30 = vsel %vm1247_vm7, %v621_v16, %v1375_v22  ;;  %v631_v32 = vadd.f32 %v2030_v28, %v2755_v1  ;;  %v951_v33 = vadd.f32 %v2126_v29, %v2755_v1 }
  0xcf   :  { %1693 = vst.msk [vmem:[%s3405_s3 + $0x200] sm:$0xff] %vm1628_vm2, %v1564_v25  ;;  %v1567_v31 = vsel %vm1311_vm8, %v941_v17, %v1439_v23  ;;  %1632 = vst.msk [vmem:[%s3405_s3 + $0x18] sm:$0xff] %vm1628_vm2, %v1503_v30  ;;  %vm1246_vm9 = vcmp.ge.f32.partialorder %v616_v26, 0.0  ;;  %v1374_v34 = vmul.f32 0.1, %v616_v26  ;;  %vm1310_vm10 = vcmp.ge.f32.partialorder %v936_v27, 0.0  ;;  %v625_v36 = vpop.f32.mrf.mxu0  ;;  %v945_v37 = vpop.f32.mrf.mxu1 }
  0xd0   :  { %1696 = vst.msk [vmem:[%s3405_s3 + $0x218] sm:$0xff] %vm1628_vm2, %v1567_v31  ;;  %v1438_v35 = vmul.f32 0.1, %v936_v27  ;;  %vm1249_vm11 = vcmp.ge.f32.partialorder %v631_v32, 0.0  ;;  %v1377_v38 = vmul.f32 0.1, %v631_v32  ;;  %v626_v42 = vadd.f32 %v2755_v1, %v625_v36 }
  0xd1   :  { %vm1313_vm12 = vcmp.ge.f32.partialorder %v951_v33, 0.0  ;;  %v1441_v39 = vmul.f32 0.1, %v951_v33  ;;  %v1502_v40 = vsel %vm1246_vm9, %v616_v26, %v1374_v34  ;;  %v946_v43 = vadd.f32 %v2755_v1, %v945_v37  ;;  %v2033_v44 = vpop.f32.mrf.mxu0  ;;  %v2129_v45 = vpop.f32.mrf.mxu1 }
  0xd2   :  { %v1566_v41 = vsel %vm1310_vm10, %v936_v27, %v1438_v35  ;;  %1631 = vst.msk [vmem:[%s3405_s3 + $0x10] sm:$0xff] %vm1628_vm2, %v1502_v40  ;;  %v1505_v46 = vsel %vm1249_vm11, %v631_v32, %v1377_v38  ;;  %v641_v48 = vadd.f32 %v2033_v44, %v2755_v1  ;;  %v961_v49 = vadd.f32 %v2129_v45, %v2755_v1 }
  0xd3   :  { %1695 = vst.msk [vmem:[%s3405_s3 + $0x210] sm:$0xff] %vm1628_vm2, %v1566_v41  ;;  %v1569_v47 = vsel %vm1313_vm12, %v951_v33, %v1441_v39  ;;  %1634 = vst.msk [vmem:[%s3405_s3 + $0x28] sm:$0xff] %vm1628_vm2, %v1505_v46  ;;  %vm1248_vm13 = vcmp.ge.f32.partialorder %v626_v42, 0.0  ;;  %v1376_v50 = vmul.f32 0.1, %v626_v42  ;;  %vm1312_vm14 = vcmp.ge.f32.partialorder %v946_v43, 0.0  ;;  %v635_v52 = vpop.f32.mrf.mxu0  ;;  %v955_v53 = vpop.f32.mrf.mxu1 }
  0xd4   :  { %1698 = vst.msk [vmem:[%s3405_s3 + $0x228] sm:$0xff] %vm1628_vm2, %v1569_v47  ;;  %v1440_v51 = vmul.f32 0.1, %v946_v43  ;;  %vm1251_vm15 = vcmp.ge.f32.partialorder %v641_v48, 0.0  ;;  %v1379_v54 = vmul.f32 0.1, %v641_v48  ;;  %v636_v58 = vadd.f32 %v2755_v1, %v635_v52 }
  0xd5   :  { %vm1315_vm0 = vcmp.ge.f32.partialorder %v961_v49, 0.0  ;;  %v1443_v55 = vmul.f32 0.1, %v961_v49  ;;  %v1504_v56 = vsel %vm1248_vm13, %v626_v42, %v1376_v50  ;;  %v956_v59 = vadd.f32 %v2755_v1, %v955_v53  ;;  %v2036_v60 = vpop.f32.mrf.mxu0  ;;  %v2132_v61 = vpop.f32.mrf.mxu1 }
  0xd6   :  { %v1568_v57 = vsel %vm1312_vm14, %v946_v43, %v1440_v51  ;;  %1633 = vst.msk [vmem:[%s3405_s3 + $0x20] sm:$0xff] %vm1628_vm2, %v1504_v56  ;;  %v1507_v62 = vsel %vm1251_vm15, %v641_v48, %v1379_v54  ;;  %v651_v0 = vadd.f32 %v2036_v60, %v2755_v1  ;;  %v971_v2 = vadd.f32 %v2132_v61, %v2755_v1 }
  0xd7   :  { %1697 = vst.msk [vmem:[%s3405_s3 + $0x220] sm:$0xff] %vm1628_vm2, %v1568_v57  ;;  %v1571_v63 = vsel %vm1315_vm0, %v961_v49, %v1443_v55  ;;  %1636 = vst.msk [vmem:[%s3405_s3 + $0x38] sm:$0xff] %vm1628_vm2, %v1507_v62  ;;  %vm1250_vm1 = vcmp.ge.f32.partialorder %v636_v58, 0.0  ;;  %v1378_v3 = vmul.f32 0.1, %v636_v58  ;;  %vm1314_vm3 = vcmp.ge.f32.partialorder %v956_v59, 0.0  ;;  %v645_v5 = vpop.f32.mrf.mxu0  ;;  %v965_v6 = vpop.f32.mrf.mxu1 }
  0xd8   :  { %1700 = vst.msk [vmem:[%s3405_s3 + $0x238] sm:$0xff] %vm1628_vm2, %v1571_v63  ;;  %v1442_v4 = vmul.f32 0.1, %v956_v59  ;;  %vm1253_vm4 = vcmp.ge.f32.partialorder %v651_v0, 0.0  ;;  %v1381_v7 = vmul.f32 0.1, %v651_v0  ;;  %v646_v11 = vadd.f32 %v2755_v1, %v645_v5 }
  0xd9   :  { %vm1317_vm5 = vcmp.ge.f32.partialorder %v971_v2, 0.0  ;;  %v1445_v8 = vmul.f32 0.1, %v971_v2  ;;  %v1506_v9 = vsel %vm1250_vm1, %v636_v58, %v1378_v3  ;;  %v966_v12 = vadd.f32 %v2755_v1, %v965_v6  ;;  %v2039_v13 = vpop.f32.mrf.mxu0  ;;  %v2135_v14 = vpop.f32.mrf.mxu1 }
  0xda   :  { %v1570_v10 = vsel %vm1314_vm3, %v956_v59, %v1442_v4  ;;  %1635 = vst.msk [vmem:[%s3405_s3 + $0x30] sm:$0xff] %vm1628_vm2, %v1506_v9  ;;  %v1509_v15 = vsel %vm1253_vm4, %v651_v0, %v1381_v7  ;;  %v661_v17 = vadd.f32 %v2039_v13, %v2755_v1  ;;  %v981_v18 = vadd.f32 %v2135_v14, %v2755_v1 }
  0xdb   :  { %1699 = vst.msk [vmem:[%s3405_s3 + $0x230] sm:$0xff] %vm1628_vm2, %v1570_v10  ;;  %v1573_v16 = vsel %vm1317_vm5, %v971_v2, %v1445_v8  ;;  %1638 = vst.msk [vmem:[%s3405_s3 + $0x48] sm:$0xff] %vm1628_vm2, %v1509_v15  ;;  %vm1252_vm6 = vcmp.ge.f32.partialorder %v646_v11, 0.0  ;;  %v1380_v19 = vmul.f32 0.1, %v646_v11  ;;  %vm1316_vm7 = vcmp.ge.f32.partialorder %v966_v12, 0.0  ;;  %v655_v21 = vpop.f32.mrf.mxu0  ;;  %v975_v22 = vpop.f32.mrf.mxu1 }
  0xdc   :  { %1702 = vst.msk [vmem:[%s3405_s3 + $0x248] sm:$0xff] %vm1628_vm2, %v1573_v16  ;;  %v1444_v20 = vmul.f32 0.1, %v966_v12  ;;  %vm1255_vm8 = vcmp.ge.f32.partialorder %v661_v17, 0.0  ;;  %v1383_v23 = vmul.f32 0.1, %v661_v17  ;;  %v656_v27 = vadd.f32 %v2755_v1, %v655_v21 }
  0xdd   :  { %vm1319_vm9 = vcmp.ge.f32.partialorder %v981_v18, 0.0  ;;  %v1447_v24 = vmul.f32 0.1, %v981_v18  ;;  %v1508_v25 = vsel %vm1252_vm6, %v646_v11, %v1380_v19  ;;  %v976_v28 = vadd.f32 %v2755_v1, %v975_v22  ;;  %v2042_v29 = vpop.f32.mrf.mxu0  ;;  %v2138_v30 = vpop.f32.mrf.mxu1 }
  0xde   :  { %v1572_v26 = vsel %vm1316_vm7, %v966_v12, %v1444_v20  ;;  %1637 = vst.msk [vmem:[%s3405_s3 + $0x40] sm:$0xff] %vm1628_vm2, %v1508_v25  ;;  %v1511_v31 = vsel %vm1255_vm8, %v661_v17, %v1383_v23  ;;  %v671_v33 = vadd.f32 %v2042_v29, %v2755_v1  ;;  %v991_v34 = vadd.f32 %v2138_v30, %v2755_v1 }
  0xdf   :  { %1701 = vst.msk [vmem:[%s3405_s3 + $0x240] sm:$0xff] %vm1628_vm2, %v1572_v26  ;;  %v1575_v32 = vsel %vm1319_vm9, %v981_v18, %v1447_v24  ;;  %1640 = vst.msk [vmem:[%s3405_s3 + $0x58] sm:$0xff] %vm1628_vm2, %v1511_v31  ;;  %vm1254_vm10 = vcmp.ge.f32.partialorder %v656_v27, 0.0  ;;  %v1382_v35 = vmul.f32 0.1, %v656_v27  ;;  %vm1318_vm11 = vcmp.ge.f32.partialorder %v976_v28, 0.0  ;;  %v665_v37 = vpop.f32.mrf.mxu0  ;;  %v985_v38 = vpop.f32.mrf.mxu1 }
  0xe0   :  { %1704 = vst.msk [vmem:[%s3405_s3 + $0x258] sm:$0xff] %vm1628_vm2, %v1575_v32  ;;  %v1446_v36 = vmul.f32 0.1, %v976_v28  ;;  %vm1257_vm12 = vcmp.ge.f32.partialorder %v671_v33, 0.0  ;;  %v1385_v39 = vmul.f32 0.1, %v671_v33  ;;  %v666_v43 = vadd.f32 %v2755_v1, %v665_v37 }
  0xe1   :  { %vm1321_vm13 = vcmp.ge.f32.partialorder %v991_v34, 0.0  ;;  %v1449_v40 = vmul.f32 0.1, %v991_v34  ;;  %v1510_v41 = vsel %vm1254_vm10, %v656_v27, %v1382_v35  ;;  %v986_v44 = vadd.f32 %v2755_v1, %v985_v38  ;;  %v2045_v45 = vpop.f32.mrf.mxu0  ;;  %v2141_v46 = vpop.f32.mrf.mxu1 }
  0xe2   :  { %v1574_v42 = vsel %vm1318_vm11, %v976_v28, %v1446_v36  ;;  %1639 = vst.msk [vmem:[%s3405_s3 + $0x50] sm:$0xff] %vm1628_vm2, %v1510_v41  ;;  %v1513_v47 = vsel %vm1257_vm12, %v671_v33, %v1385_v39  ;;  %v681_v49 = vadd.f32 %v2045_v45, %v2755_v1  ;;  %v1001_v50 = vadd.f32 %v2141_v46, %v2755_v1 }
  0xe3   :  { %1703 = vst.msk [vmem:[%s3405_s3 + $0x250] sm:$0xff] %vm1628_vm2, %v1574_v42  ;;  %v1577_v48 = vsel %vm1321_vm13, %v991_v34, %v1449_v40  ;;  %1642 = vst.msk [vmem:[%s3405_s3 + $0x68] sm:$0xff] %vm1628_vm2, %v1513_v47  ;;  %vm1256_vm14 = vcmp.ge.f32.partialorder %v666_v43, 0.0  ;;  %v1384_v51 = vmul.f32 0.1, %v666_v43  ;;  %vm1320_vm15 = vcmp.ge.f32.partialorder %v986_v44, 0.0  ;;  %v675_v53 = vpop.f32.mrf.mxu0  ;;  %v995_v54 = vpop.f32.mrf.mxu1 }
  0xe4   :  { %1706 = vst.msk [vmem:[%s3405_s3 + $0x268] sm:$0xff] %vm1628_vm2, %v1577_v48  ;;  %v1448_v52 = vmul.f32 0.1, %v986_v44  ;;  %vm1259_vm0 = vcmp.ge.f32.partialorder %v681_v49, 0.0  ;;  %v1387_v55 = vmul.f32 0.1, %v681_v49  ;;  %v676_v59 = vadd.f32 %v2755_v1, %v675_v53 }
  0xe5   :  { %vm1323_vm1 = vcmp.ge.f32.partialorder %v1001_v50, 0.0  ;;  %v1451_v56 = vmul.f32 0.1, %v1001_v50  ;;  %v1512_v57 = vsel %vm1256_vm14, %v666_v43, %v1384_v51  ;;  %v996_v60 = vadd.f32 %v2755_v1, %v995_v54  ;;  %v2048_v61 = vpop.f32.mrf.mxu0  ;;  %v2144_v62 = vpop.f32.mrf.mxu1 }
  0xe6   :  { %v1576_v58 = vsel %vm1320_vm15, %v986_v44, %v1448_v52  ;;  %1641 = vst.msk [vmem:[%s3405_s3 + $0x60] sm:$0xff] %vm1628_vm2, %v1512_v57  ;;  %v1515_v63 = vsel %vm1259_vm0, %v681_v49, %v1387_v55  ;;  %v691_v2 = vadd.f32 %v2048_v61, %v2755_v1  ;;  %v1011_v3 = vadd.f32 %v2144_v62, %v2755_v1 }
  0xe7   :  { %1705 = vst.msk [vmem:[%s3405_s3 + $0x260] sm:$0xff] %vm1628_vm2, %v1576_v58  ;;  %v1579_v0 = vsel %vm1323_vm1, %v1001_v50, %v1451_v56  ;;  %1644 = vst.msk [vmem:[%s3405_s3 + $0x78] sm:$0xff] %vm1628_vm2, %v1515_v63  ;;  %vm1258_vm3 = vcmp.ge.f32.partialorder %v676_v59, 0.0  ;;  %v1386_v4 = vmul.f32 0.1, %v676_v59  ;;  %vm1322_vm4 = vcmp.ge.f32.partialorder %v996_v60, 0.0  ;;  %v685_v6 = vpop.f32.mrf.mxu0  ;;  %v1005_v7 = vpop.f32.mrf.mxu1 }
  0xe8   :  { %1708 = vst.msk [vmem:[%s3405_s3 + $0x278] sm:$0xff] %vm1628_vm2, %v1579_v0  ;;  %v1450_v5 = vmul.f32 0.1, %v996_v60  ;;  %vm1261_vm5 = vcmp.ge.f32.partialorder %v691_v2, 0.0  ;;  %v1389_v8 = vmul.f32 0.1, %v691_v2  ;;  %v686_v12 = vadd.f32 %v2755_v1, %v685_v6 }
  0xe9   :  { %vm1325_vm6 = vcmp.ge.f32.partialorder %v1011_v3, 0.0  ;;  %v1453_v9 = vmul.f32 0.1, %v1011_v3  ;;  %v1514_v10 = vsel %vm1258_vm3, %v676_v59, %v1386_v4  ;;  %v1006_v13 = vadd.f32 %v2755_v1, %v1005_v7  ;;  %v2051_v14 = vpop.f32.mrf.mxu0  ;;  %v2147_v15 = vpop.f32.mrf.mxu1 }
  0xea   :  { %v1578_v11 = vsel %vm1322_vm4, %v996_v60, %v1450_v5  ;;  %1643 = vst.msk [vmem:[%s3405_s3 + $0x70] sm:$0xff] %vm1628_vm2, %v1514_v10  ;;  %v1517_v16 = vsel %vm1261_vm5, %v691_v2, %v1389_v8  ;;  %v701_v18 = vadd.f32 %v2051_v14, %v2755_v1  ;;  %v1021_v19 = vadd.f32 %v2147_v15, %v2755_v1 }
  0xeb   :  { %1707 = vst.msk [vmem:[%s3405_s3 + $0x270] sm:$0xff] %vm1628_vm2, %v1578_v11  ;;  %v1581_v17 = vsel %vm1325_vm6, %v1011_v3, %v1453_v9  ;;  %1646 = vst.msk [vmem:[%s3405_s3 + $0x88] sm:$0xff] %vm1628_vm2, %v1517_v16  ;;  %vm1260_vm7 = vcmp.ge.f32.partialorder %v686_v12, 0.0  ;;  %v1388_v20 = vmul.f32 0.1, %v686_v12  ;;  %vm1324_vm8 = vcmp.ge.f32.partialorder %v1006_v13, 0.0  ;;  %v695_v22 = vpop.f32.mrf.mxu0  ;;  %v1015_v23 = vpop.f32.mrf.mxu1 }
  0xec   :  { %1710 = vst.msk [vmem:[%s3405_s3 + $0x288] sm:$0xff] %vm1628_vm2, %v1581_v17  ;;  %v1452_v21 = vmul.f32 0.1, %v1006_v13  ;;  %vm1263_vm9 = vcmp.ge.f32.partialorder %v701_v18, 0.0  ;;  %v1391_v24 = vmul.f32 0.1, %v701_v18  ;;  %v696_v28 = vadd.f32 %v2755_v1, %v695_v22 }
  0xed   :  { %vm1327_vm10 = vcmp.ge.f32.partialorder %v1021_v19, 0.0  ;;  %v1455_v25 = vmul.f32 0.1, %v1021_v19  ;;  %v1516_v26 = vsel %vm1260_vm7, %v686_v12, %v1388_v20  ;;  %v1016_v29 = vadd.f32 %v2755_v1, %v1015_v23  ;;  %v2054_v30 = vpop.f32.mrf.mxu0  ;;  %v2150_v31 = vpop.f32.mrf.mxu1 }
  0xee   :  { %v1580_v27 = vsel %vm1324_vm8, %v1006_v13, %v1452_v21  ;;  %1645 = vst.msk [vmem:[%s3405_s3 + $0x80] sm:$0xff] %vm1628_vm2, %v1516_v26  ;;  %v1519_v32 = vsel %vm1263_vm9, %v701_v18, %v1391_v24  ;;  %v711_v34 = vadd.f32 %v2054_v30, %v2755_v1  ;;  %v1031_v35 = vadd.f32 %v2150_v31, %v2755_v1 }
  0xef   :  { %1709 = vst.msk [vmem:[%s3405_s3 + $0x280] sm:$0xff] %vm1628_vm2, %v1580_v27  ;;  %v1583_v33 = vsel %vm1327_vm10, %v1021_v19, %v1455_v25  ;;  %1648 = vst.msk [vmem:[%s3405_s3 + $0x98] sm:$0xff] %vm1628_vm2, %v1519_v32  ;;  %vm1262_vm11 = vcmp.ge.f32.partialorder %v696_v28, 0.0  ;;  %v1390_v36 = vmul.f32 0.1, %v696_v28  ;;  %vm1326_vm12 = vcmp.ge.f32.partialorder %v1016_v29, 0.0  ;;  %v705_v38 = vpop.f32.mrf.mxu0  ;;  %v1025_v39 = vpop.f32.mrf.mxu1 }
  0xf0   :  { %1712 = vst.msk [vmem:[%s3405_s3 + $0x298] sm:$0xff] %vm1628_vm2, %v1583_v33  ;;  %v1454_v37 = vmul.f32 0.1, %v1016_v29  ;;  %vm1265_vm13 = vcmp.ge.f32.partialorder %v711_v34, 0.0  ;;  %v1393_v40 = vmul.f32 0.1, %v711_v34  ;;  %v706_v44 = vadd.f32 %v2755_v1, %v705_v38 }
  0xf1   :  { %vm1329_vm14 = vcmp.ge.f32.partialorder %v1031_v35, 0.0  ;;  %v1457_v41 = vmul.f32 0.1, %v1031_v35  ;;  %v1518_v42 = vsel %vm1262_vm11, %v696_v28, %v1390_v36  ;;  %v1026_v45 = vadd.f32 %v2755_v1, %v1025_v39  ;;  %v2057_v46 = vpop.f32.mrf.mxu0  ;;  %v2153_v47 = vpop.f32.mrf.mxu1 }
  0xf2   :  { %v1582_v43 = vsel %vm1326_vm12, %v1016_v29, %v1454_v37  ;;  %1647 = vst.msk [vmem:[%s3405_s3 + $0x90] sm:$0xff] %vm1628_vm2, %v1518_v42  ;;  %v1521_v48 = vsel %vm1265_vm13, %v711_v34, %v1393_v40  ;;  %v721_v50 = vadd.f32 %v2057_v46, %v2755_v1  ;;  %v1041_v51 = vadd.f32 %v2153_v47, %v2755_v1 }
  0xf3   :  { %1711 = vst.msk [vmem:[%s3405_s3 + $0x290] sm:$0xff] %vm1628_vm2, %v1582_v43  ;;  %v1585_v49 = vsel %vm1329_vm14, %v1031_v35, %v1457_v41  ;;  %1650 = vst.msk [vmem:[%s3405_s3 + $0xa8] sm:$0xff] %vm1628_vm2, %v1521_v48  ;;  %vm1264_vm15 = vcmp.ge.f32.partialorder %v706_v44, 0.0  ;;  %v1392_v52 = vmul.f32 0.1, %v706_v44  ;;  %vm1328_vm0 = vcmp.ge.f32.partialorder %v1026_v45, 0.0  ;;  %v715_v54 = vpop.f32.mrf.mxu0  ;;  %v1035_v55 = vpop.f32.mrf.mxu1 }
  0xf4   :  { %1714 = vst.msk [vmem:[%s3405_s3 + $0x2a8] sm:$0xff] %vm1628_vm2, %v1585_v49  ;;  %v1456_v53 = vmul.f32 0.1, %v1026_v45  ;;  %vm1267_vm1 = vcmp.ge.f32.partialorder %v721_v50, 0.0  ;;  %v1395_v56 = vmul.f32 0.1, %v721_v50  ;;  %v716_v60 = vadd.f32 %v2755_v1, %v715_v54 }
  0xf5   :  { %vm1331_vm3 = vcmp.ge.f32.partialorder %v1041_v51, 0.0  ;;  %v1459_v57 = vmul.f32 0.1, %v1041_v51  ;;  %v1520_v58 = vsel %vm1264_vm15, %v706_v44, %v1392_v52  ;;  %v1036_v61 = vadd.f32 %v2755_v1, %v1035_v55  ;;  %v2060_v62 = vpop.f32.mrf.mxu0  ;;  %v2156_v63 = vpop.f32.mrf.mxu1 }
  0xf6   :  { %v1584_v59 = vsel %vm1328_vm0, %v1026_v45, %v1456_v53  ;;  %1649 = vst.msk [vmem:[%s3405_s3 + $0xa0] sm:$0xff] %vm1628_vm2, %v1520_v58  ;;  %v1523_v0 = vsel %vm1267_vm1, %v721_v50, %v1395_v56  ;;  %v731_v3 = vadd.f32 %v2060_v62, %v2755_v1  ;;  %v1051_v4 = vadd.f32 %v2156_v63, %v2755_v1 }
  0xf7   :  { %1713 = vst.msk [vmem:[%s3405_s3 + $0x2a0] sm:$0xff] %vm1628_vm2, %v1584_v59  ;;  %v1587_v2 = vsel %vm1331_vm3, %v1041_v51, %v1459_v57  ;;  %1652 = vst.msk [vmem:[%s3405_s3 + $0xb8] sm:$0xff] %vm1628_vm2, %v1523_v0  ;;  %vm1266_vm4 = vcmp.ge.f32.partialorder %v716_v60, 0.0  ;;  %v1394_v5 = vmul.f32 0.1, %v716_v60  ;;  %vm1330_vm5 = vcmp.ge.f32.partialorder %v1036_v61, 0.0  ;;  %v725_v7 = vpop.f32.mrf.mxu0  ;;  %v1045_v8 = vpop.f32.mrf.mxu1 }
  0xf8   :  { %1716 = vst.msk [vmem:[%s3405_s3 + $0x2b8] sm:$0xff] %vm1628_vm2, %v1587_v2  ;;  %v1458_v6 = vmul.f32 0.1, %v1036_v61  ;;  %vm1269_vm6 = vcmp.ge.f32.partialorder %v731_v3, 0.0  ;;  %v1397_v9 = vmul.f32 0.1, %v731_v3  ;;  %v726_v13 = vadd.f32 %v2755_v1, %v725_v7 }
  0xf9   :  { %vm1333_vm7 = vcmp.ge.f32.partialorder %v1051_v4, 0.0  ;;  %v1461_v10 = vmul.f32 0.1, %v1051_v4  ;;  %v1522_v11 = vsel %vm1266_vm4, %v716_v60, %v1394_v5  ;;  %v1046_v14 = vadd.f32 %v2755_v1, %v1045_v8  ;;  %v2063_v15 = vpop.f32.mrf.mxu0  ;;  %v2159_v16 = vpop.f32.mrf.mxu1 }
  0xfa   :  { %v1586_v12 = vsel %vm1330_vm5, %v1036_v61, %v1458_v6  ;;  %1651 = vst.msk [vmem:[%s3405_s3 + $0xb0] sm:$0xff] %vm1628_vm2, %v1522_v11  ;;  %v1525_v17 = vsel %vm1269_vm6, %v731_v3, %v1397_v9  ;;  %v741_v19 = vadd.f32 %v2063_v15, %v2755_v1  ;;  %v1061_v20 = vadd.f32 %v2159_v16, %v2755_v1 }
  0xfb   :  { %1715 = vst.msk [vmem:[%s3405_s3 + $0x2b0] sm:$0xff] %vm1628_vm2, %v1586_v12  ;;  %v1589_v18 = vsel %vm1333_vm7, %v1051_v4, %v1461_v10  ;;  %1654 = vst.msk [vmem:[%s3405_s3 + $0xc8] sm:$0xff] %vm1628_vm2, %v1525_v17  ;;  %vm1268_vm8 = vcmp.ge.f32.partialorder %v726_v13, 0.0  ;;  %v1396_v21 = vmul.f32 0.1, %v726_v13  ;;  %vm1332_vm9 = vcmp.ge.f32.partialorder %v1046_v14, 0.0  ;;  %v735_v23 = vpop.f32.mrf.mxu0  ;;  %v1055_v24 = vpop.f32.mrf.mxu1 }
  0xfc   :  { %1718 = vst.msk [vmem:[%s3405_s3 + $0x2c8] sm:$0xff] %vm1628_vm2, %v1589_v18  ;;  %v1460_v22 = vmul.f32 0.1, %v1046_v14  ;;  %vm1271_vm10 = vcmp.ge.f32.partialorder %v741_v19, 0.0  ;;  %v1399_v25 = vmul.f32 0.1, %v741_v19  ;;  %v736_v29 = vadd.f32 %v2755_v1, %v735_v23 }
  0xfd   :  { %vm1335_vm11 = vcmp.ge.f32.partialorder %v1061_v20, 0.0  ;;  %v1463_v26 = vmul.f32 0.1, %v1061_v20  ;;  %v1524_v27 = vsel %vm1268_vm8, %v726_v13, %v1396_v21  ;;  %v1056_v30 = vadd.f32 %v2755_v1, %v1055_v24  ;;  %v2066_v31 = vpop.f32.mrf.mxu0  ;;  %v2162_v32 = vpop.f32.mrf.mxu1 }
  0xfe   :  { %v1588_v28 = vsel %vm1332_vm9, %v1046_v14, %v1460_v22  ;;  %1653 = vst.msk [vmem:[%s3405_s3 + $0xc0] sm:$0xff] %vm1628_vm2, %v1524_v27  ;;  %v1527_v33 = vsel %vm1271_vm10, %v741_v19, %v1399_v25  ;;  %v751_v35 = vadd.f32 %v2066_v31, %v2755_v1  ;;  %v1071_v36 = vadd.f32 %v2162_v32, %v2755_v1 }
  0xff   :  { %1717 = vst.msk [vmem:[%s3405_s3 + $0x2c0] sm:$0xff] %vm1628_vm2, %v1588_v28  ;;  %v1591_v34 = vsel %vm1335_vm11, %v1061_v20, %v1463_v26  ;;  %1656 = vst.msk [vmem:[%s3405_s3 + $0xd8] sm:$0xff] %vm1628_vm2, %v1527_v33  ;;  %vm1270_vm12 = vcmp.ge.f32.partialorder %v736_v29, 0.0  ;;  %v1398_v37 = vmul.f32 0.1, %v736_v29  ;;  %vm1334_vm13 = vcmp.ge.f32.partialorder %v1056_v30, 0.0  ;;  %v745_v39 = vpop.f32.mrf.mxu0  ;;  %v1065_v40 = vpop.f32.mrf.mxu1 }
 0x100   :  { %1720 = vst.msk [vmem:[%s3405_s3 + $0x2d8] sm:$0xff] %vm1628_vm2, %v1591_v34  ;;  %v1462_v38 = vmul.f32 0.1, %v1056_v30  ;;  %vm1273_vm14 = vcmp.ge.f32.partialorder %v751_v35, 0.0  ;;  %v1401_v41 = vmul.f32 0.1, %v751_v35  ;;  %v746_v45 = vadd.f32 %v2755_v1, %v745_v39 }
 0x101   :  { %vm1337_vm15 = vcmp.ge.f32.partialorder %v1071_v36, 0.0  ;;  %v1465_v42 = vmul.f32 0.1, %v1071_v36  ;;  %v1526_v43 = vsel %vm1270_vm12, %v736_v29, %v1398_v37  ;;  %v1066_v46 = vadd.f32 %v2755_v1, %v1065_v40  ;;  %v2069_v47 = vpop.f32.mrf.mxu0  ;;  %v2165_v48 = vpop.f32.mrf.mxu1 }
 0x102   :  { %v1590_v44 = vsel %vm1334_vm13, %v1056_v30, %v1462_v38  ;;  %1655 = vst.msk [vmem:[%s3405_s3 + $0xd0] sm:$0xff] %vm1628_vm2, %v1526_v43  ;;  %v1529_v49 = vsel %vm1273_vm14, %v751_v35, %v1401_v41  ;;  %v761_v51 = vadd.f32 %v2069_v47, %v2755_v1  ;;  %v1081_v52 = vadd.f32 %v2165_v48, %v2755_v1 }
 0x103   :  { %1719 = vst.msk [vmem:[%s3405_s3 + $0x2d0] sm:$0xff] %vm1628_vm2, %v1590_v44  ;;  %v1593_v50 = vsel %vm1337_vm15, %v1071_v36, %v1465_v42  ;;  %1658 = vst.msk [vmem:[%s3405_s3 + $0xe8] sm:$0xff] %vm1628_vm2, %v1529_v49  ;;  %vm1272_vm0 = vcmp.ge.f32.partialorder %v746_v45, 0.0  ;;  %v1400_v53 = vmul.f32 0.1, %v746_v45  ;;  %vm1336_vm1 = vcmp.ge.f32.partialorder %v1066_v46, 0.0  ;;  %v755_v55 = vpop.f32.mrf.mxu0  ;;  %v1075_v56 = vpop.f32.mrf.mxu1 }
 0x104   :  { %1722 = vst.msk [vmem:[%s3405_s3 + $0x2e8] sm:$0xff] %vm1628_vm2, %v1593_v50  ;;  %v1464_v54 = vmul.f32 0.1, %v1066_v46  ;;  %vm1275_vm3 = vcmp.ge.f32.partialorder %v761_v51, 0.0  ;;  %v1403_v57 = vmul.f32 0.1, %v761_v51  ;;  %v756_v61 = vadd.f32 %v2755_v1, %v755_v55 }
 0x105   :  { %vm1339_vm4 = vcmp.ge.f32.partialorder %v1081_v52, 0.0  ;;  %v1467_v58 = vmul.f32 0.1, %v1081_v52  ;;  %v1528_v59 = vsel %vm1272_vm0, %v746_v45, %v1400_v53  ;;  %v1076_v62 = vadd.f32 %v2755_v1, %v1075_v56  ;;  %v2072_v63 = vpop.f32.mrf.mxu0  ;;  %v2168_v0 = vpop.f32.mrf.mxu1 }
 0x106   :  { %v1592_v60 = vsel %vm1336_vm1, %v1066_v46, %v1464_v54  ;;  %1657 = vst.msk [vmem:[%s3405_s3 + $0xe0] sm:$0xff] %vm1628_vm2, %v1528_v59  ;;  %v1531_v2 = vsel %vm1275_vm3, %v761_v51, %v1403_v57  ;;  %v771_v4 = vadd.f32 %v2072_v63, %v2755_v1  ;;  %v1091_v5 = vadd.f32 %v2168_v0, %v2755_v1 }
 0x107   :  { %1721 = vst.msk [vmem:[%s3405_s3 + $0x2e0] sm:$0xff] %vm1628_vm2, %v1592_v60  ;;  %v1595_v3 = vsel %vm1339_vm4, %v1081_v52, %v1467_v58  ;;  %1660 = vst.msk [vmem:[%s3405_s3 + $0xf8] sm:$0xff] %vm1628_vm2, %v1531_v2  ;;  %vm1274_vm5 = vcmp.ge.f32.partialorder %v756_v61, 0.0  ;;  %v1402_v6 = vmul.f32 0.1, %v756_v61  ;;  %vm1338_vm6 = vcmp.ge.f32.partialorder %v1076_v62, 0.0  ;;  %v765_v8 = vpop.f32.mrf.mxu0  ;;  %v1085_v9 = vpop.f32.mrf.mxu1 }
 0x108   :  { %1724 = vst.msk [vmem:[%s3405_s3 + $0x2f8] sm:$0xff] %vm1628_vm2, %v1595_v3  ;;  %v1466_v7 = vmul.f32 0.1, %v1076_v62  ;;  %vm1277_vm7 = vcmp.ge.f32.partialorder %v771_v4, 0.0  ;;  %v1405_v10 = vmul.f32 0.1, %v771_v4  ;;  %v766_v14 = vadd.f32 %v2755_v1, %v765_v8 }
 0x109   :  { %vm1341_vm8 = vcmp.ge.f32.partialorder %v1091_v5, 0.0  ;;  %v1469_v11 = vmul.f32 0.1, %v1091_v5  ;;  %v1530_v12 = vsel %vm1274_vm5, %v756_v61, %v1402_v6  ;;  %v1086_v15 = vadd.f32 %v2755_v1, %v1085_v9  ;;  %v2075_v16 = vpop.f32.mrf.mxu0  ;;  %v2171_v17 = vpop.f32.mrf.mxu1 }
 0x10a   :  { %v1594_v13 = vsel %vm1338_vm6, %v1076_v62, %v1466_v7  ;;  %1659 = vst.msk [vmem:[%s3405_s3 + $0xf0] sm:$0xff] %vm1628_vm2, %v1530_v12  ;;  %v1533_v18 = vsel %vm1277_vm7, %v771_v4, %v1405_v10  ;;  %v781_v20 = vadd.f32 %v2075_v16, %v2755_v1  ;;  %v1101_v21 = vadd.f32 %v2171_v17, %v2755_v1 }
 0x10b   :  { %1723 = vst.msk [vmem:[%s3405_s3 + $0x2f0] sm:$0xff] %vm1628_vm2, %v1594_v13  ;;  %v1597_v19 = vsel %vm1341_vm8, %v1091_v5, %v1469_v11  ;;  %1662 = vst.msk [vmem:[%s3405_s3 + $0x108] sm:$0xff] %vm1628_vm2, %v1533_v18  ;;  %vm1276_vm9 = vcmp.ge.f32.partialorder %v766_v14, 0.0  ;;  %v1404_v22 = vmul.f32 0.1, %v766_v14  ;;  %vm1340_vm10 = vcmp.ge.f32.partialorder %v1086_v15, 0.0  ;;  %v775_v24 = vpop.f32.mrf.mxu0  ;;  %v1095_v25 = vpop.f32.mrf.mxu1 }
 0x10c   :  { %1726 = vst.msk [vmem:[%s3405_s3 + $0x308] sm:$0xff] %vm1628_vm2, %v1597_v19  ;;  %v1468_v23 = vmul.f32 0.1, %v1086_v15  ;;  %vm1279_vm11 = vcmp.ge.f32.partialorder %v781_v20, 0.0  ;;  %v1407_v26 = vmul.f32 0.1, %v781_v20  ;;  %v776_v30 = vadd.f32 %v2755_v1, %v775_v24 }
 0x10d   :  { %vm1343_vm12 = vcmp.ge.f32.partialorder %v1101_v21, 0.0  ;;  %v1471_v27 = vmul.f32 0.1, %v1101_v21  ;;  %v1532_v28 = vsel %vm1276_vm9, %v766_v14, %v1404_v22  ;;  %v1096_v31 = vadd.f32 %v2755_v1, %v1095_v25  ;;  %v2078_v32 = vpop.f32.mrf.mxu0  ;;  %v2174_v33 = vpop.f32.mrf.mxu1 }
 0x10e   :  { %v1596_v29 = vsel %vm1340_vm10, %v1086_v15, %v1468_v23  ;;  %1661 = vst.msk [vmem:[%s3405_s3 + $0x100] sm:$0xff] %vm1628_vm2, %v1532_v28  ;;  %v1535_v34 = vsel %vm1279_vm11, %v781_v20, %v1407_v26  ;;  %v791_v36 = vadd.f32 %v2078_v32, %v2755_v1  ;;  %v1111_v37 = vadd.f32 %v2174_v33, %v2755_v1 }
 0x10f   :  { %1725 = vst.msk [vmem:[%s3405_s3 + $0x300] sm:$0xff] %vm1628_vm2, %v1596_v29  ;;  %v1599_v35 = vsel %vm1343_vm12, %v1101_v21, %v1471_v27  ;;  %1664 = vst.msk [vmem:[%s3405_s3 + $0x118] sm:$0xff] %vm1628_vm2, %v1535_v34  ;;  %vm1278_vm13 = vcmp.ge.f32.partialorder %v776_v30, 0.0  ;;  %v1406_v38 = vmul.f32 0.1, %v776_v30  ;;  %vm1342_vm14 = vcmp.ge.f32.partialorder %v1096_v31, 0.0  ;;  %v785_v40 = vpop.f32.mrf.mxu0  ;;  %v1105_v41 = vpop.f32.mrf.mxu1 }
 0x110   :  { %1728 = vst.msk [vmem:[%s3405_s3 + $0x318] sm:$0xff] %vm1628_vm2, %v1599_v35  ;;  %v1470_v39 = vmul.f32 0.1, %v1096_v31  ;;  %vm1281_vm15 = vcmp.ge.f32.partialorder %v791_v36, 0.0  ;;  %v1409_v42 = vmul.f32 0.1, %v791_v36  ;;  %v786_v46 = vadd.f32 %v2755_v1, %v785_v40 }
 0x111   :  { %vm1345_vm0 = vcmp.ge.f32.partialorder %v1111_v37, 0.0  ;;  %v1473_v43 = vmul.f32 0.1, %v1111_v37  ;;  %v1534_v44 = vsel %vm1278_vm13, %v776_v30, %v1406_v38  ;;  %v1106_v47 = vadd.f32 %v2755_v1, %v1105_v41  ;;  %v2081_v48 = vpop.f32.mrf.mxu0  ;;  %v2177_v49 = vpop.f32.mrf.mxu1  ;;  %v3174_v30 = vld [vmem:[%s3404_s2] ss:$0 sm:$0xff] }
 0x112   :  { %v1598_v45 = vsel %vm1342_vm14, %v1096_v31, %v1470_v39  ;;  %1663 = vst.msk [vmem:[%s3405_s3 + $0x110] sm:$0xff] %vm1628_vm2, %v1534_v44  ;;  %v1537_v50 = vsel %vm1281_vm15, %v791_v36, %v1409_v42  ;;  %v801_v52 = vadd.f32 %v2081_v48, %v2755_v1  ;;  %v1121_v53 = vadd.f32 %v2177_v49, %v2755_v1 }
 0x113   :  { %1727 = vst.msk [vmem:[%s3405_s3 + $0x310] sm:$0xff] %vm1628_vm2, %v1598_v45  ;;  %v1601_v51 = vsel %vm1345_vm0, %v1111_v37, %v1473_v43  ;;  %1666 = vst.msk [vmem:[%s3405_s3 + $0x128] sm:$0xff] %vm1628_vm2, %v1537_v50  ;;  %vm1280_vm1 = vcmp.ge.f32.partialorder %v786_v46, 0.0  ;;  %v1408_v54 = vmul.f32 0.1, %v786_v46  ;;  %vm1344_vm3 = vcmp.ge.f32.partialorder %v1106_v47, 0.0  ;;  %v795_v56 = vpop.f32.mrf.mxu0  ;;  %v1115_v57 = vpop.f32.mrf.mxu1 }
 0x114   :  { %1730 = vst.msk [vmem:[%s3405_s3 + $0x328] sm:$0xff] %vm1628_vm2, %v1601_v51  ;;  %v1472_v55 = vmul.f32 0.1, %v1106_v47  ;;  %vm1283_vm4 = vcmp.ge.f32.partialorder %v801_v52, 0.0  ;;  %v1411_v58 = vmul.f32 0.1, %v801_v52  ;;  %v796_v62 = vadd.f32 %v2755_v1, %v795_v56 }
 0x115   :  { %vm1347_vm5 = vcmp.ge.f32.partialorder %v1121_v53, 0.0  ;;  %v1475_v59 = vmul.f32 0.1, %v1121_v53  ;;  %v1536_v60 = vsel %vm1280_vm1, %v786_v46, %v1408_v54  ;;  %v1116_v63 = vadd.f32 %v2755_v1, %v1115_v57  ;;  %v2084_v0 = vpop.f32.mrf.mxu0  ;;  %v2180_v2 = vpop.f32.mrf.mxu1 }
 0x116   :  { %v1600_v61 = vsel %vm1344_vm3, %v1106_v47, %v1472_v55  ;;  %1665 = vst.msk [vmem:[%s3405_s3 + $0x120] sm:$0xff] %vm1628_vm2, %v1536_v60  ;;  %v1539_v3 = vsel %vm1283_vm4, %v801_v52, %v1411_v58  ;;  %v811_v5 = vadd.f32 %v2084_v0, %v2755_v1  ;;  %v1131_v6 = vadd.f32 %v2180_v2, %v2755_v1 }
 0x117   :  { %1729 = vst.msk [vmem:[%s3405_s3 + $0x320] sm:$0xff] %vm1628_vm2, %v1600_v61  ;;  %v1603_v4 = vsel %vm1347_vm5, %v1121_v53, %v1475_v59  ;;  %1668 = vst.msk [vmem:[%s3405_s3 + $0x138] sm:$0xff] %vm1628_vm2, %v1539_v3  ;;  %vm1282_vm6 = vcmp.ge.f32.partialorder %v796_v62, 0.0  ;;  %v1410_v7 = vmul.f32 0.1, %v796_v62  ;;  %vm1346_vm7 = vcmp.ge.f32.partialorder %v1116_v63, 0.0  ;;  %v805_v9 = vpop.f32.mrf.mxu0  ;;  %v1125_v10 = vpop.f32.mrf.mxu1 }
 0x118   :  { %1732 = vst.msk [vmem:[%s3405_s3 + $0x338] sm:$0xff] %vm1628_vm2, %v1603_v4  ;;  %v1474_v8 = vmul.f32 0.1, %v1116_v63  ;;  %vm1285_vm8 = vcmp.ge.f32.partialorder %v811_v5, 0.0  ;;  %v1413_v11 = vmul.f32 0.1, %v811_v5  ;;  %v806_v15 = vadd.f32 %v2755_v1, %v805_v9 }
 0x119   :  { %vm1349_vm9 = vcmp.ge.f32.partialorder %v1131_v6, 0.0  ;;  %v1477_v12 = vmul.f32 0.1, %v1131_v6  ;;  %v1538_v13 = vsel %vm1282_vm6, %v796_v62, %v1410_v7  ;;  %v1126_v16 = vadd.f32 %v2755_v1, %v1125_v10  ;;  %v2087_v17 = vpop.f32.mrf.mxu0  ;;  %v2183_v18 = vpop.f32.mrf.mxu1 }
 0x11a   :  { %v1602_v14 = vsel %vm1346_vm7, %v1116_v63, %v1474_v8  ;;  %1667 = vst.msk [vmem:[%s3405_s3 + $0x130] sm:$0xff] %vm1628_vm2, %v1538_v13  ;;  %v1541_v19 = vsel %vm1285_vm8, %v811_v5, %v1413_v11  ;;  %v821_v21 = vadd.f32 %v2087_v17, %v2755_v1  ;;  %v1141_v22 = vadd.f32 %v2183_v18, %v2755_v1 }
 0x11b   :  { %1731 = vst.msk [vmem:[%s3405_s3 + $0x330] sm:$0xff] %vm1628_vm2, %v1602_v14  ;;  %v1605_v20 = vsel %vm1349_vm9, %v1131_v6, %v1477_v12  ;;  %1670 = vst.msk [vmem:[%s3405_s3 + $0x148] sm:$0xff] %vm1628_vm2, %v1541_v19  ;;  %vm1284_vm10 = vcmp.ge.f32.partialorder %v806_v15, 0.0  ;;  %v1412_v23 = vmul.f32 0.1, %v806_v15  ;;  %vm1348_vm11 = vcmp.ge.f32.partialorder %v1126_v16, 0.0  ;;  %v815_v25 = vpop.f32.mrf.mxu0  ;;  %v1135_v26 = vpop.f32.mrf.mxu1 }
 0x11c   :  { %1734 = vst.msk [vmem:[%s3405_s3 + $0x348] sm:$0xff] %vm1628_vm2, %v1605_v20  ;;  %v1476_v24 = vmul.f32 0.1, %v1126_v16  ;;  %vm1287_vm12 = vcmp.ge.f32.partialorder %v821_v21, 0.0  ;;  %v1415_v27 = vmul.f32 0.1, %v821_v21  ;;  %v816_v31 = vadd.f32 %v3174_v30, %v815_v25 }
 0x11d   :  { %vm1351_vm13 = vcmp.ge.f32.partialorder %v1141_v22, 0.0  ;;  %v1479_v1 = vmul.f32 0.1, %v1141_v22  ;;  %v1540_v28 = vsel %vm1284_vm10, %v806_v15, %v1412_v23  ;;  %v1136_v32 = vadd.f32 %v3174_v30, %v1135_v26  ;;  %v2090_v33 = vpop.f32.mrf.mxu0  ;;  %v2186_v34 = vpop.f32.mrf.mxu1 }
 0x11e   :  { %v1604_v29 = vsel %vm1348_vm11, %v1126_v16, %v1476_v24  ;;  %1669 = vst.msk [vmem:[%s3405_s3 + $0x140] sm:$0xff] %vm1628_vm2, %v1540_v28  ;;  %v1543_v35 = vsel %vm1287_vm12, %v821_v21, %v1415_v27  ;;  %v831_v37 = vadd.f32 %v3174_v30, %v2090_v33  ;;  %v1151_v38 = vadd.f32 %v3174_v30, %v2186_v34 }
 0x11f   :  { %1733 = vst.msk [vmem:[%s3405_s3 + $0x340] sm:$0xff] %vm1628_vm2, %v1604_v29  ;;  %v1607_v36 = vsel %vm1351_vm13, %v1141_v22, %v1479_v1  ;;  %1672 = vst.msk [vmem:[%s3405_s3 + $0x158] sm:$0xff] %vm1628_vm2, %v1543_v35  ;;  %vm1286_vm14 = vcmp.ge.f32.partialorder %v816_v31, 0.0  ;;  %v1414_v39 = vmul.f32 0.1, %v816_v31  ;;  %vm1350_vm15 = vcmp.ge.f32.partialorder %v1136_v32, 0.0  ;;  %v825_v41 = vpop.f32.mrf.mxu0  ;;  %v1145_v42 = vpop.f32.mrf.mxu1 }
 0x120   :  { %1736 = vst.msk [vmem:[%s3405_s3 + $0x358] sm:$0xff] %vm1628_vm2, %v1607_v36  ;;  %v1478_v40 = vmul.f32 0.1, %v1136_v32  ;;  %vm1289_vm0 = vcmp.ge.f32.partialorder %v831_v37, 0.0  ;;  %v1417_v43 = vmul.f32 0.1, %v831_v37  ;;  %v826_v47 = vadd.f32 %v3174_v30, %v825_v41 }
 0x121   :  { %vm1353_vm1 = vcmp.ge.f32.partialorder %v1151_v38, 0.0  ;;  %v1481_v44 = vmul.f32 0.1, %v1151_v38  ;;  %v1542_v45 = vsel %vm1286_vm14, %v816_v31, %v1414_v39  ;;  %v1146_v48 = vadd.f32 %v3174_v30, %v1145_v42  ;;  %v2093_v49 = vpop.f32.mrf.mxu0  ;;  %v2189_v50 = vpop.f32.mrf.mxu1 }
 0x122   :  { %v1606_v46 = vsel %vm1350_vm15, %v1136_v32, %v1478_v40  ;;  %1671 = vst.msk [vmem:[%s3405_s3 + $0x150] sm:$0xff] %vm1628_vm2, %v1542_v45  ;;  %v1545_v51 = vsel %vm1289_vm0, %v831_v37, %v1417_v43  ;;  %v841_v53 = vadd.f32 %v3174_v30, %v2093_v49  ;;  %v1161_v54 = vadd.f32 %v3174_v30, %v2189_v50 }
 0x123   :  { %1735 = vst.msk [vmem:[%s3405_s3 + $0x350] sm:$0xff] %vm1628_vm2, %v1606_v46  ;;  %v1609_v52 = vsel %vm1353_vm1, %v1151_v38, %v1481_v44  ;;  %1674 = vst.msk [vmem:[%s3405_s3 + $0x168] sm:$0xff] %vm1628_vm2, %v1545_v51  ;;  %vm1288_vm3 = vcmp.ge.f32.partialorder %v826_v47, 0.0  ;;  %v1416_v55 = vmul.f32 0.1, %v826_v47  ;;  %vm1352_vm4 = vcmp.ge.f32.partialorder %v1146_v48, 0.0  ;;  %v835_v57 = vpop.f32.mrf.mxu0  ;;  %v1155_v58 = vpop.f32.mrf.mxu1 }
 0x124   :  { %1738 = vst.msk [vmem:[%s3405_s3 + $0x368] sm:$0xff] %vm1628_vm2, %v1609_v52  ;;  %v1480_v56 = vmul.f32 0.1, %v1146_v48  ;;  %vm1291_vm5 = vcmp.ge.f32.partialorder %v841_v53, 0.0  ;;  %v1419_v59 = vmul.f32 0.1, %v841_v53  ;;  %v836_v63 = vadd.f32 %v3174_v30, %v835_v57 }
 0x125   :  { %vm1355_vm6 = vcmp.ge.f32.partialorder %v1161_v54, 0.0  ;;  %v1483_v60 = vmul.f32 0.1, %v1161_v54  ;;  %v1544_v61 = vsel %vm1288_vm3, %v826_v47, %v1416_v55  ;;  %v1156_v0 = vadd.f32 %v3174_v30, %v1155_v58  ;;  %v2096_v2 = vpop.f32.mrf.mxu0  ;;  %v2192_v3 = vpop.f32.mrf.mxu1 }
 0x126   :  { %v1608_v62 = vsel %vm1352_vm4, %v1146_v48, %v1480_v56  ;;  %1673 = vst.msk [vmem:[%s3405_s3 + $0x160] sm:$0xff] %vm1628_vm2, %v1544_v61  ;;  %v1547_v4 = vsel %vm1291_vm5, %v841_v53, %v1419_v59  ;;  %v851_v6 = vadd.f32 %v3174_v30, %v2096_v2  ;;  %v1171_v7 = vadd.f32 %v3174_v30, %v2192_v3 }
 0x127   :  { %1737 = vst.msk [vmem:[%s3405_s3 + $0x360] sm:$0xff] %vm1628_vm2, %v1608_v62  ;;  %v1611_v5 = vsel %vm1355_vm6, %v1161_v54, %v1483_v60  ;;  %1676 = vst.msk [vmem:[%s3405_s3 + $0x178] sm:$0xff] %vm1628_vm2, %v1547_v4  ;;  %vm1290_vm7 = vcmp.ge.f32.partialorder %v836_v63, 0.0  ;;  %v1418_v8 = vmul.f32 0.1, %v836_v63  ;;  %vm1354_vm8 = vcmp.ge.f32.partialorder %v1156_v0, 0.0  ;;  %v845_v10 = vpop.f32.mrf.mxu0  ;;  %v1165_v11 = vpop.f32.mrf.mxu1 }
 0x128   :  { %1740 = vst.msk [vmem:[%s3405_s3 + $0x378] sm:$0xff] %vm1628_vm2, %v1611_v5  ;;  %v1482_v9 = vmul.f32 0.1, %v1156_v0  ;;  %vm1293_vm9 = vcmp.ge.f32.partialorder %v851_v6, 0.0  ;;  %v1421_v12 = vmul.f32 0.1, %v851_v6  ;;  %v846_v16 = vadd.f32 %v3174_v30, %v845_v10 }
 0x129   :  { %vm1357_vm10 = vcmp.ge.f32.partialorder %v1171_v7, 0.0  ;;  %v1485_v13 = vmul.f32 0.1, %v1171_v7  ;;  %v1546_v14 = vsel %vm1290_vm7, %v836_v63, %v1418_v8  ;;  %v1166_v17 = vadd.f32 %v3174_v30, %v1165_v11  ;;  %v2099_v18 = vpop.f32.mrf.mxu0  ;;  %v2195_v19 = vpop.f32.mrf.mxu1 }
 0x12a   :  { %v1610_v15 = vsel %vm1354_vm8, %v1156_v0, %v1482_v9  ;;  %1675 = vst.msk [vmem:[%s3405_s3 + $0x170] sm:$0xff] %vm1628_vm2, %v1546_v14  ;;  %v1549_v20 = vsel %vm1293_vm9, %v851_v6, %v1421_v12  ;;  %v861_v22 = vadd.f32 %v3174_v30, %v2099_v18  ;;  %v1181_v23 = vadd.f32 %v3174_v30, %v2195_v19 }
 0x12b   :  { %1739 = vst.msk [vmem:[%s3405_s3 + $0x370] sm:$0xff] %vm1628_vm2, %v1610_v15  ;;  %v1613_v21 = vsel %vm1357_vm10, %v1171_v7, %v1485_v13  ;;  %1678 = vst.msk [vmem:[%s3405_s3 + $0x188] sm:$0xff] %vm1628_vm2, %v1549_v20  ;;  %vm1292_vm11 = vcmp.ge.f32.partialorder %v846_v16, 0.0  ;;  %v1420_v24 = vmul.f32 0.1, %v846_v16  ;;  %vm1356_vm12 = vcmp.ge.f32.partialorder %v1166_v17, 0.0  ;;  %v855_v26 = vpop.f32.mrf.mxu0  ;;  %v1175_v27 = vpop.f32.mrf.mxu1 }
 0x12c   :  { %1742 = vst.msk [vmem:[%s3405_s3 + $0x388] sm:$0xff] %vm1628_vm2, %v1613_v21  ;;  %v1484_v25 = vmul.f32 0.1, %v1166_v17  ;;  %vm1295_vm13 = vcmp.ge.f32.partialorder %v861_v22, 0.0  ;;  %v1423_v1 = vmul.f32 0.1, %v861_v22  ;;  %v856_v32 = vadd.f32 %v3174_v30, %v855_v26 }
 0x12d   :  { %vm1359_vm14 = vcmp.ge.f32.partialorder %v1181_v23, 0.0  ;;  %v1487_v28 = vmul.f32 0.1, %v1181_v23  ;;  %v1548_v29 = vsel %vm1292_vm11, %v846_v16, %v1420_v24  ;;  %v1176_v33 = vadd.f32 %v3174_v30, %v1175_v27  ;;  %v2102_v34 = vpop.f32.mrf.mxu0  ;;  %v2198_v35 = vpop.f32.mrf.mxu1 }
 0x12e   :  { %v1612_v31 = vsel %vm1356_vm12, %v1166_v17, %v1484_v25  ;;  %1677 = vst.msk [vmem:[%s3405_s3 + $0x180] sm:$0xff] %vm1628_vm2, %v1548_v29  ;;  %v1551_v36 = vsel %vm1295_vm13, %v861_v22, %v1423_v1  ;;  %v871_v38 = vadd.f32 %v3174_v30, %v2102_v34  ;;  %v1191_v39 = vadd.f32 %v3174_v30, %v2198_v35 }
 0x12f   :  { %1741 = vst.msk [vmem:[%s3405_s3 + $0x380] sm:$0xff] %vm1628_vm2, %v1612_v31  ;;  %v1615_v37 = vsel %vm1359_vm14, %v1181_v23, %v1487_v28  ;;  %1680 = vst.msk [vmem:[%s3405_s3 + $0x198] sm:$0xff] %vm1628_vm2, %v1551_v36  ;;  %vm1294_vm15 = vcmp.ge.f32.partialorder %v856_v32, 0.0  ;;  %v1422_v40 = vmul.f32 0.1, %v856_v32  ;;  %vm1358_vm0 = vcmp.ge.f32.partialorder %v1176_v33, 0.0  ;;  %v865_v42 = vpop.f32.mrf.mxu0  ;;  %v1185_v43 = vpop.f32.mrf.mxu1 }
 0x130   :  { %1744 = vst.msk [vmem:[%s3405_s3 + $0x398] sm:$0xff] %vm1628_vm2, %v1615_v37  ;;  %v1486_v41 = vmul.f32 0.1, %v1176_v33  ;;  %vm1297_vm1 = vcmp.ge.f32.partialorder %v871_v38, 0.0  ;;  %v1425_v44 = vmul.f32 0.1, %v871_v38  ;;  %v866_v48 = vadd.f32 %v3174_v30, %v865_v42 }
 0x131   :  { %vm1361_vm3 = vcmp.ge.f32.partialorder %v1191_v39, 0.0  ;;  %v1489_v45 = vmul.f32 0.1, %v1191_v39  ;;  %v1550_v46 = vsel %vm1294_vm15, %v856_v32, %v1422_v40  ;;  %v1186_v49 = vadd.f32 %v3174_v30, %v1185_v43  ;;  %v2105_v50 = vpop.f32.mrf.mxu0  ;;  %v2201_v51 = vpop.f32.mrf.mxu1 }
 0x132   :  { %v1614_v47 = vsel %vm1358_vm0, %v1176_v33, %v1486_v41  ;;  %1679 = vst.msk [vmem:[%s3405_s3 + $0x190] sm:$0xff] %vm1628_vm2, %v1550_v46  ;;  %v1553_v52 = vsel %vm1297_vm1, %v871_v38, %v1425_v44  ;;  %v881_v54 = vadd.f32 %v3174_v30, %v2105_v50  ;;  %v1201_v55 = vadd.f32 %v3174_v30, %v2201_v51 }
 0x133   :  { %1743 = vst.msk [vmem:[%s3405_s3 + $0x390] sm:$0xff] %vm1628_vm2, %v1614_v47  ;;  %v1617_v53 = vsel %vm1361_vm3, %v1191_v39, %v1489_v45  ;;  %1682 = vst.msk [vmem:[%s3405_s3 + $0x1a8] sm:$0xff] %vm1628_vm2, %v1553_v52  ;;  %vm1296_vm4 = vcmp.ge.f32.partialorder %v866_v48, 0.0  ;;  %v1424_v56 = vmul.f32 0.1, %v866_v48  ;;  %vm1360_vm5 = vcmp.ge.f32.partialorder %v1186_v49, 0.0  ;;  %v875_v58 = vpop.f32.mrf.mxu0  ;;  %v1195_v59 = vpop.f32.mrf.mxu1 }
 0x134   :  { %1746 = vst.msk [vmem:[%s3405_s3 + $0x3a8] sm:$0xff] %vm1628_vm2, %v1617_v53  ;;  %v1488_v57 = vmul.f32 0.1, %v1186_v49  ;;  %vm1299_vm6 = vcmp.ge.f32.partialorder %v881_v54, 0.0  ;;  %v1427_v60 = vmul.f32 0.1, %v881_v54  ;;  %v876_v0 = vadd.f32 %v3174_v30, %v875_v58 }
 0x135   :  { %vm1363_vm7 = vcmp.ge.f32.partialorder %v1201_v55, 0.0  ;;  %v1491_v61 = vmul.f32 0.1, %v1201_v55  ;;  %v1552_v62 = vsel %vm1296_vm4, %v866_v48, %v1424_v56  ;;  %v1196_v2 = vadd.f32 %v3174_v30, %v1195_v59  ;;  %v2108_v3 = vpop.f32.mrf.mxu0  ;;  %v2204_v4 = vpop.f32.mrf.mxu1 }
 0x136   :  { %v1616_v63 = vsel %vm1360_vm5, %v1186_v49, %v1488_v57  ;;  %1681 = vst.msk [vmem:[%s3405_s3 + $0x1a0] sm:$0xff] %vm1628_vm2, %v1552_v62  ;;  %v1555_v5 = vsel %vm1299_vm6, %v881_v54, %v1427_v60  ;;  %v891_v7 = vadd.f32 %v3174_v30, %v2108_v3  ;;  %v1211_v8 = vadd.f32 %v3174_v30, %v2204_v4 }
 0x137   :  { %1745 = vst.msk [vmem:[%s3405_s3 + $0x3a0] sm:$0xff] %vm1628_vm2, %v1616_v63  ;;  %v1619_v6 = vsel %vm1363_vm7, %v1201_v55, %v1491_v61  ;;  %1684 = vst.msk [vmem:[%s3405_s3 + $0x1b8] sm:$0xff] %vm1628_vm2, %v1555_v5  ;;  %vm1298_vm8 = vcmp.ge.f32.partialorder %v876_v0, 0.0  ;;  %v1426_v9 = vmul.f32 0.1, %v876_v0  ;;  %vm1362_vm9 = vcmp.ge.f32.partialorder %v1196_v2, 0.0  ;;  %v885_v11 = vpop.f32.mrf.mxu0  ;;  %v1205_v12 = vpop.f32.mrf.mxu1 }
 0x138   :  { %1748 = vst.msk [vmem:[%s3405_s3 + $0x3b8] sm:$0xff] %vm1628_vm2, %v1619_v6  ;;  %v1490_v10 = vmul.f32 0.1, %v1196_v2  ;;  %vm1301_vm10 = vcmp.ge.f32.partialorder %v891_v7, 0.0  ;;  %v1429_v13 = vmul.f32 0.1, %v891_v7  ;;  %v886_v17 = vadd.f32 %v3174_v30, %v885_v11 }
 0x139   :  { %vm1365_vm11 = vcmp.ge.f32.partialorder %v1211_v8, 0.0  ;;  %v1493_v14 = vmul.f32 0.1, %v1211_v8  ;;  %v1554_v15 = vsel %vm1298_vm8, %v876_v0, %v1426_v9  ;;  %v1206_v18 = vadd.f32 %v3174_v30, %v1205_v12  ;;  %v2111_v19 = vpop.f32.mrf.mxu0  ;;  %v2207_v20 = vpop.f32.mrf.mxu1 }
 0x13a   :  { %v1618_v16 = vsel %vm1362_vm9, %v1196_v2, %v1490_v10  ;;  %1683 = vst.msk [vmem:[%s3405_s3 + $0x1b0] sm:$0xff] %vm1628_vm2, %v1554_v15  ;;  %v1557_v21 = vsel %vm1301_vm10, %v891_v7, %v1429_v13  ;;  %v901_v23 = vadd.f32 %v3174_v30, %v2111_v19  ;;  %v1221_v24 = vadd.f32 %v3174_v30, %v2207_v20 }
 0x13b   :  { %1747 = vst.msk [vmem:[%s3405_s3 + $0x3b0] sm:$0xff] %vm1628_vm2, %v1618_v16  ;;  %v1621_v22 = vsel %vm1365_vm11, %v1211_v8, %v1493_v14  ;;  %1686 = vst.msk [vmem:[%s3405_s3 + $0x1c8] sm:$0xff] %vm1628_vm2, %v1557_v21  ;;  %vm1300_vm12 = vcmp.ge.f32.partialorder %v886_v17, 0.0  ;;  %v1428_v25 = vmul.f32 0.1, %v886_v17  ;;  %vm1364_vm13 = vcmp.ge.f32.partialorder %v1206_v18, 0.0  ;;  %v895_v27 = vpop.f32.mrf.mxu0  ;;  %v1215_v1 = vpop.f32.mrf.mxu1 }
 0x13c   :  { %1750 = vst.msk [vmem:[%s3405_s3 + $0x3c8] sm:$0xff] %vm1628_vm2, %v1621_v22  ;;  %v1492_v26 = vmul.f32 0.1, %v1206_v18  ;;  %vm1303_vm14 = vcmp.ge.f32.partialorder %v901_v23, 0.0  ;;  %v1431_v28 = vmul.f32 0.1, %v901_v23  ;;  %v896_v33 = vadd.f32 %v3174_v30, %v895_v27 }
 0x13d   :  { %vm1367_vm15 = vcmp.ge.f32.partialorder %v1221_v24, 0.0  ;;  %v1495_v29 = vmul.f32 0.1, %v1221_v24  ;;  %v1556_v31 = vsel %vm1300_vm12, %v886_v17, %v1428_v25  ;;  %v1216_v34 = vadd.f32 %v3174_v30, %v1215_v1  ;;  %v2114_v35 = vpop.f32.mrf.mxu0  ;;  %v2210_v36 = vpop.f32.mrf.mxu1 }
 0x13e   :  { %v1620_v32 = vsel %vm1364_vm13, %v1206_v18, %v1492_v26  ;;  %1685 = vst.msk [vmem:[%s3405_s3 + $0x1c0] sm:$0xff] %vm1628_vm2, %v1556_v31  ;;  %v1559_v37 = vsel %vm1303_vm14, %v901_v23, %v1431_v28  ;;  %v911_v39 = vadd.f32 %v3174_v30, %v2114_v35  ;;  %v1231_v40 = vadd.f32 %v3174_v30, %v2210_v36 }
 0x13f   :  { %1749 = vst.msk [vmem:[%s3405_s3 + $0x3c0] sm:$0xff] %vm1628_vm2, %v1620_v32  ;;  %v1623_v38 = vsel %vm1367_vm15, %v1221_v24, %v1495_v29  ;;  %1688 = vst.msk [vmem:[%s3405_s3 + $0x1d8] sm:$0xff] %vm1628_vm2, %v1559_v37  ;;  %vm1302_vm0 = vcmp.ge.f32.partialorder %v896_v33, 0.0  ;;  %v1430_v41 = vmul.f32 0.1, %v896_v33  ;;  %vm1366_vm1 = vcmp.ge.f32.partialorder %v1216_v34, 0.0  ;;  %v905_v43 = vpop.f32.mrf.mxu0  ;;  %v1225_v44 = vpop.f32.mrf.mxu1 }
 0x140   :  { %1752 = vst.msk [vmem:[%s3405_s3 + $0x3d8] sm:$0xff] %vm1628_vm2, %v1623_v38  ;;  %v1494_v42 = vmul.f32 0.1, %v1216_v34  ;;  %vm1305_vm3 = vcmp.ge.f32.partialorder %v911_v39, 0.0  ;;  %v1433_v45 = vmul.f32 0.1, %v911_v39  ;;  %v906_v49 = vadd.f32 %v3174_v30, %v905_v43 }
 0x141   :  { %vm1369_vm4 = vcmp.ge.f32.partialorder %v1231_v40, 0.0  ;;  %v1497_v46 = vmul.f32 0.1, %v1231_v40  ;;  %v1558_v47 = vsel %vm1302_vm0, %v896_v33, %v1430_v41  ;;  %v1226_v50 = vadd.f32 %v3174_v30, %v1225_v44  ;;  %v2117_v51 = vpop.f32.mrf.mxu0  ;;  %v2213_v52 = vpop.f32.mrf.mxu1 }
 0x142   :  { %v1622_v48 = vsel %vm1366_vm1, %v1216_v34, %v1494_v42  ;;  %1687 = vst.msk [vmem:[%s3405_s3 + $0x1d0] sm:$0xff] %vm1628_vm2, %v1558_v47  ;;  %v1561_v53 = vsel %vm1305_vm3, %v911_v39, %v1433_v45  ;;  %v921_v55 = vadd.f32 %v3174_v30, %v2117_v51  ;;  %v1241_v56 = vadd.f32 %v3174_v30, %v2213_v52 }
 0x143   :  { %1751 = vst.msk [vmem:[%s3405_s3 + $0x3d0] sm:$0xff] %vm1628_vm2, %v1622_v48  ;;  %v1625_v54 = vsel %vm1369_vm4, %v1231_v40, %v1497_v46  ;;  %1690 = vst.msk [vmem:[%s3405_s3 + $0x1e8] sm:$0xff] %vm1628_vm2, %v1561_v53  ;;  %vm1304_vm5 = vcmp.ge.f32.partialorder %v906_v49, 0.0  ;;  %v1432_v57 = vmul.f32 0.1, %v906_v49  ;;  %vm1368_vm6 = vcmp.ge.f32.partialorder %v1226_v50, 0.0  ;;  %v915_v59 = vpop.f32.mrf.mxu0  ;;  %v1235_v60 = vpop.f32.mrf.mxu1 }
 0x144   :  { %1754 = vst.msk [vmem:[%s3405_s3 + $0x3e8] sm:$0xff] %vm1628_vm2, %v1625_v54  ;;  %v1496_v58 = vmul.f32 0.1, %v1226_v50  ;;  %vm1307_vm7 = vcmp.ge.f32.partialorder %v921_v55, 0.0  ;;  %v1435_v61 = vmul.f32 0.1, %v921_v55  ;;  %v916_v2 = vadd.f32 %v3174_v30, %v915_v59 }
 0x145   :  { %vm1371_vm8 = vcmp.ge.f32.partialorder %v1241_v56, 0.0  ;;  %v1499_v62 = vmul.f32 0.1, %v1241_v56  ;;  %v1560_v63 = vsel %vm1304_vm5, %v906_v49, %v1432_v57  ;;  %v1236_v3 = vadd.f32 %v3174_v30, %v1235_v60 }
 0x146   :  { %v1624_v0 = vsel %vm1368_vm6, %v1226_v50, %v1496_v58  ;;  %1689 = vst.msk [vmem:[%s3405_s3 + $0x1e0] sm:$0xff] %vm1628_vm2, %v1560_v63  ;;  %v1563_v4 = vsel %vm1307_vm7, %v921_v55, %v1435_v61  ;;  %vm1306_vm9 = vcmp.ge.f32.partialorder %v916_v2, 0.0  ;;  %v1434_v30 = vmul.f32 0.1, %v916_v2 }
 0x147   :  { %1753 = vst.msk [vmem:[%s3405_s3 + $0x3e0] sm:$0xff] %vm1628_vm2, %v1624_v0  ;;  %v1627_v5 = vsel %vm1371_vm8, %v1241_v56, %v1499_v62  ;;  %1692 = vst.msk [vmem:[%s3405_s3 + $0x1f8] sm:$0xff] %vm1628_vm2, %v1563_v4  ;;  %vm1370_vm10 = vcmp.ge.f32.partialorder %v1236_v3, 0.0  ;;  %v1498_v6 = vmul.f32 0.1, %v1236_v3 }
 0x148   :  { %1756 = vst.msk [vmem:[%s3405_s3 + $0x3f8] sm:$0xff] %vm1628_vm2, %v1627_v5  ;;  %v1562_v7 = vsel %vm1306_vm9, %v916_v2, %v1434_v30 }
 0x149   :  { %v1626_v8 = vsel %vm1370_vm10, %v1236_v3, %v1498_v6  ;;  %1691 = vst.msk [vmem:[%s3405_s3 + $0x1f0] sm:$0xff] %vm1628_vm2, %v1562_v7 }
 0x14a   :  { %1755 = vst.msk [vmem:[%s3405_s3 + $0x3f0] sm:$0xff] %vm1628_vm2, %v1626_v8 }

// kernel: _lambda_.10
= control target key start
LH: loop header
LB: loop body
LE: loop exit
PB: predicated region body
PF: predicated region fallthrough
CT: control target
= control target key end

     0   :  { %s2693_s25 = smov 0   ;;  %s3221_s0 = inlined_call_operand.vmem [shape: f32[8,8,128], index: 0, kind: input, shape index: {}]   ;;  %s3222_s1 = inlined_call_operand.vmem [shape: bf16[128,384], index: 1, kind: input, shape index: {}]   ;;  %s3223_s2 = inlined_call_operand.vmem [shape: f32[8,384], index: 2, kind: input, shape index: {}]   ;;  %s3224_s3 = inlined_call_operand.vmem [shape: f32[1,3], index: 3, kind: input, shape index: {}]   ;;  %s3225_s4 = inlined_call_operand.vmem [shape: f32[3,8,8], index: 4, kind: input, shape index: {}]   ;;  %s3226_s5 = inlined_call_operand.vmem [shape: bf16[3,128,192], index: 5, kind: input, shape index: {}]   ;;  %s3227_s6 = inlined_call_operand.vmem [shape: f32[1,192], index: 6, kind: input, shape index: {}]   ;;  %s3228_s7 = inlined_call_operand.vmem [shape: bf16[128,192], index: 7, kind: input, shape index: {}]   ;;  %s3229_s8 = inlined_call_operand.vmem [shape: f32[1,192], index: 8, kind: input, shape index: {}]   ;;  %s3230_s9 = inlined_call_operand.vmem [shape: bf16[192,192], index: 9, kind: input, shape index: {}]   ;;  %s3231_s10 = inlined_call_operand.vmem [shape: f32[1,192], index: 10, kind: input, shape index: {}]   ;;  %s3232_s11 = inlined_call_operand.vmem [shape: bf16[128,192], index: 11, kind: input, shape index: {}]   ;;  %s3233_s12 = inlined_call_operand.vmem [shape: f32[1,192], index: 12, kind: input, shape index: {}]   ;;  %s3234_s13 = inlined_call_operand.vmem [shape: f32[8,8,192], index: 13, kind: output, shape index: {}]  }
   0x1 LB: > { %s2112_s26 = sadd.s32 4294967295, %s2615_s25   ;;  %p2116_p0 = scmp.ge.s32.totalorder %s2615_s25, 1  ;;  %s2615_s25 = sphi %s2693_s25, %s23_s25  }
   0x2   : > { %p386_p1 = scmp.lt.s32.totalorder %s2615_s25, 9 }
   0x4   : > { %p387_p2 = pnand %p2116_p0, %p386_p1 }
   0x5   : > { %p429_p3 = scmp.lt.s32.totalorder (!%p387_p2), %s2112_s26, 7  ;;  %s2618_s18 = smov (!%p387_p2), 64  }
   0x6   : > { %390 = sbr.rel (%p387_p2) target bundleno = 1901 (0x76d), region = 72 }
   0xb   : > { %v2415_v0 = vld [vmem:[%s3222_s1 + $0xac] ss:$12 sps:$4 sm:$0xff]   ;;  %v2417_v1 = vld [vmem:[%s3222_s1 + $0xa8] ss:$12 sps:$4 sm:$0xff]   ;;  %v2617_v2 = vmov 0   ;;  %s3236_s26 = smov (!%p429_p3, %s2112_s26), 7 }
   0xc   : > { %636 = vmatprep.mubr.bf16.mxu0 %v2617_v2  ;;  %2411 = vset.pattern.permute.xlu1 %v2617_v2  ;;  %v2418_v3 = vld [vmem:[%s3222_s1 + $0x94] ss:$12 sps:$4 sm:$0xff]   ;;  %v2420_v4 = vld [vmem:[%s3222_s1 + $0x90] ss:$12 sps:$4 sm:$0xff]   ;;  %v2423_v6 = vld [vmem:[%s3222_s1 + $0x78] ss:$12 sps:$4 sm:$0xff]  }
   0xd   : > { %604 = vmatprep.subr.bf16.mxu0 %v2415_v0  ;;  %v2421_v5 = vld [vmem:[%s3222_s1 + $0x7c] ss:$12 sps:$4 sm:$0xff]   ;;  %v2424_v7 = vld [vmem:[%s3222_s1 + $0x64] ss:$12 sps:$4 sm:$0xff]   ;;  %v2426_v8 = vld [vmem:[%s3222_s1 + $0x60] ss:$12 sps:$4 sm:$0xff]  }
   0xe   : > { %605 = vmatpush1.bf16.msra.mxu0 %v2417_v1  ;;  %v2427_v9 = vld [vmem:[%s3222_s1 + $0x4c] ss:$12 sps:$4 sm:$0xff]   ;;  %v2429_v10 = vld [vmem:[%s3222_s1 + $0x48] ss:$12 sps:$4 sm:$0xff]   ;;  %v2432_v12 = vld [vmem:[%s3222_s1 + $0x30] ss:$12 sps:$4 sm:$0xff]  }
   0xf   : > { %606 = vmatprep.subr.bf16.mxu0 %v2418_v3  ;;  %v2430_v11 = vld [vmem:[%s3222_s1 + $0x34] ss:$12 sps:$4 sm:$0xff]   ;;  %v2433_v13 = vld [vmem:[%s3222_s1 + $0x1c] ss:$12 sps:$4 sm:$0xff]   ;;  %s2117_s21 = sshll.u32 %s3236_s26, 3  ;;  %v2619_v26 = vmov 0.0  }
  0x10   : > { %v2435_v14 = vld [vmem:[%s3222_s1 + $0x18] ss:$12 sps:$4 sm:$0xff]   ;;  %s432_s30 = scalar_lea.vmem %s3221_s0, %s2117_s21  ;;  %v2438_v16 = vld [vmem:[%s3222_s1] ss:$12 sps:$4 sm:$0xff]   ;;  %2323 = vmatprep.subr.bf16.mxu1 %v2619_v26  ;;  %v2439_v27 = vld [vmem:[%s3222_s1 + $0xb0] ss:$12 sps:$4 sm:$0xff]  }
  0x11   : > { %v2436_v15 = vld [vmem:[%s3222_s1 + $0x4] ss:$12 sps:$4 sm:$0xff]   ;;  %v2767_v24 = vld [vmem:[%s3224_s3] ss:$0 sm:$0xff]  ;;  %vm2620_vm0 = vmmov 0   ;;  %2324 = vmatpush3.bf16.msra.mxu1 %v2439_v27  ;;  %v474_v30 = vld [vmem:[%s3223_s2 + $0x8] sm:$0xff] }
  0x12   : > { %607 = vmatpush1.bf16.msra.mxu0 %v2420_v4  ;;  %v439_v17 = vld [vmem:[%s432_s30] sm:$0xff]  ;;  %2339 = vmatprep.mubr.msk.bf16.mxu1 %vm2620_vm0, %v2619_v26  ;;  %v2442_v31 = vld [vmem:[%s3222_s1 + $0x68] ss:$12 sps:$4 sm:$0xff]   ;;  %v2443_v33 = vld [vmem:[%s3222_s1 + $0x50] ss:$12 sps:$4 sm:$0xff]   ;;  %vm725_vm1 = vcmask 523264  }
  0x13   : > { %608 = vmatprep.subr.bf16.mxu0 %v2421_v5  ;;  %v2757_v18 = vpack.c.bf16 %v439_v17, %v439_v17  ;;  %v473_v19 = vld [vmem:[%s3223_s2] sm:$0xff]  ;;  %2325 = vmatprep.subr.bf16.mxu1 %v2619_v26  ;;  %v2446_v37 = vld [vmem:[%s3222_s1 + $0x8] ss:$12 sps:$4 sm:$0xff]   ;;  %vm789_vm2 = vcmask 1043456   ;;  %v2621_v60 = vmov 1   ;;  %vm785_vm3 = vcmask 64512  }
  0x14   : > { %v2440_v28 = vld [vmem:[%s3222_s1 + $0x98] ss:$12 sps:$4 sm:$0xff]   ;;  %v2441_v29 = vld [vmem:[%s3222_s1 + $0x80] ss:$12 sps:$4 sm:$0xff]   ;;  %v475_v53 = vld [vmem:[%s3223_s2 + $0x10] sm:$0xff]  ;;  %s2292_s24 = sshll.u32 %s3236_s26, 4 }
  0x15   : > { %2326 = vmatpush3.bf16.msra.mxu1 %v2440_v28  ;;  %v2444_v35 = vld [vmem:[%s3222_s1 + $0x38] ss:$12 sps:$4 sm:$0xff]   ;;  %v2445_v36 = vld [vmem:[%s3222_s1 + $0x20] ss:$12 sps:$4 sm:$0xff]   ;;  %v2823_v52 = vsel %vm789_vm2, %v2757_v18, 0 }
  0x16   : > { %609 = vmatpush1.bf16.msra.mxu0 %v2423_v6  ;;  %2327 = vmatprep.subr.bf16.mxu1 %v2619_v26  ;;  %v2450_v27 = vld [vmem:[%s3226_s5 + $0x60] ss:$8 sps:$4 sm:$0xff]   ;;  %v2455_v28 = vld [vmem:[%s3226_s5 + $0x54] ss:$8 sps:$4 sm:$0xff]  }
  0x17   : > { %610 = vmatprep.subr.bf16.mxu0 %v2424_v7 }
  0x19   : > { %2328 = vmatpush3.bf16.msra.mxu1 %v2441_v29  ;;  %v2453_v29 = vld [vmem:[%s3226_s5 + $0x50] ss:$8 sps:$4 sm:$0xff]  }
  0x1a   : > { %611 = vmatpush1.bf16.msra.mxu0 %v2426_v8  ;;  %2329 = vmatprep.subr.bf16.mxu1 %v2619_v26 }
  0x1b   : > { %612 = vmatprep.subr.bf16.mxu0 %v2427_v9 }
  0x1d   : > { %2330 = vmatpush3.bf16.msra.mxu1 %v2442_v31  ;;  %v2456_v31 = vld [vmem:[%s3226_s5 + $0x40] ss:$8 sps:$4 sm:$0xff]  }
  0x1e   : > { %613 = vmatpush1.bf16.msra.mxu0 %v2429_v10  ;;  %2331 = vmatprep.subr.bf16.mxu1 %v2619_v26 }
  0x1f   : > { %614 = vmatprep.subr.bf16.mxu0 %v2430_v11 }
  0x21   : > { %2332 = vmatpush3.bf16.msra.mxu1 %v2443_v33  ;;  %v2459_v33 = vld [vmem:[%s3226_s5 + $0x30] ss:$8 sps:$4 sm:$0xff]  }
  0x22   : > { %615 = vmatpush1.bf16.msra.mxu0 %v2432_v12  ;;  %2333 = vmatprep.subr.bf16.mxu1 %v2619_v26  ;;  %v782_v12 = vld [vmem:[%s3225_s4] sm:$0xff] }
  0x23   : > { %616 = vmatprep.subr.bf16.mxu0 %v2433_v13 }
  0x25   : > { %2334 = vmatpush3.bf16.msra.mxu1 %v2444_v35  ;;  %v2462_v35 = vld [vmem:[%s3226_s5 + $0x20] ss:$8 sps:$4 sm:$0xff]  }
  0x26   : > { %617 = vmatpush1.bf16.msra.mxu0 %v2435_v14  ;;  %2335 = vmatprep.subr.bf16.mxu1 %v2619_v26 }
  0x27   : > { %618 = vmatprep.subr.bf16.mxu0 %v2436_v15 }
  0x29   : > { %2336 = vmatpush3.bf16.msra.mxu1 %v2445_v36  ;;  %v2467_v36 = vld [vmem:[%s3226_s5 + $0x14] ss:$8 sps:$4 sm:$0xff]  }
  0x2a   : > { %619 = vmatpush1.bf16.msra.mxu0 %v2438_v16  ;;  %2337 = vmatprep.subr.bf16.mxu1 %v2619_v26 }
  0x2b   : > { %2343 = vmatprep.subr.bf16.mxu0 %v2619_v26 }
  0x2d   : > { %637 = vmatmul.mubr.bf16.vlgmr.msra.gmra.mxu0 %v2757_v18  ;;  %2338 = vmatpush3.bf16.msra.mxu1 %v2446_v37  ;;  %v2465_v37 = vld [vmem:[%s3226_s5 + $0x10] ss:$8 sps:$4 sm:$0xff]  }
  0x2e   : > { %2351 = vmatprep.mubr.msk.bf16.mxu0 %vm2620_vm0, %v2619_v26  ;;  %2355 = vmatprep.subr.bf16.mxu1 %v2619_v26 }
  0x30   : > { %2340 = vmatmul.mubr.bf16.vlgmr.msra.gmra.mxu1 %v2757_v18 }
  0x31   : > { %2357 = vmatprep.mubr.msk.bf16.mxu1 %vm2620_vm0, %v2619_v26  ;;  %2356 = vmatpush3.bf16.msra.mxu1 %v2823_v52 }
  0x32   : > { %2361 = vmatprep.subr.bf16.mxu1 %v2619_v26 }
  0xed   : > { %v638_v20 = vpop.f32.mrf.mxu0 }
  0xee   : > { %v639_v21 = vadd.f32 %v638_v20, %v473_v19 }
  0xef   : > { %v640_v22 = vpop.f32.mrf.mxu0 }
  0xf0   : > { %851 = vrot.lane.b32.xlu1 %v639_v21, %s2618_s18  ;;  %685 = vxpose.xlu0.b32.start.end [1/1] (short) (narrow) %v639_v21, 64  ;;  %v641_v32 = vadd.f32 %v640_v22, %v474_v30  ;;  %v679_v54 = vpop.f32.mrf.mxu1  ;;  %v2449_v21 = vld [vmem:[%s3226_s5 + $0x74] ss:$8 sps:$4 sm:$0xff]   ;;  %v2458_v30 = vld [vmem:[%s3226_s5 + $0x44] ss:$8 sps:$4 sm:$0xff]  }
  0xf1   : > { %v642_v23 = vpop.f32.mrf.mxu0  ;;  %v680_v55 = vadd.f32 %v679_v54, %v475_v53  ;;  %v2148_v53 = vld [vmem:[%s3225_s4 + $0x8] sm:$0xff] }
  0xf2   : > { %v717_v34 = vpack.c.bf16 %v641_v32, %v641_v32  ;;  %v2341_v56 = vpop.f32.mrf.mxu1  ;;  %v2447_v23 = vld [vmem:[%s3226_s5 + $0x70] ss:$8 sps:$4 sm:$0xff]  }
  0xf3   : > { %v643_v25 = vpop.f32.mrf.mxu0  ;;  %v886_v57 = vpack.c.bf16 %v680_v55, %v680_v55 }
  0xf4   : > { %778 = vperm.xlu1 %2411, %v2767_v24   ;;  %v682_v58 = vpop.f32.mrf.mxu1  ;;  %v2452_v25 = vld [vmem:[%s3226_s5 + $0x64] ss:$8 sps:$4 sm:$0xff]  }
  0xf5   : > { %v2476_v58 = vld [vmem:[%s3226_s5 + $0xe4] ss:$8 sps:$4 sm:$0xff]  }
  0xf6   : > { %v2342_v59 = vpop.f32.mrf.mxu1 }
  0xf7   : > { %v2474_v59 = vld [vmem:[%s3226_s5 + $0xe0] ss:$8 sps:$4 sm:$0xff]  }
 0x135   : > { %723 = vrot.lane.b32.xlu0 %v717_v34, %s2618_s18  ;;  %v2464_v34 = vld [vmem:[%s3226_s5 + $0x24] ss:$8 sps:$4 sm:$0xff]  }
 0x153   : > { %1248 = vxpose.xlu0.b32.start.end [1/1] (short) (narrow) %v641_v32, 64  ;;  %v2461_v32 = vld [vmem:[%s3226_s5 + $0x34] ss:$8 sps:$4 sm:$0xff]  }
 0x162   : > { %v852_v38 = vpop.permute.xlu1 %851 }
 0x163   : > { %854 = vxpose.xlu1.b32.start.end [1/1] (short) (narrow) %v852_v38, 64  ;;  %v2470_v38 = vld [vmem:[%s3226_s5 + $0x4] ss:$8 sps:$4 sm:$0xff]  }
 0x16c   : > { %v701_v39 = vpop.trf.xlu0 }
 0x16f   : > { %v779_v61 = vpop.permute.xlu1 %778 }
 0x170   : > { %v702_v40 = vpop.trf.xlu0 }
 0x171   : > { %v718_v50 = vpack.c.bf16 %v702_v40, %v701_v39  ;;  %v2468_v39 = vld [vmem:[%s3226_s5] ss:$8 sps:$4 sm:$0xff]  }
 0x174   : > { %v703_v41 = vpop.trf.xlu0 }
 0x178   : > { %v704_v42 = vpop.trf.xlu0 }
 0x179   : > { %v719_v49 = vpack.c.bf16 %v704_v42, %v703_v41 }
 0x17c   : > { %v705_v43 = vpop.trf.xlu0 }
 0x180   : > { %v706_v44 = vpop.trf.xlu0 }
 0x181   : > { %v720_v48 = vpack.c.bf16 %v706_v44, %v705_v43  ;;  %2412 = vset.pattern.permute.xlu1 %v2621_v60  ;;  %v2479_v60 = vld [vmem:[%s3226_s5 + $0xd4] ss:$8 sps:$4 sm:$0xff]  }
 0x184   : > { %v707_v45 = vpop.trf.xlu0 }
 0x188   : > { %v708_v46 = vpop.trf.xlu0 }
 0x189   : > { %v721_v47 = vpack.c.bf16 %v708_v46, %v707_v45 }
 0x18b   : > { %2344 = vmatpush3.bf16.msra.mxu0 %v721_v47 }
 0x18c   : > { %2345 = vmatprep.subr.bf16.mxu0 %v2619_v26 }
 0x18f   : > { %2346 = vmatpush3.bf16.msra.mxu0 %v720_v48 }
 0x190   : > { %2347 = vmatprep.subr.bf16.mxu0 %v2619_v26 }
 0x193   : > { %2348 = vmatpush3.bf16.msra.mxu0 %v719_v49 }
 0x194   : > { %2349 = vmatprep.subr.bf16.mxu0 %v2619_v26 }
 0x197   : > { %2350 = vmatpush3.bf16.msra.mxu0 %v718_v50 }
 0x198   : > { %2373 = vmatprep.subr.bf16.mxu0 %v2619_v26  ;;  %1285 = vrot.lane.b32.xlu0 %v886_v57, %s2618_s18  ;;  %s437_s18 = scalar_lea.vmem %s3234_s13, %s2292_s24 }
 0x19d   : > { %937 = vperm.xlu1 %2412, %v2767_v24  }
 0x1a7   : > { %v724_v51 = vpop.permute.xlu0 %723 }
 0x1a8   : > { %2352 = vmatmul.mubr.msk.bf16.vlgmr.msra.gmra.mxu0 %vm725_vm1, %v724_v51 }
 0x1a9   : > { %2375 = vmatprep.mubr.msk.bf16.mxu0 %vm2620_vm0, %v2619_v26  ;;  %2374 = vmatpush3.bf16.msra.mxu0 %v2823_v52 }
 0x1df   : > { %v870_v62 = vpop.trf.xlu1 }
 0x1e3   : > { %v871_v63 = vpop.trf.xlu1 }
 0x1e4   : > { %v887_v22 = vpack.c.bf16 %v871_v63, %v870_v62  ;;  %v2482_v62 = vld [vmem:[%s3226_s5 + $0xc4] ss:$8 sps:$4 sm:$0xff]   ;;  %v2480_v63 = vld [vmem:[%s3226_s5 + $0xc0] ss:$8 sps:$4 sm:$0xff]  }
 0x1e7   : > { %v872_v0 = vpop.trf.xlu1 }
 0x1eb   : > { %v873_v1 = vpop.trf.xlu1 }
 0x1ec   : > { %v888_v20 = vpack.c.bf16 %v873_v1, %v872_v0  ;;  %v2485_v0 = vld [vmem:[%s3226_s5 + $0xb4] ss:$8 sps:$4 sm:$0xff]   ;;  %v2483_v1 = vld [vmem:[%s3226_s5 + $0xb0] ss:$8 sps:$4 sm:$0xff]  }
 0x1ef   : > { %v874_v5 = vpop.trf.xlu1 }
 0x1f3   : > { %v875_v9 = vpop.trf.xlu1 }
 0x1f4   : > { %v889_v19 = vpack.c.bf16 %v875_v9, %v874_v5  ;;  %v2491_v5 = vld [vmem:[%s3226_s5 + $0x94] ss:$8 sps:$4 sm:$0xff]   ;;  %v2622_v9 = vmov 2  }
 0x1f5   : > { %2413 = vset.pattern.permute.xlu1 %v2622_v9  ;;  %2414 = vset.pattern.permute.xlu0 %v2622_v9  ;;  %v2522_v9 = vld [vmem:[%s3226_s5 + $0x130] ss:$8 sps:$4 sm:$0xff]  }
 0x1f6   : > { %1333 = vperm.xlu1 %2413, %v2767_v24  }
 0x1f7   : > { %v876_v10 = vpop.trf.xlu1 }
 0x1fb   : > { %v877_v14 = vpop.trf.xlu1 }
 0x1fc   : > { %v890_v17 = vpack.c.bf16 %v877_v14, %v876_v10  ;;  %v1264_v10 = vpop.trf.xlu0 }
 0x218   : > { %v938_v50 = vpop.permute.xlu1 %937 }
 0x268   : > { %v763_v3 = vpop.f32.mrf.mxu0 }
 0x269   : > { %v769_v4 = vmul.f32 0.015625, %v763_v3  ;;  %v2488_v3 = vld [vmem:[%s3226_s5 + $0xa4] ss:$8 sps:$4 sm:$0xff]  }
 0x26a   : > { %v2353_v6 = vpop.f32.mrf.mxu0 }
 0x26b   : > { %2603 = vtanh.f32 %v769_v4  ;;  %v2486_v4 = vld [vmem:[%s3226_s5 + $0xa0] ss:$8 sps:$4 sm:$0xff]   ;;  %v2489_v6 = vld [vmem:[%s3226_s5 + $0x90] ss:$8 sps:$4 sm:$0xff]  }
 0x26c   : > { %v766_v7 = vpop.f32.mrf.mxu0 }
 0x26d   : > { %v2494_v7 = vld [vmem:[%s3226_s5 + $0x84] ss:$8 sps:$4 sm:$0xff]  }
 0x26e   : > { %v2354_v8 = vpop.f32.mrf.mxu0 }
 0x26f   : > { %v2492_v8 = vld [vmem:[%s3226_s5 + $0x80] ss:$8 sps:$4 sm:$0xff]  }
 0x278   : > { %v2604_v11 = vpop.eup %2603 }
 0x279   : > { %v781_v13 = vmul.f32 %v2604_v11, %v779_v61  ;;  %v2477_v61 = vld [vmem:[%s3226_s5 + $0xd0] ss:$8 sps:$4 sm:$0xff]  }
 0x27b   : > { %v783_v15 = vadd.f32 %v782_v12, %v781_v13  ;;  %v1265_v12 = vpop.trf.xlu0 }
 0x27d   : > { %v784_v16 = vpack.c.bf16 %v783_v15, %v783_v15 }
 0x27f   : > { %2358 = vmatmul.mubr.msk.bf16.vlgmr.msra.gmra.mxu1 %vm785_vm3, %v784_v16  ;;  %v1266_v16 = vpop.trf.xlu0 }
 0x280   : > { %2362 = vmatpush3.bf16.msra.mxu1 %v890_v17  ;;  %2369 = vmatprep.mubr.msk.bf16.mxu1 %vm2620_vm0, %v2619_v26 }
 0x281   : > { %2363 = vmatprep.subr.bf16.mxu1 %v2619_v26 }
 0x283   : > { %v1267_v17 = vpop.trf.xlu0 }
 0x284   : > { %2364 = vmatpush3.bf16.msra.mxu1 %v889_v19 }
 0x285   : > { %2365 = vmatprep.subr.bf16.mxu1 %v2619_v26 }
 0x287   : > { %v1268_v19 = vpop.trf.xlu0 }
 0x288   : > { %2366 = vmatpush3.bf16.msra.mxu1 %v888_v20 }
 0x289   : > { %2367 = vmatprep.subr.bf16.mxu1 %v2619_v26 }
 0x28b   : > { %v1269_v20 = vpop.trf.xlu0 }
 0x28c   : > { %2368 = vmatpush3.bf16.msra.mxu1 %v887_v22 }
 0x28d   : > { %1207 = vmatprep.subr.bf16.mxu1 %v2449_v21 }
 0x28f   : > { %2370 = vmatmul.mubr.msk.bf16.vlgmr.msra.gmra.mxu1 %vm725_vm1, %v886_v57  ;;  %v2473_v57 = vld [vmem:[%s3226_s5 + $0xf4] ss:$8 sps:$4 sm:$0xff]   ;;  %v1270_v21 = vpop.trf.xlu0 }
 0x290   : > { %1208 = vmatpush1.bf16.msra.mxu1 %v2447_v23  ;;  %1239 = vmatprep.mubr.bf16.mxu1 %v2617_v2 }
 0x291   : > { %1209 = vmatprep.subr.bf16.mxu1 %v2452_v25  ;;  %1086 = vmatprep.subr.bf16.mxu0 %v2473_v57 }
 0x293   : > { %v1271_v23 = vpop.trf.xlu0 }
 0x294   : > { %1210 = vmatpush1.bf16.msra.mxu1 %v2450_v27  ;;  %v1283_v27 = vpack.c.bf16 %v1271_v23, %v1270_v21  ;;  %v2554_v21 = vld [vmem:[%s3232_s11 + $0x74] ss:$8 sps:$4 sm:$0xff]   ;;  %v2560_v23 = vld [vmem:[%s3232_s11 + $0x64] ss:$8 sps:$4 sm:$0xff]  }
 0x295   : > { %1211 = vmatprep.subr.bf16.mxu1 %v2455_v28 }
 0x298   : > { %1212 = vmatpush1.bf16.msra.mxu1 %v2453_v29  ;;  %v1282_v29 = vpack.c.bf16 %v1269_v20, %v1268_v19  ;;  %v2545_v19 = vld [vmem:[%s3230_s9 + $0x74] ss:$8 sps:$4 sm:$0xff]   ;;  %v2552_v20 = vld [vmem:[%s3232_s11 + $0x70] ss:$8 sps:$4 sm:$0xff]  }
 0x299   : > { %1213 = vmatprep.subr.bf16.mxu1 %v2458_v30 }
 0x29c   : > { %1214 = vmatpush1.bf16.msra.mxu1 %v2456_v31  ;;  %v1281_v31 = vpack.c.bf16 %v1267_v17, %v1266_v16  ;;  %v2542_v16 = vld [vmem:[%s3226_s5 + $0x104] ss:$8 sps:$4 sm:$0xff]   ;;  %v2540_v17 = vld [vmem:[%s3226_s5 + $0x100] ss:$8 sps:$4 sm:$0xff]  }
 0x29d   : > { %1215 = vmatprep.subr.bf16.mxu1 %v2461_v32  ;;  %v1280_v32 = vpack.c.bf16 %v1265_v12, %v1264_v10  ;;  %v2530_v10 = vld [vmem:[%s3226_s5 + $0x124] ss:$8 sps:$4 sm:$0xff]   ;;  %v2528_v12 = vld [vmem:[%s3226_s5 + $0x120] ss:$8 sps:$4 sm:$0xff]  }
 0x2a0   : > { %1216 = vmatpush1.bf16.msra.mxu1 %v2459_v33  ;;  %v1286_v33 = vpop.permute.xlu0 %1285 }
 0x2a1   : > { %1217 = vmatprep.subr.bf16.mxu1 %v2464_v34  ;;  %v2495_v34 = vld [vmem:[%s3228_s7 + $0x70] ss:$8 sps:$4 sm:$0xff]  }
 0x2a4   : > { %1218 = vmatpush1.bf16.msra.mxu1 %v2462_v35  ;;  %v2497_v35 = vld [vmem:[%s3228_s7 + $0x74] ss:$8 sps:$4 sm:$0xff]  }
 0x2a5   : > { %1219 = vmatprep.subr.bf16.mxu1 %v2467_v36  ;;  %v2500_v36 = vld [vmem:[%s3226_s5 + $0x174] ss:$8 sps:$4 sm:$0xff]  }
 0x2a8   : > { %1220 = vmatpush1.bf16.msra.mxu1 %v2465_v37  ;;  %v2501_v37 = vld [vmem:[%s3228_s7 + $0x60] ss:$8 sps:$4 sm:$0xff]  }
 0x2a9   : > { %1221 = vmatprep.subr.bf16.mxu1 %v2470_v38  ;;  %v2509_v38 = vld [vmem:[%s3228_s7 + $0x54] ss:$8 sps:$4 sm:$0xff]  }
 0x2ac   : > { %1222 = vmatpush1.bf16.msra.mxu1 %v2468_v39  ;;  %v2507_v39 = vld [vmem:[%s3228_s7 + $0x50] ss:$8 sps:$4 sm:$0xff]  }
 0x2ad   : > { %2391 = vmatprep.subr.bf16.mxu1 %v2619_v26 }
 0x33f   : > { %v827_v40 = vpop.f32.mrf.mxu1 }
 0x340   : > { %v849_v41 = vpack.c.bf16 %v827_v40, %v827_v40  ;;  %v2515_v40 = vld [vmem:[%s3228_s7 + $0x44] ss:$8 sps:$4 sm:$0xff]  }
 0x341   : > { %v2359_v42 = vpop.f32.mrf.mxu1 }
 0x342   : > { %1240 = vmatmul.mubr.bf16.vlgmr.msra.gmra.mxu1 %v849_v41  ;;  %v2513_v41 = vld [vmem:[%s3228_s7 + $0x40] ss:$8 sps:$4 sm:$0xff]   ;;  %v2521_v42 = vld [vmem:[%s3228_s7 + $0x34] ss:$8 sps:$4 sm:$0xff]  }
 0x343   : > { %v830_v43 = vpop.f32.mrf.mxu1  ;;  %2392 = vmatpush3.bf16.msra.mxu1 %v2823_v52  ;;  %2393 = vmatprep.mubr.msk.bf16.mxu1 %vm2620_vm0, %v2619_v26  ;;  %v2471_v52 = vld [vmem:[%s3226_s5 + $0xf0] ss:$8 sps:$4 sm:$0xff]  }
 0x344   : > { %1482 = vmatprep.subr.bf16.mxu1 %v2500_v36  ;;  %v2519_v43 = vld [vmem:[%s3228_s7 + $0x30] ss:$8 sps:$4 sm:$0xff]  }
 0x345   : > { %v2360_v44 = vpop.f32.mrf.mxu1 }
 0x346   : > { %v2527_v44 = vld [vmem:[%s3228_s7 + $0x24] ss:$8 sps:$4 sm:$0xff]  }
 0x34f   : > { %v928_v45 = vpop.f32.mrf.mxu1 }
 0x350   : > { %v934_v46 = vmul.f32 0.015625, %v928_v45  ;;  %v2525_v45 = vld [vmem:[%s3228_s7 + $0x20] ss:$8 sps:$4 sm:$0xff]  }
 0x351   : > { %v2371_v47 = vpop.f32.mrf.mxu1 }
 0x352   : > { %2605 = vtanh.f32 %v934_v46  ;;  %v2533_v46 = vld [vmem:[%s3228_s7 + $0x14] ss:$8 sps:$4 sm:$0xff]   ;;  %v2531_v47 = vld [vmem:[%s3228_s7 + $0x10] ss:$8 sps:$4 sm:$0xff]  }
 0x353   : > { %v931_v48 = vpop.f32.mrf.mxu1 }
 0x354   : > { %v2539_v48 = vld [vmem:[%s3228_s7 + $0x4] ss:$8 sps:$4 sm:$0xff]  }
 0x355   : > { %v2372_v49 = vpop.f32.mrf.mxu1 }
 0x356   : > { %v2537_v49 = vld [vmem:[%s3228_s7] ss:$8 sps:$4 sm:$0xff]  }
 0x35f   : > { %v2606_v51 = vpop.eup %2605 }
 0x360   : > { %v940_v54 = vmul.f32 %v2606_v51, %v938_v50 }
 0x362   : > { %v943_v55 = vadd.f32 %v2148_v53, %v940_v54 }
 0x364   : > { %v944_v56 = vpack.c.bf16 %v943_v55, %v943_v55 }
 0x366   : > { %2376 = vmatmul.mubr.msk.bf16.vlgmr.msra.gmra.mxu0 %vm785_vm3, %v944_v56 }
 0x367   : > { %1118 = vmatprep.mubr.bf16.mxu0 %v2617_v2  ;;  %1087 = vmatpush1.bf16.msra.mxu0 %v2471_v52 }
 0x368   : > { %1088 = vmatprep.subr.bf16.mxu0 %v2476_v58 }
 0x36b   : > { %1089 = vmatpush1.bf16.msra.mxu0 %v2474_v59  ;;  %v1334_v59 = vpop.permute.xlu1 %1333 }
 0x36c   : > { %1090 = vmatprep.subr.bf16.mxu0 %v2479_v60 }
 0x36f   : > { %1091 = vmatpush1.bf16.msra.mxu0 %v2477_v61  ;;  %v2199_v61 = vld [vmem:[%s3225_s4 + $0x10] sm:$0xff] }
 0x370   : > { %1092 = vmatprep.subr.bf16.mxu0 %v2482_v62 }
 0x373   : > { %1093 = vmatpush1.bf16.msra.mxu0 %v2480_v63 }
 0x374   : > { %1094 = vmatprep.subr.bf16.mxu0 %v2485_v0  ;;  %v2498_v0 = vld [vmem:[%s3226_s5 + $0x170] ss:$8 sps:$4 sm:$0xff]  }
 0x377   : > { %1095 = vmatpush1.bf16.msra.mxu0 %v2483_v1 }
 0x378   : > { %1096 = vmatprep.subr.bf16.mxu0 %v2488_v3  ;;  %v2506_v3 = vld [vmem:[%s3226_s5 + $0x164] ss:$8 sps:$4 sm:$0xff]  }
 0x37b   : > { %1097 = vmatpush1.bf16.msra.mxu0 %v2486_v4  ;;  %v2504_v4 = vld [vmem:[%s3226_s5 + $0x160] ss:$8 sps:$4 sm:$0xff]  }
 0x37c   : > { %1098 = vmatprep.subr.bf16.mxu0 %v2491_v5  ;;  %v2512_v5 = vld [vmem:[%s3226_s5 + $0x154] ss:$8 sps:$4 sm:$0xff]  }
 0x37f   : > { %1099 = vmatpush1.bf16.msra.mxu0 %v2489_v6  ;;  %v2510_v6 = vld [vmem:[%s3226_s5 + $0x150] ss:$8 sps:$4 sm:$0xff]  }
 0x380   : > { %1100 = vmatprep.subr.bf16.mxu0 %v2494_v7  ;;  %v2518_v7 = vld [vmem:[%s3226_s5 + $0x144] ss:$8 sps:$4 sm:$0xff]  }
 0x383   : > { %1101 = vmatpush1.bf16.msra.mxu0 %v2492_v8  ;;  %v2524_v8 = vld [vmem:[%s3226_s5 + $0x134] ss:$8 sps:$4 sm:$0xff]  }
 0x384   : > { %2379 = vmatprep.subr.bf16.mxu0 %v2619_v26 }
 0x402   : > { %v2951_v11 = vpop.f32.mrf.mxu1 }
 0x404   : > { %v2953_v13 = vpop.f32.mrf.mxu1 }
 0x406   : > { %v1245_v14 = vpop.f32.mrf.mxu1 }
 0x407   : > { %v2536_v14 = vld [vmem:[%s3226_s5 + $0x114] ss:$8 sps:$4 sm:$0xff]  }
 0x408   : > { %v1246_v15 = vpop.f32.mrf.mxu1 }
 0x409   : > { %v2534_v15 = vld [vmem:[%s3226_s5 + $0x110] ss:$8 sps:$4 sm:$0xff]  }
 0x426   : > { %v982_v22 = vpop.f32.mrf.mxu0 }
 0x427   : > { %v1005_v25 = vpack.c.bf16 %v982_v22, %v982_v22  ;;  %v2558_v22 = vld [vmem:[%s3232_s11 + $0x60] ss:$8 sps:$4 sm:$0xff]  }
 0x428   : > { %v2377_v28 = vpop.f32.mrf.mxu0 }
 0x429   : > { %1119 = vmatmul.mubr.bf16.vlgmr.msra.gmra.mxu0 %v1005_v25  ;;  %v2564_v25 = vld [vmem:[%s3232_s11 + $0x50] ss:$8 sps:$4 sm:$0xff]   ;;  %v2570_v28 = vld [vmem:[%s3232_s11 + $0x40] ss:$8 sps:$4 sm:$0xff]  }
 0x42a   : > { %2380 = vmatpush3.bf16.msra.mxu0 %v1283_v27  ;;  %v985_v24 = vpop.f32.mrf.mxu0  ;;  %2387 = vmatprep.mubr.msk.bf16.mxu0 %vm2620_vm0, %v2619_v26  ;;  %v2566_v27 = vld [vmem:[%s3232_s11 + $0x54] ss:$8 sps:$4 sm:$0xff]  }
 0x42b   : > { %2381 = vmatprep.subr.bf16.mxu0 %v2619_v26  ;;  %v2572_v24 = vld [vmem:[%s3232_s11 + $0x44] ss:$8 sps:$4 sm:$0xff]  }
 0x42c   : > { %v2378_v30 = vpop.f32.mrf.mxu0 }
 0x42d   : > { %v2578_v30 = vld [vmem:[%s3232_s11 + $0x34] ss:$8 sps:$4 sm:$0xff]  }
 0x42e   : > { %2382 = vmatpush3.bf16.msra.mxu0 %v1282_v29  ;;  %v2576_v29 = vld [vmem:[%s3232_s11 + $0x30] ss:$8 sps:$4 sm:$0xff]  }
 0x42f   : > { %2383 = vmatprep.subr.bf16.mxu0 %v2619_v26 }
 0x432   : > { %2384 = vmatpush3.bf16.msra.mxu0 %v1281_v31  ;;  %v2582_v31 = vld [vmem:[%s3232_s11 + $0x20] ss:$8 sps:$4 sm:$0xff]  }
 0x433   : > { %2385 = vmatprep.subr.bf16.mxu0 %v2619_v26  ;;  %v2503_v26 = vld [vmem:[%s3228_s7 + $0x64] ss:$8 sps:$4 sm:$0xff]  }
 0x436   : > { %2386 = vmatpush3.bf16.msra.mxu0 %v1280_v32  ;;  %v2584_v32 = vld [vmem:[%s3232_s11 + $0x24] ss:$8 sps:$4 sm:$0xff]  }
 0x437   : > { %1647 = vmatprep.subr.bf16.mxu0 %v2497_v35 }
 0x439   : > { %2388 = vmatmul.mubr.msk.bf16.vlgmr.msra.gmra.mxu0 %vm725_vm1, %v1286_v33 }
 0x43a   : > { %1679 = vmatprep.mubr.bf16.mxu0 %v2617_v2  ;;  %1648 = vmatpush1.bf16.msra.mxu0 %v2495_v34 }
 0x43b   : > { %1649 = vmatprep.subr.bf16.mxu0 %v2503_v26 }
 0x43e   : > { %1650 = vmatpush1.bf16.msra.mxu0 %v2501_v37  ;;  %v2543_v37 = vld [vmem:[%s3230_s9 + $0x70] ss:$8 sps:$4 sm:$0xff]  }
 0x43f   : > { %1651 = vmatprep.subr.bf16.mxu0 %v2509_v38 }
 0x442   : > { %1652 = vmatpush1.bf16.msra.mxu0 %v2507_v39  ;;  %v2548_v39 = vld [vmem:[%s3230_s9 + $0x64] ss:$8 sps:$4 sm:$0xff]  }
 0x443   : > { %1653 = vmatprep.subr.bf16.mxu0 %v2515_v40 }
 0x446   : > { %1654 = vmatpush1.bf16.msra.mxu0 %v2513_v41 }
 0x447   : > { %1655 = vmatprep.subr.bf16.mxu0 %v2521_v42  ;;  %v2546_v42 = vld [vmem:[%s3230_s9 + $0x60] ss:$8 sps:$4 sm:$0xff]  }
 0x44a   : > { %1656 = vmatpush1.bf16.msra.mxu0 %v2519_v43  ;;  %v2551_v43 = vld [vmem:[%s3230_s9 + $0x54] ss:$8 sps:$4 sm:$0xff]  }
 0x44b   : > { %1657 = vmatprep.subr.bf16.mxu0 %v2527_v44 }
 0x44e   : > { %1658 = vmatpush1.bf16.msra.mxu0 %v2525_v45  ;;  %v2549_v45 = vld [vmem:[%s3230_s9 + $0x50] ss:$8 sps:$4 sm:$0xff]  }
 0x44f   : > { %1659 = vmatprep.subr.bf16.mxu0 %v2533_v46  ;;  %v2557_v46 = vld [vmem:[%s3230_s9 + $0x44] ss:$8 sps:$4 sm:$0xff]  }
 0x452   : > { %1660 = vmatpush1.bf16.msra.mxu0 %v2531_v47  ;;  %v2555_v47 = vld [vmem:[%s3230_s9 + $0x40] ss:$8 sps:$4 sm:$0xff]  }
 0x453   : > { %1661 = vmatprep.subr.bf16.mxu0 %v2539_v48  ;;  %v2563_v48 = vld [vmem:[%s3230_s9 + $0x34] ss:$8 sps:$4 sm:$0xff]  }
 0x456   : > { %1662 = vmatpush1.bf16.msra.mxu0 %v2537_v49  ;;  %v2561_v49 = vld [vmem:[%s3230_s9 + $0x30] ss:$8 sps:$4 sm:$0xff]  }
 0x457   : > { %2006 = vmatprep.subr.bf16.mxu0 %v2554_v21 }
 0x459   : > { %1680 = vmatmul.mubr.bf16.vlgmr.msra.gmra.mxu0 %v2757_v18 }
 0x45a   : > { %2038 = vmatprep.mubr.bf16.mxu0 %v2617_v2  ;;  %2007 = vmatpush1.bf16.msra.mxu0 %v2552_v20 }
 0x45b   : > { %2008 = vmatprep.subr.bf16.mxu0 %v2560_v23 }
 0x45e   : > { %2009 = vmatpush1.bf16.msra.mxu0 %v2558_v22 }
 0x45f   : > { %2010 = vmatprep.subr.bf16.mxu0 %v2566_v27 }
 0x462   : > { %2011 = vmatpush1.bf16.msra.mxu0 %v2564_v25 }
 0x463   : > { %2012 = vmatprep.subr.bf16.mxu0 %v2572_v24 }
 0x466   : > { %2013 = vmatpush1.bf16.msra.mxu0 %v2570_v28 }
 0x467   : > { %2014 = vmatprep.subr.bf16.mxu0 %v2578_v30 }
 0x46a   : > { %2015 = vmatpush1.bf16.msra.mxu0 %v2576_v29 }
 0x46b   : > { %2016 = vmatprep.subr.bf16.mxu0 %v2584_v32 }
 0x46e   : > { %2017 = vmatpush1.bf16.msra.mxu0 %v2582_v31 }
 0x4e9   : > { %v3015_v50 = vpop.f32.mrf.mxu0 }
 0x4eb   : > { %v3017_v51 = vpop.f32.mrf.mxu0 }
 0x4ed   : > { %v1124_v53 = vpop.f32.mrf.mxu0 }
 0x4ee   : > { %v2569_v53 = vld [vmem:[%s3230_s9 + $0x24] ss:$8 sps:$4 sm:$0xff]  }
 0x4ef   : > { %v1125_v54 = vpop.f32.mrf.mxu0 }
 0x4f0   : > { %v2567_v54 = vld [vmem:[%s3230_s9 + $0x20] ss:$8 sps:$4 sm:$0xff]  }
 0x4f9   : > { %v1324_v55 = vpop.f32.mrf.mxu0 }
 0x4fa   : > { %v1330_v56 = vmul.f32 0.015625, %v1324_v55  ;;  %v2575_v55 = vld [vmem:[%s3230_s9 + $0x14] ss:$8 sps:$4 sm:$0xff]  }
 0x4fb   : > { %v2389_v52 = vpop.f32.mrf.mxu0 }
 0x4fc   : > { %2607 = vtanh.f32 %v1330_v56  ;;  %v2573_v56 = vld [vmem:[%s3230_s9 + $0x10] ss:$8 sps:$4 sm:$0xff]   ;;  %v2581_v52 = vld [vmem:[%s3230_s9 + $0x4] ss:$8 sps:$4 sm:$0xff]  }
 0x4fd   : > { %v1327_v57 = vpop.f32.mrf.mxu0 }
 0x4fe   : > { %v2579_v57 = vld [vmem:[%s3230_s9] ss:$8 sps:$4 sm:$0xff]  }
 0x4ff   : > { %v2390_v58 = vpop.f32.mrf.mxu0 }
 0x500   : > { %v2587_v58 = vld [vmem:[%s3230_s9 + $0xb4] ss:$8 sps:$4 sm:$0xff]  }
 0x509   : > { %v2608_v60 = vpop.eup %2607 }
 0x50a   : > { %v1336_v62 = vmul.f32 %v2608_v60, %v1334_v59  ;;  %v2585_v59 = vld [vmem:[%s3230_s9 + $0xb0] ss:$8 sps:$4 sm:$0xff]   ;;  %v2590_v60 = vld [vmem:[%s3232_s11 + $0x14] ss:$8 sps:$4 sm:$0xff]  }
 0x50b   : > { %2018 = vmatprep.subr.bf16.mxu0 %v2590_v60 }
 0x50c   : > { %v1339_v63 = vadd.f32 %v2199_v61, %v1336_v62  ;;  %v2588_v61 = vld [vmem:[%s3232_s11 + $0x10] ss:$8 sps:$4 sm:$0xff]   ;;  %v2593_v62 = vld [vmem:[%s3230_s9 + $0xa4] ss:$8 sps:$4 sm:$0xff]  }
 0x50d   : > { %2019 = vmatpush1.bf16.msra.mxu0 %v2588_v61 }
 0x50e   : > { %v1340_v1 = vpack.c.bf16 %v1339_v63, %v1339_v63  ;;  %v2591_v63 = vld [vmem:[%s3230_s9 + $0xa0] ss:$8 sps:$4 sm:$0xff]  }
 0x510   : > { %2394 = vmatmul.mubr.msk.bf16.vlgmr.msra.gmra.mxu1 %vm785_vm3, %v1340_v1  ;;  %v2594_v1 = vld [vmem:[%s3232_s11] ss:$8 sps:$4 sm:$0xff]  }
 0x511   : > { %1483 = vmatpush1.bf16.msra.mxu1 %v2498_v0  ;;  %1514 = vmatprep.mubr.bf16.mxu1 %v2617_v2  ;;  %v2516_v2 = vld [vmem:[%s3226_s5 + $0x140] ss:$8 sps:$4 sm:$0xff]   ;;  %v2596_v0 = vld [vmem:[%s3232_s11 + $0x4] ss:$8 sps:$4 sm:$0xff]  }
 0x512   : > { %1484 = vmatprep.subr.bf16.mxu1 %v2506_v3  ;;  %2020 = vmatprep.subr.bf16.mxu0 %v2596_v0  ;;  %v2599_v3 = vld [vmem:[%s3230_s9 + $0x94] ss:$8 sps:$4 sm:$0xff]  }
 0x513   : > { %2021 = vmatpush1.bf16.msra.mxu0 %v2594_v1 }
 0x515   : > { %1485 = vmatpush1.bf16.msra.mxu1 %v2504_v4  ;;  %v2597_v4 = vld [vmem:[%s3230_s9 + $0x90] ss:$8 sps:$4 sm:$0xff]  }
 0x516   : > { %1486 = vmatprep.subr.bf16.mxu1 %v2512_v5  ;;  %2039 = vmatmul.mubr.bf16.vlgmr.msra.gmra.mxu0 %v2757_v18  ;;  %v2600_v5 = vld [vmem:[%s3230_s9 + $0x80] ss:$8 sps:$4 sm:$0xff]  }
 0x517   : > { %v1525_v18 = vld [vmem:[%s3227_s6] sm:$0x3] }
 0x519   : > { %1487 = vmatpush1.bf16.msra.mxu1 %v2510_v6  ;;  %v3108_v33 = vpop.f32.mrf.mxu0  ;;  %v2602_v6 = vld [vmem:[%s3230_s9 + $0x84] ss:$8 sps:$4 sm:$0xff]  }
 0x51a   : > { %1488 = vmatprep.subr.bf16.mxu1 %v2518_v7  ;;  %v1527_v7 = vlaneseq }
 0x51b   : > { %v3110_v34 = vpop.f32.mrf.mxu0 }
 0x51d   : > { %1489 = vmatpush1.bf16.msra.mxu1 %v2516_v2  ;;  %v1685_v35 = vpop.f32.mrf.mxu0  ;;  %v1528_v2 = vshrl.u32 %v1527_v7, 7 }
 0x51e   : > { %1490 = vmatprep.subr.bf16.mxu1 %v2524_v8 }
 0x51f   : > { %v1686_v36 = vpop.f32.mrf.mxu0  ;;  %v1529_v8 = vsub.s32 0, %v1528_v2 }
 0x521   : > { %1491 = vmatpush1.bf16.msra.mxu1 %v2522_v9  ;;  %v1555_v9 = vld [vmem:[%s3229_s8] sm:$0x3] }
 0x522   : > { %1492 = vmatprep.subr.bf16.mxu1 %v2530_v10  ;;  %v1560_v10 = vrot.slane %v1555_v9, %v1529_v8 }
 0x525   : > { %1493 = vmatpush1.bf16.msra.mxu1 %v2528_v12  ;;  %v1533_v12 = vsub.s32 1, %v1528_v2 }
 0x526   : > { %1494 = vmatprep.subr.bf16.mxu1 %v2536_v14  ;;  %v1242_v14 = vadd.f32 %v2951_v11, %v3015_v50 }
 0x527   : > { %v1564_v20 = vrot.slane %v1555_v9, %v1533_v12  ;;  %v1534_v22 = vrot.slane %v1525_v18, %v1533_v12 }
 0x529   : > { %1495 = vmatpush1.bf16.msra.mxu1 %v2534_v15  ;;  %v1530_v15 = vrot.slane %v1525_v18, %v1529_v8  ;;  %v1684_v24 = vadd.f32 %v3110_v34, %v1564_v20 }
 0x52a   : > { %1496 = vmatprep.subr.bf16.mxu1 %v2542_v16  ;;  %v1244_v16 = vadd.f32 %v2953_v13, %v3017_v51 }
 0x52d   : > { %1497 = vmatpush1.bf16.msra.mxu1 %v2540_v17 }
 0x52e   : > { %1857 = vmatprep.subr.bf16.mxu1 %v2545_v19  ;;  %v1682_v19 = vadd.f32 %v3108_v33, %v1560_v10 }
 0x5d0   : > { %v1378_v26 = vpop.f32.mrf.mxu1 }
 0x5d1   : > { %v1401_v38 = vpack.c.bf16 %v1378_v26, %v1378_v26 }
 0x5d2   : > { %v2395_v40 = vpop.f32.mrf.mxu1 }
 0x5d3   : > { %1515 = vmatmul.mubr.bf16.vlgmr.msra.gmra.mxu1 %v1401_v38  ;;  %v1914_v38 = vld [vmem:[%s3233_s12] sm:$0x3] }
 0x5d4   : > { %v1381_v41 = vpop.f32.mrf.mxu1  ;;  %1858 = vmatpush1.bf16.msra.mxu1 %v2543_v37  ;;  %v1919_v40 = vrot.slane %v1914_v38, %v1529_v8 }
 0x5d5   : > { %1859 = vmatprep.subr.bf16.mxu1 %v2548_v39  ;;  %v1722_v39 = vld [vmem:[%s3231_s10] sm:$0x3] }
 0x5d6   : > { %v2396_v44 = vpop.f32.mrf.mxu1  ;;  %v2040_v36 = vpop.f32.mrf.mxu0  ;;  %v1727_v41 = vrot.slane %v1722_v39, %v1529_v8 }
 0x5d7   : > { %v1731_v44 = vrot.slane %v1722_v39, %v1533_v12 }
 0x5d8   : > { %1860 = vmatpush1.bf16.msra.mxu1 %v2546_v42  ;;  %v2042_v26 = vpop.f32.mrf.mxu0  ;;  %v2041_v42 = vadd.f32 %v2040_v36, %v1919_v40 }
 0x5d9   : > { %1861 = vmatprep.subr.bf16.mxu1 %v2551_v43  ;;  %v1923_v43 = vrot.slane %v1914_v38, %v1533_v12 }
 0x5da   : > { %v2044_v37 = vpop.f32.mrf.mxu0 }
 0x5dc   : > { %1862 = vmatpush1.bf16.msra.mxu1 %v2549_v45  ;;  %v2045_v34 = vpop.f32.mrf.mxu0 }
 0x5dd   : > { %1863 = vmatprep.subr.bf16.mxu1 %v2557_v46 }
 0x5e0   : > { %1864 = vmatpush1.bf16.msra.mxu1 %v2555_v47 }
 0x5e1   : > { %1865 = vmatprep.subr.bf16.mxu1 %v2563_v48  ;;  %v2043_v48 = vadd.f32 %v2042_v26, %v1923_v43 }
 0x5e4   : > { %1866 = vmatpush1.bf16.msra.mxu1 %v2561_v49 }
 0x5e5   : > { %1867 = vmatprep.subr.bf16.mxu1 %v2569_v53 }
 0x5e8   : > { %1868 = vmatpush1.bf16.msra.mxu1 %v2567_v54 }
 0x5e9   : > { %1869 = vmatprep.subr.bf16.mxu1 %v2575_v55 }
 0x5ec   : > { %1870 = vmatpush1.bf16.msra.mxu1 %v2573_v56 }
 0x5ed   : > { %1871 = vmatprep.subr.bf16.mxu1 %v2581_v52 }
 0x5f0   : > { %1872 = vmatpush1.bf16.msra.mxu1 %v2579_v57 }
 0x5f1   : > { %1881 = vmatprep.subr.bf16.mxu1 %v2587_v58 }
 0x5f4   : > { %1882 = vmatpush2.bf16.msra.mxu1 %v2585_v59 }
 0x5f5   : > { %1883 = vmatprep.subr.bf16.mxu1 %v2593_v62 }
 0x5f8   : > { %1884 = vmatpush2.bf16.msra.mxu1 %v2591_v63 }
 0x5f9   : > { %1885 = vmatprep.subr.bf16.mxu1 %v2599_v3 }
 0x5fc   : > { %1886 = vmatpush2.bf16.msra.mxu1 %v2597_v4 }
 0x5fd   : > { %1887 = vmatprep.subr.bf16.mxu1 %v2602_v6 }
 0x600   : > { %1888 = vmatpush2.bf16.msra.mxu1 %v2600_v5 }
 0x693   : > { %v1516_v17 = vpop.f32.mrf.mxu1 }
 0x694   : > { %v1523_v21 = vadd.f32 %v1516_v17, %v1242_v14 }
 0x695   : > { %v1518_v23 = vpop.f32.mrf.mxu1 }
 0x696   : > { %v1537_v25 = vadd.f32 %v1530_v15, %v1523_v21  ;;  %v1524_v27 = vadd.f32 %v1518_v23, %v1244_v16 }
 0x697   : > { %v1520_v28 = vpop.f32.mrf.mxu1 }
 0x698   : > { %v1688_v29 = vadd.f32 %v1682_v19, %v1537_v25  ;;  %v1538_v30 = vadd.f32 %v1534_v22, %v1524_v27 }
 0x699   : > { %v1521_v31 = vpop.f32.mrf.mxu1 }
 0x69a   : > { %vm1690_vm4 = vcmp.ge.f32.partialorder %v1688_v29, 0.0  ;;  %v1692_v11 = vmul.f32 0.1, %v1688_v29  ;;  %v1689_v50 = vadd.f32 %v1684_v24, %v1538_v30 }
 0x69c   : > { %vm1691_vm5 = vcmp.ge.f32.partialorder %v1689_v50, 0.0  ;;  %v1693_v13 = vmul.f32 0.1, %v1689_v50  ;;  %v1694_v51 = vsel %vm1690_vm4, %v1688_v29, %v1692_v11 }
 0x69d   : > { %v1720_v35 = vpack.c.bf16 %v1694_v51, %v1694_v51 }
 0x69e   : > { %v1695_v32 = vsel %vm1691_vm5, %v1689_v50, %v1693_v13 }
 0x69f   : > { %v1721_v33 = vpack.c.bf16 %v1695_v32, %v1695_v32 }
 0x6a1   : > { %2273 = vmatprep.mubr.msk.bf16.mxu1 %vm725_vm1, %v1721_v33 }
 0x6a2   : > { %1890 = vmatmul.mubr.bf16.vlgmr.msra.gmra.mxu1 %v1720_v35 }
 0x762   : > { %v1891_v45 = vpop.f32.mrf.mxu1 }
 0x763   : > { %v1892_v46 = vadd.f32 %v1891_v45, %v1727_v41 }
 0x764   : > { %v1893_v47 = vpop.f32.mrf.mxu1 }
 0x765   : > { %v2047_v49 = vadd.f32 %v2041_v42, %v1892_v46  ;;  %v1894_v53 = vadd.f32 %v1893_v47, %v1731_v44 }
 0x766   : > { %v1895_v54 = vpop.f32.mrf.mxu1 }
 0x767   : > { %vm2049_vm6 = vcmp.ge.f32.partialorder %v2047_v49, 0.0  ;;  %v2051_v55 = vmul.f32 0.1, %v2047_v49  ;;  %v2048_v56 = vadd.f32 %v2043_v48, %v1894_v53 }
 0x768   : > { %v1896_v52 = vpop.f32.mrf.mxu1 }
 0x769   : > { %v2053_v57 = vsel %vm2049_vm6, %v2047_v49, %v2051_v55  ;;  %vm2050_vm7 = vcmp.ge.f32.partialorder %v2048_v56, 0.0  ;;  %v2052_v58 = vmul.f32 0.1, %v2048_v56 }
 0x76a   : > { %2055 = vst [vmem:[%s437_s18] sm:$0xff] %v2053_v57 }
 0x76b   : > { %v2054_v59 = vsel %vm2050_vm7, %v2048_v56, %v2052_v58 }
 0x76c   : > { %2056 = vst.msk [vmem:[%s437_s18 + $0x8] sm:$0xff] %vm725_vm1, %v2054_v59 }
 0x76d PF: > { %s23_s25 = sadd.s32 1, %s2615_s25  }
 0x76e   : > { %p20_p4 = scmp.ge.s32.totalorder %s23_s25, 10  }
 0x770   :  { %22 = sbr.rel (!%p20_p4) target bundleno = 1 (0x1), region = 106 }

// kernel: _lambda_.11
= control target key start
LH: loop header
LB: loop body
LE: loop exit
PB: predicated region body
PF: predicated region fallthrough
CT: control target
= control target key end

     0   :  { %s2092_s21 = smov 0   ;;  %s2399_s0 = inlined_call_operand.vmem [shape: f32[8,16,96], index: 0, kind: input, shape index: {}]   ;;  %s2400_s1 = inlined_call_operand.vmem [shape: bf16[96,192], index: 1, kind: input, shape index: {}]   ;;  %s2401_s2 = inlined_call_operand.vmem [shape: f32[16,192], index: 2, kind: input, shape index: {}]   ;;  %s2402_s3 = inlined_call_operand.vmem [shape: f32[1,3], index: 3, kind: input, shape index: {}]   ;;  %s2403_s4 = inlined_call_operand.vmem [shape: bf16[3,96,96], index: 4, kind: input, shape index: {}]   ;;  %s2404_s5 = inlined_call_operand.vmem [shape: f32[1,96], index: 5, kind: input, shape index: {}]   ;;  %s2405_s6 = inlined_call_operand.vmem [shape: bf16[96,96], index: 6, kind: input, shape index: {}]   ;;  %s2406_s7 = inlined_call_operand.vmem [shape: f32[1,96], index: 7, kind: input, shape index: {}]   ;;  %s2407_s8 = inlined_call_operand.vmem [shape: bf16[96,96], index: 8, kind: input, shape index: {}]   ;;  %s2408_s9 = inlined_call_operand.vmem [shape: f32[1,96], index: 9, kind: input, shape index: {}]   ;;  %s2409_s10 = inlined_call_operand.vmem [shape: bf16[96,96], index: 10, kind: input, shape index: {}]   ;;  %s2410_s11 = inlined_call_operand.vmem [shape: f32[1,96], index: 11, kind: input, shape index: {}]   ;;  %s2411_s12 = inlined_call_operand.vmem [shape: f32[8,16,96], index: 12, kind: output, shape index: {}]  }
   0x1 LB: > { %s1627_s22 = sadd.s32 4294967295, %s2017_s21   ;;  %p1631_p0 = scmp.ge.s32.totalorder %s2017_s21, 1  ;;  %s2017_s21 = sphi %s2092_s21, %s22_s21  }
   0x2   : > { %p362_p1 = scmp.lt.s32.totalorder %s2017_s21, 9 }
   0x4   : > { %p363_p2 = pnand %p1631_p0, %p362_p1 }
   0x5   : > { %p404_p3 = scmp.lt.s32.totalorder (!%p363_p2), %s1627_s22, 7  ;;  %s2020_s24 = smov (!%p363_p2), 96  }
   0x6   : > { %366 = sbr.rel (%p363_p2) target bundleno = 1892 (0x764), region = 68  ;;  %s2021_s27 = smov (!%p363_p2), 32  }
   0xb   : > { %v1945_v0 = vld [vmem:[%s2400_s1 + $0x54] ss:$8 sps:$4 sm:$0xff]   ;;  %v1947_v1 = vld [vmem:[%s2400_s1 + $0x50] ss:$8 sps:$4 sm:$0xff]   ;;  %v2019_v2 = vmov 0   ;;  %s2413_s22 = smov (!%p404_p3, %s1627_s22), 7 }
   0xc   : > { %530 = vmatprep.mubr.bf16.mxu0 %v2019_v2  ;;  %1941 = vset.pattern.permute.xlu1 %v2019_v2  ;;  %v1948_v3 = vld [vmem:[%s2400_s1 + $0x44] ss:$8 sps:$4 sm:$0xff]   ;;  %v1950_v4 = vld [vmem:[%s2400_s1 + $0x40] ss:$8 sps:$4 sm:$0xff]   ;;  %v1951_v5 = vld [vmem:[%s2400_s1 + $0x34] ss:$8 sps:$4 sm:$0xff]  }
   0xd   : > { %502 = vmatprep.subr.bf16.mxu0 %v1945_v0  ;;  %v1953_v6 = vld [vmem:[%s2400_s1 + $0x30] ss:$8 sps:$4 sm:$0xff]   ;;  %v1954_v7 = vld [vmem:[%s2400_s1 + $0x24] ss:$8 sps:$4 sm:$0xff]   ;;  %s1728_s19 = sshll.u32 %s2413_s22, 4  ;;  %vm494_vm0 = vcmask 785408  }
   0xe   : > { %503 = vmatpush1.bf16.msra.mxu0 %v1947_v1  ;;  %v1956_v8 = vld [vmem:[%s2400_s1 + $0x20] ss:$8 sps:$4 sm:$0xff]   ;;  %v1957_v9 = vld [vmem:[%s2400_s1 + $0x14] ss:$8 sps:$4 sm:$0xff]   ;;  %v1959_v10 = vld [vmem:[%s2400_s1 + $0x10] ss:$8 sps:$4 sm:$0xff]   ;;  %s408_s14 = scalar_lea.vmem %s2399_s0, %s1728_s19  ;;  %s413_s25 = scalar_lea.vmem %s2411_s12, %s1728_s19 }
   0xf   : > { %504 = vmatprep.subr.bf16.mxu0 %v1948_v3  ;;  %v1960_v11 = vld [vmem:[%s2400_s1 + $0x4] ss:$8 sps:$4 sm:$0xff]   ;;  %v1962_v12 = vld [vmem:[%s2400_s1] ss:$8 sps:$4 sm:$0xff]   ;;  %v432_v20 = vld [vmem:[%s2401_s2 + $0x10] sm:$0xff]  ;;  %v2022_v25 = vmov 0.0  }
  0x10   : > { %v415_v13 = vld [vmem:[%s408_s14] sm:$0xff]  ;;  %v416_v14 = vld [vmem:[%s408_s14 + $0x8] sm:$0xff]  ;;  %1787 = vmatprep.subr.bf16.mxu1 %v2022_v25  ;;  %vm2023_vm1 = vmmov 0   ;;  %v2024_v26 = vmov 1   ;;  %v433_v27 = vld [vmem:[%s2401_s2 + $0x18] sm:$0xff]  ;;  %s2025_s14 = smov 64  }
  0x11   : > { %v2144_v15 = vpack.c.bf16 %v416_v14, %v415_v13  ;;  %v430_v16 = vld [vmem:[%s2401_s2] sm:$0xff]  ;;  %1791 = vmatprep.mubr.msk.bf16.mxu1 %vm2023_vm1, %v2022_v25  ;;  %v431_v29 = vld [vmem:[%s2401_s2 + $0x8] sm:$0xff]  ;;  %vm579_vm2 = vcmask 261120   ;;  %vm641_vm3 = vcmask 130048   ;;  %v1969_v63 = vld [vmem:[%s2403_s4 + $0x58] sm:$0xff]  }
  0x12   : > { %505 = vmatpush1.bf16.msra.mxu0 %v1950_v4  ;;  %v2159_v24 = vld [vmem:[%s2402_s3] ss:$0 sm:$0xff]  ;;  %v1970_v0 = vld [vmem:[%s2403_s4 + $0x50] sm:$0xff]   ;;  %v1971_v1 = vld [vmem:[%s2403_s4 + $0x48] sm:$0xff]  }
  0x13   : > { %506 = vmatprep.subr.bf16.mxu0 %v1951_v5  ;;  %v1972_v2 = vld [vmem:[%s2403_s4 + $0x40] sm:$0xff]   ;;  %v1973_v3 = vld [vmem:[%s2403_s4 + $0x38] sm:$0xff]  }
  0x16   : > { %507 = vmatpush1.bf16.msra.mxu0 %v1953_v6 }
  0x17   : > { %508 = vmatprep.subr.bf16.mxu0 %v1954_v7 }
  0x1a   : > { %509 = vmatpush1.bf16.msra.mxu0 %v1956_v8 }
  0x1b   : > { %510 = vmatprep.subr.bf16.mxu0 %v1957_v9 }
  0x1e   : > { %511 = vmatpush1.bf16.msra.mxu0 %v1959_v10 }
  0x1f   : > { %512 = vmatprep.subr.bf16.mxu0 %v1960_v11 }
  0x22   : > { %513 = vmatpush1.bf16.msra.mxu0 %v1962_v12 }
  0x23   : > { %1809 = vmatprep.subr.bf16.mxu0 %v2022_v25 }
  0x25   : > { %1648 = vmatmul.mubr.msk.bf16.vlgmr.msra.gmra.mxu0 %vm494_vm0, %v2144_v15 }
  0x26   : > { %1810 = vmatpush3.bf16.msra.mxu0 %v2144_v15  ;;  %1811 = vmatprep.mubr.msk.bf16.mxu0 %vm2023_vm1, %v2022_v25 }
  0x27   : > { %1831 = vmatprep.subr.bf16.mxu0 %v2022_v25 }
  0xe5   : > { %v532_v17 = vpop.f32.mrf.mxu0 }
  0xe6   : > { %v533_v18 = vadd.f32 %v532_v17, %v430_v16 }
  0xe7   : > { %v534_v19 = vpop.f32.mrf.mxu0 }
  0xe8   : > { %701 = vrot.lane.b32.xlu1 %v533_v18, %s2020_s24  ;;  %v535_v31 = vadd.f32 %v534_v19, %v431_v29  ;;  %v1963_v19 = vld [vmem:[%s2403_s4 + $0x28] sm:$0xff]   ;;  %v1974_v29 = vld [vmem:[%s2403_s4 + $0x30] sm:$0xff]  }
  0xe9   : > { %v536_v21 = vpop.f32.mrf.mxu0 }
  0xea   : > { %v537_v22 = vadd.f32 %v536_v21, %v432_v20  ;;  %v1964_v21 = vld [vmem:[%s2403_s4 + $0x20] sm:$0xff]  }
  0xeb   : > { %v538_v28 = vpop.f32.mrf.mxu0 }
  0xec   : > { %703 = vrot.lane.b32.xlu1 %v537_v22, %s2020_s24  ;;  %v573_v23 = vpack.c.bf16 %v537_v22, %v533_v18  ;;  %v539_v30 = vadd.f32 %v538_v28, %v433_v27  ;;  %v1968_v27 = vld [vmem:[%s2403_s4] sm:$0xff]  }
  0xee   : > { %577 = vrot.lane.b32.xlu0 %v573_v23, %s2021_s27  ;;  %v739_v32 = vpack.c.bf16 %v539_v30, %v535_v31  ;;  %v1966_v23 = vld [vmem:[%s2403_s4 + $0x10] sm:$0xff]   ;;  %v2026_v30 = vmov 2  }
  0xf0   : > { %635 = vperm.xlu1 %1941, %v2159_v24  }
 0x10c   : > { %541 = vxpose.xlu0.b32.start [1/2] (short) (narrow) %v533_v18, 32 }
 0x110   : > { %542 = vxpose.xlu0.b32.end [2/2] (short) (narrow) %v537_v22, 32 }
 0x139   : > { %1942 = vset.pattern.permute.xlu0 %v2024_v26  ;;  %v1967_v26 = vld [vmem:[%s2403_s4 + $0x8] sm:$0xff]  }
 0x141   : > { %791 = vperm.xlu0 %1942, %v2159_v24  }
 0x145   : > { %1017 = vrot.lane.b32.xlu0 %v537_v22, %s2025_s14  ;;  %v1965_v22 = vld [vmem:[%s2403_s4 + $0x18] sm:$0xff]  }
 0x149   : > { %1056 = vrot.lane.b32.xlu0 %v739_v32, %s2020_s24 }
 0x15a   : > { %v702_v33 = vpop.permute.xlu1 %701 }
 0x15b   : > { %707 = vxpose.xlu1.b32.start [1/2] (short) (narrow) %v702_v33, 32 }
 0x15e   : > { %v704_v34 = vpop.permute.xlu1 %703 }
 0x15f   : > { %708 = vxpose.xlu1.b32.end [2/2] (short) (narrow) %v704_v34, 32 }
 0x160   : > { %v578_v35 = vpop.permute.xlu0 %577 }
 0x16b   : > { %v636_v42 = vpop.permute.xlu1 %635 }
 0x17d   : > { %1943 = vset.pattern.permute.xlu1 %v2026_v30 }
 0x185   : > { %1015 = vrot.lane.b32.xlu1 %v533_v18, %s2025_s14 }
 0x188   : > { %v557_v36 = vpop.trf.xlu0 }
 0x189   : > { %1107 = vperm.xlu1 %1943, %v2159_v24  }
 0x18c   : > { %v558_v37 = vpop.trf.xlu0 }
 0x18d   : > { %v574_v41 = vpack.c.bf16 %v558_v37, %v557_v36 }
 0x190   : > { %v559_v38 = vpop.trf.xlu0 }
 0x194   : > { %v560_v39 = vpop.trf.xlu0 }
 0x195   : > { %v575_v40 = vpack.c.bf16 %v560_v39, %v559_v38 }
 0x197   : > { %1788 = vmatpush3.bf16.msra.mxu1 %v575_v40 }
 0x198   : > { %1789 = vmatprep.subr.bf16.mxu1 %v2022_v25 }
 0x19b   : > { %1790 = vmatpush3.bf16.msra.mxu1 %v574_v41 }
 0x19c   : > { %1795 = vmatprep.subr.bf16.mxu1 %v2022_v25 }
 0x19e   : > { %1792 = vmatmul.mubr.msk.bf16.vlgmr.msra.gmra.mxu1 %vm579_vm2, %v578_v35 }
 0x19f   : > { %1796 = vmatpush3.bf16.msra.mxu1 %v2144_v15  ;;  %1797 = vmatprep.mubr.msk.bf16.mxu1 %vm2023_vm1, %v2022_v25 }
 0x1a0   : > { %1801 = vmatprep.subr.bf16.mxu1 %v2022_v25 }
 0x1bc   : > { %v792_v49 = vpop.permute.xlu0 %791 }
 0x1c0   : > { %v1018_v51 = vpop.permute.xlu0 %1017 }
 0x1c4   : > { %v1057_v31 = vpop.permute.xlu0 %1056 }
 0x1d7   : > { %v723_v43 = vpop.trf.xlu1 }
 0x1db   : > { %v724_v44 = vpop.trf.xlu1 }
 0x1dc   : > { %v740_v45 = vpack.c.bf16 %v724_v44, %v723_v43 }
 0x1df   : > { %v725_v46 = vpop.trf.xlu1 }
 0x1e3   : > { %v726_v47 = vpop.trf.xlu1 }
 0x1e4   : > { %v741_v48 = vpack.c.bf16 %v726_v47, %v725_v46  ;;  %v1976_v46 = vld [vmem:[%s2403_s4 + $0x88] sm:$0xff]   ;;  %v1978_v47 = vld [vmem:[%s2403_s4 + $0x80] sm:$0xff]  }
 0x1f7   : > { %v1016_v50 = vpop.permute.xlu1 %1015 }
 0x1f8   : > { %1021 = vxpose.xlu0.b32.start [1/2] (short) (narrow) %v1016_v50, 32 }
 0x1fc   : > { %1022 = vxpose.xlu0.b32.end [2/2] (short) (narrow) %v1018_v51, 32 }
 0x225   : > { %1944 = vset.pattern.permute.xlu0 %v2026_v30  ;;  %v1995_v30 = vld [vmem:[%s2407_s8 + $0x10] sm:$0xff]  }
 0x25e   : > { %v617_v52 = vpop.f32.mrf.mxu1 }
 0x25f   : > { %v624_v53 = vmul.f32 0.03125, %v617_v52 }
 0x260   : > { %v1793_v54 = vpop.f32.mrf.mxu1 }
 0x261   : > { %1999 = vtanh.f32 %v624_v53 }
 0x262   : > { %v620_v55 = vpop.f32.mrf.mxu1 }
 0x263   : > { %v625_v56 = vmul.f32 0.03125, %v620_v55 }
 0x264   : > { %v1794_v57 = vpop.f32.mrf.mxu1 }
 0x265   : > { %2001 = vtanh.f32 %v625_v56 }
 0x26e   : > { %v2000_v58 = vpop.eup %1999 }
 0x26f   : > { %v638_v60 = vmul.f32 %v2000_v58, %v636_v42 }
 0x272   : > { %v2002_v59 = vpop.eup %2001 }
 0x273   : > { %v639_v61 = vmul.f32 %v2002_v59, %v636_v42 }
 0x275   : > { %v640_v62 = vpack.c.bf16 %v639_v61, %v638_v60  ;;  %v1108_v61 = vpop.permute.xlu1 %1107 }
 0x277   : > { %1798 = vmatmul.mubr.msk.bf16.vlgmr.msra.gmra.mxu1 %vm641_vm3, %v640_v62 }
 0x278   : > { %1802 = vmatpush3.bf16.msra.mxu1 %v741_v48  ;;  %1805 = vmatprep.mubr.msk.bf16.mxu1 %vm2023_vm1, %v2022_v25  ;;  %v1980_v48 = vld [vmem:[%s2403_s4 + $0x78] sm:$0xff]  }
 0x279   : > { %1803 = vmatprep.subr.bf16.mxu1 %v2022_v25 }
 0x27c   : > { %1804 = vmatpush3.bf16.msra.mxu1 %v740_v45 }
 0x27d   : > { %1815 = vmatprep.subr.bf16.mxu1 %v2022_v25 }
 0x27f   : > { %1806 = vmatmul.mubr.msk.bf16.vlgmr.msra.gmra.mxu1 %vm579_vm2, %v739_v32  ;;  %v1037_v32 = vpop.trf.xlu0 }
 0x280   : > { %1827 = vmatprep.mubr.msk.bf16.mxu1 %vm2023_vm1, %v2022_v25  ;;  %1816 = vmatpush3.bf16.msra.mxu1 %v1969_v63 }
 0x281   : > { %1817 = vmatprep.subr.bf16.mxu1 %v2022_v25 }
 0x283   : > { %v1038_v33 = vpop.trf.xlu0 }
 0x284   : > { %1818 = vmatpush3.bf16.msra.mxu1 %v1970_v0  ;;  %v1053_v24 = vpack.c.bf16 %v1038_v33, %v1037_v32  ;;  %v1997_v32 = vld [vmem:[%s2407_s8 + $0x8] sm:$0xff]   ;;  %v1998_v33 = vld [vmem:[%s2407_s8] sm:$0xff]  }
 0x285   : > { %1819 = vmatprep.subr.bf16.mxu1 %v2022_v25 }
 0x287   : > { %v1039_v34 = vpop.trf.xlu0 }
 0x288   : > { %1820 = vmatpush3.bf16.msra.mxu1 %v1971_v1  ;;  %v1975_v1 = vld [vmem:[%s2405_s6 + $0x28] sm:$0xff]  }
 0x289   : > { %1821 = vmatprep.subr.bf16.mxu1 %v2022_v25 }
 0x28b   : > { %v1040_v37 = vpop.trf.xlu0 }
 0x28c   : > { %1822 = vmatpush3.bf16.msra.mxu1 %v1972_v2  ;;  %v1054_v40 = vpack.c.bf16 %v1040_v37, %v1039_v34  ;;  %v1702_v34 = vld [vmem:[%s2406_s7] ss:$0 sm:$0xff] }
 0x28d   : > { %1823 = vmatprep.subr.bf16.mxu1 %v2022_v25  ;;  %v1701_v37 = vld [vmem:[%s2404_s5] ss:$0 sm:$0xff] }
 0x290   : > { %1824 = vmatpush3.bf16.msra.mxu1 %v1973_v3  ;;  %v1977_v3 = vld [vmem:[%s2405_s6 + $0x20] sm:$0xff]  }
 0x291   : > { %1825 = vmatprep.subr.bf16.mxu1 %v2022_v25 }
 0x294   : > { %1826 = vmatpush3.bf16.msra.mxu1 %v1974_v29 }
 0x295   : > { %1847 = vmatprep.subr.bf16.mxu1 %v2022_v25 }
 0x337   : > { %v679_v4 = vpop.f32.mrf.mxu1 }
 0x339   : > { %v1799_v5 = vpop.f32.mrf.mxu1 }
 0x33a   : > { %v1981_v5 = vld [vmem:[%s2405_s6 + $0x10] sm:$0xff]  }
 0x33b   : > { %v682_v6 = vpop.f32.mrf.mxu1 }
 0x33c   : > { %v698_v28 = vpack.c.bf16 %v682_v6, %v679_v4  ;;  %v1979_v4 = vld [vmem:[%s2405_s6 + $0x18] sm:$0xff]   ;;  %v1983_v6 = vld [vmem:[%s2405_s6 + $0x8] sm:$0xff]  }
 0x33d   : > { %v1800_v7 = vpop.f32.mrf.mxu1 }
 0x33e   : > { %v1984_v7 = vld [vmem:[%s2403_s4 + $0x68] sm:$0xff]  }
 0x33f   : > { %v779_v8 = vpop.f32.mrf.mxu1 }
 0x340   : > { %v786_v9 = vmul.f32 0.03125, %v779_v8  ;;  %v1985_v8 = vld [vmem:[%s2405_s6] sm:$0xff]  }
 0x341   : > { %v1807_v10 = vpop.f32.mrf.mxu1 }
 0x342   : > { %2003 = vtanh.f32 %v786_v9  ;;  %v1986_v9 = vld [vmem:[%s2403_s4 + $0x60] sm:$0xff]   ;;  %v1987_v10 = vld [vmem:[%s2409_s10 + $0x28] sm:$0xff]  }
 0x343   : > { %v782_v11 = vpop.f32.mrf.mxu1 }
 0x344   : > { %v787_v12 = vmul.f32 0.03125, %v782_v11  ;;  %v1988_v11 = vld [vmem:[%s2409_s10 + $0x20] sm:$0xff]  }
 0x345   : > { %v1808_v13 = vpop.f32.mrf.mxu1 }
 0x346   : > { %2005 = vtanh.f32 %v787_v12  ;;  %v1990_v12 = vld [vmem:[%s2409_s10 + $0x18] sm:$0xff]   ;;  %v1992_v13 = vld [vmem:[%s2409_s10 + $0x10] sm:$0xff]  }
 0x34f   : > { %v2004_v14 = vpop.eup %2003 }
 0x350   : > { %v794_v17 = vmul.f32 %v2004_v14, %v792_v49 }
 0x353   : > { %v2006_v16 = vpop.eup %2005 }
 0x354   : > { %v795_v18 = vmul.f32 %v2006_v16, %v792_v49  ;;  %v1982_v49 = vld [vmem:[%s2403_s4 + $0x70] sm:$0xff]  }
 0x356   : > { %v796_v20 = vpack.c.bf16 %v795_v18, %v794_v17  ;;  %v1989_v18 = vld [vmem:[%s2407_s8 + $0x28] sm:$0xff]  }
 0x358   : > { %1812 = vmatmul.mubr.msk.bf16.vlgmr.msra.gmra.mxu0 %vm641_vm3, %v796_v20 }
 0x359   : > { %1832 = vmatpush3.bf16.msra.mxu0 %v1963_v19  ;;  %1843 = vmatprep.mubr.msk.bf16.mxu0 %vm2023_vm1, %v2022_v25 }
 0x35a   : > { %1833 = vmatprep.subr.bf16.mxu0 %v2022_v25 }
 0x35d   : > { %1834 = vmatpush3.bf16.msra.mxu0 %v1964_v21  ;;  %v1991_v21 = vld [vmem:[%s2407_s8 + $0x20] sm:$0xff]  }
 0x35e   : > { %1835 = vmatprep.subr.bf16.mxu0 %v2022_v25 }
 0x361   : > { %1836 = vmatpush3.bf16.msra.mxu0 %v1965_v22 }
 0x362   : > { %1837 = vmatprep.subr.bf16.mxu0 %v2022_v25 }
 0x365   : > { %1838 = vmatpush3.bf16.msra.mxu0 %v1966_v23 }
 0x366   : > { %1839 = vmatprep.subr.bf16.mxu0 %v2022_v25 }
 0x369   : > { %1840 = vmatpush3.bf16.msra.mxu0 %v1967_v26  ;;  %v1993_v26 = vld [vmem:[%s2407_s8 + $0x18] sm:$0xff]  }
 0x36a   : > { %1841 = vmatprep.subr.bf16.mxu0 %v2022_v25 }
 0x36d   : > { %1842 = vmatpush3.bf16.msra.mxu0 %v1968_v27 }
 0x36e   : > { %1855 = vmatprep.subr.bf16.mxu0 %v2022_v25 }
 0x370   : > { %1844 = vmatmul.mubr.msk.bf16.vlgmr.msra.gmra.mxu0 %vm494_vm0, %v698_v28  ;;  %v1994_v28 = vld [vmem:[%s2409_s10 + $0x8] sm:$0xff]  }
 0x371   : > { %1856 = vmatpush3.bf16.msra.mxu0 %v2144_v15  ;;  %1857 = vmatprep.mubr.msk.bf16.mxu0 %vm2023_vm1, %v2022_v25 }
 0x372   : > { %1877 = vmatprep.subr.bf16.mxu0 %v2022_v25 }
 0x418   : > { %v834_v35 = vpop.f32.mrf.mxu0 }
 0x41a   : > { %v1813_v36 = vpop.f32.mrf.mxu0 }
 0x41c   : > { %v837_v38 = vpop.f32.mrf.mxu0 }
 0x41d   : > { %v854_v39 = vpack.c.bf16 %v837_v38, %v834_v35 }
 0x41e   : > { %v1814_v41 = vpop.f32.mrf.mxu0 }
 0x41f   : > { %1828 = vmatmul.mubr.msk.bf16.vlgmr.msra.gmra.mxu1 %vm494_vm0, %v854_v39 }
 0x420   : > { %1848 = vmatpush3.bf16.msra.mxu1 %v1054_v40  ;;  %1851 = vmatprep.mubr.msk.bf16.mxu1 %vm2023_vm1, %v2022_v25 }
 0x421   : > { %1849 = vmatprep.subr.bf16.mxu1 %v2022_v25 }
 0x424   : > { %1850 = vmatpush3.bf16.msra.mxu1 %v1053_v24 }
 0x425   : > { %1861 = vmatprep.subr.bf16.mxu1 %v2022_v25 }
 0x427   : > { %1852 = vmatmul.mubr.msk.bf16.vlgmr.msra.gmra.mxu1 %vm579_vm2, %v1057_v31  ;;  %v1996_v31 = vld [vmem:[%s2409_s10] sm:$0xff]  }
 0x428   : > { %1873 = vmatprep.mubr.msk.bf16.mxu1 %vm2023_vm1, %v2022_v25  ;;  %1862 = vmatpush3.bf16.msra.mxu1 %v1976_v46 }
 0x429   : > { %1863 = vmatprep.subr.bf16.mxu1 %v2022_v25 }
 0x42c   : > { %1864 = vmatpush3.bf16.msra.mxu1 %v1978_v47 }
 0x42d   : > { %1865 = vmatprep.subr.bf16.mxu1 %v2022_v25 }
 0x430   : > { %v2258_v42 = vpop.f32.mrf.mxu0  ;;  %1866 = vmatpush3.bf16.msra.mxu1 %v1980_v48 }
 0x431   : > { %1867 = vmatprep.subr.bf16.mxu1 %v2022_v25 }
 0x432   : > { %v1845_v43 = vpop.f32.mrf.mxu0 }
 0x434   : > { %v2260_v44 = vpop.f32.mrf.mxu0  ;;  %1868 = vmatpush3.bf16.msra.mxu1 %v1982_v49 }
 0x435   : > { %1869 = vmatprep.subr.bf16.mxu1 %v2022_v25 }
 0x436   : > { %v1846_v45 = vpop.f32.mrf.mxu0 }
 0x438   : > { %1870 = vmatpush3.bf16.msra.mxu1 %v1984_v7 }
 0x439   : > { %1871 = vmatprep.subr.bf16.mxu1 %v2022_v25 }
 0x43c   : > { %1872 = vmatpush3.bf16.msra.mxu1 %v1986_v9 }
 0x43d   : > { %1893 = vmatprep.subr.bf16.mxu1 %v2022_v25 }
 0x4df   : > { %v2278_v50 = vpop.f32.mrf.mxu1 }
 0x4e0   : > { %v1009_v35 = vadd.f32 %v2258_v42, %v2278_v50 }
 0x4e1   : > { %v1829_v51 = vpop.f32.mrf.mxu1 }
 0x4e3   : > { %v2280_v52 = vpop.f32.mrf.mxu1 }
 0x4e4   : > { %v1012_v39 = vadd.f32 %v2260_v44, %v2280_v52 }
 0x4e5   : > { %v1830_v53 = vpop.f32.mrf.mxu1 }
 0x4e7   : > { %v1095_v54 = vpop.f32.mrf.mxu1 }
 0x4e8   : > { %v1102_v55 = vmul.f32 0.03125, %v1095_v54 }
 0x4e9   : > { %v1853_v56 = vpop.f32.mrf.mxu1 }
 0x4ea   : > { %2007 = vtanh.f32 %v1102_v55  ;;  %v1718_v56 = vld [vmem:[%s2410_s11] ss:$0 sm:$0xff] }
 0x4eb   : > { %v1098_v57 = vpop.f32.mrf.mxu1 }
 0x4ec   : > { %v1103_v58 = vmul.f32 0.03125, %v1098_v57  ;;  %v1710_v57 = vld [vmem:[%s2408_s9] ss:$0 sm:$0xff] }
 0x4ed   : > { %v1854_v59 = vpop.f32.mrf.mxu1 }
 0x4ee   : > { %2009 = vtanh.f32 %v1103_v58 }
 0x4f7   : > { %v2008_v60 = vpop.eup %2007 }
 0x4f8   : > { %v1110_v63 = vmul.f32 %v2008_v60, %v1108_v61 }
 0x4fb   : > { %v2010_v62 = vpop.eup %2009 }
 0x4fc   : > { %v1111_v0 = vmul.f32 %v2010_v62, %v1108_v61 }
 0x4fe   : > { %v1112_v2 = vpack.c.bf16 %v1111_v0, %v1110_v63 }
 0x500   : > { %1858 = vmatmul.mubr.msk.bf16.vlgmr.msra.gmra.mxu0 %vm641_vm3, %v1112_v2 }
 0x501   : > { %1878 = vmatpush3.bf16.msra.mxu0 %v1975_v1  ;;  %1889 = vmatprep.mubr.msk.bf16.mxu0 %vm2023_vm1, %v2022_v25 }
 0x502   : > { %1879 = vmatprep.subr.bf16.mxu0 %v2022_v25 }
 0x505   : > { %1880 = vmatpush3.bf16.msra.mxu0 %v1977_v3 }
 0x506   : > { %1881 = vmatprep.subr.bf16.mxu0 %v2022_v25 }
 0x509   : > { %1882 = vmatpush3.bf16.msra.mxu0 %v1979_v4 }
 0x50a   : > { %1883 = vmatprep.subr.bf16.mxu0 %v2022_v25 }
 0x50d   : > { %1884 = vmatpush3.bf16.msra.mxu0 %v1981_v5 }
 0x50e   : > { %1885 = vmatprep.subr.bf16.mxu0 %v2022_v25 }
 0x511   : > { %1886 = vmatpush3.bf16.msra.mxu0 %v1983_v6 }
 0x512   : > { %1887 = vmatprep.subr.bf16.mxu0 %v2022_v25 }
 0x515   : > { %1888 = vmatpush3.bf16.msra.mxu0 %v1985_v8 }
 0x516   : > { %1909 = vmatprep.subr.bf16.mxu0 %v2022_v25 }
 0x518   : > { %1890 = vmatmul.mubr.msk.bf16.vlgmr.msra.gmra.mxu0 %vm494_vm0, %v2144_v15 }
 0x519   : > { %1921 = vmatprep.mubr.msk.bf16.mxu0 %vm2023_vm1, %v2022_v25  ;;  %1910 = vmatpush3.bf16.msra.mxu0 %v1987_v10 }
 0x51a   : > { %1911 = vmatprep.subr.bf16.mxu0 %v2022_v25 }
 0x51d   : > { %1912 = vmatpush3.bf16.msra.mxu0 %v1988_v11 }
 0x51e   : > { %1913 = vmatprep.subr.bf16.mxu0 %v2022_v25 }
 0x521   : > { %1914 = vmatpush3.bf16.msra.mxu0 %v1990_v12 }
 0x522   : > { %1915 = vmatprep.subr.bf16.mxu0 %v2022_v25 }
 0x525   : > { %1916 = vmatpush3.bf16.msra.mxu0 %v1992_v13 }
 0x526   : > { %1917 = vmatprep.subr.bf16.mxu0 %v2022_v25 }
 0x529   : > { %1918 = vmatpush3.bf16.msra.mxu0 %v1994_v28 }
 0x52a   : > { %1919 = vmatprep.subr.bf16.mxu0 %v2022_v25 }
 0x52d   : > { %1920 = vmatpush3.bf16.msra.mxu0 %v1996_v31 }
 0x530   : > { %1922 = vmatmul.mubr.msk.bf16.vlgmr.msra.gmra.mxu0 %vm494_vm0, %v2144_v15 }
 0x5c0   : > { %v1150_v14 = vpop.f32.mrf.mxu0 }
 0x5c2   : > { %v1859_v16 = vpop.f32.mrf.mxu0 }
 0x5c4   : > { %v1153_v17 = vpop.f32.mrf.mxu0 }
 0x5c5   : > { %v1170_v19 = vpack.c.bf16 %v1153_v17, %v1150_v14 }
 0x5c6   : > { %v1860_v20 = vpop.f32.mrf.mxu0 }
 0x5c7   : > { %1874 = vmatmul.mubr.msk.bf16.vlgmr.msra.gmra.mxu1 %vm494_vm0, %v1170_v19 }
 0x5c8   : > { %1894 = vmatpush3.bf16.msra.mxu1 %v1989_v18  ;;  %1905 = vmatprep.mubr.msk.bf16.mxu1 %vm2023_vm1, %v2022_v25 }
 0x5c9   : > { %1895 = vmatprep.subr.bf16.mxu1 %v2022_v25 }
 0x5cc   : > { %1896 = vmatpush3.bf16.msra.mxu1 %v1991_v21 }
 0x5cd   : > { %1897 = vmatprep.subr.bf16.mxu1 %v2022_v25 }
 0x5d0   : > { %1898 = vmatpush3.bf16.msra.mxu1 %v1993_v26 }
 0x5d1   : > { %1899 = vmatprep.subr.bf16.mxu1 %v2022_v25 }
 0x5d4   : > { %1900 = vmatpush3.bf16.msra.mxu1 %v1995_v30 }
 0x5d5   : > { %1901 = vmatprep.subr.bf16.mxu1 %v2022_v25 }
 0x5d8   : > { %v1351_v22 = vpop.f32.mrf.mxu0  ;;  %1902 = vmatpush3.bf16.msra.mxu1 %v1997_v32 }
 0x5d9   : > { %1903 = vmatprep.subr.bf16.mxu1 %v2022_v25  ;;  %v1352_v15 = vadd.f32 %v1702_v34, %v1351_v22 }
 0x5da   : > { %v1891_v23 = vpop.f32.mrf.mxu0 }
 0x5dc   : > { %v1354_v27 = vpop.f32.mrf.mxu0  ;;  %1904 = vmatpush3.bf16.msra.mxu1 %v1998_v33 }
 0x5dd   : > { %v1355_v46 = vadd.f32 %v1702_v34, %v1354_v27 }
 0x5de   : > { %v1892_v29 = vpop.f32.mrf.mxu0 }
 0x5f0   : > { %v1555_v54 = vpop.f32.mrf.mxu0 }
 0x5f1   : > { %v1556_v58 = vadd.f32 %v1718_v56, %v1555_v54 }
 0x5f2   : > { %v1923_v44 = vpop.f32.mrf.mxu0 }
 0x5f4   : > { %v1558_v52 = vpop.f32.mrf.mxu0 }
 0x5f5   : > { %v1559_v0 = vadd.f32 %v1718_v56, %v1558_v52 }
 0x5f6   : > { %v1924_v55 = vpop.f32.mrf.mxu0 }
 0x687   : > { %v1244_v36 = vpop.f32.mrf.mxu1 }
 0x688   : > { %v1251_v38 = vadd.f32 %v1244_v36, %v1009_v35 }
 0x689   : > { %v1875_v25 = vpop.f32.mrf.mxu1 }
 0x68a   : > { %v1260_v40 = vadd.f32 %v1701_v37, %v1251_v38 }
 0x68b   : > { %v1247_v41 = vpop.f32.mrf.mxu1 }
 0x68c   : > { %v1358_v24 = vadd.f32 %v1352_v15, %v1260_v40  ;;  %v1252_v43 = vadd.f32 %v1247_v41, %v1012_v39 }
 0x68d   : > { %v1876_v45 = vpop.f32.mrf.mxu1 }
 0x68e   : > { %v1261_v47 = vadd.f32 %v1701_v37, %v1252_v43  ;;  %v1362_v48 = vmul.f32 0.1, %v1358_v24  ;;  %vm1360_vm4 = vcmp.ge.f32.partialorder %v1358_v24, 0.0 }
 0x690   : > { %v1359_v42 = vadd.f32 %v1355_v46, %v1261_v47  ;;  %v1364_v50 = vsel %vm1360_vm4, %v1358_v24, %v1362_v48 }
 0x692   : > { %vm1361_vm5 = vcmp.ge.f32.partialorder %v1359_v42, 0.0  ;;  %v1363_v49 = vmul.f32 0.1, %v1359_v42 }
 0x694   : > { %v1365_v51 = vsel %vm1361_vm5, %v1359_v42, %v1363_v49 }
 0x695   : > { %v1378_v53 = vpack.c.bf16 %v1365_v51, %v1364_v50 }
 0x697   : > { %1906 = vmatmul.mubr.msk.bf16.vlgmr.msra.gmra.mxu1 %vm494_vm0, %v1378_v53 }
 0x757   : > { %v1459_v59 = vpop.f32.mrf.mxu1 }
 0x758   : > { %v1460_v60 = vadd.f32 %v1710_v57, %v1459_v59 }
 0x759   : > { %v1907_v61 = vpop.f32.mrf.mxu1 }
 0x75a   : > { %v1562_v62 = vadd.f32 %v1556_v58, %v1460_v60 }
 0x75b   : > { %v1462_v63 = vpop.f32.mrf.mxu1 }
 0x75c   : > { %vm1564_vm6 = vcmp.ge.f32.partialorder %v1562_v62, 0.0  ;;  %v1566_v1 = vmul.f32 0.1, %v1562_v62  ;;  %v1463_v2 = vadd.f32 %v1710_v57, %v1462_v63 }
 0x75d   : > { %v1908_v3 = vpop.f32.mrf.mxu1 }
 0x75e   : > { %v1568_v4 = vsel %vm1564_vm6, %v1562_v62, %v1566_v1  ;;  %v1563_v5 = vadd.f32 %v1559_v0, %v1463_v2 }
 0x75f   : > { %1570 = vst.msk [vmem:[%s413_s25] sm:$0xff] %vm494_vm0, %v1568_v4 }
 0x760   : > { %vm1565_vm7 = vcmp.ge.f32.partialorder %v1563_v5, 0.0  ;;  %v1567_v6 = vmul.f32 0.1, %v1563_v5 }
 0x762   : > { %v1569_v7 = vsel %vm1565_vm7, %v1563_v5, %v1567_v6 }
 0x763   : > { %1571 = vst.msk [vmem:[%s413_s25 + $0x8] sm:$0xff] %vm494_vm0, %v1569_v7 }
 0x764 PF: > { %s22_s21 = sadd.s32 1, %s2017_s21  }
 0x765   : > { %p19_p4 = scmp.ge.s32.totalorder %s22_s21, 10  }
 0x767   :  { %21 = sbr.rel (!%p19_p4) target bundleno = 1 (0x1), region = 100 }

// kernel: _lambda_.13
= control target key start
LH: loop header
LB: loop body
LE: loop exit
PB: predicated region body
PF: predicated region fallthrough
CT: control target
= control target key end

     0   :  { %s1698_s27 = smov 0   ;;  %s1947_s0 = inlined_call_operand.vmem [shape: f32[8,16,96], index: 0, kind: input, shape index: {}]   ;;  %s1948_s1 = inlined_call_operand.vmem [shape: bf16[96,192], index: 1, kind: input, shape index: {}]   ;;  %s1949_s2 = inlined_call_operand.vmem [shape: f32[16,192], index: 2, kind: input, shape index: {}]   ;;  %s1950_s3 = inlined_call_operand.vmem [shape: f32[1,3], index: 3, kind: input, shape index: {}]   ;;  %s1951_s4 = inlined_call_operand.vmem [shape: bf16[3,96,96], index: 4, kind: input, shape index: {}]   ;;  %s1952_s5 = inlined_call_operand.vmem [shape: f32[1,96], index: 5, kind: input, shape index: {}]   ;;  %s1953_s6 = inlined_call_operand.vmem [shape: bf16[96,96], index: 6, kind: input, shape index: {}]   ;;  %s1954_s7 = inlined_call_operand.vmem [shape: f32[1,96], index: 7, kind: input, shape index: {}]   ;;  %s1955_s8 = inlined_call_operand.vmem [shape: f32[8,16,96], index: 8, kind: output, shape index: {}]  }
   0x1 LB: > { %s1327_s28 = sadd.s32 4294967295, %s1643_s27   ;;  %p1331_p0 = scmp.ge.s32.totalorder %s1643_s27, 1  ;;  %s1643_s27 = sphi %s1698_s27, %s18_s27  }
   0x2   : > { %p262_p1 = scmp.lt.s32.totalorder %s1643_s27, 9 }
   0x4   : > { %p263_p2 = pnand %p1331_p0, %p262_p1 }
   0x5   : > { %p296_p3 = scmp.lt.s32.totalorder (!%p263_p2), %s1327_s28, 7  ;;  %s1646_s19 = smov (!%p263_p2), 96  }
   0x6   : > { %266 = sbr.rel (%p263_p2) target bundleno = 1892 (0x764), region = 52  ;;  %s1647_s23 = smov (!%p263_p2), 32  }
   0x7   : > { %s1651_s30 = smov (!%p263_p2), 64  }
   0xb   : > { %v1583_v0 = vld [vmem:[%s1948_s1 + $0x54] ss:$8 sps:$4 sm:$0xff]   ;;  %v1585_v1 = vld [vmem:[%s1948_s1 + $0x50] ss:$8 sps:$4 sm:$0xff]   ;;  %v1645_v2 = vmov 0   ;;  %s1957_s28 = smov (!%p296_p3, %s1327_s28), 7 }
   0xc   : > { %422 = vmatprep.mubr.bf16.mxu0 %v1645_v2  ;;  %1579 = vset.pattern.permute.xlu1 %v1645_v2  ;;  %v1586_v3 = vld [vmem:[%s1948_s1 + $0x44] ss:$8 sps:$4 sm:$0xff]   ;;  %v1588_v4 = vld [vmem:[%s1948_s1 + $0x40] ss:$8 sps:$4 sm:$0xff]   ;;  %v1589_v5 = vld [vmem:[%s1948_s1 + $0x34] ss:$8 sps:$4 sm:$0xff]  }
   0xd   : > { %394 = vmatprep.subr.bf16.mxu0 %v1583_v0  ;;  %v1591_v6 = vld [vmem:[%s1948_s1 + $0x30] ss:$8 sps:$4 sm:$0xff]   ;;  %v1592_v7 = vld [vmem:[%s1948_s1 + $0x24] ss:$8 sps:$4 sm:$0xff]   ;;  %s1412_s21 = sshll.u32 %s1957_s28, 4  ;;  %vm386_vm0 = vcmask 785408  }
   0xe   : > { %395 = vmatpush1.bf16.msra.mxu0 %v1585_v1  ;;  %v1594_v8 = vld [vmem:[%s1948_s1 + $0x20] ss:$8 sps:$4 sm:$0xff]   ;;  %v1595_v9 = vld [vmem:[%s1948_s1 + $0x14] ss:$8 sps:$4 sm:$0xff]   ;;  %v1597_v10 = vld [vmem:[%s1948_s1 + $0x10] ss:$8 sps:$4 sm:$0xff]   ;;  %s300_s12 = scalar_lea.vmem %s1947_s0, %s1412_s21  ;;  %s305_s26 = scalar_lea.vmem %s1955_s8, %s1412_s21 }
   0xf   : > { %396 = vmatprep.subr.bf16.mxu0 %v1586_v3  ;;  %v1598_v11 = vld [vmem:[%s1948_s1 + $0x4] ss:$8 sps:$4 sm:$0xff]   ;;  %v1600_v12 = vld [vmem:[%s1948_s1] ss:$8 sps:$4 sm:$0xff]   ;;  %v324_v20 = vld [vmem:[%s1949_s2 + $0x10] sm:$0xff]  ;;  %v1648_v25 = vmov 0.0  }
  0x10   : > { %v1750_v13 = vld [vmem:[%s300_s12] sm:$0xff]  ;;  %v1752_v14 = vld [vmem:[%s300_s12 + $0x8] sm:$0xff]  ;;  %1457 = vmatprep.subr.bf16.mxu1 %v1648_v25  ;;  %vm1649_vm1 = vmmov 0   ;;  %v1650_v26 = vmov 1   ;;  %v325_v27 = vld [vmem:[%s1949_s2 + $0x18] sm:$0xff]  ;;  %vm471_vm2 = vcmask 261120  }
  0x11   : > { %v1756_v15 = vpack.c.bf16 %v1752_v14, %v1750_v13  ;;  %v322_v16 = vld [vmem:[%s1949_s2] sm:$0xff]  ;;  %1461 = vmatprep.mubr.msk.bf16.mxu1 %vm1649_vm1, %v1648_v25  ;;  %v323_v29 = vld [vmem:[%s1949_s2 + $0x8] sm:$0xff]  ;;  %vm533_vm3 = vcmask 130048   ;;  %v1607_v63 = vld [vmem:[%s1951_s4 + $0x58] sm:$0xff]  }
  0x12   : > { %397 = vmatpush1.bf16.msra.mxu0 %v1588_v4  ;;  %v1771_v24 = vld [vmem:[%s1950_s3] ss:$0 sm:$0xff]  ;;  %v1608_v0 = vld [vmem:[%s1951_s4 + $0x50] sm:$0xff]   ;;  %v1609_v1 = vld [vmem:[%s1951_s4 + $0x48] sm:$0xff]  }
  0x13   : > { %398 = vmatprep.subr.bf16.mxu0 %v1589_v5  ;;  %v1610_v2 = vld [vmem:[%s1951_s4 + $0x40] sm:$0xff]   ;;  %v1611_v3 = vld [vmem:[%s1951_s4 + $0x38] sm:$0xff]  }
  0x16   : > { %399 = vmatpush1.bf16.msra.mxu0 %v1591_v6 }
  0x17   : > { %400 = vmatprep.subr.bf16.mxu0 %v1592_v7 }
  0x1a   : > { %401 = vmatpush1.bf16.msra.mxu0 %v1594_v8 }
  0x1b   : > { %402 = vmatprep.subr.bf16.mxu0 %v1595_v9 }
  0x1e   : > { %403 = vmatpush1.bf16.msra.mxu0 %v1597_v10 }
  0x1f   : > { %404 = vmatprep.subr.bf16.mxu0 %v1598_v11 }
  0x22   : > { %405 = vmatpush1.bf16.msra.mxu0 %v1600_v12 }
  0x23   : > { %1479 = vmatprep.subr.bf16.mxu0 %v1648_v25 }
  0x25   : > { %1348 = vmatmul.mubr.msk.bf16.vlgmr.msra.gmra.mxu0 %vm386_vm0, %v1756_v15 }
  0x26   : > { %1480 = vmatpush3.bf16.msra.mxu0 %v1756_v15  ;;  %1481 = vmatprep.mubr.msk.bf16.mxu0 %vm1649_vm1, %v1648_v25 }
  0x27   : > { %1501 = vmatprep.subr.bf16.mxu0 %v1648_v25 }
  0xe5   : > { %v424_v17 = vpop.f32.mrf.mxu0 }
  0xe6   : > { %v425_v18 = vadd.f32 %v424_v17, %v322_v16 }
  0xe7   : > { %v426_v19 = vpop.f32.mrf.mxu0 }
  0xe8   : > { %593 = vrot.lane.b32.xlu1 %v425_v18, %s1646_s19  ;;  %v427_v31 = vadd.f32 %v426_v19, %v323_v29  ;;  %v1606_v29 = vld [vmem:[%s1951_s4] sm:$0xff]  }
  0xe9   : > { %v428_v21 = vpop.f32.mrf.mxu0 }
  0xea   : > { %v429_v22 = vadd.f32 %v428_v21, %v324_v20  ;;  %v1601_v21 = vld [vmem:[%s1951_s4 + $0x28] sm:$0xff]  }
  0xeb   : > { %v430_v28 = vpop.f32.mrf.mxu0 }
  0xec   : > { %595 = vrot.lane.b32.xlu1 %v429_v22, %s1646_s19  ;;  %v465_v23 = vpack.c.bf16 %v429_v22, %v425_v18  ;;  %v431_v30 = vadd.f32 %v430_v28, %v325_v27  ;;  %v1604_v27 = vld [vmem:[%s1951_s4 + $0x10] sm:$0xff]   ;;  %v1605_v28 = vld [vmem:[%s1951_s4 + $0x8] sm:$0xff]  }
  0xee   : > { %469 = vrot.lane.b32.xlu0 %v465_v23, %s1647_s23  ;;  %v631_v32 = vpack.c.bf16 %v431_v30, %v427_v31  ;;  %v1602_v23 = vld [vmem:[%s1951_s4 + $0x20] sm:$0xff]   ;;  %v1612_v31 = vld [vmem:[%s1951_s4 + $0x30] sm:$0xff]  }
  0xf0   : > { %527 = vperm.xlu1 %1579, %v1771_v24  }
 0x10c   : > { %433 = vxpose.xlu0.b32.start [1/2] (short) (narrow) %v425_v18, 32 }
 0x110   : > { %434 = vxpose.xlu0.b32.end [2/2] (short) (narrow) %v429_v22, 32 }
 0x139   : > { %1580 = vset.pattern.permute.xlu0 %v1650_v26  ;;  %v1603_v26 = vld [vmem:[%s1951_s4 + $0x18] sm:$0xff]  }
 0x141   : > { %683 = vperm.xlu0 %1580, %v1771_v24  }
 0x145   : > { %909 = vrot.lane.b32.xlu0 %v429_v22, %s1651_s30 }
 0x149   : > { %948 = vrot.lane.b32.xlu0 %v631_v32, %s1646_s19 }
 0x15a   : > { %v594_v33 = vpop.permute.xlu1 %593 }
 0x15b   : > { %599 = vxpose.xlu1.b32.start [1/2] (short) (narrow) %v594_v33, 32 }
 0x15e   : > { %v596_v34 = vpop.permute.xlu1 %595 }
 0x15f   : > { %600 = vxpose.xlu1.b32.end [2/2] (short) (narrow) %v596_v34, 32 }
 0x160   : > { %v470_v35 = vpop.permute.xlu0 %469 }
 0x16b   : > { %v528_v42 = vpop.permute.xlu1 %527 }
 0x185   : > { %907 = vrot.lane.b32.xlu1 %v425_v18, %s1651_s30 }
 0x188   : > { %v449_v36 = vpop.trf.xlu0 }
 0x18c   : > { %v450_v37 = vpop.trf.xlu0 }
 0x18d   : > { %v466_v41 = vpack.c.bf16 %v450_v37, %v449_v36 }
 0x190   : > { %v451_v38 = vpop.trf.xlu0 }
 0x194   : > { %v452_v39 = vpop.trf.xlu0 }
 0x195   : > { %v467_v40 = vpack.c.bf16 %v452_v39, %v451_v38 }
 0x197   : > { %1458 = vmatpush3.bf16.msra.mxu1 %v467_v40 }
 0x198   : > { %1459 = vmatprep.subr.bf16.mxu1 %v1648_v25 }
 0x19b   : > { %1460 = vmatpush3.bf16.msra.mxu1 %v466_v41 }
 0x19c   : > { %1465 = vmatprep.subr.bf16.mxu1 %v1648_v25 }
 0x19e   : > { %1462 = vmatmul.mubr.msk.bf16.vlgmr.msra.gmra.mxu1 %vm471_vm2, %v470_v35 }
 0x19f   : > { %1466 = vmatpush3.bf16.msra.mxu1 %v1756_v15  ;;  %1467 = vmatprep.mubr.msk.bf16.mxu1 %vm1649_vm1, %v1648_v25 }
 0x1a0   : > { %1471 = vmatprep.subr.bf16.mxu1 %v1648_v25 }
 0x1bc   : > { %v684_v49 = vpop.permute.xlu0 %683 }
 0x1c0   : > { %v910_v51 = vpop.permute.xlu0 %909 }
 0x1c4   : > { %v949_v33 = vpop.permute.xlu0 %948 }
 0x1d7   : > { %v615_v43 = vpop.trf.xlu1 }
 0x1db   : > { %v616_v44 = vpop.trf.xlu1 }
 0x1dc   : > { %v632_v45 = vpack.c.bf16 %v616_v44, %v615_v43 }
 0x1df   : > { %v617_v46 = vpop.trf.xlu1 }
 0x1e3   : > { %v618_v47 = vpop.trf.xlu1 }
 0x1e4   : > { %v633_v48 = vpack.c.bf16 %v618_v47, %v617_v46  ;;  %v1613_v47 = vld [vmem:[%s1951_s4 + $0x88] sm:$0xff]  }
 0x1f7   : > { %v908_v50 = vpop.permute.xlu1 %907 }
 0x1f8   : > { %913 = vxpose.xlu0.b32.start [1/2] (short) (narrow) %v908_v50, 32  ;;  %v1616_v50 = vld [vmem:[%s1951_s4 + $0x70] sm:$0xff]  }
 0x1fc   : > { %914 = vxpose.xlu0.b32.end [2/2] (short) (narrow) %v910_v51, 32 }
 0x25e   : > { %v509_v52 = vpop.f32.mrf.mxu1 }
 0x25f   : > { %v516_v53 = vmul.f32 0.03125, %v509_v52 }
 0x260   : > { %v1463_v54 = vpop.f32.mrf.mxu1 }
 0x261   : > { %1625 = vtanh.f32 %v516_v53 }
 0x262   : > { %v512_v55 = vpop.f32.mrf.mxu1 }
 0x263   : > { %v517_v56 = vmul.f32 0.03125, %v512_v55 }
 0x264   : > { %v1464_v57 = vpop.f32.mrf.mxu1 }
 0x265   : > { %1627 = vtanh.f32 %v517_v56 }
 0x26e   : > { %v1626_v58 = vpop.eup %1625 }
 0x26f   : > { %v530_v60 = vmul.f32 %v1626_v58, %v528_v42 }
 0x272   : > { %v1628_v59 = vpop.eup %1627 }
 0x273   : > { %v531_v61 = vmul.f32 %v1628_v59, %v528_v42 }
 0x274   : > { %v929_v34 = vpop.trf.xlu0 }
 0x275   : > { %v532_v62 = vpack.c.bf16 %v531_v61, %v530_v60 }
 0x277   : > { %1468 = vmatmul.mubr.msk.bf16.vlgmr.msra.gmra.mxu1 %vm533_vm3, %v532_v62 }
 0x278   : > { %1472 = vmatpush3.bf16.msra.mxu1 %v633_v48  ;;  %1475 = vmatprep.mubr.msk.bf16.mxu1 %vm1649_vm1, %v1648_v25  ;;  %v1614_v48 = vld [vmem:[%s1951_s4 + $0x80] sm:$0xff]  }
 0x279   : > { %1473 = vmatprep.subr.bf16.mxu1 %v1648_v25 }
 0x27c   : > { %1474 = vmatpush3.bf16.msra.mxu1 %v632_v45 }
 0x27d   : > { %1485 = vmatprep.subr.bf16.mxu1 %v1648_v25 }
 0x27f   : > { %1476 = vmatmul.mubr.msk.bf16.vlgmr.msra.gmra.mxu1 %vm471_vm2, %v631_v32  ;;  %v1652_v32 = vmov 2  }
 0x280   : > { %1497 = vmatprep.mubr.msk.bf16.mxu1 %vm1649_vm1, %v1648_v25  ;;  %1486 = vmatpush3.bf16.msra.mxu1 %v1607_v63 }
 0x281   : > { %1487 = vmatprep.subr.bf16.mxu1 %v1648_v25  ;;  %1581 = vset.pattern.permute.xlu1 %v1652_v32 }
 0x282   : > { %1582 = vset.pattern.permute.xlu0 %v1652_v32  ;;  %999 = vperm.xlu1 %1581, %v1771_v24  }
 0x284   : > { %1488 = vmatpush3.bf16.msra.mxu1 %v1608_v0 }
 0x285   : > { %1489 = vmatprep.subr.bf16.mxu1 %v1648_v25 }
 0x288   : > { %1490 = vmatpush3.bf16.msra.mxu1 %v1609_v1 }
 0x289   : > { %1491 = vmatprep.subr.bf16.mxu1 %v1648_v25 }
 0x28c   : > { %1492 = vmatpush3.bf16.msra.mxu1 %v1610_v2 }
 0x28d   : > { %1493 = vmatprep.subr.bf16.mxu1 %v1648_v25 }
 0x290   : > { %1494 = vmatpush3.bf16.msra.mxu1 %v1611_v3  ;;  %v1617_v3 = vld [vmem:[%s1951_s4 + $0x68] sm:$0xff]  }
 0x291   : > { %1495 = vmatprep.subr.bf16.mxu1 %v1648_v25 }
 0x294   : > { %1496 = vmatpush3.bf16.msra.mxu1 %v1612_v31 }
 0x295   : > { %1517 = vmatprep.subr.bf16.mxu1 %v1648_v25 }
 0x2fd   : > { %v1000_v62 = vpop.permute.xlu1 %999 }
 0x337   : > { %v571_v4 = vpop.f32.mrf.mxu1 }
 0x339   : > { %v1469_v5 = vpop.f32.mrf.mxu1 }
 0x33a   : > { %v1619_v5 = vld [vmem:[%s1953_s6 + $0x28] sm:$0xff]  }
 0x33b   : > { %v574_v6 = vpop.f32.mrf.mxu1 }
 0x33c   : > { %v590_v30 = vpack.c.bf16 %v574_v6, %v571_v4  ;;  %v1618_v4 = vld [vmem:[%s1951_s4 + $0x60] sm:$0xff]  }
 0x33d   : > { %v1470_v7 = vpop.f32.mrf.mxu1  ;;  %v1620_v6 = vld [vmem:[%s1953_s6 + $0x20] sm:$0xff]  }
 0x33f   : > { %v671_v8 = vpop.f32.mrf.mxu1 }
 0x340   : > { %v678_v9 = vmul.f32 0.03125, %v671_v8 }
 0x341   : > { %v1477_v10 = vpop.f32.mrf.mxu1 }
 0x342   : > { %1629 = vtanh.f32 %v678_v9 }
 0x343   : > { %v674_v11 = vpop.f32.mrf.mxu1 }
 0x344   : > { %v679_v12 = vmul.f32 0.03125, %v674_v11 }
 0x345   : > { %v1478_v16 = vpop.f32.mrf.mxu1 }
 0x346   : > { %1631 = vtanh.f32 %v679_v12  ;;  %v1621_v12 = vld [vmem:[%s1953_s6 + $0x18] sm:$0xff]   ;;  %v1622_v16 = vld [vmem:[%s1953_s6 + $0x10] sm:$0xff]  }
 0x34f   : > { %v1630_v17 = vpop.eup %1629 }
 0x350   : > { %v686_v19 = vmul.f32 %v1630_v17, %v684_v49  ;;  %v1623_v17 = vld [vmem:[%s1953_s6 + $0x8] sm:$0xff]  }
 0x353   : > { %v1632_v18 = vpop.eup %1631 }
 0x354   : > { %v687_v20 = vmul.f32 %v1632_v18, %v684_v49  ;;  %v1615_v49 = vld [vmem:[%s1951_s4 + $0x78] sm:$0xff]   ;;  %v1624_v18 = vld [vmem:[%s1953_s6] sm:$0xff]  }
 0x356   : > { %v688_v22 = vpack.c.bf16 %v687_v20, %v686_v19 }
 0x358   : > { %1482 = vmatmul.mubr.msk.bf16.vlgmr.msra.gmra.mxu0 %vm533_vm3, %v688_v22 }
 0x359   : > { %1502 = vmatpush3.bf16.msra.mxu0 %v1601_v21  ;;  %1513 = vmatprep.mubr.msk.bf16.mxu0 %vm1649_vm1, %v1648_v25  ;;  %v1401_v21 = vld [vmem:[%s1952_s5] ss:$0 sm:$0xff] }
 0x35a   : > { %1503 = vmatprep.subr.bf16.mxu0 %v1648_v25 }
 0x35d   : > { %1504 = vmatpush3.bf16.msra.mxu0 %v1602_v23 }
 0x35e   : > { %1505 = vmatprep.subr.bf16.mxu0 %v1648_v25 }
 0x361   : > { %1506 = vmatpush3.bf16.msra.mxu0 %v1603_v26 }
 0x362   : > { %1507 = vmatprep.subr.bf16.mxu0 %v1648_v25 }
 0x365   : > { %1508 = vmatpush3.bf16.msra.mxu0 %v1604_v27 }
 0x366   : > { %1509 = vmatprep.subr.bf16.mxu0 %v1648_v25 }
 0x369   : > { %1510 = vmatpush3.bf16.msra.mxu0 %v1605_v28 }
 0x36a   : > { %1511 = vmatprep.subr.bf16.mxu0 %v1648_v25 }
 0x36d   : > { %1512 = vmatpush3.bf16.msra.mxu0 %v1606_v29 }
 0x36e   : > { %1525 = vmatprep.subr.bf16.mxu0 %v1648_v25 }
 0x370   : > { %1514 = vmatmul.mubr.msk.bf16.vlgmr.msra.gmra.mxu0 %vm386_vm0, %v590_v30 }
 0x371   : > { %1526 = vmatpush3.bf16.msra.mxu0 %v1756_v15  ;;  %1527 = vmatprep.mubr.msk.bf16.mxu0 %vm1649_vm1, %v1648_v25  ;;  %v930_v15 = vpop.trf.xlu0 }
 0x372   : > { %1547 = vmatprep.subr.bf16.mxu0 %v1648_v25  ;;  %v945_v24 = vpack.c.bf16 %v930_v15, %v929_v34 }
 0x375   : > { %v931_v35 = vpop.trf.xlu0 }
 0x379   : > { %v932_v38 = vpop.trf.xlu0 }
 0x37a   : > { %v946_v41 = vpack.c.bf16 %v932_v38, %v931_v35 }
 0x418   : > { %v726_v36 = vpop.f32.mrf.mxu0 }
 0x41a   : > { %v1483_v37 = vpop.f32.mrf.mxu0 }
 0x41b   : > { %v1402_v37 = vld [vmem:[%s1954_s7] ss:$0 sm:$0xff] }
 0x41c   : > { %v729_v39 = vpop.f32.mrf.mxu0 }
 0x41d   : > { %v746_v40 = vpack.c.bf16 %v729_v39, %v726_v36 }
 0x41e   : > { %v1484_v42 = vpop.f32.mrf.mxu0 }
 0x41f   : > { %1498 = vmatmul.mubr.msk.bf16.vlgmr.msra.gmra.mxu1 %vm386_vm0, %v746_v40 }
 0x420   : > { %1518 = vmatpush3.bf16.msra.mxu1 %v946_v41  ;;  %1521 = vmatprep.mubr.msk.bf16.mxu1 %vm1649_vm1, %v1648_v25 }
 0x421   : > { %1519 = vmatprep.subr.bf16.mxu1 %v1648_v25 }
 0x424   : > { %1520 = vmatpush3.bf16.msra.mxu1 %v945_v24 }
 0x425   : > { %1531 = vmatprep.subr.bf16.mxu1 %v1648_v25 }
 0x427   : > { %1522 = vmatmul.mubr.msk.bf16.vlgmr.msra.gmra.mxu1 %vm471_vm2, %v949_v33 }
 0x428   : > { %1543 = vmatprep.mubr.msk.bf16.mxu1 %vm1649_vm1, %v1648_v25  ;;  %1532 = vmatpush3.bf16.msra.mxu1 %v1613_v47 }
 0x429   : > { %1533 = vmatprep.subr.bf16.mxu1 %v1648_v25 }
 0x42c   : > { %1534 = vmatpush3.bf16.msra.mxu1 %v1614_v48 }
 0x42d   : > { %1535 = vmatprep.subr.bf16.mxu1 %v1648_v25 }
 0x430   : > { %v1870_v43 = vpop.f32.mrf.mxu0  ;;  %1536 = vmatpush3.bf16.msra.mxu1 %v1615_v49 }
 0x431   : > { %1537 = vmatprep.subr.bf16.mxu1 %v1648_v25 }
 0x432   : > { %v1515_v44 = vpop.f32.mrf.mxu0 }
 0x434   : > { %v1872_v45 = vpop.f32.mrf.mxu0  ;;  %1538 = vmatpush3.bf16.msra.mxu1 %v1616_v50 }
 0x435   : > { %1539 = vmatprep.subr.bf16.mxu1 %v1648_v25 }
 0x436   : > { %v1516_v46 = vpop.f32.mrf.mxu0 }
 0x438   : > { %1540 = vmatpush3.bf16.msra.mxu1 %v1617_v3 }
 0x439   : > { %1541 = vmatprep.subr.bf16.mxu1 %v1648_v25 }
 0x43c   : > { %1542 = vmatpush3.bf16.msra.mxu1 %v1618_v4 }
 0x4df   : > { %v820_v51 = vpop.f32.mrf.mxu1 }
 0x4e0   : > { %v901_v19 = vadd.f32 %v1870_v43, %v820_v51 }
 0x4e1   : > { %v1499_v52 = vpop.f32.mrf.mxu1 }
 0x4e3   : > { %v823_v53 = vpop.f32.mrf.mxu1 }
 0x4e4   : > { %v904_v26 = vadd.f32 %v1872_v45, %v823_v53 }
 0x4e5   : > { %v1500_v54 = vpop.f32.mrf.mxu1 }
 0x4e7   : > { %v987_v55 = vpop.f32.mrf.mxu1 }
 0x4e8   : > { %v994_v56 = vmul.f32 0.03125, %v987_v55 }
 0x4e9   : > { %v1523_v57 = vpop.f32.mrf.mxu1 }
 0x4ea   : > { %1633 = vtanh.f32 %v994_v56 }
 0x4eb   : > { %v990_v58 = vpop.f32.mrf.mxu1 }
 0x4ec   : > { %v995_v59 = vmul.f32 0.03125, %v990_v58 }
 0x4ed   : > { %v1524_v60 = vpop.f32.mrf.mxu1 }
 0x4ee   : > { %1635 = vtanh.f32 %v995_v59 }
 0x4f7   : > { %v1634_v61 = vpop.eup %1633 }
 0x4f8   : > { %v1002_v0 = vmul.f32 %v1634_v61, %v1000_v62 }
 0x4fb   : > { %v1636_v63 = vpop.eup %1635 }
 0x4fc   : > { %v1003_v1 = vmul.f32 %v1636_v63, %v1000_v62 }
 0x4fe   : > { %v1004_v2 = vpack.c.bf16 %v1003_v1, %v1002_v0 }
 0x500   : > { %1528 = vmatmul.mubr.msk.bf16.vlgmr.msra.gmra.mxu0 %vm533_vm3, %v1004_v2 }
 0x501   : > { %1559 = vmatprep.mubr.msk.bf16.mxu0 %vm1649_vm1, %v1648_v25  ;;  %1548 = vmatpush3.bf16.msra.mxu0 %v1619_v5 }
 0x502   : > { %1549 = vmatprep.subr.bf16.mxu0 %v1648_v25 }
 0x505   : > { %1550 = vmatpush3.bf16.msra.mxu0 %v1620_v6 }
 0x506   : > { %1551 = vmatprep.subr.bf16.mxu0 %v1648_v25 }
 0x509   : > { %1552 = vmatpush3.bf16.msra.mxu0 %v1621_v12 }
 0x50a   : > { %1553 = vmatprep.subr.bf16.mxu0 %v1648_v25 }
 0x50d   : > { %1554 = vmatpush3.bf16.msra.mxu0 %v1622_v16 }
 0x50e   : > { %1555 = vmatprep.subr.bf16.mxu0 %v1648_v25 }
 0x511   : > { %1556 = vmatpush3.bf16.msra.mxu0 %v1623_v17 }
 0x512   : > { %1557 = vmatprep.subr.bf16.mxu0 %v1648_v25 }
 0x515   : > { %1558 = vmatpush3.bf16.msra.mxu0 %v1624_v18 }
 0x5c0   : > { %v1042_v7 = vpop.f32.mrf.mxu0 }
 0x5c2   : > { %v1529_v8 = vpop.f32.mrf.mxu0 }
 0x5c4   : > { %v1045_v9 = vpop.f32.mrf.mxu0 }
 0x5c5   : > { %v1062_v10 = vpack.c.bf16 %v1045_v9, %v1042_v7 }
 0x5c6   : > { %v1530_v11 = vpop.f32.mrf.mxu0 }
 0x5c7   : > { %1544 = vmatmul.mubr.msk.bf16.vlgmr.msra.gmra.mxu1 %vm386_vm0, %v1062_v10 }
 0x687   : > { %v1136_v20 = vpop.f32.mrf.mxu1 }
 0x688   : > { %v1143_v22 = vadd.f32 %v1136_v20, %v901_v19 }
 0x689   : > { %v1545_v23 = vpop.f32.mrf.mxu1 }
 0x68a   : > { %v1152_v27 = vadd.f32 %v1401_v21, %v1143_v22 }
 0x68b   : > { %v1139_v28 = vpop.f32.mrf.mxu1 }
 0x68c   : > { %v1154_v25 = vadd.f32 %v1152_v27, %v1750_v13  ;;  %v1144_v29 = vadd.f32 %v1139_v28, %v904_v26 }
 0x68d   : > { %v1546_v30 = vpop.f32.mrf.mxu1 }
 0x68e   : > { %v1153_v31 = vadd.f32 %v1401_v21, %v1144_v29  ;;  %v1158_v32 = vmul.f32 0.1, %v1154_v25  ;;  %vm1156_vm4 = vcmp.ge.f32.partialorder %v1154_v25, 0.0 }
 0x690   : > { %v1155_v33 = vadd.f32 %v1153_v31, %v1752_v14  ;;  %v1160_v15 = vsel %vm1156_vm4, %v1154_v25, %v1158_v32 }
 0x692   : > { %vm1157_vm5 = vcmp.ge.f32.partialorder %v1155_v33, 0.0  ;;  %v1159_v34 = vmul.f32 0.1, %v1155_v33 }
 0x694   : > { %v1161_v35 = vsel %vm1157_vm5, %v1155_v33, %v1159_v34 }
 0x695   : > { %v1174_v36 = vpack.c.bf16 %v1161_v35, %v1160_v15 }
 0x697   : > { %1560 = vmatmul.mubr.msk.bf16.vlgmr.msra.gmra.mxu0 %vm386_vm0, %v1174_v36 }
 0x757   : > { %v1255_v38 = vpop.f32.mrf.mxu0 }
 0x758   : > { %v1256_v39 = vadd.f32 %v1402_v37, %v1255_v38 }
 0x759   : > { %v1561_v40 = vpop.f32.mrf.mxu0 }
 0x75a   : > { %v1262_v41 = vadd.f32 %v1256_v39, %v1750_v13 }
 0x75b   : > { %v1258_v42 = vpop.f32.mrf.mxu0 }
 0x75c   : > { %vm1264_vm6 = vcmp.ge.f32.partialorder %v1262_v41, 0.0  ;;  %v1266_v24 = vmul.f32 0.1, %v1262_v41  ;;  %v1259_v43 = vadd.f32 %v1402_v37, %v1258_v42 }
 0x75d   : > { %v1562_v44 = vpop.f32.mrf.mxu0 }
 0x75e   : > { %v1268_v45 = vsel %vm1264_vm6, %v1262_v41, %v1266_v24  ;;  %v1263_v46 = vadd.f32 %v1259_v43, %v1752_v14 }
 0x75f   : > { %1270 = vst.msk [vmem:[%s305_s26] sm:$0xff] %vm386_vm0, %v1268_v45 }
 0x760   : > { %vm1265_vm7 = vcmp.ge.f32.partialorder %v1263_v46, 0.0  ;;  %v1267_v47 = vmul.f32 0.1, %v1263_v46 }
 0x762   : > { %v1269_v48 = vsel %vm1265_vm7, %v1263_v46, %v1267_v47 }
 0x763   : > { %1271 = vst.msk [vmem:[%s305_s26 + $0x8] sm:$0xff] %vm386_vm0, %v1269_v48 }
 0x764 PF: > { %s18_s27 = sadd.s32 1, %s1643_s27  }
 0x765   : > { %p15_p4 = scmp.ge.s32.totalorder %s18_s27, 10  }
 0x767   :  { %17 = sbr.rel (!%p15_p4) target bundleno = 1 (0x1), region = 84 }

// kernel: _lambda_.12
= control target key start
LH: loop header
LB: loop body
LE: loop exit
PB: predicated region body
PF: predicated region fallthrough
CT: control target
= control target key end

     0   :  { %s2498_s30 = smov 0   ;;  %s3044_s0 = inlined_call_operand.vmem [shape: f32[8,8,192], index: 0, kind: input, shape index: {}]   ;;  %s3045_s1 = inlined_call_operand.vmem [shape: bf16[192,384], index: 1, kind: input, shape index: {}]   ;;  %s3046_s2 = inlined_call_operand.vmem [shape: f32[8,384], index: 2, kind: input, shape index: {}]   ;;  %s3047_s3 = inlined_call_operand.vmem [shape: f32[1,3], index: 3, kind: input, shape index: {}]   ;;  %s3048_s4 = inlined_call_operand.vmem [shape: f32[3,8,8], index: 4, kind: input, shape index: {}]   ;;  %s3049_s5 = inlined_call_operand.vmem [shape: bf16[3,192,192], index: 5, kind: input, shape index: {}]   ;;  %s3050_s6 = inlined_call_operand.vmem [shape: f32[1,192], index: 6, kind: input, shape index: {}]   ;;  %s3051_s7 = inlined_call_operand.vmem [shape: bf16[192,192], index: 7, kind: input, shape index: {}]   ;;  %s3052_s8 = inlined_call_operand.vmem [shape: f32[1,192], index: 8, kind: input, shape index: {}]   ;;  %s3053_s9 = inlined_call_operand.vmem [shape: f32[8,8,192], index: 9, kind: output, shape index: {}]  }
   0x1 LB: > { %s1955_s10 = sadd.s32 4294967295, %s2440_s30   ;;  %p1959_p0 = scmp.ge.s32.totalorder %s2440_s30, 1  ;;  %s2440_s30 = sphi %s2498_s30, %s19_s30  }
   0x2   : > { %p287_p1 = scmp.lt.s32.totalorder %s2440_s30, 9 }
   0x4   : > { %p288_p2 = pnand %p1959_p0, %p287_p1 }
   0x5   : > { %p323_p3 = scmp.lt.s32.totalorder (!%p288_p2), %s1955_s10, 7  ;;  %s2443_s11 = smov (!%p288_p2), 64  }
   0x6   : > { %291 = sbr.rel (%p288_p2) target bundleno = 1922 (0x782), region = 56 }
   0xb   : > { %v2235_v0 = vld [vmem:[%s3045_s1 + $0xac] ss:$12 sps:$4 sm:$0xff]   ;;  %v2237_v1 = vld [vmem:[%s3045_s1 + $0xa8] ss:$12 sps:$4 sm:$0xff]   ;;  %v2240_v3 = vld [vmem:[%s3045_s1 + $0x90] ss:$12 sps:$4 sm:$0xff]  }
   0xc   : > { %585 = vmatprep.subr.bf16.mxu0 %v2235_v0  ;;  %v2238_v2 = vld [vmem:[%s3045_s1 + $0x94] ss:$12 sps:$4 sm:$0xff]   ;;  %v2241_v4 = vld [vmem:[%s3045_s1 + $0x7c] ss:$12 sps:$4 sm:$0xff]   ;;  %s3055_s10 = smov (!%p323_p3, %s1955_s10), 7  ;;  %vm581_vm0 = vcmask 523264  }
   0xd   : > { %586 = vmatpush1.bf16.msra.mxu0 %v2237_v1  ;;  %v2243_v5 = vld [vmem:[%s3045_s1 + $0x78] ss:$12 sps:$4 sm:$0xff]   ;;  %s2164_s25 = sshll.u32 %s3055_s10, 4  ;;  %v2246_v7 = vld [vmem:[%s3045_s1 + $0x60] ss:$12 sps:$4 sm:$0xff]   ;;  %v2442_v28 = vmov 0  }
   0xe   : > { %587 = vmatprep.subr.bf16.mxu0 %v2238_v2  ;;  %v2244_v6 = vld [vmem:[%s3045_s1 + $0x64] ss:$12 sps:$4 sm:$0xff]   ;;  %v2247_v8 = vld [vmem:[%s3045_s1 + $0x4c] ss:$12 sps:$4 sm:$0xff]   ;;  %s2541_s13 = scalar_lea.vmem %s3044_s0, %s2164_s25  ;;  %v2249_v9 = vld [vmem:[%s3045_s1 + $0x48] ss:$12 sps:$4 sm:$0xff]   ;;  %2231 = vset.pattern.permute.xlu1 %v2442_v28  ;;  %s332_s27 = scalar_lea.vmem %s3053_s9, %s2164_s25 }
   0xf   : > { %v2250_v10 = vld [vmem:[%s3045_s1 + $0x34] ss:$12 sps:$4 sm:$0xff]   ;;  %v335_v11 = vld [vmem:[%s2541_s13 + $0x8] sm:$0xff]  ;;  %v2252_v12 = vld [vmem:[%s3045_s1 + $0x30] ss:$12 sps:$4 sm:$0xff]   ;;  %626 = vmatprep.subr.bf16.mxu1 %v2442_v28  ;;  %v2444_v36 = vmov 0.0  }
  0x10   : > { %v2553_v13 = vpack.c.bf16 %v335_v11, %v335_v11  ;;  %v2253_v14 = vld [vmem:[%s3045_s1 + $0x1c] ss:$12 sps:$4 sm:$0xff]   ;;  %v2255_v15 = vld [vmem:[%s3045_s1 + $0x18] ss:$12 sps:$4 sm:$0xff]   ;;  %v2258_v17 = vld [vmem:[%s3045_s1] ss:$12 sps:$4 sm:$0xff]  }
  0x11   : > { %588 = vmatpush1.bf16.msra.mxu0 %v2240_v3  ;;  %v2256_v16 = vld [vmem:[%s3045_s1 + $0x4] ss:$12 sps:$4 sm:$0xff]   ;;  %v2259_v18 = vld [vmem:[%s3045_s1 + $0x10c] ss:$12 sps:$4 sm:$0xff]   ;;  %v2261_v19 = vld [vmem:[%s3045_s1 + $0x108] ss:$12 sps:$4 sm:$0xff]  }
  0x12   : > { %589 = vmatprep.subr.bf16.mxu0 %v2241_v4  ;;  %2000 = vmatprep.mubr.msk.bf16.mxu0 %vm581_vm0, %v2553_v13  ;;  %v2262_v20 = vld [vmem:[%s3045_s1 + $0xf4] ss:$12 sps:$4 sm:$0xff]   ;;  %v2264_v21 = vld [vmem:[%s3045_s1 + $0xf0] ss:$12 sps:$4 sm:$0xff]   ;;  %v2267_v23 = vld [vmem:[%s3045_s1 + $0xd8] ss:$12 sps:$4 sm:$0xff]  }
  0x13   : > { %2001 = vmatprep.mubr.msk.bf16.mxu1 %vm581_vm0, %v2553_v13  ;;  %v2265_v22 = vld [vmem:[%s3045_s1 + $0xdc] ss:$12 sps:$4 sm:$0xff]   ;;  %v2268_v24 = vld [vmem:[%s3045_s1 + $0xc4] ss:$12 sps:$4 sm:$0xff]   ;;  %v2270_v25 = vld [vmem:[%s3045_s1 + $0xc0] ss:$12 sps:$4 sm:$0xff]  }
  0x14   : > { %v2596_v26 = vld [vmem:[%s2541_s13] sm:$0xff]  ;;  %v2271_v37 = vld [vmem:[%s3045_s1 + $0xb0] ss:$12 sps:$4 sm:$0xff]   ;;  %vm2445_vm1 = vmmov 0   ;;  %v2274_v40 = vld [vmem:[%s3045_s1 + $0x68] ss:$12 sps:$4 sm:$0xff]  }
  0x15   : > { %590 = vmatpush1.bf16.msra.mxu0 %v2243_v5  ;;  %v2600_v27 = vpack.c.bf16 %v2596_v26, %v2596_v26  ;;  %v386_v29 = vld [vmem:[%s3046_s2] sm:$0xff]  ;;  %627 = vmatpush1.bf16.msra.mxu1 %v2271_v37  ;;  %v2275_v41 = vld [vmem:[%s3045_s1 + $0x50] ss:$12 sps:$4 sm:$0xff]   ;;  %v387_v44 = vld [vmem:[%s3046_s2 + $0x8] sm:$0xff]  ;;  %vm769_vm2 = vcmask 1043456   ;;  %vm765_vm3 = vcmask 64512  }
  0x16   : > { %591 = vmatprep.subr.bf16.mxu0 %v2244_v6  ;;  %v2612_v34 = vld [vmem:[%s3047_s3] ss:$0 sm:$0xff]  ;;  %628 = vmatprep.subr.bf16.mxu1 %v2442_v28  ;;  %v2272_v38 = vld [vmem:[%s3045_s1 + $0x98] ss:$12 sps:$4 sm:$0xff]   ;;  %v2278_v45 = vld [vmem:[%s3045_s1 + $0x8] ss:$12 sps:$4 sm:$0xff]  }
  0x17   : > { %v2273_v39 = vld [vmem:[%s3045_s1 + $0x80] ss:$12 sps:$4 sm:$0xff]   ;;  %v2276_v42 = vld [vmem:[%s3045_s1 + $0x38] ss:$12 sps:$4 sm:$0xff]   ;;  %v2279_v47 = vld [vmem:[%s3045_s1 + $0x110] ss:$12 sps:$4 sm:$0xff]  }
  0x18   : > { %v2277_v43 = vld [vmem:[%s3045_s1 + $0x20] ss:$12 sps:$4 sm:$0xff]   ;;  %v2280_v49 = vld [vmem:[%s3045_s1 + $0xf8] ss:$12 sps:$4 sm:$0xff]   ;;  %v2282_v51 = vld [vmem:[%s3045_s1 + $0xc8] ss:$12 sps:$4 sm:$0xff]  }
  0x19   : > { %592 = vmatpush1.bf16.msra.mxu0 %v2246_v7  ;;  %629 = vmatpush1.bf16.msra.mxu1 %v2272_v38  ;;  %v2281_v50 = vld [vmem:[%s3045_s1 + $0xe0] ss:$12 sps:$4 sm:$0xff]   ;;  %v2680_v2 = vsel %vm769_vm2, %v2600_v27, 0  ;;  %v388_v3 = vld [vmem:[%s3046_s2 + $0x10] sm:$0xff] }
  0x1a   : > { %593 = vmatprep.subr.bf16.mxu0 %v2247_v8  ;;  %630 = vmatprep.subr.bf16.mxu1 %v2442_v28  ;;  %v2285_v38 = vld [vmem:[%s3049_s5 + $0x74] ss:$8 sps:$4 sm:$0xff]  }
  0x1d   : > { %594 = vmatpush1.bf16.msra.mxu0 %v2249_v9  ;;  %631 = vmatpush1.bf16.msra.mxu1 %v2273_v39 }
  0x1e   : > { %595 = vmatprep.subr.bf16.mxu0 %v2250_v10  ;;  %632 = vmatprep.subr.bf16.mxu1 %v2442_v28  ;;  %v2446_v10 = vmov 1  }
  0x21   : > { %596 = vmatpush1.bf16.msra.mxu0 %v2252_v12  ;;  %633 = vmatpush1.bf16.msra.mxu1 %v2274_v40  ;;  %v2283_v40 = vld [vmem:[%s3049_s5 + $0x70] ss:$8 sps:$4 sm:$0xff]  }
  0x22   : > { %597 = vmatprep.subr.bf16.mxu0 %v2253_v14  ;;  %634 = vmatprep.subr.bf16.mxu1 %v2442_v28 }
  0x25   : > { %598 = vmatpush1.bf16.msra.mxu0 %v2255_v15  ;;  %635 = vmatpush1.bf16.msra.mxu1 %v2275_v41  ;;  %v2288_v41 = vld [vmem:[%s3049_s5 + $0x64] ss:$8 sps:$4 sm:$0xff]  }
  0x26   : > { %599 = vmatprep.subr.bf16.mxu0 %v2256_v16  ;;  %636 = vmatprep.subr.bf16.mxu1 %v2442_v28 }
  0x29   : > { %600 = vmatpush1.bf16.msra.mxu0 %v2258_v17  ;;  %637 = vmatpush1.bf16.msra.mxu1 %v2276_v42  ;;  %v2286_v42 = vld [vmem:[%s3049_s5 + $0x60] ss:$8 sps:$4 sm:$0xff]  }
  0x2a   : > { %609 = vmatprep.subr.bf16.mxu0 %v2259_v18  ;;  %638 = vmatprep.subr.bf16.mxu1 %v2442_v28 }
  0x2d   : > { %610 = vmatpush2.bf16.msra.mxu0 %v2261_v19  ;;  %639 = vmatpush1.bf16.msra.mxu1 %v2277_v43  ;;  %v2291_v43 = vld [vmem:[%s3049_s5 + $0x54] ss:$8 sps:$4 sm:$0xff]  }
  0x2e   : > { %611 = vmatprep.subr.bf16.mxu0 %v2262_v20  ;;  %640 = vmatprep.subr.bf16.mxu1 %v2442_v28 }
  0x31   : > { %612 = vmatpush2.bf16.msra.mxu0 %v2264_v21  ;;  %641 = vmatpush1.bf16.msra.mxu1 %v2278_v45  ;;  %v2294_v45 = vld [vmem:[%s3049_s5 + $0x44] ss:$8 sps:$4 sm:$0xff]  }
  0x32   : > { %613 = vmatprep.subr.bf16.mxu0 %v2265_v22  ;;  %650 = vmatprep.subr.bf16.mxu1 %v2442_v28 }
  0x35   : > { %614 = vmatpush2.bf16.msra.mxu0 %v2267_v23  ;;  %651 = vmatpush2.bf16.msra.mxu1 %v2279_v47  ;;  %v2297_v47 = vld [vmem:[%s3049_s5 + $0x34] ss:$8 sps:$4 sm:$0xff]  }
  0x36   : > { %615 = vmatprep.subr.bf16.mxu0 %v2268_v24  ;;  %652 = vmatprep.subr.bf16.mxu1 %v2442_v28 }
  0x39   : > { %616 = vmatpush2.bf16.msra.mxu0 %v2270_v25  ;;  %653 = vmatpush2.bf16.msra.mxu1 %v2280_v49  ;;  %v2300_v49 = vld [vmem:[%s3049_s5 + $0x24] ss:$8 sps:$4 sm:$0xff]  }
  0x3a   : > { %2181 = vmatprep.subr.bf16.mxu0 %v2444_v36  ;;  %654 = vmatprep.subr.bf16.mxu1 %v2442_v28 }
  0x3c   : > { %618 = vmatmul.mubr.bf16.vlgmr.msra.gmra.mxu0 %v2600_v27 }
  0x3d   : > { %2189 = vmatprep.mubr.msk.bf16.mxu0 %vm2445_vm1, %v2444_v36  ;;  %655 = vmatpush2.bf16.msra.mxu1 %v2281_v50  ;;  %v2298_v50 = vld [vmem:[%s3049_s5 + $0x20] ss:$8 sps:$4 sm:$0xff]  }
  0x3e   : > { %656 = vmatprep.subr.bf16.mxu1 %v2442_v28 }
  0x41   : > { %657 = vmatpush2.bf16.msra.mxu1 %v2282_v51  ;;  %v2303_v51 = vld [vmem:[%s3049_s5 + $0x14] ss:$8 sps:$4 sm:$0xff]  }
  0x42   : > { %2004 = vmatprep.subr.msk.bf16.mxu1 %vm769_vm2, %v2553_v13 }
  0x44   : > { %659 = vmatmul.mubr.bf16.vlgmr.msra.gmra.mxu1 %v2600_v27  ;;  %v762_v27 = vld [vmem:[%s3048_s4] sm:$0xff] }
  0x45   : > { %807 = vmatprep.mubr.bf16.mxu1 %v2442_v28  ;;  %790 = vmatpush1.bf16.msra.mxu1 %v2680_v2 }
  0x46   : > { %2193 = vmatprep.subr.bf16.mxu1 %v2444_v36 }
  0xfc   : > { %v619_v30 = vpop.f32.mrf.mxu0 }
  0xfd   : > { %v620_v31 = vadd.f32 %v619_v30, %v386_v29 }
  0xfe   : > { %v621_v32 = vpop.f32.mrf.mxu0 }
  0xff   : > { %843 = vrot.lane.b32.xlu1 %v620_v31, %s2443_s11  ;;  %666 = vxpose.xlu0.b32.start.end [1/1] (short) (narrow) %v620_v31, 64  ;;  %v622_v46 = vadd.f32 %v621_v32, %v387_v44  ;;  %v2289_v44 = vld [vmem:[%s3049_s5 + $0x50] ss:$8 sps:$4 sm:$0xff]  }
 0x100   : > { %v623_v33 = vpop.f32.mrf.mxu0 }
 0x101   : > { %v698_v48 = vpack.c.bf16 %v622_v46, %v622_v46 }
 0x102   : > { %v624_v35 = vpop.f32.mrf.mxu0 }
 0x103   : > { %758 = vperm.xlu1 %2231, %v2612_v34  }
 0x104   : > { %v660_v4 = vpop.f32.mrf.mxu1 }
 0x105   : > { %v661_v5 = vadd.f32 %v660_v4, %v388_v3 }
 0x106   : > { %v662_v6 = vpop.f32.mrf.mxu1 }
 0x107   : > { %v878_v7 = vpack.c.bf16 %v661_v5, %v661_v5 }
 0x108   : > { %v663_v8 = vpop.f32.mrf.mxu1 }
 0x10a   : > { %v664_v9 = vpop.f32.mrf.mxu1 }
 0x144   : > { %704 = vrot.lane.b32.xlu0 %v698_v48, %s2443_s11  ;;  %v2295_v48 = vld [vmem:[%s3049_s5 + $0x30] ss:$8 sps:$4 sm:$0xff]  }
 0x162   : > { %1336 = vxpose.xlu0.b32.start.end [1/1] (short) (narrow) %v622_v46, 64  ;;  %v2292_v46 = vld [vmem:[%s3049_s5 + $0x40] ss:$8 sps:$4 sm:$0xff]  }
 0x171   : > { %v844_v52 = vpop.permute.xlu1 %843 }
 0x172   : > { %846 = vxpose.xlu1.b32.start.end [1/1] (short) (narrow) %v844_v52, 64  ;;  %v2301_v52 = vld [vmem:[%s3049_s5 + $0x10] ss:$8 sps:$4 sm:$0xff]  }
 0x17b   : > { %v682_v53 = vpop.trf.xlu0 }
 0x17e   : > { %v759_v11 = vpop.permute.xlu1 %758 }
 0x17f   : > { %v683_v54 = vpop.trf.xlu0 }
 0x180   : > { %v699_v0 = vpack.c.bf16 %v683_v54, %v682_v53  ;;  %v2306_v53 = vld [vmem:[%s3049_s5 + $0x4] ss:$8 sps:$4 sm:$0xff]   ;;  %v2304_v54 = vld [vmem:[%s3049_s5] ss:$8 sps:$4 sm:$0xff]  }
 0x183   : > { %v684_v55 = vpop.trf.xlu0 }
 0x187   : > { %v685_v56 = vpop.trf.xlu0 }
 0x188   : > { %v700_v63 = vpack.c.bf16 %v685_v56, %v684_v55  ;;  %v2309_v55 = vld [vmem:[%s3049_s5 + $0xb4] ss:$8 sps:$4 sm:$0xff]   ;;  %v2307_v56 = vld [vmem:[%s3049_s5 + $0xb0] ss:$8 sps:$4 sm:$0xff]  }
 0x18b   : > { %v686_v57 = vpop.trf.xlu0 }
 0x18f   : > { %v687_v58 = vpop.trf.xlu0 }
 0x190   : > { %v701_v62 = vpack.c.bf16 %v687_v58, %v686_v57  ;;  %2232 = vset.pattern.permute.xlu1 %v2446_v10  ;;  %v2312_v57 = vld [vmem:[%s3049_s5 + $0xa4] ss:$8 sps:$4 sm:$0xff]   ;;  %v2310_v58 = vld [vmem:[%s3049_s5 + $0xa0] ss:$8 sps:$4 sm:$0xff]  }
 0x193   : > { %v688_v59 = vpop.trf.xlu0 }
 0x197   : > { %v689_v60 = vpop.trf.xlu0 }
 0x198   : > { %v702_v61 = vpack.c.bf16 %v689_v60, %v688_v59  ;;  %v2315_v59 = vld [vmem:[%s3049_s5 + $0x94] ss:$8 sps:$4 sm:$0xff]   ;;  %v2313_v60 = vld [vmem:[%s3049_s5 + $0x90] ss:$8 sps:$4 sm:$0xff]  }
 0x19a   : > { %2182 = vmatpush3.bf16.msra.mxu0 %v702_v61  ;;  %v2318_v61 = vld [vmem:[%s3049_s5 + $0x84] ss:$8 sps:$4 sm:$0xff]  }
 0x19b   : > { %2183 = vmatprep.subr.bf16.mxu0 %v2444_v36 }
 0x19e   : > { %2184 = vmatpush3.bf16.msra.mxu0 %v701_v62  ;;  %v2316_v62 = vld [vmem:[%s3049_s5 + $0x80] ss:$8 sps:$4 sm:$0xff]  }
 0x19f   : > { %2185 = vmatprep.subr.bf16.mxu0 %v2444_v36 }
 0x1a2   : > { %2186 = vmatpush3.bf16.msra.mxu0 %v700_v63  ;;  %v2321_v63 = vld [vmem:[%s3049_s5 + $0x134] ss:$8 sps:$4 sm:$0xff]  }
 0x1a3   : > { %2187 = vmatprep.subr.bf16.mxu0 %v2444_v36 }
 0x1a6   : > { %2188 = vmatpush3.bf16.msra.mxu0 %v699_v0 }
 0x1a7   : > { %2008 = vmatprep.subr.msk.bf16.mxu0 %vm769_vm2, %v2553_v13  ;;  %1373 = vrot.lane.b32.xlu0 %v878_v7, %s2443_s11 }
 0x1ac   : > { %929 = vperm.xlu1 %2232, %v2612_v34  }
 0x1b6   : > { %v705_v1 = vpop.permute.xlu0 %704 }
 0x1b7   : > { %2190 = vmatmul.mubr.msk.bf16.vlgmr.msra.gmra.mxu0 %vm581_vm0, %v705_v1 }
 0x1b8   : > { %972 = vmatprep.mubr.bf16.mxu0 %v2442_v28  ;;  %955 = vmatpush1.bf16.msra.mxu0 %v2680_v2 }
 0x1b9   : > { %1131 = vmatprep.subr.bf16.mxu0 %v2321_v63 }
 0x1ee   : > { %v862_v12 = vpop.trf.xlu1 }
 0x1f2   : > { %v863_v14 = vpop.trf.xlu1 }
 0x1f3   : > { %v879_v39 = vpack.c.bf16 %v863_v14, %v862_v12  ;;  %v2007_v14 = vld [vmem:[%s3048_s4 + $0x8] sm:$0xff] }
 0x1f6   : > { %v864_v15 = vpop.trf.xlu1 }
 0x1fa   : > { %v865_v16 = vpop.trf.xlu1 }
 0x1fb   : > { %v880_v37 = vpack.c.bf16 %v865_v16, %v864_v15 }
 0x1fe   : > { %v866_v19 = vpop.trf.xlu1 }
 0x202   : > { %v867_v23 = vpop.trf.xlu1 }
 0x203   : > { %v881_v35 = vpack.c.bf16 %v867_v23, %v866_v19  ;;  %v2327_v19 = vld [vmem:[%s3049_s5 + $0x114] ss:$8 sps:$4 sm:$0xff]   ;;  %v2331_v23 = vld [vmem:[%s3049_s5 + $0xf0] ss:$8 sps:$4 sm:$0xff]  }
 0x206   : > { %v868_v24 = vpop.trf.xlu1 }
 0x20a   : > { %v869_v30 = vpop.trf.xlu1 }
 0x20b   : > { %v882_v33 = vpack.c.bf16 %v869_v30, %v868_v24  ;;  %v2333_v24 = vld [vmem:[%s3049_s5 + $0xf4] ss:$8 sps:$4 sm:$0xff]   ;;  %v2337_v30 = vld [vmem:[%s3049_s5 + $0xd0] ss:$8 sps:$4 sm:$0xff]  }
 0x277   : > { %v743_v17 = vpop.f32.mrf.mxu0 }
 0x278   : > { %v749_v18 = vmul.f32 0.015625, %v743_v17 }
 0x279   : > { %v2191_v20 = vpop.f32.mrf.mxu0 }
 0x27a   : > { %2427 = vtanh.f32 %v749_v18  ;;  %v2322_v18 = vld [vmem:[%s3049_s5 + $0x120] ss:$8 sps:$4 sm:$0xff]   ;;  %v2325_v20 = vld [vmem:[%s3049_s5 + $0x110] ss:$8 sps:$4 sm:$0xff]  }
 0x27b   : > { %v746_v21 = vpop.f32.mrf.mxu0 }
 0x27c   : > { %v2328_v21 = vld [vmem:[%s3049_s5 + $0x100] ss:$8 sps:$4 sm:$0xff]  }
 0x27d   : > { %v2192_v22 = vpop.f32.mrf.mxu0 }
 0x27e   : > { %v2330_v22 = vld [vmem:[%s3049_s5 + $0x104] ss:$8 sps:$4 sm:$0xff]  }
 0x287   : > { %v2428_v25 = vpop.eup %2427 }
 0x288   : > { %v761_v29 = vmul.f32 %v2428_v25, %v759_v11  ;;  %v930_v11 = vpop.permute.xlu1 %929  ;;  %v2336_v25 = vld [vmem:[%s3049_s5 + $0xe4] ss:$8 sps:$4 sm:$0xff]  }
 0x28a   : > { %v763_v31 = vadd.f32 %v762_v27, %v761_v29  ;;  %v2334_v27 = vld [vmem:[%s3049_s5 + $0xe0] ss:$8 sps:$4 sm:$0xff]   ;;  %v2339_v29 = vld [vmem:[%s3049_s5 + $0xd4] ss:$8 sps:$4 sm:$0xff]  }
 0x28c   : > { %v764_v32 = vpack.c.bf16 %v763_v31, %v763_v31  ;;  %v2342_v31 = vld [vmem:[%s3049_s5 + $0xc4] ss:$8 sps:$4 sm:$0xff]  }
 0x28e   : > { %2005 = vmatmul.mubr.msk.bf16.vlgmr.msra.gmra.mxu1 %vm765_vm3, %v764_v32  ;;  %v2340_v32 = vld [vmem:[%s3049_s5 + $0xc0] ss:$8 sps:$4 sm:$0xff]  }
 0x28f   : > { %2194 = vmatpush3.bf16.msra.mxu1 %v882_v33  ;;  %2201 = vmatprep.mubr.msk.bf16.mxu1 %vm2445_vm1, %v2444_v36  ;;  %v2345_v33 = vld [vmem:[%s3049_s5 + $0x174] ss:$8 sps:$4 sm:$0xff]  }
 0x290   : > { %2195 = vmatprep.subr.bf16.mxu1 %v2444_v36 }
 0x293   : > { %2196 = vmatpush3.bf16.msra.mxu1 %v881_v35  ;;  %v2343_v35 = vld [vmem:[%s3049_s5 + $0x170] ss:$8 sps:$4 sm:$0xff]  }
 0x294   : > { %2197 = vmatprep.subr.bf16.mxu1 %v2444_v36 }
 0x297   : > { %2198 = vmatpush3.bf16.msra.mxu1 %v880_v37  ;;  %v2348_v37 = vld [vmem:[%s3049_s5 + $0x164] ss:$8 sps:$4 sm:$0xff]  }
 0x298   : > { %2199 = vmatprep.subr.bf16.mxu1 %v2444_v36 }
 0x29b   : > { %2200 = vmatpush3.bf16.msra.mxu1 %v879_v39  ;;  %v2351_v39 = vld [vmem:[%s3049_s5 + $0x154] ss:$8 sps:$4 sm:$0xff]  }
 0x29c   : > { %1295 = vmatprep.subr.bf16.mxu1 %v2285_v38  ;;  %v2346_v38 = vld [vmem:[%s3049_s5 + $0x160] ss:$8 sps:$4 sm:$0xff]  }
 0x29e   : > { %2202 = vmatmul.mubr.msk.bf16.vlgmr.msra.gmra.mxu1 %vm581_vm0, %v878_v7 }
 0x29f   : > { %1296 = vmatpush1.bf16.msra.mxu1 %v2283_v40  ;;  %v2349_v40 = vld [vmem:[%s3049_s5 + $0x150] ss:$8 sps:$4 sm:$0xff]  }
 0x2a0   : > { %1297 = vmatprep.subr.bf16.mxu1 %v2288_v41  ;;  %v2354_v41 = vld [vmem:[%s3049_s5 + $0x144] ss:$8 sps:$4 sm:$0xff]  }
 0x2a3   : > { %1298 = vmatpush1.bf16.msra.mxu1 %v2286_v42  ;;  %v2352_v42 = vld [vmem:[%s3049_s5 + $0x140] ss:$8 sps:$4 sm:$0xff]  }
 0x2a4   : > { %1299 = vmatprep.subr.bf16.mxu1 %v2291_v43  ;;  %v2447_v43 = vmov 2  }
 0x2a5   : > { %2233 = vset.pattern.permute.xlu1 %v2447_v43  ;;  %2234 = vset.pattern.permute.xlu0 %v2447_v43  ;;  %v2391_v43 = vld [vmem:[%s3051_s7 + $0x70] ss:$8 sps:$4 sm:$0xff]  }
 0x2a6   : > { %1421 = vperm.xlu1 %2233, %v2612_v34  }
 0x2a7   : > { %1300 = vmatpush1.bf16.msra.mxu1 %v2289_v44  ;;  %v1352_v44 = vpop.trf.xlu0 }
 0x2a8   : > { %1301 = vmatprep.subr.bf16.mxu1 %v2294_v45 }
 0x2ab   : > { %1302 = vmatpush1.bf16.msra.mxu1 %v2292_v46  ;;  %v1353_v46 = vpop.trf.xlu0 }
 0x2ac   : > { %1303 = vmatprep.subr.bf16.mxu1 %v2297_v47 }
 0x2af   : > { %1304 = vmatpush1.bf16.msra.mxu1 %v2295_v48 }
 0x2b0   : > { %1305 = vmatprep.subr.bf16.mxu1 %v2300_v49 }
 0x2b3   : > { %1306 = vmatpush1.bf16.msra.mxu1 %v2298_v50  ;;  %v1354_v50 = vpop.trf.xlu0 }
 0x2b4   : > { %1307 = vmatprep.subr.bf16.mxu1 %v2303_v51 }
 0x2b7   : > { %1308 = vmatpush1.bf16.msra.mxu1 %v2301_v52  ;;  %v1355_v51 = vpop.trf.xlu0 }
 0x2b8   : > { %1309 = vmatprep.subr.bf16.mxu1 %v2306_v53  ;;  %v1369_v63 = vpack.c.bf16 %v1355_v51, %v1354_v50  ;;  %v2397_v50 = vld [vmem:[%s3051_s7 + $0x50] ss:$8 sps:$4 sm:$0xff]   ;;  %v2402_v51 = vld [vmem:[%s3051_s7 + $0x44] ss:$8 sps:$4 sm:$0xff]  }
 0x2bb   : > { %1310 = vmatpush1.bf16.msra.mxu1 %v2304_v54  ;;  %v1356_v52 = vpop.trf.xlu0 }
 0x2bc   : > { %1319 = vmatprep.subr.bf16.mxu1 %v2309_v55 }
 0x2bf   : > { %1320 = vmatpush2.bf16.msra.mxu1 %v2307_v56  ;;  %v1357_v53 = vpop.trf.xlu0 }
 0x2c0   : > { %1321 = vmatprep.subr.bf16.mxu1 %v2312_v57 }
 0x2c3   : > { %1322 = vmatpush2.bf16.msra.mxu1 %v2310_v58  ;;  %v1358_v54 = vpop.trf.xlu0 }
 0x2c4   : > { %1323 = vmatprep.subr.bf16.mxu1 %v2315_v59 }
 0x2c7   : > { %1324 = vmatpush2.bf16.msra.mxu1 %v2313_v60  ;;  %v1359_v58 = vpop.trf.xlu0 }
 0x2c8   : > { %1325 = vmatprep.subr.bf16.mxu1 %v2318_v61  ;;  %v1371_v34 = vpack.c.bf16 %v1359_v58, %v1358_v54  ;;  %v2403_v54 = vld [vmem:[%s3051_s7 + $0x30] ss:$8 sps:$4 sm:$0xff]  }
 0x2c9   : > { %v2409_v58 = vld [vmem:[%s3051_s7 + $0x10] ss:$8 sps:$4 sm:$0xff]  }
 0x2cb   : > { %1326 = vmatpush2.bf16.msra.mxu1 %v2316_v62  ;;  %v1370_v62 = vpack.c.bf16 %v1357_v53, %v1356_v52  ;;  %v2400_v52 = vld [vmem:[%s3051_s7 + $0x40] ss:$8 sps:$4 sm:$0xff]   ;;  %v2405_v53 = vld [vmem:[%s3051_s7 + $0x34] ss:$8 sps:$4 sm:$0xff]  }
 0x2cc   : > { %2086 = vmatprep.subr.msk.bf16.mxu1 %vm769_vm2, %v2553_v13 }
 0x34e   : > { %v809_v0 = vpop.f32.mrf.mxu1 }
 0x34f   : > { %v840_v4 = vpack.c.bf16 %v809_v0, %v809_v0  ;;  %v1368_v0 = vpack.c.bf16 %v1353_v46, %v1352_v44  ;;  %v2393_v44 = vld [vmem:[%s3051_s7 + $0x74] ss:$8 sps:$4 sm:$0xff]   ;;  %v2396_v46 = vld [vmem:[%s3051_s7 + $0x64] ss:$8 sps:$4 sm:$0xff]  }
 0x350   : > { %v811_v1 = vpop.f32.mrf.mxu1 }
 0x351   : > { %v841_v3 = vpack.c.bf16 %v811_v1, %v811_v1  ;;  %v1374_v1 = vpop.permute.xlu0 %1373 }
 0x352   : > { %v813_v5 = vpop.f32.mrf.mxu1 }
 0x353   : > { %2083 = vmatprep.mubr.msk.bf16.mxu1 %vm581_vm0, %v841_v3  ;;  %v2357_v3 = vld [vmem:[%s3049_s5 + $0x1f4] ss:$8 sps:$4 sm:$0xff]  }
 0x354   : > { %v814_v6 = vpop.f32.mrf.mxu1  ;;  %1328 = vmatmul.mubr.bf16.vlgmr.msra.gmra.mxu1 %v840_v4 }
 0x355   : > { %1447 = vmatpush1.bf16.msra.mxu1 %v2680_v2  ;;  %1464 = vmatprep.mubr.bf16.mxu1 %v2442_v28  ;;  %v2319_v2 = vld [vmem:[%s3049_s5 + $0x130] ss:$8 sps:$4 sm:$0xff]   ;;  %v2324_v28 = vld [vmem:[%s3049_s5 + $0x124] ss:$8 sps:$4 sm:$0xff]  }
 0x356   : > { %1623 = vmatprep.subr.bf16.mxu1 %v2357_v3 }
 0x35e   : > { %v920_v7 = vpop.f32.mrf.mxu1 }
 0x35f   : > { %v926_v13 = vmul.f32 0.015625, %v920_v7 }
 0x360   : > { %v2203_v8 = vpop.f32.mrf.mxu1 }
 0x361   : > { %2429 = vtanh.f32 %v926_v13 }
 0x362   : > { %v923_v9 = vpop.f32.mrf.mxu1 }
 0x364   : > { %v2204_v10 = vpop.f32.mrf.mxu1 }
 0x36e   : > { %v2430_v12 = vpop.eup %2429 }
 0x36f   : > { %v932_v15 = vmul.f32 %v2430_v12, %v930_v11  ;;  %v1422_v11 = vpop.permute.xlu1 %1421 }
 0x371   : > { %v935_v16 = vadd.f32 %v2007_v14, %v932_v15  ;;  %v2085_v14 = vld [vmem:[%s3048_s4 + $0x10] sm:$0xff] }
 0x373   : > { %v936_v17 = vpack.c.bf16 %v935_v16, %v935_v16 }
 0x375   : > { %2009 = vmatmul.mubr.msk.bf16.vlgmr.msra.gmra.mxu0 %vm765_vm3, %v936_v17 }
 0x376   : > { %1132 = vmatpush1.bf16.msra.mxu0 %v2319_v2  ;;  %v2355_v2 = vld [vmem:[%s3049_s5 + $0x1f0] ss:$8 sps:$4 sm:$0xff]  }
 0x377   : > { %1133 = vmatprep.subr.bf16.mxu0 %v2324_v28  ;;  %v2360_v28 = vld [vmem:[%s3049_s5 + $0x1e4] ss:$8 sps:$4 sm:$0xff]  }
 0x37a   : > { %1134 = vmatpush1.bf16.msra.mxu0 %v2322_v18  ;;  %v2358_v18 = vld [vmem:[%s3049_s5 + $0x1e0] ss:$8 sps:$4 sm:$0xff]  }
 0x37b   : > { %1135 = vmatprep.subr.bf16.mxu0 %v2327_v19  ;;  %v2363_v19 = vld [vmem:[%s3049_s5 + $0x1d4] ss:$8 sps:$4 sm:$0xff]  }
 0x37e   : > { %1136 = vmatpush1.bf16.msra.mxu0 %v2325_v20  ;;  %v2361_v20 = vld [vmem:[%s3049_s5 + $0x1d0] ss:$8 sps:$4 sm:$0xff]  }
 0x37f   : > { %1137 = vmatprep.subr.bf16.mxu0 %v2330_v22  ;;  %v2364_v22 = vld [vmem:[%s3049_s5 + $0x1c0] ss:$8 sps:$4 sm:$0xff]  }
 0x382   : > { %1138 = vmatpush1.bf16.msra.mxu0 %v2328_v21  ;;  %v2366_v21 = vld [vmem:[%s3049_s5 + $0x1c4] ss:$8 sps:$4 sm:$0xff]  }
 0x383   : > { %1139 = vmatprep.subr.bf16.mxu0 %v2333_v24  ;;  %v2367_v24 = vld [vmem:[%s3049_s5 + $0x1b0] ss:$8 sps:$4 sm:$0xff]  }
 0x386   : > { %1140 = vmatpush1.bf16.msra.mxu0 %v2331_v23  ;;  %v2369_v23 = vld [vmem:[%s3049_s5 + $0x1b4] ss:$8 sps:$4 sm:$0xff]  }
 0x387   : > { %1141 = vmatprep.subr.bf16.mxu0 %v2336_v25  ;;  %v2372_v25 = vld [vmem:[%s3049_s5 + $0x1a4] ss:$8 sps:$4 sm:$0xff]  }
 0x38a   : > { %1142 = vmatpush1.bf16.msra.mxu0 %v2334_v27  ;;  %v2370_v27 = vld [vmem:[%s3049_s5 + $0x1a0] ss:$8 sps:$4 sm:$0xff]  }
 0x38b   : > { %1143 = vmatprep.subr.bf16.mxu0 %v2339_v29  ;;  %v2375_v29 = vld [vmem:[%s3049_s5 + $0x194] ss:$8 sps:$4 sm:$0xff]  }
 0x38e   : > { %1144 = vmatpush1.bf16.msra.mxu0 %v2337_v30  ;;  %v2373_v30 = vld [vmem:[%s3049_s5 + $0x190] ss:$8 sps:$4 sm:$0xff]  }
 0x38f   : > { %1145 = vmatprep.subr.bf16.mxu0 %v2342_v31  ;;  %v2378_v31 = vld [vmem:[%s3049_s5 + $0x184] ss:$8 sps:$4 sm:$0xff]  }
 0x392   : > { %1146 = vmatpush1.bf16.msra.mxu0 %v2340_v32  ;;  %v2376_v32 = vld [vmem:[%s3049_s5 + $0x180] ss:$8 sps:$4 sm:$0xff]  }
 0x393   : > { %1155 = vmatprep.subr.bf16.mxu0 %v2345_v33  ;;  %v2381_v33 = vld [vmem:[%s3049_s5 + $0x234] ss:$8 sps:$4 sm:$0xff]  }
 0x396   : > { %1156 = vmatpush2.bf16.msra.mxu0 %v2343_v35  ;;  %v2379_v35 = vld [vmem:[%s3049_s5 + $0x230] ss:$8 sps:$4 sm:$0xff]  }
 0x397   : > { %1157 = vmatprep.subr.bf16.mxu0 %v2348_v37  ;;  %v2384_v37 = vld [vmem:[%s3049_s5 + $0x224] ss:$8 sps:$4 sm:$0xff]  }
 0x39a   : > { %1158 = vmatpush2.bf16.msra.mxu0 %v2346_v38  ;;  %v2382_v38 = vld [vmem:[%s3049_s5 + $0x220] ss:$8 sps:$4 sm:$0xff]  }
 0x39b   : > { %1159 = vmatprep.subr.bf16.mxu0 %v2351_v39  ;;  %v2387_v39 = vld [vmem:[%s3049_s5 + $0x214] ss:$8 sps:$4 sm:$0xff]  }
 0x39e   : > { %1160 = vmatpush2.bf16.msra.mxu0 %v2349_v40  ;;  %v2385_v40 = vld [vmem:[%s3049_s5 + $0x210] ss:$8 sps:$4 sm:$0xff]  }
 0x39f   : > { %1161 = vmatprep.subr.bf16.mxu0 %v2354_v41  ;;  %v2390_v41 = vld [vmem:[%s3049_s5 + $0x204] ss:$8 sps:$4 sm:$0xff]  }
 0x3a2   : > { %1162 = vmatpush2.bf16.msra.mxu0 %v2352_v42  ;;  %v2388_v42 = vld [vmem:[%s3049_s5 + $0x200] ss:$8 sps:$4 sm:$0xff]  }
 0x3a3   : > { %2205 = vmatprep.subr.bf16.mxu0 %v2444_v36 }
 0x414   : > { %v2857_v45 = vpop.f32.mrf.mxu1 }
 0x416   : > { %v2859_v47 = vpop.f32.mrf.mxu1 }
 0x418   : > { %v1333_v48 = vpop.f32.mrf.mxu1 }
 0x419   : > { %v2394_v48 = vld [vmem:[%s3051_s7 + $0x60] ss:$8 sps:$4 sm:$0xff]  }
 0x41a   : > { %v1334_v49 = vpop.f32.mrf.mxu1 }
 0x41b   : > { %v2399_v49 = vld [vmem:[%s3051_s7 + $0x54] ss:$8 sps:$4 sm:$0xff]  }
 0x435   : > { %v974_v55 = vpop.f32.mrf.mxu0 }
 0x436   : > { %v1006_v59 = vpack.c.bf16 %v974_v55, %v974_v55  ;;  %v2408_v55 = vld [vmem:[%s3051_s7 + $0x24] ss:$8 sps:$4 sm:$0xff]  }
 0x437   : > { %v976_v56 = vpop.f32.mrf.mxu0 }
 0x438   : > { %v1007_v57 = vpack.c.bf16 %v976_v56, %v976_v56  ;;  %v2406_v56 = vld [vmem:[%s3051_s7 + $0x20] ss:$8 sps:$4 sm:$0xff]  }
 0x439   : > { %v978_v60 = vpop.f32.mrf.mxu0 }
 0x43a   : > { %2058 = vmatprep.mubr.msk.bf16.mxu0 %vm581_vm0, %v1007_v57  ;;  %v2411_v57 = vld [vmem:[%s3051_s7 + $0x14] ss:$8 sps:$4 sm:$0xff]   ;;  %v2412_v60 = vld [vmem:[%s3051_s7] ss:$8 sps:$4 sm:$0xff]  }
 0x43b   : > { %v979_v61 = vpop.f32.mrf.mxu0  ;;  %1164 = vmatmul.mubr.bf16.vlgmr.msra.gmra.mxu0 %v1006_v59  ;;  %v2414_v59 = vld [vmem:[%s3051_s7 + $0x4] ss:$8 sps:$4 sm:$0xff]  }
 0x43c   : > { %2206 = vmatpush3.bf16.msra.mxu0 %v1371_v34  ;;  %2213 = vmatprep.mubr.msk.bf16.mxu0 %vm2445_vm1, %v2444_v36  ;;  %v2417_v34 = vld [vmem:[%s3051_s7 + $0xb4] ss:$8 sps:$4 sm:$0xff]   ;;  %v2415_v61 = vld [vmem:[%s3051_s7 + $0xb0] ss:$8 sps:$4 sm:$0xff]  }
 0x43d   : > { %2207 = vmatprep.subr.bf16.mxu0 %v2444_v36 }
 0x440   : > { %2208 = vmatpush3.bf16.msra.mxu0 %v1370_v62 }
 0x441   : > { %2209 = vmatprep.subr.bf16.mxu0 %v2444_v36 }
 0x444   : > { %2210 = vmatpush3.bf16.msra.mxu0 %v1369_v63 }
 0x445   : > { %2211 = vmatprep.subr.bf16.mxu0 %v2444_v36 }
 0x448   : > { %2212 = vmatpush3.bf16.msra.mxu0 %v1368_v0 }
 0x449   : > { %1849 = vmatprep.subr.bf16.mxu0 %v2393_v44 }
 0x44b   : > { %2214 = vmatmul.mubr.msk.bf16.vlgmr.msra.gmra.mxu0 %vm581_vm0, %v1374_v1 }
 0x44c   : > { %1850 = vmatpush1.bf16.msra.mxu0 %v2391_v43 }
 0x44d   : > { %1851 = vmatprep.subr.bf16.mxu0 %v2396_v46 }
 0x450   : > { %1852 = vmatpush1.bf16.msra.mxu0 %v2394_v48 }
 0x451   : > { %1853 = vmatprep.subr.bf16.mxu0 %v2399_v49 }
 0x454   : > { %1854 = vmatpush1.bf16.msra.mxu0 %v2397_v50 }
 0x455   : > { %1855 = vmatprep.subr.bf16.mxu0 %v2402_v51 }
 0x458   : > { %1856 = vmatpush1.bf16.msra.mxu0 %v2400_v52 }
 0x459   : > { %1857 = vmatprep.subr.bf16.mxu0 %v2405_v53 }
 0x45c   : > { %1858 = vmatpush1.bf16.msra.mxu0 %v2403_v54 }
 0x45d   : > { %1859 = vmatprep.subr.bf16.mxu0 %v2408_v55 }
 0x460   : > { %1860 = vmatpush1.bf16.msra.mxu0 %v2406_v56 }
 0x461   : > { %1861 = vmatprep.subr.bf16.mxu0 %v2411_v57 }
 0x464   : > { %1862 = vmatpush1.bf16.msra.mxu0 %v2409_v58 }
 0x465   : > { %1863 = vmatprep.subr.bf16.mxu0 %v2414_v59 }
 0x468   : > { %1864 = vmatpush1.bf16.msra.mxu0 %v2412_v60 }
 0x469   : > { %1873 = vmatprep.subr.bf16.mxu0 %v2417_v34 }
 0x46c   : > { %1874 = vmatpush2.bf16.msra.mxu0 %v2415_v61 }
 0x4fb   : > { %v2871_v4 = vpop.f32.mrf.mxu0 }
 0x4fd   : > { %v2873_v5 = vpop.f32.mrf.mxu0 }
 0x4ff   : > { %v1169_v6 = vpop.f32.mrf.mxu0 }
 0x501   : > { %v1170_v7 = vpop.f32.mrf.mxu0 }
 0x502   : > { %v2420_v7 = vld [vmem:[%s3051_s7 + $0xa4] ss:$8 sps:$4 sm:$0xff]  }
 0x503   : > { %1875 = vmatprep.subr.bf16.mxu0 %v2420_v7 }
 0x50b   : > { %v1412_v13 = vpop.f32.mrf.mxu0 }
 0x50c   : > { %v1418_v8 = vmul.f32 0.015625, %v1412_v13  ;;  %v2418_v13 = vld [vmem:[%s3051_s7 + $0xa0] ss:$8 sps:$4 sm:$0xff]  }
 0x50d   : > { %v2215_v9 = vpop.f32.mrf.mxu0  ;;  %1876 = vmatpush2.bf16.msra.mxu0 %v2418_v13 }
 0x50e   : > { %2431 = vtanh.f32 %v1418_v8  ;;  %v2423_v8 = vld [vmem:[%s3051_s7 + $0x94] ss:$8 sps:$4 sm:$0xff]   ;;  %v2421_v9 = vld [vmem:[%s3051_s7 + $0x90] ss:$8 sps:$4 sm:$0xff]  }
 0x50f   : > { %v1415_v36 = vpop.f32.mrf.mxu0  ;;  %1877 = vmatprep.subr.bf16.mxu0 %v2423_v8 }
 0x510   : > { %v2424_v36 = vld [vmem:[%s3051_s7 + $0x80] ss:$8 sps:$4 sm:$0xff]  }
 0x511   : > { %v2216_v10 = vpop.f32.mrf.mxu0  ;;  %1878 = vmatpush2.bf16.msra.mxu0 %v2421_v9 }
 0x512   : > { %v2426_v10 = vld [vmem:[%s3051_s7 + $0x84] ss:$8 sps:$4 sm:$0xff]  }
 0x513   : > { %1879 = vmatprep.subr.bf16.mxu0 %v2426_v10 }
 0x515   : > { %1880 = vmatpush2.bf16.msra.mxu0 %v2424_v36 }
 0x51b   : > { %v2432_v12 = vpop.eup %2431 }
 0x51c   : > { %v1424_v15 = vmul.f32 %v2432_v12, %v1422_v11  ;;  %v1668_v11 = vlaneseq }
 0x51e   : > { %v1427_v16 = vadd.f32 %v2085_v14, %v1424_v15  ;;  %v1669_v12 = vshrl.u32 %v1668_v11, 7  ;;  %v1666_v15 = vld [vmem:[%s3050_s6] sm:$0x3] }
 0x520   : > { %v1428_v17 = vpack.c.bf16 %v1427_v16, %v1427_v16  ;;  %v1670_v14 = vsub.s32 0, %v1669_v12  ;;  %v1674_v16 = vsub.s32 1, %v1669_v12 }
 0x522   : > { %2087 = vmatmul.mubr.msk.bf16.vlgmr.msra.gmra.mxu1 %vm765_vm3, %v1428_v17  ;;  %v1671_v17 = vrot.slane %v1666_v15, %v1670_v14 }
 0x523   : > { %1624 = vmatpush1.bf16.msra.mxu1 %v2355_v2  ;;  %v1330_v2 = vadd.f32 %v2857_v45, %v2871_v4 }
 0x524   : > { %1625 = vmatprep.subr.bf16.mxu1 %v2360_v28 }
 0x527   : > { %1626 = vmatpush1.bf16.msra.mxu1 %v2358_v18  ;;  %v1332_v18 = vadd.f32 %v2859_v47, %v2873_v5 }
 0x528   : > { %1627 = vmatprep.subr.bf16.mxu1 %v2363_v19 }
 0x52b   : > { %1628 = vmatpush1.bf16.msra.mxu1 %v2361_v20  ;;  %v1675_v20 = vrot.slane %v1666_v15, %v1674_v16 }
 0x52c   : > { %1629 = vmatprep.subr.bf16.mxu1 %v2366_v21 }
 0x52f   : > { %1630 = vmatpush1.bf16.msra.mxu1 %v2364_v22 }
 0x530   : > { %1631 = vmatprep.subr.bf16.mxu1 %v2369_v23 }
 0x533   : > { %1632 = vmatpush1.bf16.msra.mxu1 %v2367_v24 }
 0x534   : > { %1633 = vmatprep.subr.bf16.mxu1 %v2372_v25 }
 0x537   : > { %1634 = vmatpush1.bf16.msra.mxu1 %v2370_v27 }
 0x538   : > { %1635 = vmatprep.subr.bf16.mxu1 %v2375_v29 }
 0x53b   : > { %1636 = vmatpush1.bf16.msra.mxu1 %v2373_v30 }
 0x53c   : > { %1637 = vmatprep.subr.bf16.mxu1 %v2378_v31  ;;  %v2433_v31 = vld [vmem:[%s2541_s13 + $0x8] sm:$0xff] }
 0x53f   : > { %1638 = vmatpush1.bf16.msra.mxu1 %v2376_v32 }
 0x540   : > { %1647 = vmatprep.subr.bf16.mxu1 %v2381_v33 }
 0x543   : > { %1648 = vmatpush2.bf16.msra.mxu1 %v2379_v35  ;;  %v1714_v35 = vld [vmem:[%s3052_s8] sm:$0x3] }
 0x544   : > { %1649 = vmatprep.subr.bf16.mxu1 %v2384_v37  ;;  %v1719_v37 = vrot.slane %v1714_v35, %v1670_v14 }
 0x547   : > { %1650 = vmatpush2.bf16.msra.mxu1 %v2382_v38  ;;  %v1723_v38 = vrot.slane %v1714_v35, %v1674_v16 }
 0x548   : > { %1651 = vmatprep.subr.bf16.mxu1 %v2387_v39 }
 0x54b   : > { %1652 = vmatpush2.bf16.msra.mxu1 %v2385_v40 }
 0x54c   : > { %1653 = vmatprep.subr.bf16.mxu1 %v2390_v41 }
 0x54f   : > { %1654 = vmatpush2.bf16.msra.mxu1 %v2388_v42 }
 0x5e2   : > { %v1466_v62 = vpop.f32.mrf.mxu1 }
 0x5e3   : > { %v1498_v1 = vpack.c.bf16 %v1466_v62, %v1466_v62 }
 0x5e4   : > { %v1468_v63 = vpop.f32.mrf.mxu1 }
 0x5e5   : > { %v1499_v0 = vpack.c.bf16 %v1468_v63, %v1468_v63 }
 0x5e6   : > { %v1470_v3 = vpop.f32.mrf.mxu1 }
 0x5e7   : > { %2136 = vmatprep.mubr.msk.bf16.mxu1 %vm581_vm0, %v1499_v0 }
 0x5e8   : > { %v1471_v6 = vpop.f32.mrf.mxu1  ;;  %1656 = vmatmul.mubr.bf16.vlgmr.msra.gmra.mxu1 %v1498_v1 }
 0x6a8   : > { %v1657_v28 = vpop.f32.mrf.mxu1 }
 0x6a9   : > { %v1664_v19 = vadd.f32 %v1657_v28, %v1330_v2 }
 0x6aa   : > { %v1659_v21 = vpop.f32.mrf.mxu1 }
 0x6ab   : > { %v1678_v22 = vadd.f32 %v1671_v17, %v1664_v19  ;;  %v1665_v23 = vadd.f32 %v1659_v21, %v1332_v18 }
 0x6ac   : > { %v1661_v24 = vpop.f32.mrf.mxu1 }
 0x6ad   : > { %v1680_v25 = vadd.f32 %v1678_v22, %v2596_v26  ;;  %v1679_v27 = vadd.f32 %v1675_v20, %v1665_v23 }
 0x6ae   : > { %v1662_v29 = vpop.f32.mrf.mxu1 }
 0x6af   : > { %vm1682_vm4 = vcmp.ge.f32.partialorder %v1680_v25, 0.0  ;;  %v1684_v30 = vmul.f32 0.1, %v1680_v25  ;;  %v1681_v32 = vadd.f32 %v2433_v31, %v1679_v27 }
 0x6b1   : > { %vm1683_vm5 = vcmp.ge.f32.partialorder %v1681_v32, 0.0  ;;  %v1685_v45 = vmul.f32 0.1, %v1681_v32  ;;  %v1686_v4 = vsel %vm1682_vm4, %v1680_v25, %v1684_v30 }
 0x6b2   : > { %v1712_v5 = vpack.c.bf16 %v1686_v4, %v1686_v4 }
 0x6b3   : > { %v1687_v33 = vsel %vm1683_vm5, %v1681_v32, %v1685_v45 }
 0x6b4   : > { %v1713_v47 = vpack.c.bf16 %v1687_v33, %v1687_v33 }
 0x6b6   : > { %2161 = vmatprep.mubr.msk.bf16.mxu0 %vm581_vm0, %v1713_v47 }
 0x6b7   : > { %1882 = vmatmul.mubr.bf16.vlgmr.msra.gmra.mxu0 %v1712_v5 }
 0x777   : > { %v1883_v39 = vpop.f32.mrf.mxu0 }
 0x778   : > { %v1884_v40 = vadd.f32 %v1883_v39, %v1719_v37 }
 0x779   : > { %v1885_v41 = vpop.f32.mrf.mxu0 }
 0x77a   : > { %v1890_v42 = vadd.f32 %v1884_v40, %v2596_v26  ;;  %v1886_v43 = vadd.f32 %v1885_v41, %v1723_v38 }
 0x77b   : > { %v1887_v44 = vpop.f32.mrf.mxu0 }
 0x77c   : > { %vm1892_vm6 = vcmp.ge.f32.partialorder %v1890_v42, 0.0  ;;  %v1894_v46 = vmul.f32 0.1, %v1890_v42  ;;  %v1891_v48 = vadd.f32 %v2433_v31, %v1886_v43 }
 0x77d   : > { %v1888_v49 = vpop.f32.mrf.mxu0 }
 0x77e   : > { %v1896_v50 = vsel %vm1892_vm6, %v1890_v42, %v1894_v46  ;;  %vm1893_vm7 = vcmp.ge.f32.partialorder %v1891_v48, 0.0  ;;  %v1895_v51 = vmul.f32 0.1, %v1891_v48 }
 0x77f   : > { %1898 = vst [vmem:[%s332_s27] sm:$0xff] %v1896_v50 }
 0x780   : > { %v1897_v52 = vsel %vm1893_vm7, %v1891_v48, %v1895_v51 }
 0x781   : > { %1899 = vst.msk [vmem:[%s332_s27 + $0x8] sm:$0xff] %vm581_vm0, %v1897_v52 }
 0x782 PF: > { %s19_s30 = sadd.s32 1, %s2440_s30  }
 0x783   : > { %p16_p4 = scmp.ge.s32.totalorder %s19_s30, 10  }
 0x785   :  { %18 = sbr.rel (!%p16_p4) target bundleno = 1 (0x1), region = 90 }

// kernel: _lambda_.17
= control target key start
LH: loop header
LB: loop body
LE: loop exit
PB: predicated region body
PF: predicated region fallthrough
CT: control target
= control target key end

     0   :  { %s2052_s27 = smov 0   ;;  %s2462_s0 = inlined_call_operand.vmem [shape: f32[8,8,192], index: 0, kind: input, shape index: {}, may-alias: {0,1}]   ;;  %s2463_s1 = inlined_call_operand.vmem [shape: f32[8,8,192], index: 1, kind: input, shape index: {}, may-alias: {0,1}]   ;;  %s2464_s2 = inlined_call_operand.vmem [shape: bf16[192,192], index: 2, kind: input, shape index: {}]   ;;  %s2465_s3 = inlined_call_operand.vmem [shape: f32[1,192], index: 3, kind: input, shape index: {}]   ;;  %s2466_s4 = inlined_call_operand.vmem [shape: bf16[192,384], index: 4, kind: input, shape index: {}]   ;;  %s2467_s5 = inlined_call_operand.vmem [shape: f32[1,384], index: 5, kind: input, shape index: {}]   ;;  %s2468_s6 = inlined_call_operand.vmem [shape: bf16[3,64,192], index: 6, kind: input, shape index: {}]   ;;  %s2469_s7 = inlined_call_operand.vmem [shape: f32[1,192], index: 7, kind: input, shape index: {}]   ;;  %s2470_s8 = inlined_call_operand.vmem [shape: f32[8,8,192], index: 8, kind: output, shape index: {}]  }
   0x1 LB: > { %s1654_s28 = sadd.s32 4294967295, %s2001_s27   ;;  %p1658_p0 = scmp.ge.s32.totalorder %s2001_s27, 1  ;;  %s2001_s27 = sphi %s2052_s27, %s18_s27  }
   0x2   : > { %p272_p1 = scmp.lt.s32.totalorder %s2001_s27, 9 }
   0x4   : > { %p273_p2 = pnand %p1658_p0, %p272_p1 }
   0x5   : > { %p311_p3 = scmp.lt.s32.totalorder (!%p273_p2), %s1654_s28, 7 }
   0x6   : > { %276 = sbr.rel (%p273_p2) target bundleno = 1685 (0x695), region = 52 }
   0xb   : > { %v1869_v0 = vld [vmem:[%s2466_s4 + $0xac] ss:$12 sps:$4 sm:$0xff]   ;;  %v1871_v1 = vld [vmem:[%s2466_s4 + $0xa8] ss:$12 sps:$4 sm:$0xff]   ;;  %v1874_v3 = vld [vmem:[%s2466_s4 + $0x90] ss:$12 sps:$4 sm:$0xff]   ;;  %v359_v56 = vlaneseq }
   0xc   : > { %796 = vmatprep.subr.bf16.mxu1 %v1869_v0  ;;  %v1872_v2 = vld [vmem:[%s2466_s4 + $0x94] ss:$12 sps:$4 sm:$0xff]   ;;  %v1875_v4 = vld [vmem:[%s2466_s4 + $0x7c] ss:$12 sps:$4 sm:$0xff]   ;;  %s2472_s28 = smov (!%p311_p3, %s1654_s28), 7  ;;  %vm489_vm0 = vcmask 523264  }
   0xd   : > { %797 = vmatpush1.bf16.msra.mxu1 %v1871_v1  ;;  %v1877_v5 = vld [vmem:[%s2466_s4 + $0x78] ss:$12 sps:$4 sm:$0xff]   ;;  %s2081_s21 = sshll.u32 %s2472_s28, 4  ;;  %v1880_v7 = vld [vmem:[%s2466_s4 + $0x60] ss:$12 sps:$4 sm:$0xff]   ;;  %v2240_v57 = vshrl.u32 %v359_v56, 7 }
   0xe   : > { %798 = vmatprep.subr.bf16.mxu1 %v1872_v2  ;;  %v1878_v6 = vld [vmem:[%s2466_s4 + $0x64] ss:$12 sps:$4 sm:$0xff]   ;;  %v1881_v8 = vld [vmem:[%s2466_s4 + $0x4c] ss:$12 sps:$4 sm:$0xff]   ;;  %s2093_s30 = scalar_lea.vmem %s2463_s1, %s2081_s21  ;;  %v1883_v9 = vld [vmem:[%s2466_s4 + $0x48] ss:$12 sps:$4 sm:$0xff]   ;;  %s2155_s26 = scalar_lea.vmem %s2462_s0, %s2081_s21 }
   0xf   : > { %v1884_v10 = vld [vmem:[%s2466_s4 + $0x34] ss:$12 sps:$4 sm:$0xff]   ;;  %v330_v11 = vld [vmem:[%s2093_s30 + $0x8] sm:$0xff]  ;;  %v1907_v14 = vld [vmem:[%s2464_s2 + $0x70] ss:$8 sps:$4 sm:$0xff]   ;;  %v2243_v58 = vsub.s32 0, %v2240_v57  ;;  %s325_s15 = scalar_lea.vmem %s2470_s8, %s2081_s21 }
  0x10   : > { %v2102_v12 = vpack.c.bf16 %v330_v11, %v330_v11  ;;  %v1905_v13 = vld [vmem:[%s2464_s2 + $0x74] ss:$8 sps:$4 sm:$0xff]   ;;  %v1908_v15 = vld [vmem:[%s2464_s2 + $0x64] ss:$8 sps:$4 sm:$0xff]   ;;  %v1910_v18 = vld [vmem:[%s2464_s2 + $0x60] ss:$8 sps:$4 sm:$0xff]  }
  0x11   : > { %799 = vmatpush1.bf16.msra.mxu1 %v1874_v3  ;;  %v1886_v16 = vld [vmem:[%s2466_s4 + $0x30] ss:$12 sps:$4 sm:$0xff]   ;;  %493 = vmatprep.subr.bf16.mxu0 %v1905_v13  ;;  %v1889_v20 = vld [vmem:[%s2466_s4 + $0x18] ss:$12 sps:$4 sm:$0xff]   ;;  %v1892_v24 = vld [vmem:[%s2466_s4] ss:$12 sps:$4 sm:$0xff]  }
  0x12   : > { %800 = vmatprep.subr.bf16.mxu1 %v1875_v4  ;;  %1726 = vmatprep.mubr.msk.bf16.mxu1 %vm489_vm0, %v2102_v12  ;;  %v1887_v17 = vld [vmem:[%s2466_s4 + $0x1c] ss:$12 sps:$4 sm:$0xff]   ;;  %v1890_v21 = vld [vmem:[%s2466_s4 + $0x4] ss:$12 sps:$4 sm:$0xff]   ;;  %v1893_v25 = vld [vmem:[%s2466_s4 + $0x10c] ss:$12 sps:$4 sm:$0xff]  }
  0x13   : > { %494 = vmatpush1.bf16.msra.mxu0 %v1907_v14  ;;  %v1911_v19 = vld [vmem:[%s2464_s2 + $0x54] ss:$8 sps:$4 sm:$0xff]   ;;  %v1913_v22 = vld [vmem:[%s2464_s2 + $0x50] ss:$8 sps:$4 sm:$0xff]   ;;  %v1914_v23 = vld [vmem:[%s2464_s2 + $0x44] ss:$8 sps:$4 sm:$0xff]  }
  0x14   : > { %495 = vmatprep.subr.bf16.mxu0 %v1908_v15  ;;  %v1916_v26 = vld [vmem:[%s2464_s2 + $0x40] ss:$8 sps:$4 sm:$0xff]   ;;  %v1917_v27 = vld [vmem:[%s2464_s2 + $0x34] ss:$8 sps:$4 sm:$0xff]   ;;  %v1919_v30 = vld [vmem:[%s2464_s2 + $0x30] ss:$8 sps:$4 sm:$0xff]  }
  0x15   : > { %801 = vmatpush1.bf16.msra.mxu1 %v1877_v5  ;;  %v1895_v28 = vld [vmem:[%s2466_s4 + $0x108] ss:$12 sps:$4 sm:$0xff]   ;;  %v1898_v31 = vld [vmem:[%s2466_s4 + $0xf0] ss:$12 sps:$4 sm:$0xff]   ;;  %v1920_v32 = vld [vmem:[%s2464_s2 + $0x24] ss:$8 sps:$4 sm:$0xff]  }
  0x16   : > { %802 = vmatprep.subr.bf16.mxu1 %v1878_v6  ;;  %v1896_v29 = vld [vmem:[%s2466_s4 + $0xf4] ss:$12 sps:$4 sm:$0xff]   ;;  %v2173_v33 = vld [vmem:[%s2155_s26 + $0x8] sm:$0xff]  ;;  %v1901_v38 = vld [vmem:[%s2466_s4 + $0xd8] ss:$12 sps:$4 sm:$0xff]   ;;  %v2251_v60 = vsub.s32 1, %v2240_v57 }
  0x17   : > { %496 = vmatpush1.bf16.msra.mxu0 %v1910_v18  ;;  %v1899_v34 = vld [vmem:[%s2466_s4 + $0xdc] ss:$12 sps:$4 sm:$0xff]   ;;  %v356_v35 = vpack.c.bf16 %v2173_v33, %v2173_v33  ;;  %v1902_v39 = vld [vmem:[%s2466_s4 + $0xc4] ss:$12 sps:$4 sm:$0xff]   ;;  %v1904_v42 = vld [vmem:[%s2466_s4 + $0xc0] ss:$12 sps:$4 sm:$0xff]  }
  0x18   : > { %497 = vmatprep.subr.bf16.mxu0 %v1911_v19  ;;  %v1922_v36 = vld [vmem:[%s2464_s2 + $0x20] ss:$8 sps:$4 sm:$0xff]   ;;  %v1923_v37 = vld [vmem:[%s2464_s2 + $0x14] ss:$8 sps:$4 sm:$0xff]   ;;  %v1925_v40 = vld [vmem:[%s2464_s2 + $0x10] ss:$8 sps:$4 sm:$0xff]  }
  0x19   : > { %803 = vmatpush1.bf16.msra.mxu1 %v1880_v7  ;;  %1689 = vmatprep.mubr.msk.bf16.mxu0 %vm489_vm0, %v356_v35  ;;  %v1926_v41 = vld [vmem:[%s2464_s2 + $0x4] ss:$8 sps:$4 sm:$0xff]   ;;  %v1928_v44 = vld [vmem:[%s2464_s2] ss:$8 sps:$4 sm:$0xff]   ;;  %v1929_v45 = vld [vmem:[%s2464_s2 + $0xb4] ss:$8 sps:$4 sm:$0xff]  }
  0x1a   : > { %804 = vmatprep.subr.bf16.mxu1 %v1881_v8  ;;  %v329_v43 = vld [vmem:[%s2093_s30] sm:$0xff]  ;;  %v1931_v47 = vld [vmem:[%s2464_s2 + $0xb0] ss:$8 sps:$4 sm:$0xff]   ;;  %v1935_v50 = vld [vmem:[%s2464_s2 + $0x94] ss:$8 sps:$4 sm:$0xff]   ;;  %v2004_v6 = vmov 0.0  }
  0x1b   : > { %498 = vmatpush1.bf16.msra.mxu0 %v1913_v22  ;;  %v2209_v46 = vpack.c.bf16 %v329_v43, %v329_v43  ;;  %v1932_v48 = vld [vmem:[%s2464_s2 + $0xa4] ss:$8 sps:$4 sm:$0xff]   ;;  %v1934_v49 = vld [vmem:[%s2464_s2 + $0xa0] ss:$8 sps:$4 sm:$0xff]   ;;  %v1937_v51 = vld [vmem:[%s2464_s2 + $0x90] ss:$8 sps:$4 sm:$0xff]  }
  0x1c   : > { %499 = vmatprep.subr.bf16.mxu0 %v1914_v23  ;;  %v1938_v52 = vld [vmem:[%s2464_s2 + $0x84] ss:$8 sps:$4 sm:$0xff]   ;;  %v1940_v53 = vld [vmem:[%s2464_s2 + $0x80] ss:$8 sps:$4 sm:$0xff]   ;;  %vm2005_vm1 = vmmov 0   ;;  %vm968_vm2 = vcmask 1043456  }
  0x1d   : > { %805 = vmatpush1.bf16.msra.mxu1 %v1883_v9  ;;  %v2234_v54 = vld [vmem:[%s2155_s26] sm:$0xff]  ;;  %s2003_s26 = smov 64   ;;  %vm964_vm3 = vcmask 64512  }
  0x1e   : > { %806 = vmatprep.subr.bf16.mxu1 %v1884_v10  ;;  %v355_v55 = vpack.c.bf16 %v2234_v54, %v2234_v54  ;;  %v2248_v59 = vld [vmem:[%s2467_s5] sm:$0x7]  ;;  %v1942_v35 = vld [vmem:[%s2466_s4 + $0x98] ss:$12 sps:$4 sm:$0xff]  }
  0x1f   : > { %500 = vmatpush1.bf16.msra.mxu0 %v1916_v26  ;;  %v589_v61 = vrot.slane %v2248_v59, %v2243_v58  ;;  %v593_v62 = vrot.slane %v2248_v59, %v2251_v60  ;;  %v357_v7 = vld [vmem:[%s2465_s3] sm:$0x3]  ;;  %v1950_v43 = vld [vmem:[%s2466_s4 + $0xf8] ss:$12 sps:$4 sm:$0xff]  }
  0x20   : > { %501 = vmatprep.subr.bf16.mxu0 %v1917_v27  ;;  %v366_v9 = vrot.slane %v357_v7, %v2251_v60 }
  0x21   : > { %807 = vmatpush1.bf16.msra.mxu1 %v1886_v16 }
  0x22   : > { %808 = vmatprep.subr.bf16.mxu1 %v1887_v17 }
  0x23   : > { %502 = vmatpush1.bf16.msra.mxu0 %v1919_v30 }
  0x24   : > { %503 = vmatprep.subr.bf16.mxu0 %v1920_v32  ;;  %v2006_v32 = vmov 0  }
  0x25   : > { %809 = vmatpush1.bf16.msra.mxu1 %v1889_v20 }
  0x26   : > { %810 = vmatprep.subr.bf16.mxu1 %v1890_v21 }
  0x27   : > { %504 = vmatpush1.bf16.msra.mxu0 %v1922_v36  ;;  %v1943_v36 = vld [vmem:[%s2466_s4 + $0x80] ss:$12 sps:$4 sm:$0xff]  }
  0x28   : > { %505 = vmatprep.subr.bf16.mxu0 %v1923_v37  ;;  %v1944_v37 = vld [vmem:[%s2466_s4 + $0x68] ss:$12 sps:$4 sm:$0xff]  }
  0x29   : > { %811 = vmatpush1.bf16.msra.mxu1 %v1892_v24  ;;  %v362_v24 = vrot.slane %v357_v7, %v2243_v58 }
  0x2a   : > { %820 = vmatprep.subr.bf16.mxu1 %v1893_v25 }
  0x2b   : > { %506 = vmatpush1.bf16.msra.mxu0 %v1925_v40  ;;  %v1947_v40 = vld [vmem:[%s2466_s4 + $0x20] ss:$12 sps:$4 sm:$0xff]  }
  0x2c   : > { %507 = vmatprep.subr.bf16.mxu0 %v1926_v41  ;;  %v1948_v41 = vld [vmem:[%s2466_s4 + $0x8] ss:$12 sps:$4 sm:$0xff]  }
  0x2d   : > { %821 = vmatpush2.bf16.msra.mxu1 %v1895_v28 }
  0x2e   : > { %822 = vmatprep.subr.bf16.mxu1 %v1896_v29 }
  0x2f   : > { %508 = vmatpush1.bf16.msra.mxu0 %v1928_v44  ;;  %v1951_v44 = vld [vmem:[%s2466_s4 + $0xe0] ss:$12 sps:$4 sm:$0xff]  }
  0x30   : > { %517 = vmatprep.subr.bf16.mxu0 %v1929_v45  ;;  %v1952_v45 = vld [vmem:[%s2466_s4 + $0xc8] ss:$12 sps:$4 sm:$0xff]  }
  0x31   : > { %823 = vmatpush2.bf16.msra.mxu1 %v1898_v31 }
  0x32   : > { %824 = vmatprep.subr.bf16.mxu1 %v1899_v34  ;;  %v1941_v34 = vld [vmem:[%s2466_s4 + $0xb0] ss:$12 sps:$4 sm:$0xff]  }
  0x33   : > { %518 = vmatpush2.bf16.msra.mxu0 %v1931_v47 }
  0x34   : > { %519 = vmatprep.subr.bf16.mxu0 %v1932_v48 }
  0x35   : > { %825 = vmatpush2.bf16.msra.mxu1 %v1901_v38  ;;  %v1945_v38 = vld [vmem:[%s2466_s4 + $0x50] ss:$12 sps:$4 sm:$0xff]  }
  0x36   : > { %826 = vmatprep.subr.bf16.mxu1 %v1902_v39  ;;  %v1946_v39 = vld [vmem:[%s2466_s4 + $0x38] ss:$12 sps:$4 sm:$0xff]  }
  0x37   : > { %520 = vmatpush2.bf16.msra.mxu0 %v1934_v49 }
  0x38   : > { %521 = vmatprep.subr.bf16.mxu0 %v1935_v50 }
  0x39   : > { %827 = vmatpush2.bf16.msra.mxu1 %v1904_v42  ;;  %v1949_v42 = vld [vmem:[%s2466_s4 + $0x110] ss:$12 sps:$4 sm:$0xff]  }
  0x3a   : > { %1803 = vmatprep.subr.bf16.mxu1 %v2004_v6 }
  0x3b   : > { %522 = vmatpush2.bf16.msra.mxu0 %v1937_v51 }
  0x3c   : > { %829 = vmatmul.mubr.bf16.vlgmr.msra.gmra.mxu1 %v2209_v46  ;;  %523 = vmatprep.subr.bf16.mxu0 %v1938_v52 }
  0x3d   : > { %1811 = vmatprep.mubr.msk.bf16.mxu1 %vm2005_vm1, %v2004_v6 }
  0x3f   : > { %524 = vmatpush2.bf16.msra.mxu0 %v1940_v53 }
  0x40   : > { %837 = vmatprep.subr.bf16.mxu0 %v2006_v32 }
  0x42   : > { %526 = vmatmul.mubr.bf16.vlgmr.msra.gmra.mxu0 %v355_v55 }
  0x43   : > { %1727 = vmatprep.mubr.msk.bf16.mxu0 %vm489_vm0, %v2102_v12  ;;  %838 = vmatpush1.bf16.msra.mxu0 %v1941_v34 }
  0x44   : > { %839 = vmatprep.subr.bf16.mxu0 %v2006_v32 }
  0x47   : > { %840 = vmatpush1.bf16.msra.mxu0 %v1942_v35 }
  0x48   : > { %841 = vmatprep.subr.bf16.mxu0 %v2006_v32 }
  0x4b   : > { %842 = vmatpush1.bf16.msra.mxu0 %v1943_v36 }
  0x4c   : > { %843 = vmatprep.subr.bf16.mxu0 %v2006_v32 }
  0x4f   : > { %844 = vmatpush1.bf16.msra.mxu0 %v1944_v37 }
  0x50   : > { %845 = vmatprep.subr.bf16.mxu0 %v2006_v32 }
  0x53   : > { %846 = vmatpush1.bf16.msra.mxu0 %v1945_v38 }
  0x54   : > { %847 = vmatprep.subr.bf16.mxu0 %v2006_v32 }
  0x57   : > { %848 = vmatpush1.bf16.msra.mxu0 %v1946_v39 }
  0x58   : > { %849 = vmatprep.subr.bf16.mxu0 %v2006_v32 }
  0x5b   : > { %850 = vmatpush1.bf16.msra.mxu0 %v1947_v40 }
  0x5c   : > { %851 = vmatprep.subr.bf16.mxu0 %v2006_v32 }
  0x5f   : > { %852 = vmatpush1.bf16.msra.mxu0 %v1948_v41 }
  0x60   : > { %861 = vmatprep.subr.bf16.mxu0 %v2006_v32 }
  0x63   : > { %862 = vmatpush2.bf16.msra.mxu0 %v1949_v42 }
  0x64   : > { %863 = vmatprep.subr.bf16.mxu0 %v2006_v32 }
  0x67   : > { %864 = vmatpush2.bf16.msra.mxu0 %v1950_v43 }
  0x68   : > { %865 = vmatprep.subr.bf16.mxu0 %v2006_v32 }
  0x6b   : > { %866 = vmatpush2.bf16.msra.mxu0 %v1951_v44 }
  0x6c   : > { %867 = vmatprep.subr.bf16.mxu0 %v2006_v32 }
  0x6f   : > { %868 = vmatpush2.bf16.msra.mxu0 %v1952_v45 }
  0x72   : > { %870 = vmatmul.mubr.bf16.vlgmr.msra.gmra.mxu0 %v2209_v46 }
  0x73   : > { %1242 = vmatprep.mubr.bf16.mxu0 %v2006_v32 }
  0xfc   : > { %v830_v63 = vpop.f32.mrf.mxu1 }
  0xfd   : > { %v831_v0 = vadd.f32 %v830_v63, %v589_v61 }
  0xfe   : > { %v832_v1 = vpop.f32.mrf.mxu1 }
  0xff   : > { %v833_v2 = vadd.f32 %v832_v1, %v593_v62  ;;  %877 = vxpose.xlu0.b32.start.end [1/1] (short) (narrow) %v831_v0, 64 }
 0x100   : > { %v834_v3 = vpop.f32.mrf.mxu1 }
 0x101   : > { %v960_v4 = vpack.c.bf16 %v833_v2, %v833_v2 }
 0x102   : > { %v835_v5 = vpop.f32.mrf.mxu1  ;;  %v527_v8 = vpop.f32.mrf.mxu0 }
 0x103   : > { %962 = vrot.lane.b32.xlu1 %v960_v4, %s2003_s26  ;;  %v528_v26 = vadd.f32 %v527_v8, %v362_v24  ;;  %v596_v8 = vsub.s32 2, %v2240_v57  ;;  %v1965_v57 = vld [vmem:[%s2468_s6 + $0x70] ss:$8 sps:$4 sm:$0xff]   ;;  %v1973_v24 = vld [vmem:[%s2468_s6 + $0x54] ss:$8 sps:$4 sm:$0xff]  }
 0x104   : > { %v529_v10 = vpop.f32.mrf.mxu0 }
 0x105   : > { %v2263_v11 = vadd.f32 %v529_v10, %v366_v9  ;;  %v909_v28 = vpack.c.bf16 %v528_v26, %v528_v26  ;;  %v597_v9 = vrot.slane %v2248_v59, %v596_v8  ;;  %v1967_v59 = vld [vmem:[%s2468_s6 + $0x74] ss:$8 sps:$4 sm:$0xff]   ;;  %v1971_v26 = vld [vmem:[%s2468_s6 + $0x50] ss:$8 sps:$4 sm:$0xff]  }
 0x106   : > { %v531_v12 = vpop.f32.mrf.mxu0  ;;  %1218 = vmatprep.subr.bf16.mxu0 %v1967_v59 }
 0x107   : > { %1219 = vmatpush1.bf16.msra.mxu0 %v1965_v57  ;;  %v1367_v8 = vpack.c.bf16 %v2263_v11, %v2263_v11 }
 0x108   : > { %v532_v13 = vpop.f32.mrf.mxu0 }
 0x132   : > { %v871_v10 = vpop.f32.mrf.mxu0 }
 0x133   : > { %v872_v12 = vadd.f32 %v871_v10, %v597_v9 }
 0x134   : > { %v873_v13 = vpop.f32.mrf.mxu0 }
 0x135   : > { %v1979_v13 = vld [vmem:[%s2468_s6 + $0xb4] ss:$8 sps:$4 sm:$0xff]  }
 0x144   : > { %1022 = vrot.lane.b32.xlu0 %v831_v0, %s2003_s26 }
 0x162   : > { %1335 = vxpose.xlu0.b32.start.end [1/1] (short) (narrow) %v833_v2, 64 }
 0x175   : > { %v963_v29 = vpop.permute.xlu1 %962 }
 0x176   : > { %v970_v30 = vsel %vm968_vm2, %v963_v29, 0  ;;  %v1974_v29 = vld [vmem:[%s2468_s6 + $0x40] ss:$8 sps:$4 sm:$0xff]  }
 0x17b   : > { %v893_v14 = vpop.trf.xlu0 }
 0x17f   : > { %v894_v15 = vpop.trf.xlu0 }
 0x180   : > { %v910_v27 = vpack.c.bf16 %v894_v15, %v893_v14  ;;  %v1110_v14 = vpack.c.bf16 %v872_v12, %v872_v12  ;;  %v874_v15 = vpop.f32.mrf.mxu0 }
 0x183   : > { %v895_v16 = vpop.trf.xlu0 }
 0x187   : > { %v896_v17 = vpop.trf.xlu0 }
 0x188   : > { %v911_v25 = vpack.c.bf16 %v896_v17, %v895_v16  ;;  %v1115_v16 = vsel %vm968_vm2, %v1110_v14, 0  ;;  %v875_v17 = vpop.f32.mrf.mxu0 }
 0x18b   : > { %v897_v18 = vpop.trf.xlu0 }
 0x18f   : > { %v898_v19 = vpop.trf.xlu0 }
 0x190   : > { %v912_v23 = vpack.c.bf16 %v898_v19, %v897_v18  ;;  %v1955_v18 = vld [vmem:[%s2468_s6 + $0x34] ss:$8 sps:$4 sm:$0xff]  }
 0x193   : > { %v899_v20 = vpop.trf.xlu0 }
 0x197   : > { %v900_v21 = vpop.trf.xlu0 }
 0x198   : > { %v913_v22 = vpack.c.bf16 %v900_v21, %v899_v20  ;;  %v1970_v20 = vld [vmem:[%s2468_s6 + $0x64] ss:$8 sps:$4 sm:$0xff]  }
 0x199   : > { %1220 = vmatprep.subr.bf16.mxu0 %v1970_v20  ;;  %v1977_v20 = vld [vmem:[%s2468_s6 + $0xb0] ss:$8 sps:$4 sm:$0xff]  }
 0x19a   : > { %1804 = vmatpush3.bf16.msra.mxu1 %v913_v22  ;;  %v1968_v22 = vld [vmem:[%s2468_s6 + $0x60] ss:$8 sps:$4 sm:$0xff]  }
 0x19b   : > { %1805 = vmatprep.subr.bf16.mxu1 %v2004_v6  ;;  %1221 = vmatpush1.bf16.msra.mxu0 %v1968_v22  ;;  %v1982_v22 = vld [vmem:[%s2468_s6 + $0xa4] ss:$8 sps:$4 sm:$0xff]  }
 0x19c   : > { %1222 = vmatprep.subr.bf16.mxu0 %v1973_v24  ;;  %v1985_v24 = vld [vmem:[%s2468_s6 + $0x94] ss:$8 sps:$4 sm:$0xff]  }
 0x19e   : > { %1806 = vmatpush3.bf16.msra.mxu1 %v912_v23 }
 0x19f   : > { %1807 = vmatprep.subr.bf16.mxu1 %v2004_v6  ;;  %1223 = vmatpush1.bf16.msra.mxu0 %v1971_v26  ;;  %v1988_v26 = vld [vmem:[%s2468_s6 + $0x84] ss:$8 sps:$4 sm:$0xff]  }
 0x1a2   : > { %1808 = vmatpush3.bf16.msra.mxu1 %v911_v25 }
 0x1a3   : > { %1809 = vmatprep.subr.bf16.mxu1 %v2004_v6 }
 0x1a6   : > { %1810 = vmatpush3.bf16.msra.mxu1 %v910_v27  ;;  %v1976_v27 = vld [vmem:[%s2468_s6 + $0x44] ss:$8 sps:$4 sm:$0xff]  }
 0x1a7   : > { %1815 = vmatprep.subr.bf16.mxu1 %v2004_v6  ;;  %1419 = vrot.lane.b32.xlu0 %v1110_v14, %s2003_s26 }
 0x1a8   : > { %1224 = vmatprep.subr.bf16.mxu0 %v1976_v27 }
 0x1a9   : > { %1812 = vmatmul.mubr.msk.bf16.vlgmr.msra.gmra.mxu1 %vm489_vm0, %v909_v28  ;;  %1225 = vmatpush1.bf16.msra.mxu0 %v1974_v29 }
 0x1aa   : > { %1816 = vmatpush3.bf16.msra.mxu1 %v970_v30  ;;  %1817 = vmatprep.mubr.msk.bf16.mxu1 %vm2005_vm1, %v2004_v6 }
 0x1ab   : > { %1821 = vmatprep.subr.bf16.mxu1 %v2004_v6  ;;  %1839 = vmatprep.subr.bf16.mxu0 %v2004_v6 }
 0x1b6   : > { %v1023_v31 = vpop.permute.xlu0 %1022 }
 0x1b7   : > { %1025 = vxpose.xlu1.b32.start.end [1/1] (short) (narrow) %v1023_v31, 64 }
 0x1de   : > { %v2346_v19 = vpop.trf.xlu0 }
 0x1e2   : > { %v2357_v21 = vpop.trf.xlu0 }
 0x1e3   : > { %v1368_v23 = vpack.c.bf16 %v2357_v21, %v2346_v19 }
 0x1e6   : > { %v2367_v25 = vpop.trf.xlu0 }
 0x1f1   : > { %1062 = vrot.lane.b32.xlu1 %v909_v28, %s2003_s26  ;;  %v1354_v28 = vpop.trf.xlu0 }
 0x1f2   : > { %v1369_v30 = vpack.c.bf16 %v1354_v28, %v2367_v25  ;;  %v1983_v25 = vld [vmem:[%s2468_s6 + $0x90] ss:$8 sps:$4 sm:$0xff]  }
 0x1f5   : > { %v1355_v31 = vpop.trf.xlu0 }
 0x1f9   : > { %v1356_v34 = vpop.trf.xlu0 }
 0x1fa   : > { %v1370_v35 = vpack.c.bf16 %v1356_v34, %v1355_v31  ;;  %v1563_v34 = vld [vmem:[%s2469_s7] sm:$0x3] }
 0x1fd   : > { %v1357_v36 = vpop.trf.xlu0 }
 0x201   : > { %v1358_v37 = vpop.trf.xlu0 }
 0x202   : > { %v1371_v38 = vpack.c.bf16 %v1358_v37, %v1357_v36  ;;  %v1568_v36 = vrot.slane %v1563_v34, %v2243_v58 }
 0x233   : > { %v1041_v47 = vpop.trf.xlu1 }
 0x237   : > { %v1042_v48 = vpop.trf.xlu1 }
 0x238   : > { %v1057_v5 = vpack.c.bf16 %v1042_v48, %v1041_v47 }
 0x23b   : > { %v1043_v49 = vpop.trf.xlu1 }
 0x23f   : > { %v1044_v50 = vpop.trf.xlu1 }
 0x240   : > { %v1058_v4 = vpack.c.bf16 %v1044_v50, %v1043_v49  ;;  %v1953_v50 = vld [vmem:[%s2468_s6 + $0x30] ss:$8 sps:$4 sm:$0xff]  }
 0x243   : > { %v1045_v51 = vpop.trf.xlu1 }
 0x247   : > { %v1046_v61 = vpop.trf.xlu1 }
 0x248   : > { %v1059_v3 = vpack.c.bf16 %v1046_v61, %v1045_v51  ;;  %v1964_v61 = vld [vmem:[%s2468_s6 + $0x4] ss:$8 sps:$4 sm:$0xff]  }
 0x24b   : > { %v1047_v63 = vpop.trf.xlu1 }
 0x24f   : > { %v1048_v1 = vpop.trf.xlu1 }
 0x250   : > { %v1060_v46 = vpack.c.bf16 %v1048_v1, %v1047_v63  ;;  %v1420_v63 = vpop.permute.xlu0 %1419 }
 0x251   : > { %v1425_v1 = vsel %vm968_vm2, %v1420_v63, 0 }
 0x263   : > { %v1063_v7 = vpop.permute.xlu1 %1062 }
 0x269   : > { %v951_v52 = vpop.f32.mrf.mxu1 }
 0x26a   : > { %v957_v53 = vmul.f32 0.015625, %v951_v52  ;;  %v1958_v52 = vld [vmem:[%s2468_s6 + $0x24] ss:$8 sps:$4 sm:$0xff]  }
 0x26b   : > { %v1813_v55 = vpop.f32.mrf.mxu1 }
 0x26c   : > { %1989 = vtanh.f32 %v957_v53  ;;  %v1956_v53 = vld [vmem:[%s2468_s6 + $0x20] ss:$8 sps:$4 sm:$0xff]   ;;  %v1961_v55 = vld [vmem:[%s2468_s6 + $0x14] ss:$8 sps:$4 sm:$0xff]  }
 0x26d   : > { %v954_v56 = vpop.f32.mrf.mxu1 }
 0x26e   : > { %v1959_v56 = vld [vmem:[%s2468_s6 + $0x10] ss:$8 sps:$4 sm:$0xff]  }
 0x26f   : > { %v1814_v62 = vpop.f32.mrf.mxu1 }
 0x270   : > { %v1962_v62 = vld [vmem:[%s2468_s6] ss:$8 sps:$4 sm:$0xff]  }
 0x279   : > { %v1990_v0 = vpop.eup %1989 }
 0x27a   : > { %v959_v2 = vpack.c.bf16 %v1990_v0, %v1990_v0 }
 0x27c   : > { %1818 = vmatmul.mubr.msk.bf16.vlgmr.msra.gmra.mxu1 %vm964_vm3, %v959_v2 }
 0x27d   : > { %1822 = vmatpush3.bf16.msra.mxu1 %v1060_v46  ;;  %1829 = vmatprep.mubr.msk.bf16.mxu1 %vm2005_vm1, %v2004_v6 }
 0x27e   : > { %1823 = vmatprep.subr.bf16.mxu1 %v2004_v6 }
 0x281   : > { %1824 = vmatpush3.bf16.msra.mxu1 %v1059_v3 }
 0x282   : > { %1825 = vmatprep.subr.bf16.mxu1 %v2004_v6 }
 0x285   : > { %1826 = vmatpush3.bf16.msra.mxu1 %v1058_v4 }
 0x286   : > { %1827 = vmatprep.subr.bf16.mxu1 %v2004_v6 }
 0x289   : > { %1828 = vmatpush3.bf16.msra.mxu1 %v1057_v5 }
 0x28a   : > { %1833 = vmatprep.subr.bf16.mxu1 %v2004_v6 }
 0x28c   : > { %1830 = vmatmul.mubr.msk.bf16.vlgmr.msra.gmra.mxu1 %vm489_vm0, %v1063_v7 }
 0x28d   : > { %1835 = vmatprep.mubr.msk.bf16.mxu1 %vm2005_vm1, %v2004_v6  ;;  %1834 = vmatpush3.bf16.msra.mxu1 %v1115_v16 }
 0x28e   : > { %1302 = vmatprep.subr.bf16.mxu1 %v1955_v18 }
 0x33c   : > { %v1006_v39 = vpop.f32.mrf.mxu1 }
 0x33d   : > { %v1020_v0 = vpack.c.bf16 %v1006_v39, %v1006_v39 }
 0x33e   : > { %v1819_v40 = vpop.f32.mrf.mxu1 }
 0x33f   : > { %v1572_v40 = vrot.slane %v1563_v34, %v2251_v60 }
 0x340   : > { %v1009_v41 = vpop.f32.mrf.mxu1 }
 0x342   : > { %v1820_v42 = vpop.f32.mrf.mxu1 }
 0x34c   : > { %v1101_v43 = vpop.f32.mrf.mxu1 }
 0x34d   : > { %v1107_v44 = vmul.f32 0.015625, %v1101_v43 }
 0x34e   : > { %v1831_v45 = vpop.f32.mrf.mxu1 }
 0x34f   : > { %1991 = vtanh.f32 %v1107_v44 }
 0x350   : > { %v1104_v47 = vpop.f32.mrf.mxu1 }
 0x352   : > { %v1832_v48 = vpop.f32.mrf.mxu1 }
 0x35c   : > { %v1992_v49 = vpop.eup %1991 }
 0x35d   : > { %v1109_v51 = vpack.c.bf16 %v1992_v49, %v1992_v49 }
 0x35f   : > { %1836 = vmatmul.mubr.msk.bf16.vlgmr.msra.gmra.mxu1 %vm964_vm3, %v1109_v51 }
 0x360   : > { %1303 = vmatpush1.bf16.msra.mxu1 %v1953_v50  ;;  %1326 = vmatprep.mubr.bf16.mxu1 %v2006_v32 }
 0x361   : > { %1304 = vmatprep.subr.bf16.mxu1 %v1958_v52 }
 0x364   : > { %1305 = vmatpush1.bf16.msra.mxu1 %v1956_v53 }
 0x365   : > { %1306 = vmatprep.subr.bf16.mxu1 %v1961_v55 }
 0x368   : > { %1307 = vmatpush1.bf16.msra.mxu1 %v1959_v56 }
 0x369   : > { %1308 = vmatprep.subr.bf16.mxu1 %v1964_v61 }
 0x36c   : > { %1309 = vmatpush1.bf16.msra.mxu1 %v1962_v62 }
 0x36d   : > { %1851 = vmatprep.subr.bf16.mxu1 %v2004_v6 }
 0x36f   : > { %1757 = vmatmul.mubr.msk.bf16.vlgmr.msra.gmra.mxu1 %vm489_vm0, %v1020_v0 }
 0x370   : > { %1852 = vmatpush3.bf16.msra.mxu1 %v1425_v1  ;;  %1853 = vmatprep.mubr.msk.bf16.mxu1 %vm2005_vm1, %v2004_v6 }
 0x371   : > { %1528 = vmatprep.subr.bf16.mxu1 %v1979_v13 }
 0x41f   : > { %v1151_v2 = vpop.f32.mrf.mxu1 }
 0x420   : > { %v1166_v46 = vpack.c.bf16 %v1151_v2, %v1151_v2 }
 0x421   : > { %v1837_v3 = vpop.f32.mrf.mxu1 }
 0x422   : > { %1748 = vmatmul.mubr.msk.bf16.vlgmr.msra.gmra.mxu0 %vm489_vm0, %v1166_v46 }
 0x423   : > { %1840 = vmatpush3.bf16.msra.mxu0 %v1371_v38  ;;  %v1154_v4 = vpop.f32.mrf.mxu1  ;;  %1847 = vmatprep.mubr.msk.bf16.mxu0 %vm2005_vm1, %v2004_v6 }
 0x424   : > { %1841 = vmatprep.subr.bf16.mxu0 %v2004_v6 }
 0x425   : > { %v1838_v5 = vpop.f32.mrf.mxu1 }
 0x427   : > { %1842 = vmatpush3.bf16.msra.mxu0 %v1370_v35 }
 0x428   : > { %1843 = vmatprep.subr.bf16.mxu0 %v2004_v6 }
 0x42b   : > { %1844 = vmatpush3.bf16.msra.mxu0 %v1369_v30 }
 0x42c   : > { %1845 = vmatprep.subr.bf16.mxu0 %v2004_v6 }
 0x42f   : > { %v1328_v7 = vpop.f32.mrf.mxu1  ;;  %1846 = vmatpush3.bf16.msra.mxu0 %v1368_v23  ;;  %v1980_v23 = vld [vmem:[%s2468_s6 + $0xa0] ss:$8 sps:$4 sm:$0xff]  }
 0x431   : > { %v1330_v9 = vpop.f32.mrf.mxu1 }
 0x432   : > { %1848 = vmatmul.mubr.msk.bf16.vlgmr.msra.gmra.mxu0 %vm489_vm0, %v1367_v8 }
 0x433   : > { %v1332_v10 = vpop.f32.mrf.mxu1 }
 0x435   : > { %v1333_v12 = vpop.f32.mrf.mxu1 }
 0x4e2   : > { %v1244_v14 = vpop.f32.mrf.mxu0 }
 0x4e3   : > { %v1329_v35 = vadd.f32 %v1328_v7, %v1244_v14 }
 0x4e4   : > { %v1246_v6 = vpop.f32.mrf.mxu0 }
 0x4e5   : > { %v1331_v38 = vadd.f32 %v1330_v9, %v1246_v6 }
 0x4e6   : > { %v1248_v15 = vpop.f32.mrf.mxu0 }
 0x4e8   : > { %v1249_v16 = vpop.f32.mrf.mxu0 }
 0x4f2   : > { %v1409_v17 = vpop.f32.mrf.mxu0 }
 0x4f3   : > { %v1415_v18 = vmul.f32 0.015625, %v1409_v17 }
 0x4f4   : > { %v1849_v19 = vpop.f32.mrf.mxu0 }
 0x4f5   : > { %1993 = vtanh.f32 %v1415_v18 }
 0x4f6   : > { %v1412_v57 = vpop.f32.mrf.mxu0 }
 0x4f8   : > { %v1850_v11 = vpop.f32.mrf.mxu0 }
 0x502   : > { %v1994_v59 = vpop.eup %1993 }
 0x503   : > { %v1417_v21 = vpack.c.bf16 %v1994_v59, %v1994_v59 }
 0x505   : > { %1854 = vmatmul.mubr.msk.bf16.vlgmr.msra.gmra.mxu1 %vm964_vm3, %v1417_v21 }
 0x506   : > { %1529 = vmatpush1.bf16.msra.mxu1 %v1977_v20  ;;  %1552 = vmatprep.mubr.bf16.mxu1 %v2006_v32  ;;  %v1986_v32 = vld [vmem:[%s2468_s6 + $0x80] ss:$8 sps:$4 sm:$0xff]  }
 0x507   : > { %1530 = vmatprep.subr.bf16.mxu1 %v1982_v22 }
 0x50a   : > { %1531 = vmatpush1.bf16.msra.mxu1 %v1980_v23 }
 0x50b   : > { %1532 = vmatprep.subr.bf16.mxu1 %v1985_v24 }
 0x50e   : > { %1533 = vmatpush1.bf16.msra.mxu1 %v1983_v25 }
 0x50f   : > { %1534 = vmatprep.subr.bf16.mxu1 %v1988_v26 }
 0x512   : > { %1535 = vmatpush1.bf16.msra.mxu1 %v1986_v32 }
 0x5c5   : > { %v1461_v27 = vpop.f32.mrf.mxu1 }
 0x5c6   : > { %v1476_v28 = vpack.c.bf16 %v1461_v27, %v1461_v27 }
 0x5c7   : > { %v1855_v29 = vpop.f32.mrf.mxu1 }
 0x5c8   : > { %1776 = vmatmul.mubr.msk.bf16.vlgmr.msra.gmra.mxu1 %vm489_vm0, %v1476_v28 }
 0x5c9   : > { %v1464_v30 = vpop.f32.mrf.mxu1 }
 0x5cb   : > { %v1856_v31 = vpop.f32.mrf.mxu1 }
 0x688   : > { %v1554_v37 = vpop.f32.mrf.mxu1 }
 0x689   : > { %v1561_v39 = vadd.f32 %v1554_v37, %v1329_v35 }
 0x68a   : > { %v1556_v41 = vpop.f32.mrf.mxu1 }
 0x68b   : > { %v1575_v42 = vadd.f32 %v1568_v36, %v1561_v39  ;;  %v1562_v43 = vadd.f32 %v1556_v41, %v1331_v38 }
 0x68c   : > { %v1558_v44 = vpop.f32.mrf.mxu1 }
 0x68d   : > { %v1577_v45 = vadd.f32 %v1575_v42, %v2234_v54  ;;  %v1576_v47 = vadd.f32 %v1572_v40, %v1562_v43 }
 0x68e   : > { %v1559_v48 = vpop.f32.mrf.mxu1 }
 0x68f   : > { %vm1579_vm4 = vcmp.ge.f32.partialorder %v1577_v45, 0.0  ;;  %v1581_v49 = vmul.f32 0.1, %v1577_v45  ;;  %v1578_v58 = vadd.f32 %v1576_v47, %v2173_v33 }
 0x691   : > { %v1583_v50 = vsel %vm1579_vm4, %v1577_v45, %v1581_v49  ;;  %vm1580_vm5 = vcmp.ge.f32.partialorder %v1578_v58, 0.0  ;;  %v1582_v51 = vmul.f32 0.1, %v1578_v58 }
 0x692   : > { %1585 = vst [vmem:[%s325_s15] sm:$0xff] %v1583_v50 }
 0x693   : > { %v1584_v60 = vsel %vm1580_vm5, %v1578_v58, %v1582_v51 }
 0x694   : > { %1586 = vst.msk [vmem:[%s325_s15 + $0x8] sm:$0xff] %vm489_vm0, %v1584_v60 }
 0x695 PF: > { %s18_s27 = sadd.s32 1, %s2001_s27  }
 0x696   : > { %p15_p4 = scmp.ge.s32.totalorder %s18_s27, 10  }
 0x698   :  { %17 = sbr.rel (!%p15_p4) target bundleno = 1 (0x1), region = 87 }

// kernel: _lambda_.16
= control target key start
LH: loop header
LB: loop body
LE: loop exit
PB: predicated region body
PF: predicated region fallthrough
CT: control target
= control target key end

     0   :  { %s1538_s27 = smov 0   ;;  %s1712_s0 = inlined_call_operand.vmem [shape: f32[8,16,96], index: 0, kind: input, shape index: {}, may-alias: {0,1}]   ;;  %s1713_s1 = inlined_call_operand.vmem [shape: f32[8,16,96], index: 1, kind: input, shape index: {}, may-alias: {0,1}]   ;;  %s1714_s2 = inlined_call_operand.vmem [shape: bf16[96,96], index: 2, kind: input, shape index: {}]   ;;  %s1715_s3 = inlined_call_operand.vmem [shape: f32[1,96], index: 3, kind: input, shape index: {}]   ;;  %s1716_s4 = inlined_call_operand.vmem [shape: bf16[96,192], index: 4, kind: input, shape index: {}]   ;;  %s1717_s5 = inlined_call_operand.vmem [shape: f32[1,192], index: 5, kind: input, shape index: {}]   ;;  %s1718_s6 = inlined_call_operand.vmem [shape: bf16[3,32,96], index: 6, kind: input, shape index: {}]   ;;  %s1719_s7 = inlined_call_operand.vmem [shape: f32[1,96], index: 7, kind: input, shape index: {}]   ;;  %s1720_s8 = inlined_call_operand.vmem [shape: f32[8,16,96], index: 8, kind: output, shape index: {}]  }
   0x1 LB: > { %s1249_s28 = sadd.s32 4294967295, %s1485_s27   ;;  %p1253_p0 = scmp.ge.s32.totalorder %s1485_s27, 1  ;;  %s1485_s27 = sphi %s1538_s27, %s18_s27  }
   0x2   : > { %p272_p1 = scmp.lt.s32.totalorder %s1485_s27, 9 }
   0x4   : > { %p273_p2 = pnand %p1253_p0, %p272_p1 }
   0x5   : > { %p1553_p3 = scmp.lt.s32.totalorder (!%p273_p2), %s1249_s28, 7  ;;  %s1490_s15 = smov (!%p273_p2), 96  }
   0x6   : > { %276 = sbr.rel (%p273_p2) target bundleno = 1536 (0x600), region = 52  ;;  %s1491_s16 = smov (!%p273_p2), 64  }
   0xb   : > { %v1437_v0 = vld [vmem:[%s1714_s2 + $0x28] sm:$0xff]   ;;  %v1487_v1 = vmov 0.0   ;;  %v1438_v2 = vld [vmem:[%s1716_s4 + $0x54] ss:$8 sps:$4 sm:$0xff]   ;;  %v1440_v3 = vld [vmem:[%s1716_s4 + $0x50] ss:$8 sps:$4 sm:$0xff]   ;;  %v447_v26 = vlaneseq }
   0xc   : > { %1341 = vmatprep.subr.bf16.mxu0 %v1487_v1  ;;  %vm1488_vm0 = vmmov 0   ;;  %524 = vmatprep.subr.bf16.mxu1 %v1438_v2  ;;  %v1441_v4 = vld [vmem:[%s1714_s2 + $0x20] sm:$0xff]   ;;  %v1489_v7 = vmov 0   ;;  %v1445_v8 = vld [vmem:[%s1714_s2 + $0x18] sm:$0xff]   ;;  %s1723_s28 = smov (!%p1553_p3, %s1249_s28), 7  ;;  %v1449_v12 = vld [vmem:[%s1714_s2 + $0x10] sm:$0xff]  }
   0xd   : > { %1342 = vmatpush3.bf16.msra.mxu0 %v1437_v0  ;;  %1353 = vmatprep.mubr.msk.bf16.mxu0 %vm1488_vm0, %v1487_v1  ;;  %v1442_v5 = vld [vmem:[%s1716_s4 + $0x44] ss:$8 sps:$4 sm:$0xff]   ;;  %v1444_v6 = vld [vmem:[%s1716_s4 + $0x40] ss:$8 sps:$4 sm:$0xff]   ;;  %v1446_v9 = vld [vmem:[%s1716_s4 + $0x34] ss:$8 sps:$4 sm:$0xff]  }
   0xe   : > { %1343 = vmatprep.subr.bf16.mxu0 %v1487_v1  ;;  %525 = vmatpush1.bf16.msra.mxu1 %v1440_v3  ;;  %v1448_v10 = vld [vmem:[%s1716_s4 + $0x30] ss:$8 sps:$4 sm:$0xff]   ;;  %v1450_v11 = vld [vmem:[%s1716_s4 + $0x24] ss:$8 sps:$4 sm:$0xff]   ;;  %s1590_s10 = sshll.u32 %s1723_s28, 4  ;;  %vm387_vm1 = vcmask 785408  }
   0xf   : > { %552 = vmatprep.mubr.bf16.mxu1 %v1489_v7  ;;  %526 = vmatprep.subr.bf16.mxu1 %v1442_v5  ;;  %v1452_v13 = vld [vmem:[%s1716_s4 + $0x20] ss:$8 sps:$4 sm:$0xff]   ;;  %v1454_v14 = vld [vmem:[%s1716_s4 + $0x14] ss:$8 sps:$4 sm:$0xff]   ;;  %s315_s17 = scalar_lea.vmem %s1712_s0, %s1590_s10  ;;  %v1456_v16 = vld [vmem:[%s1716_s4 + $0x10] ss:$8 sps:$4 sm:$0xff]   ;;  %s320_s29 = scalar_lea.vmem %s1713_s1, %s1590_s10 }
  0x10   : > { %v1453_v15 = vld [vmem:[%s1714_s2 + $0x8] sm:$0xff]   ;;  %v1457_v18 = vld [vmem:[%s1714_s2] sm:$0xff]   ;;  %v448_v27 = vshrl.u32 %v447_v26, 7  ;;  %vm598_vm2 = vcmask 261120   ;;  %vm653_vm3 = vcmask 130048   ;;  %s325_s14 = scalar_lea.vmem %s1720_s8, %s1590_s10 }
  0x11   : > { %1344 = vmatpush3.bf16.msra.mxu0 %v1441_v4  ;;  %v1458_v17 = vld [vmem:[%s1716_s4 + $0x4] ss:$8 sps:$4 sm:$0xff]   ;;  %v1460_v21 = vld [vmem:[%s1716_s4] ss:$8 sps:$4 sm:$0xff]  }
  0x12   : > { %1345 = vmatprep.subr.bf16.mxu0 %v1487_v1  ;;  %527 = vmatpush1.bf16.msra.mxu1 %v1444_v6  ;;  %v1616_v19 = vld [vmem:[%s315_s17] sm:$0xff]  ;;  %v1618_v20 = vld [vmem:[%s315_s17 + $0x8] sm:$0xff]  ;;  %v453_v28 = vsub.s32 1, %v448_v27  ;;  %v449_v31 = vsub.s32 0, %v448_v27  ;;  %s1492_s17 = smov 32  }
  0x13   : > { %528 = vmatprep.subr.bf16.mxu1 %v1446_v9  ;;  %v329_v22 = vld [vmem:[%s320_s29] sm:$0xff]  ;;  %v330_v23 = vld [vmem:[%s320_s29 + $0x8] sm:$0xff]  ;;  %v343_v24 = vpack.c.bf16 %v1618_v20, %v1616_v19 }
  0x14   : > { %v444_v25 = vpack.c.bf16 %v330_v23, %v329_v22  ;;  %v445_v29 = vld [vmem:[%s1717_s5] sm:$0x3] }
  0x15   : > { %1346 = vmatpush3.bf16.msra.mxu0 %v1445_v8  ;;  %v454_v30 = vrot.slane %v445_v29, %v453_v28  ;;  %v450_v32 = vrot.slane %v445_v29, %v449_v31  ;;  %v1260_v33 = vld [vmem:[%s1715_s3] ss:$0 sm:$0xff]  ;;  %v1463_v28 = vld [vmem:[%s1718_s6 + $0x18] sm:$0xff]   ;;  %v1464_v29 = vld [vmem:[%s1718_s6 + $0x10] sm:$0xff]  }
  0x16   : > { %1347 = vmatprep.subr.bf16.mxu0 %v1487_v1  ;;  %529 = vmatpush1.bf16.msra.mxu1 %v1448_v10  ;;  %v1462_v27 = vld [vmem:[%s1718_s6] sm:$0xff]  }
  0x17   : > { %530 = vmatprep.subr.bf16.mxu1 %v1450_v11 }
  0x19   : > { %1348 = vmatpush3.bf16.msra.mxu0 %v1449_v12 }
  0x1a   : > { %1349 = vmatprep.subr.bf16.mxu0 %v1487_v1  ;;  %531 = vmatpush1.bf16.msra.mxu1 %v1452_v13 }
  0x1b   : > { %532 = vmatprep.subr.bf16.mxu1 %v1454_v14 }
  0x1d   : > { %1350 = vmatpush3.bf16.msra.mxu0 %v1453_v15 }
  0x1e   : > { %1351 = vmatprep.subr.bf16.mxu0 %v1487_v1  ;;  %533 = vmatpush1.bf16.msra.mxu1 %v1456_v16 }
  0x1f   : > { %534 = vmatprep.subr.bf16.mxu1 %v1458_v17 }
  0x21   : > { %1352 = vmatpush3.bf16.msra.mxu0 %v1457_v18 }
  0x22   : > { %1357 = vmatprep.subr.bf16.mxu0 %v1487_v1  ;;  %535 = vmatpush1.bf16.msra.mxu1 %v1460_v21 }
  0x23   : > { %1365 = vmatprep.subr.bf16.mxu1 %v1487_v1 }
  0x24   : > { %1354 = vmatmul.mubr.msk.bf16.vlgmr.msra.gmra.mxu0 %vm387_vm1, %v343_v24 }
  0x25   : > { %1361 = vmatprep.mubr.msk.bf16.mxu0 %vm1488_vm0, %v1487_v1  ;;  %1280 = vmatmul.mubr.msk.bf16.vlgmr.msra.gmra.mxu1 %vm387_vm1, %v444_v25  ;;  %v1461_v25 = vld [vmem:[%s1718_s6 + $0x8] sm:$0xff]  }
  0x26   : > { %1367 = vmatprep.mubr.msk.bf16.mxu1 %vm1488_vm0, %v1487_v1 }
  0xe4   : > { %v425_v34 = vpop.f32.mrf.mxu0 }
  0xe5   : > { %v554_v35 = vpop.f32.mrf.mxu1  ;;  %v426_v37 = vadd.f32 %v1260_v33, %v425_v34 }
  0xe6   : > { %v1355_v36 = vpop.f32.mrf.mxu0  ;;  %v555_v38 = vadd.f32 %v554_v35, %v450_v32 }
  0xe7   : > { %v556_v39 = vpop.f32.mrf.mxu1 }
  0xe8   : > { %v428_v40 = vpop.f32.mrf.mxu0  ;;  %v557_v41 = vadd.f32 %v556_v39, %v454_v30  ;;  %705 = vrot.lane.b32.xlu0 %v555_v38, %s1490_s15 }
  0xe9   : > { %v429_v42 = vadd.f32 %v1260_v33, %v428_v40  ;;  %v558_v43 = vpop.f32.mrf.mxu1 }
  0xea   : > { %v1356_v44 = vpop.f32.mrf.mxu0  ;;  %v559_v46 = vadd.f32 %v558_v43, %v450_v32 }
  0xeb   : > { %v595_v45 = vpack.c.bf16 %v429_v42, %v426_v37  ;;  %v560_v47 = vpop.f32.mrf.mxu1 }
  0xec   : > { %v561_v48 = vadd.f32 %v560_v47, %v454_v30  ;;  %707 = vrot.lane.b32.xlu0 %v559_v46, %s1490_s15  ;;  %v648_v53 = vpack.c.bf16 %v559_v46, %v555_v38 }
  0xed   : > { %746 = vrot.lane.b32.xlu1 %v595_v45, %s1490_s15 }
  0xee   : > { %v797_v49 = vpack.c.bf16 %v561_v48, %v557_v41 }
 0x116   : > { %563 = vxpose.xlu1.b32.start [1/2] (short) (narrow) %v555_v38, 32 }
 0x11a   : > { %564 = vxpose.xlu1.b32.end [2/2] (short) (narrow) %v559_v46, 32 }
 0x140   : > { %960 = vrot.lane.b32.xlu1 %v555_v38, %s1491_s16 }
 0x144   : > { %962 = vrot.lane.b32.xlu1 %v559_v46, %s1491_s16 }
 0x15a   : > { %v706_v50 = vpop.permute.xlu0 %705 }
 0x15b   : > { %711 = vxpose.xlu0.b32.start [1/2] (short) (narrow) %v706_v50, 32 }
 0x15e   : > { %v708_v51 = vpop.permute.xlu0 %707 }
 0x15f   : > { %712 = vxpose.xlu0.b32.end [2/2] (short) (narrow) %v708_v51, 32  ;;  %v747_v52 = vpop.permute.xlu1 %746 }
 0x190   : > { %650 = vrot.lane.b32.xlu0 %v648_v53, %s1492_s17 }
 0x192   : > { %v579_v54 = vpop.trf.xlu1 }
 0x194   : > { %1000 = vrot.lane.b32.xlu0 %v595_v45, %s1491_s16 }
 0x196   : > { %v580_v55 = vpop.trf.xlu1 }
 0x197   : > { %v596_v59 = vpack.c.bf16 %v580_v55, %v579_v54 }
 0x198   : > { %1052 = vrot.lane.b32.xlu0 %v797_v49, %s1490_s15 }
 0x19a   : > { %v581_v56 = vpop.trf.xlu1 }
 0x19e   : > { %v582_v57 = vpop.trf.xlu1 }
 0x19f   : > { %v597_v58 = vpack.c.bf16 %v582_v57, %v581_v56 }
 0x1a1   : > { %1358 = vmatpush3.bf16.msra.mxu0 %v597_v58 }
 0x1a2   : > { %1359 = vmatprep.subr.bf16.mxu0 %v1487_v1 }
 0x1a5   : > { %1360 = vmatpush3.bf16.msra.mxu0 %v596_v59 }
 0x1a6   : > { %1371 = vmatprep.subr.bf16.mxu0 %v1487_v1 }
 0x1a8   : > { %1362 = vmatmul.mubr.msk.bf16.vlgmr.msra.gmra.mxu0 %vm598_vm2, %v595_v45 }
 0x1a9   : > { %1375 = vmatprep.mubr.msk.bf16.mxu0 %vm1488_vm0, %v1487_v1 }
 0x1b2   : > { %v961_v60 = vpop.permute.xlu1 %960 }
 0x1b3   : > { %966 = vxpose.xlu1.b32.start [1/2] (short) (narrow) %v961_v60, 32 }
 0x1b6   : > { %v963_v61 = vpop.permute.xlu1 %962 }
 0x1b7   : > { %967 = vxpose.xlu1.b32.end [2/2] (short) (narrow) %v963_v61, 32 }
 0x1d7   : > { %v727_v62 = vpop.trf.xlu0 }
 0x1db   : > { %v728_v63 = vpop.trf.xlu0 }
 0x1dc   : > { %v743_v4 = vpack.c.bf16 %v728_v63, %v727_v62 }
 0x1df   : > { %v729_v0 = vpop.trf.xlu0 }
 0x1e3   : > { %v730_v2 = vpop.trf.xlu0 }
 0x1e4   : > { %v744_v3 = vpack.c.bf16 %v730_v2, %v729_v0  ;;  %v1465_v2 = vld [vmem:[%s1718_s6 + $0x28] sm:$0xff]  }
 0x1e6   : > { %1372 = vmatpush3.bf16.msra.mxu0 %v744_v3  ;;  %v1466_v3 = vld [vmem:[%s1718_s6 + $0x20] sm:$0xff]  }
 0x1e7   : > { %1373 = vmatprep.subr.bf16.mxu0 %v1487_v1 }
 0x1ea   : > { %1374 = vmatpush3.bf16.msra.mxu0 %v743_v4 }
 0x1eb   : > { %1385 = vmatprep.subr.bf16.mxu0 %v1487_v1 }
 0x1ed   : > { %1376 = vmatmul.mubr.msk.bf16.vlgmr.msra.gmra.mxu0 %vm598_vm2, %v747_v52 }
 0x1ee   : > { %1389 = vmatprep.mubr.msk.bf16.mxu0 %vm1488_vm0, %v1487_v1  ;;  %1386 = vmatpush3.bf16.msra.mxu0 %v1463_v28 }
 0x1ef   : > { %1387 = vmatprep.subr.bf16.mxu0 %v1487_v1 }
 0x1f2   : > { %1388 = vmatpush3.bf16.msra.mxu0 %v1464_v29 }
 0x1f3   : > { %1401 = vmatprep.subr.bf16.mxu0 %v1487_v1 }
 0x202   : > { %v651_v5 = vpop.permute.xlu0 %650 }
 0x203   : > { %1366 = vmatpush3.bf16.msra.mxu1 %v651_v5 }
 0x204   : > { %1379 = vmatprep.subr.bf16.mxu1 %v1487_v1 }
 0x206   : > { %v1001_v31 = vpop.permute.xlu0 %1000 }
 0x20a   : > { %v1053_v36 = vpop.permute.xlu0 %1052 }
 0x22f   : > { %v982_v37 = vpop.trf.xlu1 }
 0x233   : > { %v983_v38 = vpop.trf.xlu1 }
 0x234   : > { %v998_v47 = vpack.c.bf16 %v983_v38, %v982_v37 }
 0x237   : > { %v984_v39 = vpop.trf.xlu1 }
 0x23b   : > { %v985_v42 = vpop.trf.xlu1 }
 0x23c   : > { %v999_v45 = vpack.c.bf16 %v985_v42, %v984_v39 }
 0x268   : > { %v636_v6 = vpop.f32.mrf.mxu0 }
 0x269   : > { %v643_v7 = vmul.f32 0.03125, %v636_v6 }
 0x26a   : > { %v1363_v8 = vpop.f32.mrf.mxu0 }
 0x26b   : > { %1467 = vtanh.f32 %v643_v7 }
 0x26c   : > { %v639_v9 = vpop.f32.mrf.mxu0 }
 0x26d   : > { %v644_v10 = vmul.f32 0.03125, %v639_v9 }
 0x26e   : > { %v1364_v11 = vpop.f32.mrf.mxu0 }
 0x26f   : > { %1469 = vtanh.f32 %v644_v10  ;;  %v1304_v11 = vld [vmem:[%s1719_s7] ss:$0 sm:$0xff] }
 0x278   : > { %v1468_v12 = vpop.eup %1467 }
 0x27c   : > { %v1470_v13 = vpop.eup %1469 }
 0x27d   : > { %v647_v14 = vpack.c.bf16 %v1470_v13, %v1468_v12 }
 0x27f   : > { %1368 = vmatmul.mubr.msk.bf16.vlgmr.msra.gmra.mxu1 %vm653_vm3, %v647_v14 }
 0x280   : > { %1380 = vmatpush3.bf16.msra.mxu1 %v797_v49  ;;  %1381 = vmatprep.mubr.msk.bf16.mxu1 %vm1488_vm0, %v1487_v1 }
 0x281   : > { %1393 = vmatprep.subr.bf16.mxu1 %v1487_v1 }
 0x2ad   : > { %v785_v15 = vpop.f32.mrf.mxu0 }
 0x2ae   : > { %v792_v16 = vmul.f32 0.03125, %v785_v15 }
 0x2af   : > { %v1377_v17 = vpop.f32.mrf.mxu0 }
 0x2b0   : > { %1471 = vtanh.f32 %v792_v16 }
 0x2b1   : > { %v788_v18 = vpop.f32.mrf.mxu0 }
 0x2b2   : > { %v793_v21 = vmul.f32 0.03125, %v788_v18 }
 0x2b3   : > { %v1378_v22 = vpop.f32.mrf.mxu0 }
 0x2b4   : > { %1473 = vtanh.f32 %v793_v21 }
 0x2bd   : > { %v1472_v23 = vpop.eup %1471 }
 0x2c1   : > { %v1474_v24 = vpop.eup %1473 }
 0x2c2   : > { %v796_v26 = vpack.c.bf16 %v1474_v24, %v1472_v23 }
 0x2c4   : > { %1382 = vmatmul.mubr.msk.bf16.vlgmr.msra.gmra.mxu1 %vm653_vm3, %v796_v26 }
 0x2c5   : > { %1394 = vmatpush3.bf16.msra.mxu1 %v1461_v25  ;;  %1397 = vmatprep.mubr.msk.bf16.mxu1 %vm1488_vm0, %v1487_v1 }
 0x2c6   : > { %1395 = vmatprep.subr.bf16.mxu1 %v1487_v1 }
 0x2c9   : > { %1396 = vmatpush3.bf16.msra.mxu1 %v1462_v27 }
 0x2ca   : > { %1409 = vmatprep.subr.bf16.mxu1 %v1487_v1 }
 0x33f   : > { %v691_v30 = vpop.f32.mrf.mxu1 }
 0x341   : > { %v1369_v32 = vpop.f32.mrf.mxu1 }
 0x343   : > { %v694_v33 = vpop.f32.mrf.mxu1 }
 0x344   : > { %v702_v34 = vpack.c.bf16 %v694_v33, %v691_v30 }
 0x345   : > { %v1370_v35 = vpop.f32.mrf.mxu1 }
 0x346   : > { %1398 = vmatmul.mubr.msk.bf16.vlgmr.msra.gmra.mxu1 %vm598_vm2, %v702_v34 }
 0x347   : > { %1410 = vmatpush3.bf16.msra.mxu1 %v1053_v36  ;;  %1411 = vmatprep.mubr.msk.bf16.mxu1 %vm1488_vm0, %v1487_v1 }
 0x384   : > { %v835_v40 = vpop.f32.mrf.mxu1 }
 0x386   : > { %v1383_v41 = vpop.f32.mrf.mxu1 }
 0x388   : > { %v838_v43 = vpop.f32.mrf.mxu1 }
 0x389   : > { %v847_v44 = vpack.c.bf16 %v838_v43, %v835_v40 }
 0x38a   : > { %v1384_v46 = vpop.f32.mrf.mxu1 }
 0x38b   : > { %1390 = vmatmul.mubr.msk.bf16.vlgmr.msra.gmra.mxu0 %vm598_vm2, %v847_v44 }
 0x38c   : > { %1402 = vmatpush3.bf16.msra.mxu0 %v999_v45  ;;  %1405 = vmatprep.mubr.msk.bf16.mxu0 %vm1488_vm0, %v1487_v1 }
 0x38d   : > { %1403 = vmatprep.subr.bf16.mxu0 %v1487_v1 }
 0x390   : > { %1404 = vmatpush3.bf16.msra.mxu0 %v998_v47 }
 0x391   : > { %1415 = vmatprep.subr.bf16.mxu0 %v1487_v1 }
 0x393   : > { %1406 = vmatmul.mubr.msk.bf16.vlgmr.msra.gmra.mxu0 %vm598_vm2, %v1001_v31 }
 0x394   : > { %1419 = vmatprep.mubr.msk.bf16.mxu0 %vm1488_vm0, %v1487_v1  ;;  %1416 = vmatpush3.bf16.msra.mxu0 %v1465_v2 }
 0x395   : > { %1417 = vmatprep.subr.bf16.mxu0 %v1487_v1 }
 0x398   : > { %1418 = vmatpush3.bf16.msra.mxu0 %v1466_v3 }
 0x406   : > { %v953_v48 = vpop.f32.mrf.mxu1 }
 0x408   : > { %v1399_v49 = vpop.f32.mrf.mxu1 }
 0x40a   : > { %v956_v50 = vpop.f32.mrf.mxu1 }
 0x40c   : > { %v1400_v51 = vpop.f32.mrf.mxu1 }
 0x44b   : > { %v897_v52 = vpop.f32.mrf.mxu0 }
 0x44c   : > { %v954_v9 = vadd.f32 %v953_v48, %v897_v52 }
 0x44d   : > { %v1391_v53 = vpop.f32.mrf.mxu0 }
 0x44f   : > { %v900_v54 = vpop.f32.mrf.mxu0 }
 0x450   : > { %v957_v13 = vadd.f32 %v956_v50, %v900_v54 }
 0x451   : > { %v1392_v55 = vpop.f32.mrf.mxu0 }
 0x453   : > { %v1039_v56 = vpop.f32.mrf.mxu0 }
 0x454   : > { %v1046_v57 = vmul.f32 0.03125, %v1039_v56 }
 0x455   : > { %v1407_v58 = vpop.f32.mrf.mxu0 }
 0x456   : > { %1475 = vtanh.f32 %v1046_v57 }
 0x457   : > { %v1042_v59 = vpop.f32.mrf.mxu0 }
 0x458   : > { %v1047_v60 = vmul.f32 0.03125, %v1042_v59 }
 0x459   : > { %v1408_v61 = vpop.f32.mrf.mxu0 }
 0x45a   : > { %1477 = vtanh.f32 %v1047_v60 }
 0x463   : > { %v1476_v62 = vpop.eup %1475 }
 0x467   : > { %v1478_v63 = vpop.eup %1477 }
 0x468   : > { %v1050_v0 = vpack.c.bf16 %v1478_v63, %v1476_v62 }
 0x46a   : > { %1412 = vmatmul.mubr.msk.bf16.vlgmr.msra.gmra.mxu1 %vm653_vm3, %v1050_v0 }
 0x52a   : > { %v1092_v4 = vpop.f32.mrf.mxu1 }
 0x52c   : > { %v1413_v5 = vpop.f32.mrf.mxu1 }
 0x52e   : > { %v1095_v6 = vpop.f32.mrf.mxu1 }
 0x52f   : > { %v1104_v7 = vpack.c.bf16 %v1095_v6, %v1092_v4 }
 0x530   : > { %v1414_v8 = vpop.f32.mrf.mxu1 }
 0x531   : > { %1420 = vmatmul.mubr.msk.bf16.vlgmr.msra.gmra.mxu0 %vm598_vm2, %v1104_v7 }
 0x5f1   : > { %v1154_v10 = vpop.f32.mrf.mxu0 }
 0x5f2   : > { %v1161_v1 = vadd.f32 %v1154_v10, %v954_v9 }
 0x5f3   : > { %v1421_v12 = vpop.f32.mrf.mxu0 }
 0x5f4   : > { %v1170_v14 = vadd.f32 %v1304_v11, %v1161_v1 }
 0x5f5   : > { %v1157_v15 = vpop.f32.mrf.mxu0 }
 0x5f6   : > { %v1172_v16 = vadd.f32 %v1170_v14, %v1616_v19  ;;  %v1162_v17 = vadd.f32 %v1157_v15, %v957_v13 }
 0x5f7   : > { %v1422_v18 = vpop.f32.mrf.mxu0 }
 0x5f8   : > { %vm1174_vm4 = vcmp.ge.f32.partialorder %v1172_v16, 0.0  ;;  %v1176_v21 = vmul.f32 0.1, %v1172_v16  ;;  %v1171_v22 = vadd.f32 %v1304_v11, %v1162_v17 }
 0x5fa   : > { %v1178_v23 = vsel %vm1174_vm4, %v1172_v16, %v1176_v21  ;;  %v1173_v24 = vadd.f32 %v1171_v22, %v1618_v20 }
 0x5fb   : > { %1180 = vst.msk [vmem:[%s325_s14] sm:$0xff] %vm387_vm1, %v1178_v23 }
 0x5fc   : > { %vm1175_vm5 = vcmp.ge.f32.partialorder %v1173_v24, 0.0  ;;  %v1177_v25 = vmul.f32 0.1, %v1173_v24 }
 0x5fe   : > { %v1179_v26 = vsel %vm1175_vm5, %v1173_v24, %v1177_v25 }
 0x5ff   : > { %1181 = vst.msk [vmem:[%s325_s14 + $0x8] sm:$0xff] %vm387_vm1, %v1179_v26 }
 0x600 PF: > { %s18_s27 = sadd.s32 1, %s1485_s27  }
 0x601   : > { %p15_p4 = scmp.ge.s32.totalorder %s18_s27, 10  }
 0x603   :  { %17 = sbr.rel (!%p15_p4) target bundleno = 1 (0x1), region = 87 }

</bundles_post_ra>
